<compile_context>
chip_gen: v7x
topology: tpu7x:2x2x1
jax: 0.10.0
libtpu: 0.0.40
codegen_flags: <defaults>
</compile_context>

<pallas_src>
import math
import jax
import jax.numpy as jnp
from jax.experimental import pallas as pl
from jax.experimental.pallas import tpu as pltpu


def _round_up(n, m):
    return ((n + m - 1) // m) * m


# ----------------------------------------------------------------------------
# Fused kernel: HeteroGraphConv(SAGE-lstm) relation-sum + LN/leaky/residual
# ----------------------------------------------------------------------------

def hetero_sage_kernel(self_ref, neigh_ref, mask_ref,
                       w_ih_ref, w_hh_ref, b_ref, w_out_ref,
                       g1_ref, b1_ref, g3_ref, b3_ref,
                       out_ref):
    """Grid = (node_tiles, num_relations); relation axis is the reduction.

      self_ref   : [T, D_in]        dst node features (also the residual)
      neigh_ref  : [K, T, D_in]     gathered neighbor feats for relation r (bf16)
      mask_ref   : [Kp, T]          lane-dense mask (1 real neighbor, 0 padding)
      w_ih_ref   : [R, D_in, 4H]    LSTM input weights, gate order (i, f, o, g), bf16
      w_hh_ref   : [R, H, 4H]       LSTM hidden weights, bf16
      b_ref      : [R, 1, 4H]       LSTM bias (b_ih + b_hh), f32
      w_out_ref  : [R, D_in+H, D_o] fused [W_self; W_neigh], bf16
      g1/b1/g3/b3: [1, D_o]         LayerNorm params, f32
      out_ref    : [T, D_o]         f32, block-resident across r (accumulator)
    """
    r = pl.program_id(1)
    K, T, D = neigh_ref.shape
    H = w_hh_ref.shape[1]

    @pl.when(r == 0)
    def _():
        out_ref[...] = jnp.zeros_like(out_ref)

    # Relation-r weight slabs: dynamic reads from the VMEM-resident [R,...] stacks.
    w_ih = w_ih_ref[r]
    w_hh = w_hh_ref[r]
    bias = b_ref[r]

    # ---- hoisted input projection: one big matmul for all K LSTM steps ------
    neigh2d = neigh_ref[...].reshape(K * T, D)
    gates_x = (jnp.dot(neigh2d, w_ih, preferred_element_type=jnp.float32)
               + bias).astype(jnp.bfloat16).reshape(K, T, 4 * H)

    # Lane-dense mask block [Kp, T]; tiny XLU transpose -> [T, Kp] bool.
    mask = mask_ref[...].T > 0.0

    # ---- LSTM recurrence over neighbors (K small & static -> unroll) --------
    h = jnp.zeros((T, H), jnp.float32)
    c = jnp.zeros((T, H), jnp.float32)
    for k in range(K):
        gates = (gates_x[k].astype(jnp.float32)
                 + jnp.dot(h.astype(jnp.bfloat16), w_hh,
                           preferred_element_type=jnp.float32))
        # sigmoid(x) = 0.5*tanh(0.5x)+0.5 : one EUP op for the (i,f,o) slab
        sig = 0.5 * jnp.tanh(0.5 * gates[:, :3 * H]) + 0.5
        i_g = sig[:, 0 * H:1 * H]
        f_g = sig[:, 1 * H:2 * H]
        o_g = sig[:, 2 * H:3 * H]
        g_g = jnp.tanh(gates[:, 3 * H:])
        c_new = f_g * c + i_g * g_g
        h_new = o_g * jnp.tanh(c_new)
        m = mask[:, k:k + 1]                 # [T, 1]; tail-padded neighbors skipped
        c = jnp.where(m, c_new, c)
        h = jnp.where(m, h_new, h)

    # ---- fused 256-deep output matmul, accumulated over relations -----------
    x_cat = jnp.concatenate(
        [self_ref[...].astype(jnp.bfloat16), h.astype(jnp.bfloat16)], axis=-1)
    out_ref[...] += jnp.dot(x_cat, w_out_ref[r],
                            preferred_element_type=jnp.float32)

    # ---- epilogue: LN1 -> leaky -> +residual -> LN3 -> leaky -----------------
    @pl.when(r == pl.num_programs(1) - 1)
    def _():
        eps = 1e-5
        slope = 0.01

        def layer_norm(x, g, b):
            mu = jnp.mean(x, axis=-1, keepdims=True)
            var = jnp.mean((x - mu) ** 2, axis=-1, keepdims=True)
            return (x - mu) * jax.lax.rsqrt(var + eps) * g + b

        def leaky(x):
            return jnp.where(x >= 0, x, slope * x)

        y = leaky(layer_norm(out_ref[...], g1_ref[...], b1_ref[...]))
        y = self_ref[...] + y                      # residual (dst feats in VMEM)
        y = leaky(layer_norm(y, g3_ref[...], b3_ref[...]))
        out_ref[...] = y.astype(out_ref.dtype)


# ----------------------------------------------------------------------------
# pallas_call wrapper
# ----------------------------------------------------------------------------

def _node_tiling(n, tile_n):
    """Pick (tile, padded_n) for the node axis.

    The node axis is the LANE axis of the lane-dense mask block, so tiles are
    multiples of 128.  Also guarantee >=2 node tiles whenever possible so the
    "parallel" grid axis keeps both v7x TensorCores busy.
    """
    tile_n = max(128, (tile_n // 128) * 128)
    n128 = _round_up(n, 128)
    t = min(tile_n, max(128, (n128 // 2) // 128 * 128))
    return t, _round_up(n128, t)


def hetero_sage_call(self_feats, neigh_stack, mask_stack,
                     w_ih, w_hh, b, w_out, g1, b1, g3, b3, *, tile_n=512):
    """Fused conv + epilogue for one destination node type.

    self_feats : [N, D_in] f32
    neigh_stack: [R, K, N, D_in] bf16     (k-major gathered neighbor features)
    mask_stack : [R, Kp, N] f32           (lane-dense; Kp = K padded to >= 8)
    w_ih       : [R, D_in, 4H] bf16 ; w_hh: [R, H, 4H] bf16 ; b: [R, 1, 4H] f32
    w_out      : [R, D_in+H, D_out] bf16  (fused [W_self; W_neigh])
    g1/b1/g3/b3: [1, D_out] f32
    """
    n, d_in = self_feats.shape
    R, K, _, _ = neigh_stack.shape
    Kp = mask_stack.shape[1]
    H = w_hh.shape[1]
    d_out = w_out.shape[-1]

    tile, n_pad = _node_tiling(n, tile_n)
    if n_pad != n:
        pad = n_pad - n
        self_feats = jnp.pad(self_feats, ((0, pad), (0, 0)))
        neigh_stack = jnp.pad(neigh_stack, ((0, 0), (0, 0), (0, pad), (0, 0)))
        mask_stack = jnp.pad(mask_stack, ((0, 0), (0, 0), (0, pad)))

    out = pl.pallas_call(
        hetero_sage_kernel,
        out_shape=jax.ShapeDtypeStruct((n_pad, d_out), jnp.float32),
        grid=(n_pad // tile, R),
        in_specs=[
            # per-node-tile blocks (software-pipelined / double-buffered)
            pl.BlockSpec((tile, d_in), lambda i, r: (i, 0)),               # self/residual
            pl.BlockSpec((None, K, tile, d_in), lambda i, r: (r, 0, i, 0)),
            pl.BlockSpec((None, Kp, tile), lambda i, r: (r, 0, i)),        # lane-dense mask
            # stacked relation weights: constant block index -> DMA'd once,
            # VMEM-resident for the whole grid; indexed by r inside the kernel.
            pl.BlockSpec((R, d_in, 4 * H), lambda i, r: (0, 0, 0)),        # w_ih
            pl.BlockSpec((R, H, 4 * H), lambda i, r: (0, 0, 0)),           # w_hh
            pl.BlockSpec((R, 1, 4 * H), lambda i, r: (0, 0, 0)),           # b
            pl.BlockSpec((R, d_in + H, d_out), lambda i, r: (0, 0, 0)),    # w_out
            pl.BlockSpec((1, d_out), lambda i, r: (0, 0)),                 # g1
            pl.BlockSpec((1, d_out), lambda i, r: (0, 0)),                 # b1
            pl.BlockSpec((1, d_out), lambda i, r: (0, 0)),                 # g3
            pl.BlockSpec((1, d_out), lambda i, r: (0, 0)),                 # b3
        ],
        out_specs=pl.BlockSpec((tile, d_out), lambda i, r: (i, 0)),
        compiler_params=pltpu.CompilerParams(
            dimension_semantics=("parallel", "arbitrary"),
            # Lift v5e's 16 MiB scoped-VMEM default; actual use at tile<=512 is
            # ~10 MiB, comfortably inside v7x's 64 MiB physical budget. Shrink
            # tile_n before the working set approaches ~32 MiB on v7x.
            vmem_limit_bytes=64 * 1024 * 1024),
    )(self_feats, neigh_stack, mask_stack, w_ih, w_hh, b, w_out, g1, b1, g3, b3)
    return out[:n]


def passthrough_norm(x, g3, b3):
    """Node types with no incoming relation: y = leaky(LN3(x + x)).

    Plain jnp (per review): for small no-relation types the pallas_call fixed
    cost dominates, and XLA's fused elementwise+LN is already at the HBM roofline.
    """
    eps, slope = 1e-5, 0.01
    y = x + x
    mu = jnp.mean(y, axis=-1, keepdims=True)
    var = jnp.mean((y - mu) ** 2, axis=-1, keepdims=True)
    y = (y - mu) * jax.lax.rsqrt(var + eps) * g3 + b3
    return jnp.where(y >= 0, y, slope * y)


# ----------------------------------------------------------------------------
# Parameter init (mirrors reset_parameters: kaiming_uniform_ linears w/ default
# a=0 -> bound sqrt(6/fan_in), zero bias; LSTM default uniform(-1/sqrt(H),
# 1/sqrt(H)); LayerNorm gamma=1, beta=0). Matmul weights bf16; bias/LN f32.
# ----------------------------------------------------------------------------

def _kaiming_uniform(key, out_f, in_f):
    bound = math.sqrt(6.0 / in_f)
    w = jax.random.uniform(key, (out_f, in_f), jnp.float32, -bound, bound)
    return w.T                                    # stored [in, out] for x @ W


def init_params(key, in_size, out_size, rel_names, node_name):
    H = in_size                                   # DGL lstm aggregator: hidden = in_feats
    params = {"conv": {}, "norm": {}}
    for rel in rel_names:
        key, k1, k2, k3, k4, k5, k6 = jax.random.split(key, 7)
        stdv = 1.0 / math.sqrt(H)
        # Gate order here is (i, f, o, g).
        # TODO(synk): permute the 4H axis (PyTorch nn.LSTM packs (i, f, g, o))
        #             when porting trained PyTorch weights.
        w_ih = jax.random.uniform(k1, (4 * H, in_size), jnp.float32, -stdv, stdv).T
        w_hh = jax.random.uniform(k2, (4 * H, H), jnp.float32, -stdv, stdv).T
        b = (jax.random.uniform(k3, (1, 4 * H), jnp.float32, -stdv, stdv)
             + jax.random.uniform(k4, (1, 4 * H), jnp.float32, -stdv, stdv))
        w_self = _kaiming_uniform(k5, out_size, in_size)
        w_neigh = _kaiming_uniform(k6, out_size, H)
        # Fuse the two output projections into one 256-deep MXU contraction.
        w_out = jnp.concatenate([w_self, w_neigh], axis=0).astype(jnp.bfloat16)
        params["conv"][rel] = (w_ih.astype(jnp.bfloat16),
                               w_hh.astype(jnp.bfloat16), b, w_out)
    for nt in node_name:
        params["norm"][nt] = (jnp.ones((1, out_size), jnp.float32),
                              jnp.zeros((1, out_size), jnp.float32),
                              jnp.ones((1, out_size), jnp.float32),
                              jnp.zeros((1, out_size), jnp.float32))
    return params


# ----------------------------------------------------------------------------
# HeteroLayer forward (graph glue in plain JAX, hot path in one fused kernel
# per destination node type)
# ----------------------------------------------------------------------------

def hetero_layer_forward(inputs, graphs, rel_meta, node_name, params, *, tile_n=512):
    # group relations by destination node type (HeteroGraphConv 'sum' aggregate)
    by_dst = {}
    for rel, (src, dst) in rel_meta.items():
        by_dst.setdefault(dst, []).append(rel)

    out = {}
    for nt in node_name:
        g1, b1, g3, b3 = params["norm"][nt]
        if nt not in by_dst:
            out[nt] = passthrough_norm(inputs[nt], g3, b3)
            continue

        rels = by_dst[nt]
        k_max = max(graphs[rel][0].shape[1] for rel in rels)   # common K per dst
        kp = _round_up(max(k_max, 8), 8)                       # mask sublane pad

        neighs, masks = [], []
        w_ih_l, w_hh_l, b_l, w_out_l = [], [], [], []
        for rel in rels:
            src, _ = rel_meta[rel]
            nbr_idx, nbr_mask = graphs[rel]
            k_r = nbr_idx.shape[1]
            if k_r < k_max:                                    # pad to common K
                nbr_idx = jnp.pad(nbr_idx, ((0, 0), (0, k_max - k_r)))
                nbr_mask = jnp.pad(nbr_mask, ((0, 0), (0, k_max - k_r)))
            # k-major gather [K, N_dst, D_in] in bf16 (halves HBM/VMEM traffic).
            # TODO(synk): move this gather in-kernel (PrefetchScalarGridSpec +
            #             per-row DMA from HBM src feats) to avoid materializing it.
            neighs.append(inputs[src].astype(jnp.bfloat16)[nbr_idx.T])
            # lane-dense mask layout [Kp, N]: K on sublanes, nodes on lanes.
            masks.append(jnp.pad(nbr_mask.T, ((0, kp - k_max), (0, 0))))
            w_ih, w_hh, b, w_out = params["conv"][rel]
            w_ih_l.append(w_ih); w_hh_l.append(w_hh)
            b_l.append(b); w_out_l.append(w_out)

        out[nt] = hetero_sage_call(
            inputs[nt],
            jnp.stack(neighs), jnp.stack(masks),
            jnp.stack(w_ih_l), jnp.stack(w_hh_l), jnp.stack(b_l),
            jnp.stack(w_out_l),
            g1, b1, g3, b3, tile_n=tile_n)
    return out


# ----------------------------------------------------------------------------
# Demo
# ----------------------------------------------------------------------------

if __name__ == "__main__":
    in_size = out_size = 128                 # residual requires in_size == out_size;
    K = 4                                    # 128 keeps all loads/stores lane-dense
    node_name = ["user", "item", "tag"]      # "tag" has no incoming relation
    rel_names = ["follows", "buys", "liked-by"]
    rel_meta = {"follows": ("user", "user"),
                "buys": ("user", "item"),
                "liked-by": ("item", "user")}   # "user" dst sums 2 relations
    n_nodes = {"user": 256, "item": 64, "tag": 48}   # user -> 2 node tiles of 128

    key = jax.random.PRNGKey(0)
    inputs = {}
    for nt in node_name:
        key, kf = jax.random.split(key)
        inputs[nt] = jax.random.normal(kf, (n_nodes[nt], in_size), jnp.float32)

    # Deterministic synthetic adjacency per relation (tail-padded + masked).
    graphs = {}
    for rel, (src, dst) in rel_meta.items():
        key, ki, km = jax.random.split(key, 3)
        nbr_idx = jax.random.randint(ki, (n_nodes[dst], K), 0, n_nodes[src])
        n_valid = jax.random.randint(km, (n_nodes[dst], 1), 1, K + 1)   # 1..K neighbors
        nbr_mask = (jnp.arange(K)[None, :] < n_valid).astype(jnp.float32)
        graphs[rel] = (nbr_idx, nbr_mask)

    key, kp = jax.random.split(key)
    params = init_params(kp, in_size, out_size, rel_names, node_name)

    out = hetero_layer_forward(inputs, graphs, rel_meta, node_name, params)
    out = jax.tree_util.tree_map(jax.block_until_ready, out)

    for nt in node_name:
        assert out[nt].shape == (n_nodes[nt], out_size), (nt, out[nt].shape)
        assert bool(jnp.all(jnp.isfinite(out[nt])))
    print("KERNEL_OK")
</pallas_src>

<mosaic_0001>
module attributes {stable_mosaic.version = 11 : i64} {
  func.func @hetero_sage_kernel(%arg0: i32, %arg1: i32, %arg2: memref<128x128xf32, #tpu.memory_space<vmem>>, %arg3: memref<1x4x128x128xbf16, #tpu.memory_space<vmem>>, %arg4: memref<1x8x128xf32, #tpu.memory_space<vmem>>, %arg5: memref<2x128x512xbf16, #tpu.memory_space<vmem>>, %arg6: memref<2x128x512xbf16, #tpu.memory_space<vmem>>, %arg7: memref<2x1x512xf32, #tpu.memory_space<vmem>>, %arg8: memref<2x256x128xbf16, #tpu.memory_space<vmem>>, %arg9: memref<1x128xf32, #tpu.memory_space<vmem>>, %arg10: memref<1x128xf32, #tpu.memory_space<vmem>>, %arg11: memref<1x128xf32, #tpu.memory_space<vmem>>, %arg12: memref<1x128xf32, #tpu.memory_space<vmem>>, %arg13: memref<128x128xf32, #tpu.memory_space<vmem>>) attributes {dimension_semantics = [#tpu.dimension_semantics<parallel>, #tpu.dimension_semantics<arbitrary>], iteration_bounds = array<i64: 2, 2>, scalar_prefetch = 0 : i64, scratch_operands = 0 : i64, tpu.core_type = #tpu.core_type<tc>, window_params = [{transform_indices = @transform_0, window_bounds = array<i64: 128, 128>}, {transform_indices = @transform_1, window_bounds = array<i64: 1, 4, 128, 128>}, {transform_indices = @transform_2, window_bounds = array<i64: 1, 8, 128>}, {pipeline_mode = #tpu.pipeline_mode<synchronous>, transform_indices = @transform_3, window_bounds = array<i64: 2, 128, 512>}, {pipeline_mode = #tpu.pipeline_mode<synchronous>, transform_indices = @transform_4, window_bounds = array<i64: 2, 128, 512>}, {pipeline_mode = #tpu.pipeline_mode<synchronous>, transform_indices = @transform_5, window_bounds = array<i64: 2, 1, 512>}, {pipeline_mode = #tpu.pipeline_mode<synchronous>, transform_indices = @transform_6, window_bounds = array<i64: 2, 256, 128>}, {pipeline_mode = #tpu.pipeline_mode<synchronous>, transform_indices = @transform_7, window_bounds = array<i64: 1, 128>}, {pipeline_mode = #tpu.pipeline_mode<synchronous>, transform_indices = @transform_8, window_bounds = array<i64: 1, 128>}, {pipeline_mode = #tpu.pipeline_mode<synchronous>, transform_indices = @transform_9, window_bounds = array<i64: 1, 128>}, {pipeline_mode = #tpu.pipeline_mode<synchronous>, transform_indices = @transform_10, window_bounds = array<i64: 1, 128>}, {transform_indices = @transform_11, window_bounds = array<i64: 128, 128>}]} {
    %c0_i32 = arith.constant 0 : i32
    %0 = arith.cmpi eq, %arg1, %c0_i32 : i32
    %1 = arith.extui %0 : i1 to i32
    %c0_i32_0 = arith.constant 0 : i32
    %2 = arith.cmpi ne, %1, %c0_i32_0 : i32
    scf.if %2 {
      %cst_42 = arith.constant 0.000000e+00 : f32
      %162 = vector.broadcast %cst_42 : f32 to vector<128x128xf32>
      %c0_43 = arith.constant 0 : index
      %c0_44 = arith.constant 0 : index
      %163 = vector.load %arg13[%c0_43, %c0_44] : memref<128x128xf32, #tpu.memory_space<vmem>>, vector<128x128xf32>
      tpu.vector_store %arg13[%c0_43, %c0_44], %162 {strides = array<i32>} : memref<128x128xf32, #tpu.memory_space<vmem>>, vector<128x128xf32>,
    } else {
    }
    %3 = arith.index_cast %arg1 : i32 to index
    %c0 = arith.constant 0 : index
    %c0_1 = arith.constant 0 : index
    %4 = vector.load %arg5[%3, %c0, %c0_1] : memref<2x128x512xbf16, #tpu.memory_space<vmem>>, vector<1x128x512xbf16>
    %5 = vector.shape_cast %4 : vector<1x128x512xbf16> to vector<128x512xbf16>
    %6 = arith.index_cast %arg1 : i32 to index
    %c0_2 = arith.constant 0 : index
    %c0_3 = arith.constant 0 : index
    %7 = vector.load %arg6[%6, %c0_2, %c0_3] : memref<2x128x512xbf16, #tpu.memory_space<vmem>>, vector<1x128x512xbf16>
    %8 = vector.shape_cast %7 : vector<1x128x512xbf16> to vector<128x512xbf16>
    %9 = arith.index_cast %arg1 : i32 to index
    %c0_4 = arith.constant 0 : index
    %c0_5 = arith.constant 0 : index
    %10 = vector.load %arg7[%9, %c0_4, %c0_5] : memref<2x1x512xf32, #tpu.memory_space<vmem>>, vector<1x1x512xf32>
    %11 = vector.shape_cast %10 : vector<1x1x512xf32> to vector<1x512xf32>
    %c0_6 = arith.constant 0 : index
    %c0_7 = arith.constant 0 : index
    %c0_8 = arith.constant 0 : index
    %c0_9 = arith.constant 0 : index
    %12 = vector.load %arg3[%c0_6, %c0_7, %c0_8, %c0_9] : memref<1x4x128x128xbf16, #tpu.memory_space<vmem>>, vector<1x4x128x128xbf16>
    %13 = vector.shape_cast %12 : vector<1x4x128x128xbf16> to vector<4x128x128xbf16>
    %14 = vector.shape_cast %13 : vector<4x128x128xbf16> to vector<512x128xbf16>
    %cst = arith.constant dense<0.000000e+00> : vector<512x512xf32>
    %15 = tpu.matmul %14, %5, %cst {dimension_numbers = #tpu.dot_dimension_numbers<[1], [0], [0], [1], [0, 0, 1, 1], [], []>} : vector<512x128xbf16>, vector<128x512xbf16>, vector<512x512xf32> -> vector<512x512xf32>
    %16 = vector.broadcast %11 : vector<1x512xf32> to vector<512x512xf32>
    %17 = arith.addf %15, %16 : vector<512x512xf32>
    %18 = arith.truncf %17 : vector<512x512xf32> to vector<512x512xbf16>
    %19 = vector.shape_cast %18 : vector<512x512xbf16> to vector<4x128x512xbf16>
    %c0_10 = arith.constant 0 : index
    %c0_11 = arith.constant 0 : index
    %c0_12 = arith.constant 0 : index
    %20 = vector.load %arg4[%c0_10, %c0_11, %c0_12] : memref<1x8x128xf32, #tpu.memory_space<vmem>>, vector<1x8x128xf32>
    %21 = vector.shape_cast %20 : vector<1x8x128xf32> to vector<8x128xf32>
    %22 = tpu.transpose %21, [1, 0] : vector<8x128xf32> -> vector<128x8xf32>
    %cst_13 = arith.constant 0.000000e+00 : f32
    %23 = vector.broadcast %cst_13 : f32 to vector<128x8xf32>
    %24 = arith.cmpf ogt, %22, %23 : vector<128x8xf32>
    %cst_14 = arith.constant 0.000000e+00 : f32
    %25 = vector.broadcast %cst_14 : f32 to vector<128x128xf32>
    %cst_15 = arith.constant 0.000000e+00 : f32
    %26 = vector.broadcast %cst_15 : f32 to vector<128x128xf32>
    %27 = vector.extract_strided_slice %19 {offsets = [0, 0, 0], sizes = [1, 128, 512], strides = [1, 1, 1]} : vector<4x128x512xbf16> to vector<1x128x512xbf16>
    %28 = vector.shape_cast %27 : vector<1x128x512xbf16> to vector<128x512xbf16>
    %29 = arith.extf %28 : vector<128x512xbf16> to vector<128x512xf32>
    %30 = arith.truncf %25 : vector<128x128xf32> to vector<128x128xbf16>
    %cst_16 = arith.constant dense<0.000000e+00> : vector<128x512xf32>
    %31 = tpu.matmul %30, %8, %cst_16 {dimension_numbers = #tpu.dot_dimension_numbers<[1], [0], [0], [1], [0, 0, 1, 1], [], []>} : vector<128x128xbf16>, vector<128x512xbf16>, vector<128x512xf32> -> vector<128x512xf32>
    %32 = arith.addf %29, %31 : vector<128x512xf32>
    %33 = vector.extract_strided_slice %32 {offsets = [0, 0], sizes = [128, 384], strides = [1, 1]} : vector<128x512xf32> to vector<128x384xf32>
    %cst_17 = arith.constant 5.000000e-01 : f32
    %34 = vector.broadcast %cst_17 : f32 to vector<128x384xf32>
    %35 = arith.mulf %34, %33 : vector<128x384xf32>
    %36 = math.tanh %35 : vector<128x384xf32>
    %cst_18 = arith.constant 5.000000e-01 : f32
    %37 = vector.broadcast %cst_18 : f32 to vector<128x384xf32>
    %38 = arith.mulf %37, %36 : vector<128x384xf32>
    %cst_19 = arith.constant 5.000000e-01 : f32
    %39 = vector.broadcast %cst_19 : f32 to vector<128x384xf32>
    %40 = arith.addf %38, %39 : vector<128x384xf32>
    %41 = vector.extract_strided_slice %40 {offsets = [0, 0], sizes = [128, 128], strides = [1, 1]} : vector<128x384xf32> to vector<128x128xf32>
    %42 = vector.extract_strided_slice %40 {offsets = [0, 128], sizes = [128, 128], strides = [1, 1]} : vector<128x384xf32> to vector<128x128xf32>
    %43 = vector.extract_strided_slice %40 {offsets = [0, 256], sizes = [128, 128], strides = [1, 1]} : vector<128x384xf32> to vector<128x128xf32>
    %44 = vector.extract_strided_slice %32 {offsets = [0, 384], sizes = [128, 128], strides = [1, 1]} : vector<128x512xf32> to vector<128x128xf32>
    %45 = math.tanh %44 : vector<128x128xf32>
    %46 = arith.mulf %42, %26 : vector<128x128xf32>
    %47 = arith.mulf %41, %45 : vector<128x128xf32>
    %48 = arith.addf %46, %47 : vector<128x128xf32>
    %49 = math.tanh %48 : vector<128x128xf32>
    %50 = arith.mulf %43, %49 : vector<128x128xf32>
    %51 = vector.extract_strided_slice %24 {offsets = [0, 0], sizes = [128, 1], strides = [1, 1]} : vector<128x8xi1> to vector<128x1xi1>
    %52 = vector.shape_cast %51 : vector<128x1xi1> to vector<128x1xi1>
    %53 = vector.broadcast %52 : vector<128x1xi1> to vector<128x128xi1>
    %54 = arith.select %53, %48, %26 : vector<128x128xi1>, vector<128x128xf32>
    %55 = vector.shape_cast %51 : vector<128x1xi1> to vector<128x1xi1>
    %56 = vector.broadcast %55 : vector<128x1xi1> to vector<128x128xi1>
    %57 = arith.select %56, %50, %25 : vector<128x128xi1>, vector<128x128xf32>
    %58 = vector.extract_strided_slice %19 {offsets = [1, 0, 0], sizes = [1, 128, 512], strides = [1, 1, 1]} : vector<4x128x512xbf16> to vector<1x128x512xbf16>
    %59 = vector.shape_cast %58 : vector<1x128x512xbf16> to vector<128x512xbf16>
    %60 = arith.extf %59 : vector<128x512xbf16> to vector<128x512xf32>
    %61 = arith.truncf %57 : vector<128x128xf32> to vector<128x128xbf16>
    %cst_20 = arith.constant dense<0.000000e+00> : vector<128x512xf32>
    %62 = tpu.matmul %61, %8, %cst_20 {dimension_numbers = #tpu.dot_dimension_numbers<[1], [0], [0], [1], [0, 0, 1, 1], [], []>} : vector<128x128xbf16>, vector<128x512xbf16>, vector<128x512xf32> -> vector<128x512xf32>
    %63 = arith.addf %60, %62 : vector<128x512xf32>
    %64 = vector.extract_strided_slice %63 {offsets = [0, 0], sizes = [128, 384], strides = [1, 1]} : vector<128x512xf32> to vector<128x384xf32>
    %cst_21 = arith.constant 5.000000e-01 : f32
    %65 = vector.broadcast %cst_21 : f32 to vector<128x384xf32>
    %66 = arith.mulf %65, %64 : vector<128x384xf32>
    %67 = math.tanh %66 : vector<128x384xf32>
    %cst_22 = arith.constant 5.000000e-01 : f32
    %68 = vector.broadcast %cst_22 : f32 to vector<128x384xf32>
    %69 = arith.mulf %68, %67 : vector<128x384xf32>
    %cst_23 = arith.constant 5.000000e-01 : f32
    %70 = vector.broadcast %cst_23 : f32 to vector<128x384xf32>
    %71 = arith.addf %69, %70 : vector<128x384xf32>
    %72 = vector.extract_strided_slice %71 {offsets = [0, 0], sizes = [128, 128], strides = [1, 1]} : vector<128x384xf32> to vector<128x128xf32>
    %73 = vector.extract_strided_slice %71 {offsets = [0, 128], sizes = [128, 128], strides = [1, 1]} : vector<128x384xf32> to vector<128x128xf32>
    %74 = vector.extract_strided_slice %71 {offsets = [0, 256], sizes = [128, 128], strides = [1, 1]} : vector<128x384xf32> to vector<128x128xf32>
    %75 = vector.extract_strided_slice %63 {offsets = [0, 384], sizes = [128, 128], strides = [1, 1]} : vector<128x512xf32> to vector<128x128xf32>
    %76 = math.tanh %75 : vector<128x128xf32>
    %77 = arith.mulf %73, %54 : vector<128x128xf32>
    %78 = arith.mulf %72, %76 : vector<128x128xf32>
    %79 = arith.addf %77, %78 : vector<128x128xf32>
    %80 = math.tanh %79 : vector<128x128xf32>
    %81 = arith.mulf %74, %80 : vector<128x128xf32>
    %82 = vector.extract_strided_slice %24 {offsets = [0, 1], sizes = [128, 1], strides = [1, 1]} : vector<128x8xi1> to vector<128x1xi1>
    %83 = vector.shape_cast %82 : vector<128x1xi1> to vector<128x1xi1>
    %84 = vector.broadcast %83 : vector<128x1xi1> to vector<128x128xi1>
    %85 = arith.select %84, %79, %54 : vector<128x128xi1>, vector<128x128xf32>
    %86 = vector.shape_cast %82 : vector<128x1xi1> to vector<128x1xi1>
    %87 = vector.broadcast %86 : vector<128x1xi1> to vector<128x128xi1>
    %88 = arith.select %87, %81, %57 : vector<128x128xi1>, vector<128x128xf32>
    %89 = vector.extract_strided_slice %19 {offsets = [2, 0, 0], sizes = [1, 128, 512], strides = [1, 1, 1]} : vector<4x128x512xbf16> to vector<1x128x512xbf16>
    %90 = vector.shape_cast %89 : vector<1x128x512xbf16> to vector<128x512xbf16>
    %91 = arith.extf %90 : vector<128x512xbf16> to vector<128x512xf32>
    %92 = arith.truncf %88 : vector<128x128xf32> to vector<128x128xbf16>
    %cst_24 = arith.constant dense<0.000000e+00> : vector<128x512xf32>
    %93 = tpu.matmul %92, %8, %cst_24 {dimension_numbers = #tpu.dot_dimension_numbers<[1], [0], [0], [1], [0, 0, 1, 1], [], []>} : vector<128x128xbf16>, vector<128x512xbf16>, vector<128x512xf32> -> vector<128x512xf32>
    %94 = arith.addf %91, %93 : vector<128x512xf32>
    %95 = vector.extract_strided_slice %94 {offsets = [0, 0], sizes = [128, 384], strides = [1, 1]} : vector<128x512xf32> to vector<128x384xf32>
    %cst_25 = arith.constant 5.000000e-01 : f32
    %96 = vector.broadcast %cst_25 : f32 to vector<128x384xf32>
    %97 = arith.mulf %96, %95 : vector<128x384xf32>
    %98 = math.tanh %97 : vector<128x384xf32>
    %cst_26 = arith.constant 5.000000e-01 : f32
    %99 = vector.broadcast %cst_26 : f32 to vector<128x384xf32>
    %100 = arith.mulf %99, %98 : vector<128x384xf32>
    %cst_27 = arith.constant 5.000000e-01 : f32
    %101 = vector.broadcast %cst_27 : f32 to vector<128x384xf32>
    %102 = arith.addf %100, %101 : vector<128x384xf32>
    %103 = vector.extract_strided_slice %102 {offsets = [0, 0], sizes = [128, 128], strides = [1, 1]} : vector<128x384xf32> to vector<128x128xf32>
    %104 = vector.extract_strided_slice %102 {offsets = [0, 128], sizes = [128, 128], strides = [1, 1]} : vector<128x384xf32> to vector<128x128xf32>
    %105 = vector.extract_strided_slice %102 {offsets = [0, 256], sizes = [128, 128], strides = [1, 1]} : vector<128x384xf32> to vector<128x128xf32>
    %106 = vector.extract_strided_slice %94 {offsets = [0, 384], sizes = [128, 128], strides = [1, 1]} : vector<128x512xf32> to vector<128x128xf32>
    %107 = math.tanh %106 : vector<128x128xf32>
    %108 = arith.mulf %104, %85 : vector<128x128xf32>
    %109 = arith.mulf %103, %107 : vector<128x128xf32>
    %110 = arith.addf %108, %109 : vector<128x128xf32>
    %111 = math.tanh %110 : vector<128x128xf32>
    %112 = arith.mulf %105, %111 : vector<128x128xf32>
    %113 = vector.extract_strided_slice %24 {offsets = [0, 2], sizes = [128, 1], strides = [1, 1]} : vector<128x8xi1> to vector<128x1xi1>
    %114 = vector.shape_cast %113 : vector<128x1xi1> to vector<128x1xi1>
    %115 = vector.broadcast %114 : vector<128x1xi1> to vector<128x128xi1>
    %116 = arith.select %115, %110, %85 : vector<128x128xi1>, vector<128x128xf32>
    %117 = vector.shape_cast %113 : vector<128x1xi1> to vector<128x1xi1>
    %118 = vector.broadcast %117 : vector<128x1xi1> to vector<128x128xi1>
    %119 = arith.select %118, %112, %88 : vector<128x128xi1>, vector<128x128xf32>
    %120 = vector.extract_strided_slice %19 {offsets = [3, 0, 0], sizes = [1, 128, 512], strides = [1, 1, 1]} : vector<4x128x512xbf16> to vector<1x128x512xbf16>
    %121 = vector.shape_cast %120 : vector<1x128x512xbf16> to vector<128x512xbf16>
    %122 = arith.extf %121 : vector<128x512xbf16> to vector<128x512xf32>
    %123 = arith.truncf %119 : vector<128x128xf32> to vector<128x128xbf16>
    %cst_28 = arith.constant dense<0.000000e+00> : vector<128x512xf32>
    %124 = tpu.matmul %123, %8, %cst_28 {dimension_numbers = #tpu.dot_dimension_numbers<[1], [0], [0], [1], [0, 0, 1, 1], [], []>} : vector<128x128xbf16>, vector<128x512xbf16>, vector<128x512xf32> -> vector<128x512xf32>
    %125 = arith.addf %122, %124 : vector<128x512xf32>
    %126 = vector.extract_strided_slice %125 {offsets = [0, 0], sizes = [128, 384], strides = [1, 1]} : vector<128x512xf32> to vector<128x384xf32>
    %cst_29 = arith.constant 5.000000e-01 : f32
    %127 = vector.broadcast %cst_29 : f32 to vector<128x384xf32>
    %128 = arith.mulf %127, %126 : vector<128x384xf32>
    %129 = math.tanh %128 : vector<128x384xf32>
    %cst_30 = arith.constant 5.000000e-01 : f32
    %130 = vector.broadcast %cst_30 : f32 to vector<128x384xf32>
    %131 = arith.mulf %130, %129 : vector<128x384xf32>
    %cst_31 = arith.constant 5.000000e-01 : f32
    %132 = vector.broadcast %cst_31 : f32 to vector<128x384xf32>
    %133 = arith.addf %131, %132 : vector<128x384xf32>
    %134 = vector.extract_strided_slice %133 {offsets = [0, 0], sizes = [128, 128], strides = [1, 1]} : vector<128x384xf32> to vector<128x128xf32>
    %135 = vector.extract_strided_slice %133 {offsets = [0, 128], sizes = [128, 128], strides = [1, 1]} : vector<128x384xf32> to vector<128x128xf32>
    %136 = vector.extract_strided_slice %133 {offsets = [0, 256], sizes = [128, 128], strides = [1, 1]} : vector<128x384xf32> to vector<128x128xf32>
    %137 = vector.extract_strided_slice %125 {offsets = [0, 384], sizes = [128, 128], strides = [1, 1]} : vector<128x512xf32> to vector<128x128xf32>
    %138 = math.tanh %137 : vector<128x128xf32>
    %139 = arith.mulf %135, %116 : vector<128x128xf32>
    %140 = arith.mulf %134, %138 : vector<128x128xf32>
    %141 = arith.addf %139, %140 : vector<128x128xf32>
    %142 = math.tanh %141 : vector<128x128xf32>
    %143 = arith.mulf %136, %142 : vector<128x128xf32>
    %144 = vector.extract_strided_slice %24 {offsets = [0, 3], sizes = [128, 1], strides = [1, 1]} : vector<128x8xi1> to vector<128x1xi1>
    %145 = vector.shape_cast %144 : vector<128x1xi1> to vector<128x1xi1>
    %146 = vector.broadcast %145 : vector<128x1xi1> to vector<128x128xi1>
    %147 = arith.select %146, %143, %119 : vector<128x128xi1>, vector<128x128xf32>
    %c0_32 = arith.constant 0 : index
    %c0_33 = arith.constant 0 : index
    %148 = vector.load %arg2[%c0_32, %c0_33] : memref<128x128xf32, #tpu.memory_space<vmem>>, vector<128x128xf32>
    %149 = arith.truncf %148 : vector<128x128xf32> to vector<128x128xbf16>
    %150 = arith.truncf %147 : vector<128x128xf32> to vector<128x128xbf16>
    %151 = tpu.concatenate %149, %150 in 1 : vector<128x128xbf16>, vector<128x128xbf16> -> vector<128x256xbf16>
    %c0_34 = arith.constant 0 : index
    %c0_35 = arith.constant 0 : index
    %152 = vector.load %arg13[%c0_34, %c0_35] : memref<128x128xf32, #tpu.memory_space<vmem>>, vector<128x128xf32>
    %153 = arith.index_cast %arg1 : i32 to index
    %c0_36 = arith.constant 0 : index
    %c0_37 = arith.constant 0 : index
    %154 = vector.load %arg8[%153, %c0_36, %c0_37] : memref<2x256x128xbf16, #tpu.memory_space<vmem>>, vector<1x256x128xbf16>
    %155 = vector.shape_cast %154 : vector<1x256x128xbf16> to vector<256x128xbf16>
    %cst_38 = arith.constant dense<0.000000e+00> : vector<128x128xf32>
    %156 = tpu.matmul %151, %155, %cst_38 {dimension_numbers = #tpu.dot_dimension_numbers<[1], [0], [0], [1], [0, 0, 1, 1], [], []>} : vector<128x256xbf16>, vector<256x128xbf16>, vector<128x128xf32> -> vector<128x128xf32>
    %157 = arith.addf %152, %156 : vector<128x128xf32>
    %c0_39 = arith.constant 0 : index
    %c0_40 = arith.constant 0 : index
    %158 = vector.load %arg13[%c0_39, %c0_40] : memref<128x128xf32, #tpu.memory_space<vmem>>, vector<128x128xf32>
    tpu.vector_store %arg13[%c0_39, %c0_40], %157 {strides = array<i32>} : memref<128x128xf32, #tpu.memory_space<vmem>>, vector<128x128xf32>,
    %c1_i32 = arith.constant 1 : i32
    %159 = arith.cmpi eq, %arg1, %c1_i32 : i32
    %160 = arith.extui %159 : i1 to i32
    %c0_i32_41 = arith.constant 0 : i32
    %161 = arith.cmpi ne, %160, %c0_i32_41 : i32
    scf.if %161 {
      %c0_42 = arith.constant 0 : index
      %c0_43 = arith.constant 0 : index
      %162 = vector.load %arg13[%c0_42, %c0_43] : memref<128x128xf32, #tpu.memory_space<vmem>>, vector<128x128xf32>
      %c0_44 = arith.constant 0 : index
      %c0_45 = arith.constant 0 : index
      %163 = vector.load %arg9[%c0_44, %c0_45] : memref<1x128xf32, #tpu.memory_space<vmem>>, vector<1x128xf32>
      %c0_46 = arith.constant 0 : index
      %c0_47 = arith.constant 0 : index
      %164 = vector.load %arg10[%c0_46, %c0_47] : memref<1x128xf32, #tpu.memory_space<vmem>>, vector<1x128xf32>
      %cst_48 = arith.constant dense<0.000000e+00> : vector<128xf32>
      %165 = vector.multi_reduction <add>, %162, %cst_48 [1] : vector<128x128xf32> to vector<128xf32>
      %166 = vector.shape_cast %165 : vector<128xf32> to vector<128x1xf32>
      %cst_49 = arith.constant 1.280000e+02 : f32
      %167 = vector.broadcast %cst_49 : f32 to vector<128x1xf32>
      %168 = arith.divf %166, %167 : vector<128x1xf32>
      %169 = vector.broadcast %168 : vector<128x1xf32> to vector<128x128xf32>
      %170 = arith.subf %162, %169 : vector<128x128xf32>
      %171 = arith.mulf %170, %170 : vector<128x128xf32>
      %cst_50 = arith.constant dense<0.000000e+00> : vector<128xf32>
      %172 = vector.multi_reduction <add>, %171, %cst_50 [1] : vector<128x128xf32> to vector<128xf32>
      %173 = vector.shape_cast %172 : vector<128xf32> to vector<128x1xf32>
      %cst_51 = arith.constant 1.280000e+02 : f32
      %174 = vector.broadcast %cst_51 : f32 to vector<128x1xf32>
      %175 = arith.divf %173, %174 : vector<128x1xf32>
      %176 = vector.broadcast %168 : vector<128x1xf32> to vector<128x128xf32>
      %177 = arith.subf %162, %176 : vector<128x128xf32>
      %cst_52 = arith.constant 9.99999974E-6 : f32
      %178 = vector.broadcast %cst_52 : f32 to vector<128x1xf32>
      %179 = arith.addf %175, %178 : vector<128x1xf32>
      %180 = math.rsqrt %179 : vector<128x1xf32>
      %181 = vector.broadcast %180 : vector<128x1xf32> to vector<128x128xf32>
      %182 = arith.mulf %177, %181 : vector<128x128xf32>
      %183 = vector.broadcast %163 : vector<1x128xf32> to vector<128x128xf32>
      %184 = arith.mulf %182, %183 : vector<128x128xf32>
      %185 = vector.broadcast %164 : vector<1x128xf32> to vector<128x128xf32>
      %186 = arith.addf %184, %185 : vector<128x128xf32>
      %cst_53 = arith.constant 0.000000e+00 : f32
      %187 = vector.broadcast %cst_53 : f32 to vector<128x128xf32>
      %188 = arith.cmpf oge, %186, %187 : vector<128x128xf32>
      %cst_54 = arith.constant 0.00999999977 : f32
      %189 = vector.broadcast %cst_54 : f32 to vector<128x128xf32>
      %190 = arith.mulf %189, %186 : vector<128x128xf32>
      %191 = arith.select %188, %186, %190 : vector<128x128xi1>, vector<128x128xf32>
      %c0_55 = arith.constant 0 : index
      %c0_56 = arith.constant 0 : index
      %192 = vector.load %arg2[%c0_55, %c0_56] : memref<128x128xf32, #tpu.memory_space<vmem>>, vector<128x128xf32>
      %193 = arith.addf %192, %191 : vector<128x128xf32>
      %c0_57 = arith.constant 0 : index
      %c0_58 = arith.constant 0 : index
      %194 = vector.load %arg11[%c0_57, %c0_58] : memref<1x128xf32, #tpu.memory_space<vmem>>, vector<1x128xf32>
      %c0_59 = arith.constant 0 : index
      %c0_60 = arith.constant 0 : index
      %195 = vector.load %arg12[%c0_59, %c0_60] : memref<1x128xf32, #tpu.memory_space<vmem>>, vector<1x128xf32>
      %cst_61 = arith.constant dense<0.000000e+00> : vector<128xf32>
      %196 = vector.multi_reduction <add>, %193, %cst_61 [1] : vector<128x128xf32> to vector<128xf32>
      %197 = vector.shape_cast %196 : vector<128xf32> to vector<128x1xf32>
      %cst_62 = arith.constant 1.280000e+02 : f32
      %198 = vector.broadcast %cst_62 : f32 to vector<128x1xf32>
      %199 = arith.divf %197, %198 : vector<128x1xf32>
      %200 = vector.broadcast %199 : vector<128x1xf32> to vector<128x128xf32>
      %201 = arith.subf %193, %200 : vector<128x128xf32>
      %202 = arith.mulf %201, %201 : vector<128x128xf32>
      %cst_63 = arith.constant dense<0.000000e+00> : vector<128xf32>
      %203 = vector.multi_reduction <add>, %202, %cst_63 [1] : vector<128x128xf32> to vector<128xf32>
      %204 = vector.shape_cast %203 : vector<128xf32> to vector<128x1xf32>
      %cst_64 = arith.constant 1.280000e+02 : f32
      %205 = vector.broadcast %cst_64 : f32 to vector<128x1xf32>
      %206 = arith.divf %204, %205 : vector<128x1xf32>
      %207 = vector.broadcast %199 : vector<128x1xf32> to vector<128x128xf32>
      %208 = arith.subf %193, %207 : vector<128x128xf32>
      %cst_65 = arith.constant 9.99999974E-6 : f32
      %209 = vector.broadcast %cst_65 : f32 to vector<128x1xf32>
      %210 = arith.addf %206, %209 : vector<128x1xf32>
      %211 = math.rsqrt %210 : vector<128x1xf32>
      %212 = vector.broadcast %211 : vector<128x1xf32> to vector<128x128xf32>
      %213 = arith.mulf %208, %212 : vector<128x128xf32>
      %214 = vector.broadcast %194 : vector<1x128xf32> to vector<128x128xf32>
      %215 = arith.mulf %213, %214 : vector<128x128xf32>
      %216 = vector.broadcast %195 : vector<1x128xf32> to vector<128x128xf32>
      %217 = arith.addf %215, %216 : vector<128x128xf32>
      %cst_66 = arith.constant 0.000000e+00 : f32
      %218 = vector.broadcast %cst_66 : f32 to vector<128x128xf32>
      %219 = arith.cmpf oge, %217, %218 : vector<128x128xf32>
      %cst_67 = arith.constant 0.00999999977 : f32
      %220 = vector.broadcast %cst_67 : f32 to vector<128x128xf32>
      %221 = arith.mulf %220, %217 : vector<128x128xf32>
      %222 = arith.select %219, %217, %221 : vector<128x128xi1>, vector<128x128xf32>
      %c0_68 = arith.constant 0 : index
      %c0_69 = arith.constant 0 : index
      %223 = vector.load %arg13[%c0_68, %c0_69] : memref<128x128xf32, #tpu.memory_space<vmem>>, vector<128x128xf32>
      tpu.vector_store %arg13[%c0_68, %c0_69], %222 {strides = array<i32>} : memref<128x128xf32, #tpu.memory_space<vmem>>, vector<128x128xf32>,
    } else {
    }
    return
  }
  func.func @transform_0(%arg0: i32, %arg1: i32) -> (i32, i32) {
    %c0_i32 = arith.constant 0 : i32
    %c0_i32_0 = arith.constant 0 : i32
    return %arg0, %c0_i32 : i32, i32
  }
  func.func @transform_1(%arg0: i32, %arg1: i32) -> (i32, i32, i32, i32) {
    %c0_i32 = arith.constant 0 : i32
    %c0_i32_0 = arith.constant 0 : i32
    %c0_i32_1 = arith.constant 0 : i32
    return %arg1, %c0_i32, %arg0, %c0_i32_0 : i32, i32, i32, i32
  }
  func.func @transform_2(%arg0: i32, %arg1: i32) -> (i32, i32, i32) {
    %c0_i32 = arith.constant 0 : i32
    %c0_i32_0 = arith.constant 0 : i32
    return %arg1, %c0_i32, %arg0 : i32, i32, i32
  }
  func.func @transform_3(%arg0: i32, %arg1: i32) -> (i32, i32, i32) {
    %c0_i32 = arith.constant 0 : i32
    %c0_i32_0 = arith.constant 0 : i32
    %c0_i32_1 = arith.constant 0 : i32
    %c0_i32_2 = arith.constant 0 : i32
    return %c0_i32, %c0_i32_0, %c0_i32_1 : i32, i32, i32
  }
  func.func @transform_4(%arg0: i32, %arg1: i32) -> (i32, i32, i32) {
    %c0_i32 = arith.constant 0 : i32
    %c0_i32_0 = arith.constant 0 : i32
    %c0_i32_1 = arith.constant 0 : i32
    %c0_i32_2 = arith.constant 0 : i32
    return %c0_i32, %c0_i32_0, %c0_i32_1 : i32, i32, i32
  }
  func.func @transform_5(%arg0: i32, %arg1: i32) -> (i32, i32, i32) {
    %c0_i32 = arith.constant 0 : i32
    %c0_i32_0 = arith.constant 0 : i32
    %c0_i32_1 = arith.constant 0 : i32
    %c0_i32_2 = arith.constant 0 : i32
    return %c0_i32, %c0_i32_0, %c0_i32_1 : i32, i32, i32
  }
  func.func @transform_6(%arg0: i32, %arg1: i32) -> (i32, i32, i32) {
    %c0_i32 = arith.constant 0 : i32
    %c0_i32_0 = arith.constant 0 : i32
    %c0_i32_1 = arith.constant 0 : i32
    %c0_i32_2 = arith.constant 0 : i32
    return %c0_i32, %c0_i32_0, %c0_i32_1 : i32, i32, i32
  }
  func.func @transform_7(%arg0: i32, %arg1: i32) -> (i32, i32) {
    %c0_i32 = arith.constant 0 : i32
    %c0_i32_0 = arith.constant 0 : i32
    %c0_i32_1 = arith.constant 0 : i32
    return %c0_i32, %c0_i32_0 : i32, i32
  }
  func.func @transform_8(%arg0: i32, %arg1: i32) -> (i32, i32) {
    %c0_i32 = arith.constant 0 : i32
    %c0_i32_0 = arith.constant 0 : i32
    %c0_i32_1 = arith.constant 0 : i32
    return %c0_i32, %c0_i32_0 : i32, i32
  }
  func.func @transform_9(%arg0: i32, %arg1: i32) -> (i32, i32) {
    %c0_i32 = arith.constant 0 : i32
    %c0_i32_0 = arith.constant 0 : i32
    %c0_i32_1 = arith.constant 0 : i32
    return %c0_i32, %c0_i32_0 : i32, i32
  }
  func.func @transform_10(%arg0: i32, %arg1: i32) -> (i32, i32) {
    %c0_i32 = arith.constant 0 : i32
    %c0_i32_0 = arith.constant 0 : i32
    %c0_i32_1 = arith.constant 0 : i32
    return %c0_i32, %c0_i32_0 : i32, i32
  }
  func.func @transform_11(%arg0: i32, %arg1: i32) -> (i32, i32) {
    %c0_i32 = arith.constant 0 : i32
    %c0_i32_0 = arith.constant 0 : i32
    return %arg0, %c0_i32 : i32, i32
  }
}

</mosaic_0001>

<bundles_post_ra>
// kernel: tpu_custom_call.1
= control target key start
LH: loop header
LB: loop body
LE: loop exit
PB: predicated region body
PF: predicated region fallthrough
CT: control target
= control target key end

     0   :  { %s12629_s0 = inlined_call_operand.hbm [shape: f32[256,128], index: 0, kind: input, shape index: {}]   ;;  %s12630_s1 = inlined_call_operand.hbm [shape: bf16[2,4,256,128], index: 1, kind: input, shape index: {}]   ;;  %s12631_s2 = inlined_call_operand.hbm [shape: f32[2,8,256], index: 2, kind: input, shape index: {}]   ;;  %s12632_s3 = inlined_call_operand.hbm [shape: bf16[2,128,512], index: 3, kind: input, shape index: {}]   ;;  %s12633_s4 = inlined_call_operand.hbm [shape: bf16[2,128,512], index: 4, kind: input, shape index: {}]   ;;  %s12634_s5 = inlined_call_operand.hbm [shape: f32[2,1,512], index: 5, kind: input, shape index: {}]   ;;  %s12635_s6 = inlined_call_operand.hbm [shape: bf16[2,256,128], index: 6, kind: input, shape index: {}]   ;;  %s12636_s7 = inlined_call_operand.hbm [shape: f32[1,128], index: 7, kind: input, shape index: {}]   ;;  %s12637_s8 = inlined_call_operand.hbm [shape: f32[1,128], index: 8, kind: input, shape index: {}]   ;;  %s12638_s9 = inlined_call_operand.hbm [shape: f32[1,128], index: 9, kind: input, shape index: {}]   ;;  %s12639_s10 = inlined_call_operand.hbm [shape: f32[1,128], index: 10, kind: input, shape index: {}]   ;;  %s12640_s11 = inlined_call_operand.hbm [shape: f32[256,128], index: 11, kind: output, shape index: {}]  }
   0x1   :  { %12881 = sst [smem:[#allocation161_spill]] %s12629_s0 }
   0x2   :  { %12882 = sst [smem:[#allocation162_spill]] %s12630_s1 }
   0x3   :  { %12883 = sst [smem:[#allocation163_spill]] %s12631_s2 }
   0x4   :  { %12884 = sst [smem:[#allocation164_spill]] %s12632_s3 }
   0x5   :  { %12885 = sst [smem:[#allocation165_spill]] %s12633_s4 }
   0x6   :  { %12886 = sst [smem:[#allocation166_spill]] %s12640_s11 }
   0x7   :  { %16 = vsyncpa [#allocation3], 0 }
   0x8   :  { %18 = vsyncpa [#allocation3 + $0x1], 0 }
   0x9   :  { %19 = vsyncpa [#allocation6], 0 }
   0xa   :  { %21 = vsyncpa [#allocation6 + $0x1], 0 }
   0xb   :  { %22 = vsyncpa [#allocation9], 0 }
   0xc   :  { %23 = vsyncpa [#allocation12], 0 }
   0xd   :  { %24 = vsyncpa [#allocation15], 0 }
   0xe   :  { %25 = vsyncpa [#allocation18], 0 }
   0xf   :  { %26 = vsyncpa [#allocation4], 0 }
  0x10   :  { %28 = vsyncpa [#allocation4 + $0x1], 0  ;;  %s8292_s17 = smov 0   ;;  %s8294_s18 = smov 0  }
  0x11   :  { %s8296_s19 = smov 0   ;;  %s8298_s20 = smov 0  }
  0x12   :  { %s8300_s21 = smov 0   ;;  %s8302_s22 = smov 0  }
  0x13   :  { %s8304_s23 = smov 0   ;;  %s8306_s24 = smov 0  }
  0x14   :  { %s8308_s25 = smov 0   ;;  %s8310_s26 = smov 0  }
  0x15   :  { %s8312_s27 = smov 0  }
  0x16 LB: > { %12887 = sst [smem:[#allocation31_spill]] %s8164_s18  ;;  %s8348_s28 = sadd.s32 4294967295, %s8200_s27   ;;  %s8200_s27 = sphi %s8312_s27, %s34_s27   ;;  %s8196_s26 = sphi %s8310_s26, %s13581_s26   ;;  %s8192_s25 = sphi %s8308_s25, %s13580_s25   ;;  %s8188_s24 = sphi %s8306_s24, %s13579_s24   ;;  %s8184_s23 = sphi %s8304_s23, %s13578_s23   ;;  %s8180_s22 = sphi %s8302_s22, %s13577_s22   ;;  %s8176_s21 = sphi %s8300_s21, %s13576_s21   ;;  %s8172_s20 = sphi %s8298_s20, %s13575_s20   ;;  %s8168_s19 = sphi %s8296_s19, %s13574_s19   ;;  %s8164_s18 = sphi %s8294_s18, %s13573_s18   ;;  %s8160_s17 = sphi %s8292_s17, %s13567_s17  }
  0x17   : > { %12888 = sst [smem:[#allocation32_spill]] %s8172_s20  ;;  %s6332_s29 = sadd.s32 4294967294, %s8200_s27  }
  0x18   : > { %12889 = sst [smem:[#allocation33_spill]] %s8176_s21  ;;  %s43_s30 = sadd.s32 1, %s8192_s25 }
  0x19   : > { %12890 = sst [smem:[#allocation34_spill]] %s8184_s23  ;;  %s46_s12 = sadd.s32 1, %s8196_s26 }
  0x1a   : > { %12891 = sst [smem:[#allocation35_spill]] %s8188_s24  ;;  %p44_p0 = scmp.ge.s32.totalorder %s43_s30, 2 }
  0x1b   : > { %12892 = sst [smem:[#allocation36_spill]] %s8348_s28  ;;  %s53_s13 = sadd.s32 1, %s8180_s22 }
  0x1c   : > { %p60_p1 = scmp.ne.s32.totalorder %s8180_s22, %s8176_s21  ;;  %p61_p2 = scmp.eq.s32.totalorder %s8200_s27, 0 }
  0x1d   : > { %s13583_s30 = smov (%p44_p0, %s43_s30), 0  ;;  %s13585_s12 = smov (!%p44_p0, %s46_s12), %s8196_s26 }
  0x1e   : > { %12893 = sst [smem:[#allocation37_spill]] %s13583_s30  ;;  %p8365_p3 = por %p61_p2, %p60_p1 }
  0x1f   : > { %p12647_p4 = scmp.ne.s32.totalorder %s8176_s21, %s8172_s20  ;;  %p48_p5 = scmp.ge.s32.totalorder %s13585_s12, 2 }
  0x20   : > { %s12894_s14 = scalar_select %p8365_p3, 1, 0 }
  0x21   : > { %p12657_p6 = scmp.eq.s32.totalorder %s8348_s28, 0  ;;  %s76_s15 = ssub.s32 %s8192_s25, %s13583_s30 }
  0x22   : > { %s81_s16 = sadd.s32 1, %s8168_s19  ;;  %s13587_s12 = smov (%p48_p5, %s13585_s12), 0 }
  0x23   : > { %12895 = sst [smem:[#allocation38_spill]] %s13587_s12  ;;  %p8382_p7 = por %p12657_p6, %p12647_p4 }
  0x24   : > { %p88_p8 = scmp.ne.s32.totalorder %s8168_s19, %s8164_s18  ;;  %s50_s24 = ssub.s32 %s8196_s26, %s13587_s12 }
  0x25   : > { %s12896_s11 = scalar_select %p8382_p7, 1, 0 }
  0x26   : > { %p94_p9 = scmp.ne.s32.totalorder %s8164_s18, %s8160_s17  ;;  %p51_p10 = scmp.eq.s32.totalorder %s50_s24, 0 }
  0x27   : > { %12897 = sst [smem:[#allocation39_spill]] %s12896_s11  ;;  %s78_s30 = sor.u32 %s76_s15, %s50_s24 }
  0x28   : > { %p79_p11 = scmp.eq.s32.totalorder %s78_s30, 0  ;;  %p8394_p12 = por %p88_p8, %p61_p2 }
  0x29   : > { %s8399_s2 = scalar_select %p51_p10, %s8180_s22, %s53_s13  }
  0x2a   : > { %s12898_s23 = scalar_select %p8394_p12, 1, 0 }
  0x2b   : > { %12899 = sst [smem:[#allocation40_spill]] %s8399_s2  ;;  %p8406_p13 = por %p94_p9, %p12657_p6 }
  0x2c   : > { %s8402_s1 = scalar_select %p79_p11, %s8168_s19, %s81_s16  }
  0x2d   : > { %s12901_s11 = scalar_select %p8406_p13, 1, 0 }
  0x2e   : > { %12900 = sst [smem:[#allocation41_spill]] %s8402_s1  ;;  %p314_p0 = scmp.eq.s32.totalorder %s8348_s28, 3 }
  0x2f   : > { %12902 = sst [smem:[#allocation42_spill]] %s12901_s11  ;;  %p320_p5 = scmp.eq.s32.totalorder %s6332_s29, 3 }
  0x30   : > { %p6333_p4 = scmp.ge.s32.totalorder %s8200_s27, 1  ;;  %p8415_p7 = por %p314_p0, %p60_p1 }
  0x31   : > { %p327_p2 = scmp.lt.s32.totalorder %s8200_s27, 5  ;;  %p12905_p8 = scmp.ne.s32.totalorder %s8176_s21, %s8172_s20 }
  0x32   : > { %s12903_s17 = scalar_select %p8415_p7, 1, 0 }
  0x33   : > { %p8423_p12 = por %p320_p5, %p12905_p8  ;;  %p8427_p10 = pnand %p6333_p4, %p327_p2 }
  0x34   : > { %12904 = sst [smem:[#allocation43_spill]] %s12903_s17  ;;  %s8202_s13 = smov [#allocation8]  }
  0x35   : > { %s12906_s24 = scalar_select %p8423_p12, 1, 0 }
  0x36   : > { %s12908_s30 = scalar_select %p8427_p10, 1, 0 }
  0x37   : > { %12907 = sst [smem:[#allocation44_spill]] %s12906_s24  ;;  %s339_s15 = sshll.u32 %s8202_s13, 4  ;;  %s340_s15 = int_to_ptr.vmem [resolvable:$true] %s339_s15 }
  0x38   : > { %12909 = sst [smem:[#allocation45_spill]] %s12908_s30  ;;  %p6677_p9 = pneg %p8427_p10 }
  0x39   : > { %s8203_s16 = smov [#allocation11]   ;;  %s12911_s3 = sld [smem:[#allocation164_spill]] }
  0x3a   : > { %p8435_p1 = pnand %p6677_p9, %p12657_p6  ;;  %s365_s12 = sshll.u32 %s8203_s16, 4  ;;  %s8439_s12 = int_to_ptr.vmem [resolvable:$true] %s365_s12 }
  0x3c   : > { %p8449_p11 = pneg %p8435_p1 }
  0x3f   : > { %s7778_s24 = scalar_lea.hbm %s12911_s3, 8192 }
  0x40   : > { %p7779_p4 = scmp.ne.s32.totalorder %s12911_s3, %s7778_s24  ;;  %p7785_p2 = scmp.lt.u32.totalorder %s7778_s24, %s12911_s3 }
  0x42   : > { %p7781_p0 = pnand %p8449_p11, %p7779_p4 }
  0x44   : > { %p7782_p5 = pneg %p7781_p0 }
  0x46   : > { %p7787_p8 = pnand %p7785_p2, %p7782_p5 }
  0x48   : > { %7790 = shalt.err (!%p7787_p8)
}
  0x49   : > { %s7791_s1 = scalar_lea.vmem %s340_s15, 8192  ;;  %p7799_p7 = scmp.lt.s32.totalorder %s340_s15, %s340_s15 }
  0x4a   : > { %p7792_p9 = scmp.ne.s32.totalorder %s340_s15, %s7791_s1  ;;  %p7800_p13 = scmp.lt.s32.totalorder %s7791_s1, %s7791_s1 }
  0x4c   : > { %p7794_p6 = pnand %p7792_p9, %p8449_p11  ;;  %p7801_p10 = por %p7800_p13, %p7799_p7 }
  0x4e   : > { %p7795_p12 = pneg %p7794_p6 }
  0x50   : > { %p7802_p3 = pnand %p7801_p10, %p7795_p12 }
  0x52   : > { %7805 = shalt.err (!%p7802_p3)
}
  0x53   : > { %s12667_s2 = smov 256   ;;  %s12668_s20 = smov 16  }
  0x54   : > { %6680 = dma.hbm_to_vmem [thread:$0]  (!%p8435_p1), %s12911_s3, 8192, %s340_s15, [#allocation9], %s12667_s2, %s12667_s2, %s12668_s20  }
  0x55   : > { %s7806_s18 = scalar_lea.hbm %s12634_s5, 128 }
  0x56   : > { %p7807_p3 = scmp.ne.s32.totalorder %s12634_s5, %s7806_s18  ;;  %p7813_p12 = scmp.lt.u32.totalorder %s7806_s18, %s12634_s5 }
  0x58   : > { %p7809_p6 = pnand %p7807_p3, %p8449_p11 }
  0x5a   : > { %p7810_p7 = pneg %p7809_p6 }
  0x5c   : > { %p7815_p13 = pnand %p7813_p12, %p7810_p7 }
  0x5e   : > { %7818 = shalt.err (!%p7815_p13)
}
  0x5f   : > { %s7819_s15 = scalar_lea.vmem %s8439_s12, 128  ;;  %p7827_p5 = scmp.lt.s32.totalorder %s8439_s12, %s8439_s12 }
  0x60   : > { %p7820_p10 = scmp.ne.s32.totalorder %s8439_s12, %s7819_s15  ;;  %p7828_p2 = scmp.lt.s32.totalorder %s7819_s15, %s7819_s15 }
  0x62   : > { %p7822_p4 = pnand %p7820_p10, %p8449_p11  ;;  %p7829_p8 = por %p7828_p2, %p7827_p5 }
  0x64   : > { %p7823_p0 = pneg %p7822_p4 }
  0x66   : > { %p7830_p9 = pnand %p7829_p8, %p7823_p0 }
  0x68   : > { %7833 = shalt.err (!%p7830_p9)
}
  0x69   : > { %s12669_s28 = smov 64   ;;  %s8207_s18 = smov 4  }
  0x6a   : > { %6686 = dma.hbm_to_vmem [thread:$0]  (!%p8435_p1), %s12634_s5, 128, %s8439_s12, [#allocation12], %s12669_s28, %s12669_s28, %s8207_s18  }
  0x6b   : > { %s8208_s11 = smov [#allocation14]   ;;  %s8209_s24 = smov [#allocation17]  }
  0x6c   : > { %s392_s17 = sshll.u32 %s8208_s11, 4  ;;  %s414_s16 = sshll.u32 %s8209_s24, 4  ;;  %s393_s17 = int_to_ptr.vmem [resolvable:$true] %s392_s17  ;;  %s8494_s16 = int_to_ptr.vmem [resolvable:$true] %s414_s16 }
  0x6d   : > { %s7834_s2 = scalar_lea.hbm %s12636_s7, 16 }
  0x6e   : > { %p7835_p3 = scmp.ne.s32.totalorder %s12636_s7, %s7834_s2  ;;  %p7841_p12 = scmp.lt.u32.totalorder %s7834_s2, %s12636_s7 }
  0x70   : > { %p7837_p6 = pnand %p7835_p3, %p8449_p11 }
  0x72   : > { %p7838_p7 = pneg %p7837_p6 }
  0x74   : > { %p7843_p13 = pnand %p7841_p12, %p7838_p7 }
  0x76   : > { %7846 = shalt.err (!%p7843_p13)
}
  0x77   : > { %s7847_s30 = scalar_lea.vmem %s393_s17, 16  ;;  %s7854_s11 = scalar_lea.vmem %s393_s17, 32 }
  0x78   : > { %p7848_p10 = scmp.ne.s32.totalorder %s393_s17, %s7847_s30  ;;  %p7855_p5 = scmp.lt.s32.totalorder %s393_s17, %s393_s17 }
  0x79   : > { %p7856_p2 = scmp.lt.s32.totalorder %s7854_s11, %s7847_s30 }
  0x7a   : > { %p7850_p4 = pnand %p7848_p10, %p8449_p11 }
  0x7b   : > { %p7857_p8 = por %p7856_p2, %p7855_p5 }
  0x7c   : > { %p7851_p0 = pneg %p7850_p4 }
  0x7e   : > { %p7858_p9 = pnand %p7857_p8, %p7851_p0 }
  0x80   : > { %7861 = shalt.err (!%p7858_p9)
}
  0x81   : > { %6692 = dma.hbm_to_vmem [thread:$0]  (!%p8435_p1), %s12636_s7, 16, %s393_s17, [#allocation15]  }
  0x82   : > { %s7862_s1 = scalar_lea.hbm %s12638_s9, 16 }
  0x83   : > { %p7863_p3 = scmp.ne.s32.totalorder %s12638_s9, %s7862_s1  ;;  %p7869_p12 = scmp.lt.u32.totalorder %s7862_s1, %s12638_s9 }
  0x85   : > { %p7865_p6 = pnand %p7863_p3, %p8449_p11 }
  0x87   : > { %p7866_p7 = pneg %p7865_p6 }
  0x89   : > { %p7871_p13 = pnand %p7869_p12, %p7866_p7 }
  0x8b   : > { %7874 = shalt.err (!%p7871_p13)
}
  0x8c   : > { %s7875_s17 = scalar_lea.vmem %s8494_s16, 16  ;;  %s7882_s11 = scalar_lea.vmem %s8494_s16, 32 }
  0x8d   : > { %p7876_p10 = scmp.ne.s32.totalorder %s8494_s16, %s7875_s17  ;;  %p7883_p5 = scmp.lt.s32.totalorder %s8494_s16, %s8494_s16 }
  0x8e   : > { %p7884_p2 = scmp.lt.s32.totalorder %s7882_s11, %s7875_s17 }
  0x8f   : > { %p7878_p4 = pnand %p7876_p10, %p8449_p11 }
  0x90   : > { %p7885_p8 = por %p7884_p2, %p7883_p5 }
  0x91   : > { %p7879_p0 = pneg %p7878_p4 }
  0x93   : > { %p7886_p9 = pnand %p7885_p8, %p7879_p0 }
  0x95   : > { %7889 = shalt.err (!%p7886_p9)
}
  0x96   : > { %6698 = dma.hbm_to_vmem [thread:$0]  (!%p8435_p1), %s12638_s9, 16, %s8494_s16, [#allocation18]  }
  0x97   : > { %s8210_s2 = smov [#allocation10]   ;;  %s8211_s1 = smov [#allocation13]  }
  0x98   : > { %s352_s24 = sshll.u32 %s8210_s2, 4  ;;  %s378_s15 = sshll.u32 %s8211_s1, 4  ;;  %s353_s24 = int_to_ptr.vmem [resolvable:$true] %s352_s24  ;;  %s8538_s15 = int_to_ptr.vmem [resolvable:$true] %s378_s15 }
  0x99   : > { %s12913_s4 = sld [smem:[#allocation165_spill]] }
  0x9f   : > { %s7890_s30 = scalar_lea.hbm %s12913_s4, 8192 }
  0xa0   : > { %p7891_p3 = scmp.ne.s32.totalorder %s12913_s4, %s7890_s30  ;;  %p7897_p12 = scmp.lt.u32.totalorder %s7890_s30, %s12913_s4 }
  0xa2   : > { %p7893_p6 = pnand %p7891_p3, %p8449_p11 }
  0xa4   : > { %p7894_p7 = pneg %p7893_p6 }
  0xa6   : > { %p7899_p13 = pnand %p7897_p12, %p7894_p7 }
  0xa8   : > { %7902 = shalt.err (!%p7899_p13)
}
  0xa9   : > { %s7903_s20 = scalar_lea.vmem %s353_s24, 8192  ;;  %p7911_p5 = scmp.lt.s32.totalorder %s353_s24, %s353_s24 }
  0xaa   : > { %p7904_p10 = scmp.ne.s32.totalorder %s353_s24, %s7903_s20  ;;  %p7912_p2 = scmp.lt.s32.totalorder %s7903_s20, %s7903_s20 }
  0xac   : > { %p7906_p4 = pnand %p7904_p10, %p8449_p11  ;;  %p7913_p8 = por %p7912_p2, %p7911_p5 }
  0xae   : > { %p7907_p0 = pneg %p7906_p4 }
  0xb0   : > { %p7914_p9 = pnand %p7913_p8, %p7907_p0 }
  0xb2   : > { %7917 = shalt.err (!%p7914_p9)
}
  0xb3   : > { %s12914_s2 = smov 16   ;;  %s12915_s1 = smov 256  }
  0xb4   : > { %6683 = dma.hbm_to_vmem [thread:$0]  (!%p8435_p1), %s12913_s4, 8192, %s353_s24, [#allocation9], %s12915_s1, %s12915_s1, %s12914_s2  }
  0xb5   : > { %s7918_s11 = scalar_lea.hbm %s12635_s6, 4096 }
  0xb6   : > { %p7919_p3 = scmp.ne.s32.totalorder %s12635_s6, %s7918_s11  ;;  %p7925_p12 = scmp.lt.u32.totalorder %s7918_s11, %s12635_s6 }
  0xb8   : > { %p7921_p6 = pnand %p7919_p3, %p8449_p11 }
  0xba   : > { %p7922_p7 = pneg %p7921_p6 }
  0xbc   : > { %p7927_p13 = pnand %p7925_p12, %p7922_p7 }
  0xbe   : > { %7930 = shalt.err (!%p7927_p13)
}
  0xbf   : > { %s7931_s24 = scalar_lea.vmem %s8538_s15, 4096  ;;  %p7939_p5 = scmp.lt.s32.totalorder %s8538_s15, %s8538_s15 }
  0xc0   : > { %p7932_p10 = scmp.ne.s32.totalorder %s8538_s15, %s7931_s24  ;;  %p7940_p2 = scmp.lt.s32.totalorder %s7931_s24, %s7931_s24 }
  0xc2   : > { %p7934_p4 = pnand %p7932_p10, %p8449_p11  ;;  %p7941_p8 = por %p7940_p2, %p7939_p5 }
  0xc4   : > { %p7935_p0 = pneg %p7934_p4 }
  0xc6   : > { %p7942_p9 = pnand %p7941_p8, %p7935_p0 }
  0xc8   : > { %7945 = shalt.err (!%p7942_p9)
}
  0xc9   : > { %s12916_s28 = smov 64   ;;  %s8212_s21 = smov [#allocation16]  }
  0xca   : > { %6689 = dma.hbm_to_vmem [thread:$0]  (!%p8435_p1), %s12635_s6, 4096, %s8538_s15, [#allocation12], %s12916_s28, %s12916_s28, %s8207_s18  }
  0xcb   : > { %s403_s12 = sshll.u32 %s8212_s21, 4  ;;  %s8213_s30 = smov [#allocation19]   ;;  %s404_s12 = int_to_ptr.vmem [resolvable:$true] %s403_s12 }
  0xcc   : > { %s425_s17 = sshll.u32 %s8213_s30, 4  ;;  %s7946_s16 = scalar_lea.hbm %s12637_s8, 16  ;;  %s8587_s17 = int_to_ptr.vmem [resolvable:$true] %s425_s17 }
  0xcd   : > { %p7947_p3 = scmp.ne.s32.totalorder %s12637_s8, %s7946_s16  ;;  %p7953_p12 = scmp.lt.u32.totalorder %s7946_s16, %s12637_s8 }
  0xcf   : > { %p7949_p6 = pnand %p7947_p3, %p8449_p11 }
  0xd1   : > { %p7950_p7 = pneg %p7949_p6 }
  0xd3   : > { %p7955_p13 = pnand %p7953_p12, %p7950_p7 }
  0xd5   : > { %7958 = shalt.err (!%p7955_p13)
}
  0xd6   : > { %s7959_s15 = scalar_lea.vmem %s404_s12, 16  ;;  %s7966_s28 = scalar_lea.vmem %s404_s12, 32 }
  0xd7   : > { %p7960_p10 = scmp.ne.s32.totalorder %s404_s12, %s7959_s15  ;;  %p7967_p5 = scmp.lt.s32.totalorder %s404_s12, %s404_s12 }
  0xd8   : > { %p7968_p2 = scmp.lt.s32.totalorder %s7966_s28, %s7959_s15 }
  0xd9   : > { %p7962_p4 = pnand %p7960_p10, %p8449_p11 }
  0xda   : > { %p7969_p8 = por %p7968_p2, %p7967_p5 }
  0xdb   : > { %p7963_p0 = pneg %p7962_p4 }
  0xdd   : > { %p7970_p9 = pnand %p7969_p8, %p7963_p0 }
  0xdf   : > { %7973 = shalt.err (!%p7970_p9)
}
  0xe0   : > { %6695 = dma.hbm_to_vmem [thread:$0]  (!%p8435_p1), %s12637_s8, 16, %s404_s12, [#allocation15]  }
  0xe1   : > { %s7974_s3 = scalar_lea.hbm %s12639_s10, 16 }
  0xe2   : > { %p7975_p3 = scmp.ne.s32.totalorder %s12639_s10, %s7974_s3  ;;  %p7981_p12 = scmp.lt.u32.totalorder %s7974_s3, %s12639_s10 }
  0xe4   : > { %p7977_p6 = pnand %p7975_p3, %p8449_p11 }
  0xe6   : > { %p7978_p7 = pneg %p7977_p6 }
  0xe8   : > { %p7983_p13 = pnand %p7981_p12, %p7978_p7 }
  0xea   : > { %7986 = shalt.err (!%p7983_p13)
}
  0xeb   : > { %s7987_s12 = scalar_lea.vmem %s8587_s17, 16  ;;  %s7994_s18 = scalar_lea.vmem %s8587_s17, 32 }
  0xec   : > { %p7988_p10 = scmp.ne.s32.totalorder %s8587_s17, %s7987_s12  ;;  %p7995_p5 = scmp.lt.s32.totalorder %s8587_s17, %s8587_s17 }
  0xed   : > { %p7996_p2 = scmp.lt.s32.totalorder %s7994_s18, %s7987_s12 }
  0xee   : > { %p7990_p4 = pnand %p7988_p10, %p8449_p11 }
  0xef   : > { %p7997_p8 = por %p7996_p2, %p7995_p5 }
  0xf0   : > { %p7991_p0 = pneg %p7990_p4 }
  0xf2   : > { %p7998_p9 = pnand %p7997_p8, %p7991_p0 }
  0xf4   : > { %8001 = shalt.err (!%p7998_p9)
}
  0xf5   : > { %6701 = dma.hbm_to_vmem [thread:$0]  (!%p8435_p1), %s12639_s10, 16, %s8587_s17, [#allocation18]  }
  0xf6   : > { %p6342_p3 = scmp.ge.s32.totalorder %s8200_s27, 4 }
  0xf7   : > { %s436_s13 = sand.u32 (!%p6342_p3), 1, %s8180_s22   ;;  %s6545_s1 = sshll.u32 (!%p6342_p3), %s8196_s26, 11 }
  0xf8   : > { %432 = sbr.rel (%p6342_p3) target bundleno = 326 (0x146), region = 48  ;;  %s6343_s21 = sshll.u32 (!%p6342_p3), %s436_s13, 7 }
  0xf9   : > { %s12917_s0 = sld [smem:[#allocation161_spill]] (!%p6342_p3)  ;;  %s440_s29 = scalar_lea.vmem (!%p6342_p3), [#allocation2], %s6343_s21 }
  0xfa   : > { %s447_s17 = sshll.u32 (!%p6342_p3), %s440_s29, 4  ;;  %s8641_s16 = scalar_lea.sflag (!%p6342_p3), [#allocation3], %s436_s13  ;;  %s8639_s17 = int_to_ptr.vmem [resolvable:$true] %s447_s17 }
  0xfb   : > { %p12918_p11 = scmp.ne.s32.totalorder (!%p6342_p3), %s12894_s14, 0 }
  0xff   : > { %s8637_s3 = scalar_lea.hbm %s12917_s0, %s6545_s1  ;;  %s8006_s12 = scalar_lea.hbm %s12917_s0, 4096 }
 0x100   : > { %s8002_s20 = scalar_lea.hbm %s8637_s3, 2048  ;;  %p8007_p12 = scmp.lt.u32.totalorder %s8637_s3, %s12917_s0 }
 0x101   : > { %p8003_p1 = scmp.ne.s32.totalorder %s8637_s3, %s8002_s20  ;;  %p8008_p13 = scmp.lt.u32.totalorder %s8006_s12, %s8002_s20 }
 0x102   : > { %p8010_p4 = scmp.lt.u32.totalorder %s8002_s20, %s8637_s3 }
 0x103   : > { %p8004_p6 = pnand %p8003_p1, %p12918_p11  ;;  %p8009_p10 = por %p8008_p13, %p8007_p12 }
 0x105   : > { %p8005_p7 = pneg %p8004_p6  ;;  %p8011_p0 = por %p8010_p4, %p8009_p10 }
 0x107   : > { %p8012_p5 = pnand %p8011_p0, %p8005_p7 }
 0x109   : > { %8015 = shalt.err (!%p8012_p5)
}
 0x10a   : > { %s8016_s28 = scalar_lea.vmem %s8639_s17, 2048  ;;  %s8214_s13 = smov [#allocation2]  }
 0x10b   : > { %p8017_p2 = scmp.ne.s32.totalorder %s8639_s17, %s8016_s28  ;;  %s8020_s1 = sshll.u32 %s8214_s13, 4  ;;  %s8021_s1 = int_to_ptr.vmem [resolvable:$false] %s8020_s1 }
 0x10c   : > { %s8022_s21 = scalar_lea.vmem %s8021_s1, 4096  ;;  %p8023_p3 = scmp.lt.s32.totalorder %s8639_s17, %s8021_s1 }
 0x10d   : > { %p8018_p8 = pnand %p8017_p2, %p12918_p11  ;;  %p8024_p1 = scmp.lt.s32.totalorder %s8022_s21, %s8016_s28 }
 0x10f   : > { %p8019_p9 = pneg %p8018_p8  ;;  %p8025_p6 = por %p8024_p1, %p8023_p3 }
 0x111   : > { %p8026_p12 = pnand %p8025_p6, %p8019_p9 }
 0x113   : > { %8029 = shalt.err (!%p8026_p12)
}
 0x114   : > { %s8215_s30 = smov 128   ;;  %s8216_s11 = smov 8  }
 0x115   : > { %6646 = dma.hbm_to_vmem [thread:$0]  (%p12918_p11), %s8637_s3, 2048, %s8639_s17, %s8641_s16, %s8215_s30, %s8215_s30, %s8216_s11  }
 0x116   : > { %s459_s29 = sand.u32 1, %s8168_s19   ;;  %s6347_s24 = sshll.u32 %s8196_s26, 4 }
 0x117   : > { %s6346_s20 = sshll.u32 %s459_s29, 8  ;;  %s6348_s2 = sshll.u32 %s8192_s25, 7 }
 0x118   : > { %s457_s12 = sand.u32 1, %s8200_s27   ;;  %s467_s18 = sadd.s32 %s6348_s2, %s6347_s24 }
 0x119   : > { %s461_s14 = scalar_lea.vmem [#allocation5], %s6346_s20  ;;  %s6349_s17 = sshll.u32 %s467_s18, 6 }
 0x11a   : > { %s482_s3 = sshll.u32 %s461_s14, 4  ;;  %s8217_s16 = smov 2048   ;;  %s483_s3 = int_to_ptr.vmem [resolvable:$true] %s482_s3 }
 0x11b   : > { %p12919_p11 = scmp.ne.s32.totalorder %s12898_s23, 0  ;;  %s8218_s13 = smov 1024  }
 0x11c   : > { %s8219_s1 = smov 16   ;;  %s8220_s21 = smov 64  }
 0x11d   : > { %6648 = sst [smem:[#allocation22]] (%p12919_p11), %s8217_s16  ;;  %s8221_s30 = smov 4  }
 0x11e   : > { %s6647_s15 = scalar_select %p12919_p11, [#allocation0], [#allocation23] }
 0x11f   : > { %6649 = sst [smem:[#allocation22 + $0x1]] (%p12919_p11), %s8218_s13  ;;  %s8688_s16 = scalar_lea.sflag [#allocation6], %s457_s12 }
 0x120   : > { %s474_s28 = sld [smem:[%s6647_s15]]   ;;  %s8222_s15 = smov [#allocation21]  }
 0x121   : > { %6650 = sst [smem:[#allocation22 + $0x2]] (%p12919_p11), %s8219_s1  ;;  %s12920_s24 = sld [smem:[#allocation162_spill]] }
 0x122   : > { %6651 = sst [smem:[#allocation22 + $0x3]] (%p12919_p11), %s8220_s21  ;;  %s6352_s13 = sshll.u32 %s459_s29, 3 }
 0x123   : > { %6652 = sst [smem:[#allocation22 + $0x4]] (%p12919_p11), %s8220_s21  ;;  %s6353_s1 = sshll.u32 %s8192_s25, 1 }
 0x124   : > { %6653 = sst [smem:[#allocation22 + $0x5]] (%p12919_p11), %s8221_s30  ;;  %s514_s21 = sadd.s32 %s8196_s26, %s6353_s1 }
 0x125   : > { %s6354_s30 = sshll.u32 %s514_s21, 7  ;;  %s509_s0 = scalar_lea.vmem [#allocation7], %s6352_s13 }
 0x126   : > { %s6350_s18 = sshll.u32 %s474_s28, 26  ;;  %s518_s11 = sshll.u32 %s509_s0, 4  ;;  %s519_s11 = int_to_ptr.vmem [resolvable:$true] %s518_s11 }
 0x127   : > { %s469_s2 = scalar_lea.hbm %s12920_s24, %s6349_s17  ;;  %s6351_s14 = sadd.s32 134217728, %s6350_s18 }
 0x128   : > { %6654 = dma.general (%p12919_p11), %s469_s2, 4096, %s483_s3, %s8688_s16, %s8222_s15, [#allocation22], %s6351_s14, 0  }
 0x129   : > { %s12921_s20 = sld [smem:[#allocation163_spill]] }
 0x12f   : > { %s12922_s4 = smov %s12921_s20  ;;  %s516_s12 = scalar_lea.hbm %s12921_s20, %s6354_s30 }
 0x130   : > { %s8030_s24 = scalar_lea.hbm %s516_s12, 128  ;;  %s8034_s18 = scalar_lea.hbm %s12922_s4, 512 }
 0x131   : > { %p8031_p7 = scmp.ne.s32.totalorder %s516_s12, %s8030_s24  ;;  %p8035_p4 = scmp.lt.u32.totalorder %s516_s12, %s12922_s4 }
 0x132   : > { %p8036_p0 = scmp.lt.u32.totalorder %s8034_s18, %s8030_s24  ;;  %p8038_p2 = scmp.lt.u32.totalorder %s8030_s24, %s516_s12 }
 0x133   : > { %p8032_p13 = pnand %p8031_p7, %p12919_p11 }
 0x134   : > { %p8037_p5 = por %p8036_p0, %p8035_p4 }
 0x135   : > { %p8033_p10 = pneg %p8032_p13 }
 0x136   : > { %p8039_p8 = por %p8038_p2, %p8037_p5 }
 0x138   : > { %p8040_p9 = pnand %p8039_p8, %p8033_p10 }
 0x13a   : > { %8043 = shalt.err (!%p8040_p9)
}
 0x13b   : > { %s8044_s0 = scalar_lea.vmem %s519_s11, 128  ;;  %s8223_s15 = smov [#allocation7]  }
 0x13c   : > { %p8045_p3 = scmp.ne.s32.totalorder %s519_s11, %s8044_s0  ;;  %s8048_s13 = sshll.u32 %s8223_s15, 4  ;;  %s8049_s13 = int_to_ptr.vmem [resolvable:$false] %s8048_s13 }
 0x13d   : > { %s8050_s1 = scalar_lea.vmem %s8049_s13, 256  ;;  %p8051_p12 = scmp.lt.s32.totalorder %s519_s11, %s8049_s13 }
 0x13e   : > { %p8046_p1 = pnand %p8045_p3, %p12919_p11  ;;  %p8052_p7 = scmp.lt.s32.totalorder %s8050_s1, %s8044_s0 }
 0x140   : > { %p8047_p6 = pneg %p8046_p1  ;;  %p8053_p13 = por %p8052_p7, %p8051_p12 }
 0x142   : > { %p8054_p0 = pnand %p8053_p13, %p8047_p6 }
 0x144   : > { %8057 = shalt.err (!%p8054_p0)
}
 0x145   : > { %6655 = dma.hbm_to_vmem [thread:$0]  (%p12919_p11), %s516_s12, 128, %s519_s11, %s8688_s16  }
 0x146 PF: > { %s12923_s21 = sld [smem:[#allocation45_spill]] }
 0x14c   : > { %p12924_p10 = scmp.ne.s32.totalorder %s12923_s21, 0 }
 0x14e   : > { %527 = sbr.rel (%p12924_p10) target bundleno = 2803 (0xaf3), region = 64 }
 0x155   : > { %s12925_s30 = sld [smem:[#allocation33_spill]]  ;;  %s12926_s17 = sld [smem:[#allocation39_spill]] }
 0x15b   : > { %s8716_s28 = sand.u32 1, %s12925_s30   ;;  %p12927_p4 = scmp.ne.s32.totalorder %s12926_s17, 0 }
 0x15c   : > { %s6356_s20 = sshll.u32 %s8716_s28, 7  ;;  %s530_s24 = scalar_lea.sflag [#allocation3], %s8716_s28 }
 0x15d   : > { %s8720_s3 = scalar_lea.vmem [#allocation2], %s6356_s20 }
 0x15e   : > { %8131 = dma.done.wait (%p12927_p4), %s530_s24, 2048  }
 0x15f   : > { %8133 = vsyncadd (%p12927_p4), %s530_s24, 4294965248  ;;  %s12928_s23 = sld [smem:[#allocation36_spill]]  ;;  %s12929_s16 = sld [smem:[#allocation31_spill]] }
 0x160   : > { %s12930_s11 = sld [smem:[#allocation42_spill]] }
 0x165   : > { %s538_s12 = sand.u32 1, %s12928_s23   ;;  %s540_s2 = sand.u32 1, %s12929_s16  }
 0x166   : > { %s6357_s18 = sshll.u32 %s540_s2, 8  ;;  %s539_s29 = scalar_lea.sflag [#allocation6], %s538_s12 }
 0x167   : > { %s8728_s14 = scalar_lea.vmem [#allocation5], %s6357_s18  ;;  %p12931_p11 = scmp.ne.s32.totalorder %s12930_s11, 0 }
 0x169   : > { %8135 = dma.done.wait (%p12931_p11), %s539_s29, 4224  }
 0x16a   : > { %8137 = vsyncadd (%p12931_p11), %s539_s29, 4294963072  ;;  %s8734_s0 = sshll.u32 %s540_s2, 3  ;;  %p12932_p5 = scmp.eq.s32.totalorder %s12928_s23, 0 }
 0x16b   : > { %s551_s15 = scalar_lea.vmem [#allocation7], %s8734_s0 }
 0x16c   : > { %8139 = dma.done.wait (%p12932_p5), [#allocation9], 16384   ;;  %p12933_p2 = pmov %p12932_p5 }
 0x16e   : > { %8141 = vsyncadd (%p12933_p2), [#allocation9], 4294950912  ;;  %p12934_p8 = pmov %p12933_p2 }
 0x16f   : > { %p12935_p9 = pmov %p12933_p2 }
 0x170   : > { %8143 = dma.done.wait (%p12934_p8), [#allocation12], 4224  }
 0x171   : > { %8145 = vsyncadd (%p12935_p9), [#allocation12], 4294963072  ;;  %p12936_p3 = pmov %p12933_p2 }
 0x172   : > { %p12937_p1 = pmov %p12933_p2 }
 0x173   : > { %8147 = dma.done.wait (%p12936_p3), [#allocation15], 32  }
 0x174   : > { %8149 = vsyncadd (%p12937_p1), [#allocation15], 4294967264  ;;  %p12938_p6 = pmov %p12937_p1 }
 0x175   : > { %p12939_p12 = pmov %p12937_p1 }
 0x176   : > { %8151 = dma.done.wait (%p12938_p6), [#allocation18], 32  }
 0x177   : > { %8153 = vsyncadd (%p12939_p12), [#allocation18], 4294967264  ;;  %s8753_s13 = scalar_lea.vmem [#allocation20], %s6356_s20  ;;  %s12940_s1 = sld [smem:[#allocation34_spill]] }
 0x17d   : > { %p6368_p7 = scmp.ne.s32.totalorder %s12940_s1, 0 }
 0x17e   : > { %v8224_v0 = vmov (!%p6368_p7), 0.0  }
 0x17f   : > { %639 = sbr.rel (%p6368_p7) target bundleno = 391 (0x187), region = 112  ;;  %640 = vst [vmem:[%s8753_s13] sm:$0xff] (!%p6368_p7), %v8224_v0  ;;  %641 = vst [vmem:[%s8753_s13 + $0x8] sm:$0xff] (!%p6368_p7), %v8224_v0 }
 0x180   : > { %642 = vst [vmem:[%s8753_s13 + $0x10] sm:$0xff] (!%p6368_p7), %v8224_v0  ;;  %643 = vst [vmem:[%s8753_s13 + $0x18] sm:$0xff] (!%p6368_p7), %v8224_v0 }
 0x181   : > { %644 = vst [vmem:[%s8753_s13 + $0x20] sm:$0xff] (!%p6368_p7), %v8224_v0  ;;  %645 = vst [vmem:[%s8753_s13 + $0x28] sm:$0xff] (!%p6368_p7), %v8224_v0 }
 0x182   : > { %646 = vst [vmem:[%s8753_s13 + $0x30] sm:$0xff] (!%p6368_p7), %v8224_v0  ;;  %647 = vst [vmem:[%s8753_s13 + $0x38] sm:$0xff] (!%p6368_p7), %v8224_v0 }
 0x183   : > { %648 = vst [vmem:[%s8753_s13 + $0x40] sm:$0xff] (!%p6368_p7), %v8224_v0  ;;  %649 = vst [vmem:[%s8753_s13 + $0x48] sm:$0xff] (!%p6368_p7), %v8224_v0 }
 0x184   : > { %650 = vst [vmem:[%s8753_s13 + $0x50] sm:$0xff] (!%p6368_p7), %v8224_v0  ;;  %651 = vst [vmem:[%s8753_s13 + $0x58] sm:$0xff] (!%p6368_p7), %v8224_v0 }
 0x185   : > { %652 = vst [vmem:[%s8753_s13 + $0x60] sm:$0xff] (!%p6368_p7), %v8224_v0  ;;  %653 = vst [vmem:[%s8753_s13 + $0x68] sm:$0xff] (!%p6368_p7), %v8224_v0 }
 0x186   : > { %654 = vst [vmem:[%s8753_s13 + $0x70] sm:$0xff] %v8224_v0  ;;  %655 = vst [vmem:[%s8753_s13 + $0x78] sm:$0xff] %v8224_v0 }
 0x187 PF: > { %s12941_s21 = sld [smem:[#allocation34_spill]]  ;;  %v12670_v1 = vmov 0   ;;  %v8802_v19 = vld [vmem:[%s8728_s14] sm:$0xff]   ;;  %v8819_v27 = vld [vmem:[%s8728_s14 + $0x8] sm:$0xff]   ;;  %v8838_v34 = vld [vmem:[%s8728_s14 + $0x10] sm:$0xff]  }
 0x188   : > { %1197 = vmatprep.mubr.bf16.mxu0 %v12670_v1  ;;  %1477 = vmatprep.mubr.bf16.mxu1 %v12670_v1  ;;  %v6872_v20 = vld [vmem:[%s8728_s14 + $0xe0] sm:$0xff]   ;;  %v6880_v28 = vld [vmem:[%s8728_s14 + $0xe8] sm:$0xff]   ;;  %v6888_v36 = vld [vmem:[%s8728_s14 + $0xf0] sm:$0xff]  }
 0x189   : > { %6840 = vset.pattern.permute.xlu1 %v12670_v1  ;;  %v1999_v39 = vld [vmem:[%s551_s15] sm:$0xff]  ;;  %v6895_v44 = vld [vmem:[%s8728_s14 + $0x18] sm:$0xff]   ;;  %v6908_v0 = vld [vmem:[%s8728_s14 + $0x30] sm:$0xff]  }
 0x18a   : > { %2000 = vxpose.xlu0.b32.start.end [1/1] (short) %v1999_v39, 128  ;;  %v6896_v45 = vld [vmem:[%s8728_s14 + $0xf8] sm:$0xff]   ;;  %v6903_v52 = vld [vmem:[%s8728_s14 + $0x20] sm:$0xff]   ;;  %v6907_v57 = vld [vmem:[%s8728_s14 + $0x28] sm:$0xff]  }
 0x18d   : > { %s6546_s30 = sshll.u32 %s12941_s21, 8  ;;  %s6372_s24 = sshll.u32 %s12941_s21, 2 }
 0x18e   : > { %s8777_s17 = scalar_lea.vmem [#allocation8], %s6546_s30  ;;  %s8799_s20 = scalar_lea.vmem [#allocation10], %s6546_s30 }
 0x18f   : > { %v6847_v2 = vld [vmem:[%s8777_s17 + $0x4] ss:$16 sps:$4 sm:$0xff]   ;;  %v6849_v3 = vld [vmem:[%s8777_s17] ss:$16 sps:$4 sm:$0xff]   ;;  %v6875_v18 = vld [vmem:[%s8777_s17 + $0xc] ss:$16 sps:$4 sm:$0xff]  }
 0x190   : > { %1165 = vmatprep.subr.bf16.mxu0 %v6847_v2  ;;  %6614 = vmatprep.subr.bf16.mxu1 %v6847_v2  ;;  %v6850_v4 = vld [vmem:[%s8777_s17 + $0x24] ss:$16 sps:$4 sm:$0xff]   ;;  %v6852_v5 = vld [vmem:[%s8777_s17 + $0x20] ss:$16 sps:$4 sm:$0xff]   ;;  %v6873_v21 = vld [vmem:[%s8777_s17 + $0x8] ss:$16 sps:$4 sm:$0xff]  }
 0x191   : > { %1166 = vmatpush1.bf16.msra.mxu0 %v6849_v3  ;;  %6622 = vmatpush1.bf16.msra.mxu1 %v6849_v3  ;;  %v6853_v6 = vld [vmem:[%s8777_s17 + $0x44] ss:$16 sps:$4 sm:$0xff]   ;;  %v6855_v7 = vld [vmem:[%s8777_s17 + $0x40] ss:$16 sps:$4 sm:$0xff]   ;;  %v6878_v22 = vld [vmem:[%s8777_s17 + $0x2c] ss:$16 sps:$4 sm:$0xff]  }
 0x192   : > { %1167 = vmatprep.subr.bf16.mxu0 %v6850_v4  ;;  %6615 = vmatprep.subr.bf16.mxu1 %v6850_v4  ;;  %v6856_v8 = vld [vmem:[%s8777_s17 + $0x64] ss:$16 sps:$4 sm:$0xff]   ;;  %v6858_v9 = vld [vmem:[%s8777_s17 + $0x60] ss:$16 sps:$4 sm:$0xff]   ;;  %v6876_v25 = vld [vmem:[%s8777_s17 + $0x28] ss:$16 sps:$4 sm:$0xff]  }
 0x193   : > { %v6859_v10 = vld [vmem:[%s8777_s17 + $0x84] ss:$16 sps:$4 sm:$0xff]   ;;  %v6861_v11 = vld [vmem:[%s8777_s17 + $0x80] ss:$16 sps:$4 sm:$0xff]   ;;  %v6883_v26 = vld [vmem:[%s8777_s17 + $0x4c] ss:$16 sps:$4 sm:$0xff]  }
 0x194   : > { %v6862_v12 = vld [vmem:[%s8777_s17 + $0xa4] ss:$16 sps:$4 sm:$0xff]   ;;  %v6864_v13 = vld [vmem:[%s8777_s17 + $0xa0] ss:$16 sps:$4 sm:$0xff]   ;;  %v6881_v29 = vld [vmem:[%s8777_s17 + $0x48] ss:$16 sps:$4 sm:$0xff]  }
 0x195   : > { %1168 = vmatpush1.bf16.msra.mxu0 %v6852_v5  ;;  %6623 = vmatpush1.bf16.msra.mxu1 %v6852_v5  ;;  %v6865_v14 = vld [vmem:[%s8777_s17 + $0xc4] ss:$16 sps:$4 sm:$0xff]   ;;  %v6867_v15 = vld [vmem:[%s8777_s17 + $0xc0] ss:$16 sps:$4 sm:$0xff]   ;;  %v6886_v31 = vld [vmem:[%s8777_s17 + $0x6c] ss:$16 sps:$4 sm:$0xff]  }
 0x196   : > { %1169 = vmatprep.subr.bf16.mxu0 %v6853_v6  ;;  %6616 = vmatprep.subr.bf16.mxu1 %v6853_v6  ;;  %v6868_v16 = vld [vmem:[%s8777_s17 + $0xe4] ss:$16 sps:$4 sm:$0xff]   ;;  %v6870_v17 = vld [vmem:[%s8777_s17 + $0xe0] ss:$16 sps:$4 sm:$0xff]   ;;  %v6884_v33 = vld [vmem:[%s8777_s17 + $0x68] ss:$16 sps:$4 sm:$0xff]  }
 0x197   : > { %v8808_v23 = vld [vmem:[%s8799_s20 + $0x4] ss:$16 sps:$4 sm:$0xff]   ;;  %v8812_v24 = vld [vmem:[%s8799_s20] ss:$16 sps:$4 sm:$0xff]   ;;  %v6891_v35 = vld [vmem:[%s8777_s17 + $0x8c] ss:$16 sps:$4 sm:$0xff]  }
 0x198   : > { %v8826_v30 = vld [vmem:[%s8799_s20 + $0x24] ss:$16 sps:$4 sm:$0xff]   ;;  %v8831_v32 = vld [vmem:[%s8799_s20 + $0x20] ss:$16 sps:$4 sm:$0xff]   ;;  %v6889_v40 = vld [vmem:[%s8777_s17 + $0x88] ss:$16 sps:$4 sm:$0xff]  }
 0x199   : > { %1170 = vmatpush1.bf16.msra.mxu0 %v6855_v7  ;;  %6624 = vmatpush1.bf16.msra.mxu1 %v6855_v7  ;;  %v8844_v37 = vld [vmem:[%s8799_s20 + $0x44] ss:$16 sps:$4 sm:$0xff]   ;;  %v8847_v38 = vld [vmem:[%s8799_s20 + $0x40] ss:$16 sps:$4 sm:$0xff]   ;;  %v6894_v41 = vld [vmem:[%s8777_s17 + $0xac] ss:$16 sps:$4 sm:$0xff]  }
 0x19a   : > { %1171 = vmatprep.subr.bf16.mxu0 %v6856_v8  ;;  %6617 = vmatprep.subr.bf16.mxu1 %v6856_v8  ;;  %v6892_v42 = vld [vmem:[%s8777_s17 + $0xa8] ss:$16 sps:$4 sm:$0xff]   ;;  %v6899_v43 = vld [vmem:[%s8777_s17 + $0xcc] ss:$16 sps:$4 sm:$0xff]   ;;  %v8863_v46 = vld [vmem:[%s8799_s20 + $0x64] ss:$16 sps:$4 sm:$0xff]  }
 0x19b   : > { %v8866_v47 = vld [vmem:[%s8799_s20 + $0x60] ss:$16 sps:$4 sm:$0xff]   ;;  %v6897_v48 = vld [vmem:[%s8777_s17 + $0xc8] ss:$16 sps:$4 sm:$0xff]   ;;  %v6902_v49 = vld [vmem:[%s8777_s17 + $0xec] ss:$16 sps:$4 sm:$0xff]  }
 0x19c   : > { %v6900_v50 = vld [vmem:[%s8777_s17 + $0xe8] ss:$16 sps:$4 sm:$0xff]   ;;  %v8875_v51 = vld [vmem:[%s8799_s20 + $0xc] ss:$16 sps:$4 sm:$0xff]   ;;  %v8892_v60 = vld [vmem:[%s8799_s20 + $0x84] ss:$16 sps:$4 sm:$0xff]  }
 0x19d   : > { %1172 = vmatpush1.bf16.msra.mxu0 %v6858_v9  ;;  %6625 = vmatpush1.bf16.msra.mxu1 %v6858_v9  ;;  %v6906_v53 = vld [vmem:[%s8799_s20 + $0x8] ss:$16 sps:$4 sm:$0xff]   ;;  %v6914_v54 = vld [vmem:[%s8799_s20 + $0x2c] ss:$16 sps:$4 sm:$0xff]   ;;  %v8895_v61 = vld [vmem:[%s8799_s20 + $0x80] ss:$16 sps:$4 sm:$0xff]  }
 0x19e   : > { %1173 = vmatprep.subr.bf16.mxu0 %v6859_v10  ;;  %6618 = vmatprep.subr.bf16.mxu1 %v6859_v10  ;;  %v6916_v55 = vld [vmem:[%s8799_s20 + $0x28] ss:$16 sps:$4 sm:$0xff]   ;;  %v6924_v56 = vld [vmem:[%s8799_s20 + $0x4c] ss:$16 sps:$4 sm:$0xff]   ;;  %v6913_v4 = vld [vmem:[%s8728_s14 + $0x40] sm:$0xff]   ;;  %s726_s23 = scalar_lea.vmem [#allocation11], %s6372_s24 }
 0x19f   : > { %v6926_v58 = vld [vmem:[%s8799_s20 + $0x48] ss:$16 sps:$4 sm:$0xff]   ;;  %v6934_v59 = vld [vmem:[%s8799_s20 + $0x6c] ss:$16 sps:$4 sm:$0xff]   ;;  %v8916_v7 = vld [vmem:[%s8799_s20 + $0xa4] ss:$16 sps:$4 sm:$0xff]  }
 0x1a0   : > { %v6936_v62 = vld [vmem:[%s8799_s20 + $0x68] ss:$16 sps:$4 sm:$0xff]   ;;  %v6944_v63 = vld [vmem:[%s8799_s20 + $0x8c] ss:$16 sps:$4 sm:$0xff]   ;;  %v8921_v8 = vld [vmem:[%s8799_s20 + $0xa0] ss:$16 sps:$4 sm:$0xff]  }
 0x1a1   : > { %1174 = vmatpush1.bf16.msra.mxu0 %v6861_v11  ;;  %6626 = vmatpush1.bf16.msra.mxu1 %v6861_v11  ;;  %v6946_v2 = vld [vmem:[%s8799_s20 + $0x88] ss:$16 sps:$4 sm:$0xff]   ;;  %v6954_v5 = vld [vmem:[%s8799_s20 + $0xac] ss:$16 sps:$4 sm:$0xff]   ;;  %v6918_v10 = vld [vmem:[%s8728_s14 + $0x50] sm:$0xff]   ;;  %s6548_s16 = sshll.u32 %s12941_s21, 7 }
 0x1a2   : > { %1175 = vmatprep.subr.bf16.mxu0 %v6862_v12  ;;  %6619 = vmatprep.subr.bf16.mxu1 %v6862_v12  ;;  %v6909_v3 = vld [vmem:[%s8728_s14 + $0x38] sm:$0xff]   ;;  %v6917_v9 = vld [vmem:[%s8728_s14 + $0x48] sm:$0xff]   ;;  %v8933_v12 = vld [vmem:[%s8799_s20 + $0xc4] ss:$16 sps:$4 sm:$0xff]   ;;  %s11173_s11 = scalar_lea.vmem [#allocation13], %s6548_s16  ;;  %p6535_p13 = scmp.ne.s32.totalorder %s12941_s21, 1 }
 0x1a3   : > { %v6956_v6 = vld [vmem:[%s8799_s20 + $0xa8] ss:$16 sps:$4 sm:$0xff]  }
 0x1a4   : > { %v6922_v11 = vld [vmem:[%s8728_s14 + $0x58] sm:$0xff]  }
 0x1a5   : > { %1176 = vmatpush1.bf16.msra.mxu0 %v6864_v13  ;;  %6627 = vmatpush1.bf16.msra.mxu1 %v6864_v13  ;;  %v8936_v13 = vld [vmem:[%s8799_s20 + $0xc0] ss:$16 sps:$4 sm:$0xff]  }
 0x1a6   : > { %1177 = vmatprep.subr.bf16.mxu0 %v6865_v14  ;;  %6620 = vmatprep.subr.bf16.mxu1 %v6865_v14  ;;  %v8942_v14 = vld [vmem:[%s8799_s20 + $0xe4] ss:$16 sps:$4 sm:$0xff]  }
 0x1a9   : > { %1178 = vmatpush1.bf16.msra.mxu0 %v6867_v15  ;;  %6628 = vmatpush1.bf16.msra.mxu1 %v6867_v15  ;;  %v8946_v15 = vld [vmem:[%s8799_s20 + $0xe0] ss:$16 sps:$4 sm:$0xff]  }
 0x1aa   : > { %1179 = vmatprep.subr.bf16.mxu0 %v6868_v16  ;;  %6621 = vmatprep.subr.bf16.mxu1 %v6868_v16  ;;  %v6923_v16 = vld [vmem:[%s8728_s14 + $0x60] sm:$0xff]  }
 0x1ad   : > { %1180 = vmatpush1.bf16.msra.mxu0 %v6870_v17  ;;  %6629 = vmatpush1.bf16.msra.mxu1 %v6870_v17  ;;  %v6969_v17 = vld [vmem:[%s8799_s20 + $0xcc] ss:$16 sps:$4 sm:$0xff]  }
 0x1ae   : > { %1518 = vmatprep.subr.bf16.mxu1 %v6875_v18  ;;  %2272 = vmatprep.subr.bf16.mxu0 %v8808_v23  ;;  %v6971_v18 = vld [vmem:[%s8799_s20 + $0xc8] ss:$16 sps:$4 sm:$0xff]  }
 0x1b0   : > { %1198 = vmatmul.mubr.bf16.vlgmr.msra.gmra.mrb[0].mxu0 %v8802_v19  ;;  %1478 = vmatmul.mubr.bf16.vlgmr.msra.gmra.mrb[0].mxu1 %v6872_v20  ;;  %v6928_v20 = vld [vmem:[%s8728_s14 + $0x70] sm:$0xff]  }
 0x1b1   : > { %1519 = vmatpush1.bf16.msra.mxu1 %v6873_v21  ;;  %1207 = vmatprep.mubr.bf16.mxu0 %v12670_v1  ;;  %v6932_v21 = vld [vmem:[%s8728_s14 + $0x78] sm:$0xff]  }
 0x1b2   : > { %1520 = vmatprep.subr.bf16.mxu1 %v6878_v22  ;;  %1487 = vmatprep.mubr.bf16.mxu1 %v12670_v1  ;;  %v6933_v22 = vld [vmem:[%s8728_s14 + $0x80] sm:$0xff]  }
 0x1b3   : > { %2273 = vmatpush1.bf16.msra.mxu0 %v8812_v24  ;;  %6839 = vset.pattern.permute.xlu0 %v12670_v1 }
 0x1b4   : > { %2274 = vmatprep.subr.bf16.mxu0 %v8826_v30 }
 0x1b5   : > { %1521 = vmatpush1.bf16.msra.mxu1 %v6876_v25  ;;  %v6974_v25 = vld [vmem:[%s8799_s20 + $0xe8] ss:$16 sps:$4 sm:$0xff]  }
 0x1b6   : > { %1522 = vmatprep.subr.bf16.mxu1 %v6883_v26  ;;  %v6937_v26 = vld [vmem:[%s8728_s14 + $0x88] sm:$0xff]  }
 0x1b7   : > { %2275 = vmatpush1.bf16.msra.mxu0 %v8831_v32 }
 0x1b8   : > { %1208 = vmatmul.mubr.bf16.gmra.mrb[4].mxu0 %v8819_v27  ;;  %1488 = vmatmul.mubr.bf16.gmra.mrb[4].mxu1 %v6880_v28 }
 0x1b9   : > { %1523 = vmatpush1.bf16.msra.mxu1 %v6881_v29  ;;  %1217 = vmatprep.mubr.bf16.mxu0 %v12670_v1 }
 0x1ba   : > { %1524 = vmatprep.subr.bf16.mxu1 %v6886_v31  ;;  %1497 = vmatprep.mubr.bf16.mxu1 %v12670_v1 }
 0x1bb   : > { %2276 = vmatprep.subr.bf16.mxu0 %v8844_v37 }
 0x1bc   : > { %2277 = vmatpush1.bf16.msra.mxu0 %v8847_v38 }
 0x1bd   : > { %1525 = vmatpush1.bf16.msra.mxu1 %v6884_v33  ;;  %2278 = vmatprep.subr.bf16.mxu0 %v8863_v46 }
 0x1be   : > { %1526 = vmatprep.subr.bf16.mxu1 %v6891_v35 }
 0x1c0   : > { %1218 = vmatmul.mubr.bf16.gmra.mrb[8].mxu0 %v8838_v34  ;;  %1498 = vmatmul.mubr.bf16.gmra.mrb[8].mxu1 %v6888_v36 }
 0x1c1   : > { %1527 = vmatpush1.bf16.msra.mxu1 %v6889_v40  ;;  %1227 = vmatprep.mubr.bf16.mxu0 %v12670_v1 }
 0x1c2   : > { %1528 = vmatprep.subr.bf16.mxu1 %v6894_v41  ;;  %1507 = vmatprep.mubr.bf16.mxu1 %v12670_v1  ;;  %v6943_v41 = vld [vmem:[%s8728_s14 + $0xa0] sm:$0xff]  }
 0x1c3   : > { %2279 = vmatpush1.bf16.msra.mxu0 %v8866_v47 }
 0x1c4   : > { %2280 = vmatprep.subr.bf16.mxu0 %v8892_v60 }
 0x1c5   : > { %1529 = vmatpush1.bf16.msra.mxu1 %v6892_v42 }
 0x1c6   : > { %1530 = vmatprep.subr.bf16.mxu1 %v6899_v43 }
 0x1c7   : > { %2281 = vmatpush1.bf16.msra.mxu0 %v8895_v61 }
 0x1c8   : > { %1228 = vmatmul.mubr.bf16.gmra.mrb[12].mxu0 %v6895_v44  ;;  %1508 = vmatmul.mubr.bf16.gmra.mrb[12].mxu1 %v6896_v45 }
 0x1c9   : > { %1531 = vmatpush1.bf16.msra.mxu1 %v6897_v48  ;;  %1237 = vmatprep.mubr.bf16.mxu0 %v12670_v1  ;;  %v6947_v48 = vld [vmem:[%s8728_s14 + $0xa8] sm:$0xff]  }
 0x1ca   : > { %1532 = vmatprep.subr.bf16.mxu1 %v6902_v49  ;;  %1550 = vmatprep.mubr.bf16.mxu1 %v12670_v1 }
 0x1cb   : > { %2282 = vmatprep.subr.bf16.mxu0 %v8916_v7 }
 0x1cc   : > { %2283 = vmatpush1.bf16.msra.mxu0 %v8921_v8 }
 0x1cd   : > { %1533 = vmatpush1.bf16.msra.mxu1 %v6900_v50  ;;  %2284 = vmatprep.subr.bf16.mxu0 %v8933_v12 }
 0x1ce   : > { %2385 = vmatprep.subr.bf16.mxu1 %v8875_v51 }
 0x1d0   : > { %1238 = vmatmul.mubr.bf16.gmra.mrb[16].mxu0 %v6903_v52  ;;  %1551 = vmatmul.mubr.bf16.vlgmr.msra.gmra.mrb[16].mxu1 %v8802_v19  ;;  %v6927_v19 = vld [vmem:[%s8728_s14 + $0x68] sm:$0xff]  }
 0x1d1   : > { %2386 = vmatpush1.bf16.msra.mxu1 %v6906_v53  ;;  %1247 = vmatprep.mubr.bf16.mxu0 %v12670_v1  ;;  %v9018_v53 = vld [vmem:[%s8728_s14 + $0xb0] sm:$0xff]  }
 0x1d2   : > { %1560 = vmatprep.mubr.bf16.mxu1 %v12670_v1  ;;  %2387 = vmatprep.subr.bf16.mxu1 %v6914_v54 }
 0x1d3   : > { %2285 = vmatpush1.bf16.msra.mxu0 %v8936_v13 }
 0x1d4   : > { %2286 = vmatprep.subr.bf16.mxu0 %v8942_v14 }
 0x1d5   : > { %2388 = vmatpush1.bf16.msra.mxu1 %v6916_v55 }
 0x1d6   : > { %2389 = vmatprep.subr.bf16.mxu1 %v6924_v56 }
 0x1d7   : > { %2287 = vmatpush1.bf16.msra.mxu0 %v8946_v15 }
 0x1d8   : > { %1248 = vmatmul.mubr.bf16.gmra.mrb[20].mxu0 %v6907_v57  ;;  %1561 = vmatmul.mubr.bf16.gmra.mrb[20].mxu1 %v8819_v27  ;;  %v6941_v27 = vld [vmem:[%s8728_s14 + $0x90] sm:$0xff]  }
 0x1d9   : > { %1257 = vmatprep.mubr.bf16.mxu0 %v12670_v1  ;;  %1570 = vmatprep.mubr.bf16.mxu1 %v12670_v1 }
 0x1da   : > { %2390 = vmatpush1.bf16.msra.mxu1 %v6926_v58  ;;  %3034 = vmatprep.subr.bf16.mxu0 %v8808_v23  ;;  %v6972_v23 = vld [vmem:[%s8799_s20 + $0xec] ss:$16 sps:$4 sm:$0xff]  }
 0x1db   : > { %2391 = vmatprep.subr.bf16.mxu1 %v6934_v59  ;;  %v9032_v58 = vld [vmem:[%s8728_s14 + $0xb8] sm:$0xff]  }
 0x1de   : > { %2392 = vmatpush1.bf16.msra.mxu1 %v6936_v62  ;;  %v8226_v62 = vmov 1  }
 0x1df   : > { %2393 = vmatprep.subr.bf16.mxu1 %v6944_v63 }
 0x1e0   : > { %1258 = vmatmul.mubr.bf16.gmra.mrb[24].mxu0 %v6908_v0  ;;  %1571 = vmatmul.mubr.bf16.gmra.mrb[24].mxu1 %v8838_v34  ;;  %v6942_v34 = vld [vmem:[%s8728_s14 + $0x98] sm:$0xff]  }
 0x1e1   : > { %1267 = vmatprep.mubr.bf16.mxu0 %v12670_v1  ;;  %1580 = vmatprep.mubr.bf16.mxu1 %v12670_v1 }
 0x1e2   : > { %2394 = vmatpush1.bf16.msra.mxu1 %v6946_v2 }
 0x1e3   : > { %2395 = vmatprep.subr.bf16.mxu1 %v6954_v5 }
 0x1e6   : > { %2396 = vmatpush1.bf16.msra.mxu1 %v6956_v6 }
 0x1e7   : > { %2397 = vmatprep.subr.bf16.mxu1 %v6969_v17 }
 0x1e8   : > { %1268 = vmatmul.mubr.bf16.gmra.mrb[28].mxu0 %v6909_v3  ;;  %1581 = vmatmul.mubr.bf16.gmra.mrb[28].mxu1 %v6895_v44 }
 0x1e9   : > { %1277 = vmatprep.mubr.bf16.mxu0 %v12670_v1  ;;  %1590 = vmatprep.mubr.bf16.mxu1 %v12670_v1 }
 0x1ea   : > { %2398 = vmatpush1.bf16.msra.mxu1 %v6971_v18 }
 0x1eb   : > { %2399 = vmatprep.subr.bf16.mxu1 %v6972_v23  ;;  %v9083_v23 = vld [vmem:[%s726_s23] sm:$0xf] }
 0x1ee   : > { %2400 = vmatpush1.bf16.msra.mxu1 %v6974_v25 }
 0x1ef   : > { %3147 = vmatprep.subr.bf16.mxu1 %v8875_v51 }
 0x1f0   : > { %1278 = vmatmul.mubr.bf16.gmra.mrb[32].mxu0 %v6913_v4  ;;  %1591 = vmatmul.mubr.bf16.gmra.mrb[32].mxu1 %v6903_v52 }
 0x1f1   : > { %1287 = vmatprep.mubr.bf16.mxu0 %v12670_v1  ;;  %1600 = vmatprep.mubr.bf16.mxu1 %v12670_v1 }
 0x1f8   : > { %1288 = vmatmul.mubr.bf16.gmra.mrb[36].mxu0 %v6917_v9  ;;  %1601 = vmatmul.mubr.bf16.gmra.mrb[36].mxu1 %v6907_v57 }
 0x1f9   : > { %1297 = vmatprep.mubr.bf16.mxu0 %v12670_v1  ;;  %1610 = vmatprep.mubr.bf16.mxu1 %v12670_v1 }
 0x200   : > { %1298 = vmatmul.mubr.bf16.gmra.mrb[40].mxu0 %v6918_v10  ;;  %1611 = vmatmul.mubr.bf16.gmra.mrb[40].mxu1 %v6908_v0 }
 0x201   : > { %1307 = vmatprep.mubr.bf16.mxu0 %v12670_v1  ;;  %1620 = vmatprep.mubr.bf16.mxu1 %v12670_v1 }
 0x208   : > { %1308 = vmatmul.mubr.bf16.gmra.mrb[44].mxu0 %v6922_v11  ;;  %1621 = vmatmul.mubr.bf16.gmra.mrb[44].mxu1 %v6909_v3  ;;  %v9046_v3 = vld [vmem:[%s8728_s14 + $0xc0] sm:$0xff]  }
 0x209   : > { %1317 = vmatprep.mubr.bf16.mxu0 %v12670_v1  ;;  %1630 = vmatprep.mubr.bf16.mxu1 %v12670_v1 }
 0x20a   : > { %v2016_v28 = vpop.trf.xlu0 }
 0x20b   : > { %vm2032_vm0 = vcmp.gt.f32.partialorder %v2016_v28, 0.0 }
 0x20c   : > { %v8978_v29 = vsel %vm2032_vm0, 1, %v12670_v1 }
 0x20d   : > { %2867 = vperm.xlu0 %6839, %v8978_v29  }
 0x20e   : > { %v2017_v31 = vpop.trf.xlu0 }
 0x20f   : > { %vm2033_vm1 = vcmp.gt.f32.partialorder %v2017_v31, 0.0 }
 0x210   : > { %1318 = vmatmul.mubr.bf16.gmra.mrb[48].mxu0 %v6923_v16  ;;  %1631 = vmatmul.mubr.bf16.gmra.mrb[48].mxu1 %v6913_v4  ;;  %v8982_v33 = vsel %vm2033_vm1, 1, %v12670_v1 }
 0x211   : > { %1327 = vmatprep.mubr.bf16.mxu0 %v12670_v1  ;;  %1640 = vmatprep.mubr.bf16.mxu1 %v12670_v1 }
 0x212   : > { %2870 = vperm.xlu1 %6840, %v8982_v33   ;;  %v2018_v35 = vpop.trf.xlu0  ;;  %6842 = vset.pattern.permute.xlu0 %v8226_v62 }
 0x213   : > { %vm2034_vm2 = vcmp.gt.f32.partialorder %v2018_v35, 0.0  ;;  %v9098_v35 = vld [vmem:[%s8728_s14 + $0xd8] sm:$0xff]  }
 0x214   : > { %v8987_v36 = vsel %vm2034_vm2, 1, %v12670_v1 }
 0x216   : > { %v2019_v39 = vpop.trf.xlu0  ;;  %2873 = vperm.xlu1 %6840, %v8987_v36  }
 0x217   : > { %vm2035_vm3 = vcmp.gt.f32.partialorder %v2019_v39, 0.0 }
 0x218   : > { %1328 = vmatmul.mubr.bf16.gmra.mrb[52].mxu0 %v6927_v19  ;;  %1641 = vmatmul.mubr.bf16.gmra.mrb[52].mxu1 %v6917_v9  ;;  %v8993_v40 = vsel %vm2035_vm3, 1, %v12670_v1 }
 0x219   : > { %1337 = vmatprep.mubr.bf16.mxu0 %v12670_v1  ;;  %1650 = vmatprep.mubr.bf16.mxu1 %v12670_v1 }
 0x21a   : > { %v2020_v42 = vpop.trf.xlu0  ;;  %2876 = vperm.xlu1 %6840, %v8993_v40  }
 0x21b   : > { %vm2036_vm4 = vcmp.gt.f32.partialorder %v2020_v42, 0.0 }
 0x21c   : > { %v8998_v43 = vsel %vm2036_vm4, 1, %v12670_v1 }
 0x21e   : > { %v2021_v44 = vpop.trf.xlu0  ;;  %2879 = vperm.xlu1 %6840, %v8998_v43  }
 0x21f   : > { %vm2037_vm5 = vcmp.gt.f32.partialorder %v2021_v44, 0.0 }
 0x220   : > { %1338 = vmatmul.mubr.bf16.gmra.mrb[56].mxu0 %v6928_v20  ;;  %1651 = vmatmul.mubr.bf16.gmra.mrb[56].mxu1 %v6918_v10  ;;  %v9004_v45 = vsel %vm2037_vm5, 1, %v12670_v1  ;;  %v9061_v10 = vld [vmem:[%s8728_s14 + $0xc8] sm:$0xff]  }
 0x221   : > { %1347 = vmatprep.mubr.bf16.mxu0 %v12670_v1  ;;  %1660 = vmatprep.mubr.bf16.mxu1 %v12670_v1 }
 0x222   : > { %v2022_v49 = vpop.trf.xlu0  ;;  %2882 = vperm.xlu1 %6840, %v9004_v45  }
 0x223   : > { %vm2038_vm6 = vcmp.gt.f32.partialorder %v2022_v49, 0.0 }
 0x224   : > { %v9009_v50 = vsel %vm2038_vm6, 1, %v12670_v1 }
 0x226   : > { %v2023_v51 = vpop.trf.xlu0  ;;  %2885 = vperm.xlu1 %6840, %v9009_v50  }
 0x227   : > { %vm2039_vm7 = vcmp.gt.f32.partialorder %v2023_v51, 0.0 }
 0x228   : > { %1348 = vmatmul.mubr.bf16.gmra.mrb[60].mxu0 %v6932_v21  ;;  %1661 = vmatmul.mubr.bf16.gmra.mrb[60].mxu1 %v6922_v11  ;;  %v9015_v52 = vsel %vm2039_vm7, 1, %v12670_v1 }
 0x229   : > { %1357 = vmatprep.mubr.bf16.mxu0 %v12670_v1  ;;  %1670 = vmatprep.mubr.bf16.mxu1 %v12670_v1 }
 0x22a   : > { %v2024_v54 = vpop.trf.xlu0  ;;  %2888 = vperm.xlu1 %6840, %v9015_v52  }
 0x22b   : > { %vm2040_vm8 = vcmp.gt.f32.partialorder %v2024_v54, 0.0 }
 0x22c   : > { %v9022_v55 = vsel %vm2040_vm8, 1, %v12670_v1 }
 0x22e   : > { %v2025_v56 = vpop.trf.xlu0  ;;  %2891 = vperm.xlu1 %6840, %v9022_v55  }
 0x22f   : > { %vm2041_vm9 = vcmp.gt.f32.partialorder %v2025_v56, 0.0 }
 0x230   : > { %1358 = vmatmul.mubr.bf16.gmra.mrb[64].mxu0 %v6933_v22  ;;  %1671 = vmatmul.mubr.bf16.gmra.mrb[64].mxu1 %v6923_v16  ;;  %v9029_v57 = vsel %vm2041_vm9, 1, %v12670_v1  ;;  %v793_v16 = vlaneseq }
 0x231   : > { %1367 = vmatprep.mubr.bf16.mxu0 %v12670_v1  ;;  %1680 = vmatprep.mubr.bf16.mxu1 %v12670_v1 }
 0x232   : > { %v2026_v59 = vpop.trf.xlu0  ;;  %2894 = vperm.xlu1 %6840, %v9029_v57  }
 0x233   : > { %vm2042_vm10 = vcmp.gt.f32.partialorder %v2026_v59, 0.0 }
 0x234   : > { %v9036_v63 = vsel %vm2042_vm10, 1, %v12670_v1 }
 0x236   : > { %v2027_v0 = vpop.trf.xlu0  ;;  %2897 = vperm.xlu1 %6840, %v9036_v63  }
 0x237   : > { %vm2043_vm11 = vcmp.gt.f32.partialorder %v2027_v0, 0.0 }
 0x238   : > { %1368 = vmatmul.mubr.bf16.gmra.mrb[68].mxu0 %v6937_v26  ;;  %1681 = vmatmul.mubr.bf16.gmra.mrb[68].mxu1 %v6927_v19  ;;  %v9043_v2 = vsel %vm2043_vm11, 1, %v12670_v1  ;;  %v9071_v19 = vshrl.u32 %v793_v16, 7 }
 0x239   : > { %1377 = vmatprep.mubr.bf16.mxu0 %v12670_v1  ;;  %1690 = vmatprep.mubr.bf16.mxu1 %v12670_v1 }
 0x23a   : > { %v2028_v4 = vpop.trf.xlu0  ;;  %2900 = vperm.xlu1 %6840, %v9043_v2   ;;  %v799_v25 = vsub.s32 1, %v9071_v19 }
 0x23b   : > { %vm2044_vm12 = vcmp.gt.f32.partialorder %v2028_v4, 0.0 }
 0x23c   : > { %v9050_v5 = vsel %vm2044_vm12, 1, %v12670_v1  ;;  %v9094_v28 = vrot.slane %v9083_v23, %v799_v25 }
 0x23d   : > { %3649 = vperm.xlu0 %6842, %v9050_v5  }
 0x23e   : > { %v2029_v6 = vpop.trf.xlu0  ;;  %2903 = vperm.xlu1 %6840, %v9050_v5  }
 0x23f   : > { %vm2045_vm13 = vcmp.gt.f32.partialorder %v2029_v6, 0.0 }
 0x240   : > { %1378 = vmatmul.mubr.bf16.gmra.mrb[72].mxu0 %v6941_v27  ;;  %1691 = vmatmul.mubr.bf16.gmra.mrb[72].mxu1 %v6928_v20  ;;  %v9058_v9 = vsel %vm2045_vm13, 1, %v12670_v1 }
 0x241   : > { %1387 = vmatprep.mubr.bf16.mxu0 %v12670_v1  ;;  %1700 = vmatprep.mubr.bf16.mxu1 %v12670_v1 }
 0x242   : > { %v2030_v11 = vpop.trf.xlu0  ;;  %2906 = vperm.xlu1 %6840, %v9058_v9  }
 0x243   : > { %vm2046_vm14 = vcmp.gt.f32.partialorder %v2030_v11, 0.0 }
 0x244   : > { %v9065_v17 = vsel %vm2046_vm14, 1, %v12670_v1 }
 0x246   : > { %v2031_v18 = vpop.trf.xlu0  ;;  %2909 = vperm.xlu1 %6840, %v9065_v17  }
 0x247   : > { %vm2047_vm15 = vcmp.gt.f32.partialorder %v2031_v18, 0.0 }
 0x248   : > { %1388 = vmatmul.mubr.bf16.gmra.mrb[76].mxu0 %v6942_v34  ;;  %1701 = vmatmul.mubr.bf16.gmra.mrb[76].mxu1 %v6932_v21  ;;  %v9075_v20 = vsel %vm2047_vm15, 1, %v12670_v1  ;;  %v9078_v21 = vld [vmem:[%s8728_s14 + $0xd0] sm:$0xff]  }
 0x249   : > { %1397 = vmatprep.mubr.bf16.mxu0 %v12670_v1  ;;  %1710 = vmatprep.mubr.bf16.mxu1 %v12670_v1 }
 0x24a   : > { %3658 = vperm.xlu0 %6842, %v9075_v20   ;;  %2912 = vperm.xlu1 %6840, %v9075_v20  }
 0x24e   : > { %6841 = vset.pattern.permute.xlu1 %v8226_v62 }
 0x24f   : > { %3613 = vperm.xlu1 %6841, %v8978_v29  }
 0x250   : > { %1398 = vmatmul.mubr.bf16.gmra.mrb[80].mxu0 %v6943_v41  ;;  %1711 = vmatmul.mubr.bf16.gmra.mrb[80].mxu1 %v6933_v22  ;;  %v795_v22 = vsub.s32 0, %v9071_v19 }
 0x251   : > { %1407 = vmatprep.mubr.bf16.mxu0 %v12670_v1  ;;  %1720 = vmatprep.mubr.bf16.mxu1 %v12670_v1 }
 0x253   : > { %3616 = vperm.xlu1 %6841, %v8982_v33  }
 0x257   : > { %3619 = vperm.xlu1 %6841, %v8987_v36  }
 0x258   : > { %1408 = vmatmul.mubr.bf16.gmra.mrb[84].mxu0 %v6947_v48  ;;  %1721 = vmatmul.mubr.bf16.gmra.mrb[84].mxu1 %v6937_v26  ;;  %v9091_v26 = vrot.slane %v9083_v23, %v795_v22 }
 0x259   : > { %1417 = vmatprep.mubr.bf16.mxu0 %v12670_v1  ;;  %1730 = vmatprep.mubr.bf16.mxu1 %v12670_v1 }
 0x25b   : > { %3622 = vperm.xlu1 %6841, %v8993_v40  }
 0x25f   : > { %3625 = vperm.xlu1 %6841, %v8998_v43  }
 0x260   : > { %1418 = vmatmul.mubr.bf16.gmra.mrb[88].mxu0 %v9018_v53  ;;  %1731 = vmatmul.mubr.bf16.gmra.mrb[88].mxu1 %v6941_v27 }
 0x261   : > { %1427 = vmatprep.mubr.bf16.mxu0 %v12670_v1  ;;  %1740 = vmatprep.mubr.bf16.mxu1 %v12670_v1 }
 0x263   : > { %3628 = vperm.xlu1 %6841, %v9004_v45  }
 0x267   : > { %3631 = vperm.xlu1 %6841, %v9009_v50  }
 0x268   : > { %1428 = vmatmul.mubr.bf16.gmra.mrb[92].mxu0 %v9032_v58  ;;  %1741 = vmatmul.mubr.bf16.gmra.mrb[92].mxu1 %v6942_v34 }
 0x269   : > { %1437 = vmatprep.mubr.bf16.mxu0 %v12670_v1  ;;  %1750 = vmatprep.mubr.bf16.mxu1 %v12670_v1 }
 0x26b   : > { %3634 = vperm.xlu1 %6841, %v9015_v52  }
 0x26f   : > { %3637 = vperm.xlu1 %6841, %v9022_v55  }
 0x270   : > { %1438 = vmatmul.mubr.bf16.gmra.mrb[96].mxu0 %v9046_v3  ;;  %1751 = vmatmul.mubr.bf16.gmra.mrb[96].mxu1 %v6943_v41 }
 0x271   : > { %1447 = vmatprep.mubr.bf16.mxu0 %v12670_v1  ;;  %1760 = vmatprep.mubr.bf16.mxu1 %v12670_v1 }
 0x273   : > { %3640 = vperm.xlu1 %6841, %v9029_v57  }
 0x277   : > { %3643 = vperm.xlu1 %6841, %v9036_v63  }
 0x278   : > { %1448 = vmatmul.mubr.bf16.gmra.mrb[100].mxu0 %v9061_v10  ;;  %1761 = vmatmul.mubr.bf16.gmra.mrb[100].mxu1 %v6947_v48 }
 0x279   : > { %1457 = vmatprep.mubr.bf16.mxu0 %v12670_v1  ;;  %1770 = vmatprep.mubr.bf16.mxu1 %v12670_v1 }
 0x27b   : > { %3646 = vperm.xlu1 %6841, %v9043_v2  }
 0x27f   : > { %3652 = vperm.xlu1 %6841, %v9058_v9  }
 0x280   : > { %1458 = vmatmul.mubr.bf16.gmra.mrb[104].mxu0 %v9078_v21  ;;  %1771 = vmatmul.mubr.bf16.gmra.mrb[104].mxu1 %v9018_v53 }
 0x281   : > { %1467 = vmatprep.mubr.bf16.mxu0 %v12670_v1  ;;  %1780 = vmatprep.mubr.bf16.mxu1 %v12670_v1 }
 0x283   : > { %v1479_v27 = vpop.f32.mrb[0].mxu1  ;;  %v1199_v31 = vpop.f32.mrb[0].mxu0  ;;  %3655 = vperm.xlu1 %6841, %v9065_v17  }
 0x284   : > { %v1481_v34 = vpop.f32.mrb[1].mxu1  ;;  %v1200_v39 = vadd.f32 %v1199_v31, %v9091_v26  ;;  %v1201_v41 = vpop.f32.mrb[1].mxu0  ;;  %v1480_v49 = vadd.f32 %v1479_v27, %v9091_v26 }
 0x285   : > { %v1483_v42 = vpop.f32.mrb[2].mxu1  ;;  %v1202_v44 = vadd.f32 %v1201_v41, %v9094_v28  ;;  %v1203_v48 = vpop.f32.mrb[2].mxu0  ;;  %v1482_v59 = vadd.f32 %v1481_v34, %v9094_v28 }
 0x286   : > { %v1484_v51 = vadd.f32 %v1483_v42, %v9091_v26  ;;  %v1485_v53 = vpop.f32.mrb[3].mxu1  ;;  %v1204_v54 = vadd.f32 %v1203_v48, %v9091_v26  ;;  %v1205_v56 = vpop.f32.mrb[3].mxu0 }
 0x287   : > { %v1486_v62 = vadd.f32 %v1485_v53, %v9094_v28  ;;  %v1206_v0 = vadd.f32 %v1205_v56, %v9094_v28 }
 0x288   : > { %1468 = vmatmul.mubr.bf16.gmra.mrb[108].mxu0 %v9098_v35  ;;  %1781 = vmatmul.mubr.bf16.gmra.mrb[108].mxu1 %v9032_v58  ;;  %v9111_v4 = vpack.c.bf16 %v1204_v54, %v1200_v39  ;;  %v9113_v6 = vpack.c.bf16 %v1484_v51, %v1480_v49 }
 0x289   : > { %1790 = vmatprep.mubr.bf16.mxu1 %v12670_v1  ;;  %2304 = vmatprep.mubr.bf16.mxu0 %v12670_v1  ;;  %v9117_v11 = vpack.c.bf16 %v1206_v0, %v1202_v44  ;;  %v9119_v16 = vpack.c.bf16 %v1486_v62, %v1482_v59 }
 0x28a   : > { %12942 = vst [vmem:[#allocation46_spill] sm:$0xff] %v9113_v6 }
 0x28b   : > { %12943 = vst [vmem:[#allocation47_spill] sm:$0xff] %v9119_v16  ;;  %v1489_v18 = vpop.f32.mrb[4].mxu1  ;;  %v1209_v22 = vpop.f32.mrb[4].mxu0 }
 0x28c   : > { %v1491_v25 = vpop.f32.mrb[5].mxu1  ;;  %v1210_v27 = vadd.f32 %v1209_v22, %v9091_v26  ;;  %v1211_v58 = vpop.f32.mrb[5].mxu0  ;;  %v1490_v41 = vadd.f32 %v1489_v18, %v9091_v26 }
 0x28d   : > { %v1493_v31 = vpop.f32.mrb[6].mxu1  ;;  %v1212_v34 = vadd.f32 %v1211_v58, %v9094_v28  ;;  %v1213_v39 = vpop.f32.mrb[6].mxu0  ;;  %v1492_v51 = vadd.f32 %v1491_v25, %v9094_v28 }
 0x28e   : > { %v1494_v42 = vadd.f32 %v1493_v31, %v9091_v26  ;;  %v1495_v44 = vpop.f32.mrb[7].mxu1  ;;  %v1214_v48 = vadd.f32 %v1213_v39, %v9091_v26  ;;  %v1215_v49 = vpop.f32.mrb[7].mxu0 }
 0x28f   : > { %v1496_v53 = vadd.f32 %v1495_v44, %v9094_v28  ;;  %v1216_v54 = vadd.f32 %v1215_v49, %v9094_v28 }
 0x290   : > { %1791 = vmatmul.mubr.bf16.gmra.mrb[112].mxu1 %v9046_v3  ;;  %2305 = vmatmul.mubr.bf16.vlgmr.msra.gmra.mrb[112].mxu0 %v12670_v1  ;;  %v9133_v56 = vpack.c.bf16 %v1214_v48, %v1210_v27  ;;  %v9135_v59 = vpack.c.bf16 %v1494_v42, %v1490_v41 }
 0x291   : > { %1800 = vmatprep.mubr.bf16.mxu1 %v12670_v1  ;;  %2314 = vmatprep.mubr.bf16.mxu0 %v12670_v1  ;;  %v9139_v62 = vpack.c.bf16 %v1216_v54, %v1212_v34  ;;  %v9141_v0 = vpack.c.bf16 %v1496_v53, %v1492_v51 }
 0x292   : > { %12944 = vst [vmem:[#allocation48_spill] sm:$0xff] %v9135_v59  ;;  %3035 = vmatpush1.bf16.msra.mxu0 %v8812_v24 }
 0x293   : > { %12945 = vst [vmem:[#allocation49_spill] sm:$0xff] %v9141_v0  ;;  %v1499_v18 = vpop.f32.mrb[8].mxu1  ;;  %v1219_v22 = vpop.f32.mrb[8].mxu0  ;;  %3036 = vmatprep.subr.bf16.mxu0 %v8826_v30 }
 0x294   : > { %v1501_v3 = vpop.f32.mrb[9].mxu1  ;;  %v1220_v25 = vadd.f32 %v1219_v22, %v9091_v26  ;;  %v1221_v27 = vpop.f32.mrb[9].mxu0  ;;  %v1500_v34 = vadd.f32 %v1499_v18, %v9091_v26 }
 0x295   : > { %v1503_v58 = vpop.f32.mrb[10].mxu1  ;;  %v1222_v31 = vadd.f32 %v1221_v27, %v9094_v28  ;;  %v1223_v39 = vpop.f32.mrb[10].mxu0  ;;  %v1502_v30 = vadd.f32 %v1501_v3, %v9094_v28  ;;  %v803_v27 = vsub.s32 2, %v9071_v19 }
 0x296   : > { %v1504_v41 = vadd.f32 %v1503_v58, %v9091_v26  ;;  %v1505_v42 = vpop.f32.mrb[11].mxu1  ;;  %v1224_v24 = vadd.f32 %v1223_v39, %v9091_v26  ;;  %v1225_v44 = vpop.f32.mrb[11].mxu0  ;;  %3037 = vmatpush1.bf16.msra.mxu0 %v8831_v32 }
 0x297   : > { %v1506_v48 = vadd.f32 %v1505_v42, %v9094_v28  ;;  %v1226_v49 = vadd.f32 %v1225_v44, %v9094_v28  ;;  %3038 = vmatprep.subr.bf16.mxu0 %v8844_v37  ;;  %v807_v44 = vsub.s32 3, %v9071_v19 }
 0x298   : > { %1801 = vmatmul.mubr.bf16.gmra.mrb[116].mxu1 %v9061_v10  ;;  %2315 = vmatmul.mubr.bf16.gmra.mrb[116].mxu0 %v12670_v1  ;;  %v9159_v51 = vpack.c.bf16 %v1224_v24, %v1220_v25  ;;  %v9161_v53 = vpack.c.bf16 %v1504_v41, %v1500_v34 }
 0x299   : > { %1810 = vmatprep.mubr.bf16.mxu1 %v12670_v1  ;;  %2324 = vmatprep.mubr.bf16.mxu0 %v12670_v1  ;;  %v9165_v32 = vpack.c.bf16 %v1226_v49, %v1222_v31  ;;  %v9167_v54 = vpack.c.bf16 %v1506_v48, %v1502_v30  ;;  %v8227_v48 = vmov 2  }
 0x29a   : > { %12946 = vst [vmem:[#allocation50_spill] sm:$0xff] %v9161_v53  ;;  %3039 = vmatpush1.bf16.msra.mxu0 %v8847_v38  ;;  %6844 = vset.pattern.permute.xlu0 %v8227_v48  ;;  %v7635_v53 = vld [vmem:[%s8728_s14 + $0xf8] sm:$0xff]  }
 0x29b   : > { %12947 = vst [vmem:[#allocation51_spill] sm:$0xff] %v9167_v54  ;;  %v1509_v18 = vpop.f32.mrb[12].mxu1  ;;  %v1229_v37 = vpop.f32.mrb[12].mxu0  ;;  %3040 = vmatprep.subr.bf16.mxu0 %v8863_v46  ;;  %4362 = vperm.xlu0 %6844, %v8982_v33  }
 0x29c   : > { %v1511_v10 = vpop.f32.mrb[13].mxu1  ;;  %v1230_v22 = vadd.f32 %v1229_v37, %v9091_v26  ;;  %v1231_v3 = vpop.f32.mrb[13].mxu0  ;;  %v1510_v39 = vadd.f32 %v1509_v18, %v9091_v26  ;;  %v9198_v37 = vrot.slane %v9083_v23, %v803_v27  ;;  %6843 = vset.pattern.permute.xlu1 %v8227_v48 }
 0x29d   : > { %v1513_v25 = vpop.f32.mrb[14].mxu1  ;;  %v1232_v58 = vadd.f32 %v1231_v3, %v9094_v28  ;;  %v1233_v31 = vpop.f32.mrb[14].mxu0  ;;  %v1512_v46 = vadd.f32 %v1511_v10, %v9094_v28  ;;  %v9203_v10 = vrot.slane %v9083_v23, %v807_v44  ;;  %4359 = vperm.xlu1 %6843, %v8978_v29  }
 0x29e   : > { %v1514_v38 = vadd.f32 %v1513_v25, %v9091_v26  ;;  %v1515_v34 = vpop.f32.mrb[15].mxu1  ;;  %v1234_v41 = vadd.f32 %v1233_v31, %v9091_v26  ;;  %v1235_v42 = vpop.f32.mrb[15].mxu0  ;;  %3041 = vmatpush1.bf16.msra.mxu0 %v8866_v47 }
 0x29f   : > { %v1516_v24 = vadd.f32 %v1515_v34, %v9094_v28  ;;  %v1236_v30 = vadd.f32 %v1235_v42, %v9094_v28  ;;  %3042 = vmatprep.subr.bf16.mxu0 %v8892_v60  ;;  %4371 = vperm.xlu0 %6844, %v8998_v43  }
 0x2a0   : > { %1811 = vmatmul.mubr.bf16.gmra.mrb[120].mxu1 %v9078_v21  ;;  %2325 = vmatmul.mubr.bf16.gmra.mrb[120].mxu0 %v12670_v1  ;;  %v9187_v49 = vpack.c.bf16 %v1234_v41, %v1230_v22  ;;  %v9189_v47 = vpack.c.bf16 %v1514_v38, %v1510_v39 }
 0x2a1   : > { %1820 = vmatprep.mubr.bf16.mxu1 %v12670_v1  ;;  %2334 = vmatprep.mubr.bf16.mxu0 %v12670_v1  ;;  %v9193_v19 = vpack.c.bf16 %v1236_v30, %v1232_v58  ;;  %v9195_v18 = vpack.c.bf16 %v1516_v24, %v1512_v46 }
 0x2a2   : > { %12948 = vst [vmem:[#allocation52_spill] sm:$0xff] %v9189_v47  ;;  %3043 = vmatpush1.bf16.msra.mxu0 %v8895_v61  ;;  %4365 = vperm.xlu1 %6843, %v8987_v36  }
 0x2a3   : > { %12949 = vst [vmem:[#allocation53_spill] sm:$0xff] %v9195_v18  ;;  %v1552_v21 = vpop.f32.mrb[16].mxu1  ;;  %v1239_v22 = vpop.f32.mrb[16].mxu0  ;;  %3044 = vmatprep.subr.bf16.mxu0 %v8916_v7  ;;  %4377 = vperm.xlu0 %6844, %v9009_v50   ;;  %v7634_v18 = vld [vmem:[%s8728_s14 + $0xf0] sm:$0xff]  }
 0x2a4   : > { %v1554_v3 = vpop.f32.mrb[17].mxu1  ;;  %v1240_v25 = vadd.f32 %v1239_v22, %v9091_v26  ;;  %v1241_v58 = vpop.f32.mrb[17].mxu0  ;;  %v1553_v60 = vadd.f32 %v1552_v21, %v9198_v37 }
 0x2a5   : > { %v1556_v27 = vpop.f32.mrb[18].mxu1  ;;  %v1242_v31 = vadd.f32 %v1241_v58, %v9094_v28  ;;  %v1243_v39 = vpop.f32.mrb[18].mxu0  ;;  %v1555_v61 = vadd.f32 %v1554_v3, %v9203_v10 }
 0x2a6   : > { %v1557_v23 = vadd.f32 %v1556_v27, %v9198_v37  ;;  %v1558_v38 = vpop.f32.mrb[19].mxu1  ;;  %v1244_v34 = vadd.f32 %v1243_v39, %v9091_v26  ;;  %v1245_v41 = vpop.f32.mrb[19].mxu0  ;;  %3045 = vmatpush1.bf16.msra.mxu0 %v8921_v8  ;;  %4368 = vperm.xlu1 %6843, %v8993_v40  }
 0x2a7   : > { %v1559_v42 = vadd.f32 %v1558_v38, %v9203_v10  ;;  %v1246_v7 = vadd.f32 %v1245_v41, %v9094_v28  ;;  %3046 = vmatprep.subr.bf16.mxu0 %v8933_v12  ;;  %4383 = vperm.xlu0 %6844, %v9022_v55   ;;  %v7631_v41 = vld [vmem:[%s8728_s14 + $0xe0] sm:$0xff]  }
 0x2a8   : > { %v9219_v46 = vpack.c.bf16 %v1557_v23, %v1553_v60  ;;  %1821 = vmatmul.mubr.bf16.gmra.mrb[124].mxu1 %v9098_v35  ;;  %2335 = vmatmul.mubr.bf16.gmra.mrb[124].mxu0 %v12670_v1  ;;  %v9223_v24 = vpack.c.bf16 %v1244_v34, %v1240_v25 }
 0x2a9   : > { %v9225_v44 = vpack.c.bf16 %v1559_v42, %v1555_v61  ;;  %1830 = vmatprep.mubr.bf16.mxu1 %v12670_v1  ;;  %2344 = vmatprep.mubr.bf16.mxu0 %v12670_v1  ;;  %v9229_v30 = vpack.c.bf16 %v1246_v7, %v1242_v31 }
 0x2aa   : > { %3047 = vmatpush1.bf16.msra.mxu0 %v8936_v13  ;;  %4374 = vperm.xlu1 %6843, %v9004_v45  }
 0x2ab   : > { %v1562_v8 = vpop.f32.mrb[20].mxu1  ;;  %v1249_v21 = vpop.f32.mrb[20].mxu0  ;;  %3048 = vmatprep.subr.bf16.mxu0 %v8942_v14  ;;  %4389 = vperm.xlu0 %6844, %v9036_v63  }
 0x2ac   : > { %v1564_v35 = vpop.f32.mrb[21].mxu1  ;;  %v1250_v22 = vadd.f32 %v1249_v21, %v9091_v26  ;;  %v1251_v3 = vpop.f32.mrb[21].mxu0  ;;  %v1563_v31 = vadd.f32 %v1562_v8, %v9198_v37  ;;  %v7632_v8 = vld [vmem:[%s8799_s20 + $0x4] ss:$16 sps:$4 sm:$0xff]  }
 0x2ad   : > { %v1566_v25 = vpop.f32.mrb[22].mxu1  ;;  %v1252_v58 = vadd.f32 %v1251_v3, %v9094_v28  ;;  %v1253_v27 = vpop.f32.mrb[22].mxu0  ;;  %v1565_v13 = vadd.f32 %v1564_v35, %v9203_v10 }
 0x2ae   : > { %v1567_v12 = vadd.f32 %v1566_v25, %v9198_v37  ;;  %v1568_v39 = vpop.f32.mrb[23].mxu1  ;;  %v1254_v60 = vadd.f32 %v1253_v27, %v9091_v26  ;;  %v1255_v23 = vpop.f32.mrb[23].mxu0  ;;  %3049 = vmatpush1.bf16.msra.mxu0 %v8946_v15  ;;  %4380 = vperm.xlu1 %6843, %v9015_v52  }
 0x2af   : > { %v1569_v14 = vadd.f32 %v1568_v39, %v9203_v10  ;;  %v1256_v38 = vadd.f32 %v1255_v23, %v9094_v28  ;;  %3780 = vmatprep.subr.bf16.mxu0 %v7632_v8  ;;  %4395 = vperm.xlu0 %6844, %v9050_v5   ;;  %v7633_v8 = vld [vmem:[%s8728_s14 + $0xe8] sm:$0xff]  }
 0x2b0   : > { %v9247_v34 = vpack.c.bf16 %v1567_v12, %v1563_v31  ;;  %1831 = vmatmul.mubr.bf16.gmra.mrb[128].mxu1 %v7631_v41  ;;  %2345 = vmatmul.mubr.bf16.gmra.mrb[128].mxu0 %v12670_v1  ;;  %v9251_v61 = vpack.c.bf16 %v1254_v60, %v1250_v22 }
 0x2b1   : > { %v9253_v42 = vpack.c.bf16 %v1569_v14, %v1565_v13  ;;  %1840 = vmatprep.mubr.bf16.mxu1 %v12670_v1  ;;  %2354 = vmatprep.mubr.bf16.mxu0 %v12670_v1  ;;  %v9257_v7 = vpack.c.bf16 %v1256_v38, %v1252_v58 }
 0x2b2   : > { %4386 = vperm.xlu1 %6843, %v9029_v57  }
 0x2b3   : > { %v1572_v15 = vpop.f32.mrb[24].mxu1  ;;  %v1259_v21 = vpop.f32.mrb[24].mxu0  ;;  %4401 = vperm.xlu0 %6844, %v9065_v17  }
 0x2b4   : > { %v1574_v35 = vpop.f32.mrb[25].mxu1  ;;  %v1260_v22 = vadd.f32 %v1259_v21, %v9091_v26  ;;  %v1261_v3 = vpop.f32.mrb[25].mxu0  ;;  %v1573_v58 = vadd.f32 %v1572_v15, %v9198_v37 }
 0x2b5   : > { %v1576_v25 = vpop.f32.mrb[26].mxu1  ;;  %v1262_v27 = vadd.f32 %v1261_v3, %v9094_v28  ;;  %v1263_v31 = vpop.f32.mrb[26].mxu0  ;;  %v1575_v13 = vadd.f32 %v1574_v35, %v9203_v10 }
 0x2b6   : > { %v1577_v12 = vadd.f32 %v1576_v25, %v9198_v37  ;;  %v1578_v39 = vpop.f32.mrb[27].mxu1  ;;  %v1264_v60 = vadd.f32 %v1263_v31, %v9091_v26  ;;  %v1265_v23 = vpop.f32.mrb[27].mxu0  ;;  %4392 = vperm.xlu1 %6843, %v9043_v2  }
 0x2b7   : > { %v1579_v14 = vadd.f32 %v1578_v39, %v9203_v10  ;;  %v1266_v38 = vadd.f32 %v1265_v23, %v9094_v28 }
 0x2b8   : > { %v9272_v41 = vpack.c.bf16 %v1577_v12, %v1573_v58  ;;  %1841 = vmatmul.mubr.bf16.gmra.mrb[132].mxu1 %v7633_v8  ;;  %2355 = vmatmul.mubr.bf16.gmra.mrb[132].mxu0 %v12670_v1  ;;  %v9276_v15 = vpack.c.bf16 %v1264_v60, %v1260_v22 }
 0x2b9   : > { %v9278_v21 = vpack.c.bf16 %v1579_v14, %v1575_v13  ;;  %1850 = vmatprep.mubr.bf16.mxu1 %v12670_v1  ;;  %2364 = vmatprep.mubr.bf16.mxu0 %v12670_v1  ;;  %v9282_v35 = vpack.c.bf16 %v1266_v38, %v1262_v27 }
 0x2ba   : > { %4398 = vperm.xlu1 %6843, %v9058_v9  }
 0x2bb   : > { %v1582_v3 = vpop.f32.mrb[28].mxu1  ;;  %v1269_v25 = vpop.f32.mrb[28].mxu0 }
 0x2bc   : > { %v1584_v31 = vpop.f32.mrb[29].mxu1  ;;  %v1270_v58 = vadd.f32 %v1269_v25, %v9091_v26  ;;  %v1271_v22 = vpop.f32.mrb[29].mxu0  ;;  %v1583_v27 = vadd.f32 %v1582_v3, %v9198_v37 }
 0x2bd   : > { %v1586_v12 = vpop.f32.mrb[30].mxu1  ;;  %v1272_v39 = vadd.f32 %v1271_v22, %v9094_v28  ;;  %v1273_v60 = vpop.f32.mrb[30].mxu0  ;;  %v1585_v48 = vadd.f32 %v1584_v31, %v9203_v10  ;;  %v12950_v22 = vmov 0   ;;  %v12674_v31 = vmov 3  }
 0x2be   : > { %v1587_v23 = vadd.f32 %v1586_v12, %v9198_v37  ;;  %v1588_v13 = vpop.f32.mrb[31].mxu1  ;;  %v1274_v14 = vadd.f32 %v1273_v60, %v9091_v26  ;;  %v1275_v38 = vpop.f32.mrb[31].mxu0  ;;  %6845 = vset.pattern.permute.xlu0 %v12674_v31  ;;  %4404 = vperm.xlu1 %6843, %v9075_v20  }
 0x2bf   : > { %v1589_v8 = vadd.f32 %v1588_v13, %v9203_v10  ;;  %v1276_v25 = vadd.f32 %v1275_v38, %v9094_v28  ;;  %5105 = vperm.xlu0 %6845, %v8978_v29  }
 0x2c0   : > { %v9295_v1 = vpack.c.bf16 %v1587_v23, %v1583_v27  ;;  %1851 = vmatmul.mubr.bf16.gmra.mrb[136].mxu1 %v7634_v18  ;;  %2365 = vmatmul.mubr.bf16.gmra.mrb[136].mxu0 %v12950_v22  ;;  %v9299_v47 = vpack.c.bf16 %v1274_v14, %v1270_v58 }
 0x2c1   : > { %v9301_v3 = vpack.c.bf16 %v1589_v8, %v1585_v48  ;;  %1860 = vmatprep.mubr.bf16.mxu1 %v12950_v22  ;;  %2374 = vmatprep.mubr.bf16.mxu0 %v12950_v22  ;;  %v9305_v12 = vpack.c.bf16 %v1276_v25, %v1272_v39 }
 0x2c3   : > { %v1592_v60 = vpop.f32.mrb[32].mxu1  ;;  %v1279_v27 = vpop.f32.mrb[32].mxu0  ;;  %5114 = vperm.xlu0 %6845, %v8993_v40  }
 0x2c4   : > { %v1594_v18 = vpop.f32.mrb[33].mxu1  ;;  %v1280_v58 = vadd.f32 %v1279_v27, %v9091_v26  ;;  %v1281_v23 = vpop.f32.mrb[33].mxu0  ;;  %v1593_v39 = vadd.f32 %v1592_v60, %v9198_v37 }
 0x2c5   : > { %v1596_v13 = vpop.f32.mrb[34].mxu1  ;;  %v1282_v14 = vadd.f32 %v1281_v23, %v9094_v28  ;;  %v1283_v38 = vpop.f32.mrb[34].mxu0  ;;  %v1595_v29 = vadd.f32 %v1594_v18, %v9203_v10 }
 0x2c6   : > { %v1597_v48 = vadd.f32 %v1596_v13, %v9198_v37  ;;  %v1598_v8 = vpop.f32.mrb[35].mxu1  ;;  %v1284_v25 = vadd.f32 %v1283_v38, %v9091_v26  ;;  %v1285_v31 = vpop.f32.mrb[35].mxu0 }
 0x2c7   : > { %v1599_v27 = vadd.f32 %v1598_v8, %v9203_v10  ;;  %v1286_v54 = vadd.f32 %v1285_v31, %v9094_v28  ;;  %5120 = vperm.xlu0 %6845, %v9004_v45  }
 0x2c8   : > { %v9320_v23 = vpack.c.bf16 %v1597_v48, %v1593_v39  ;;  %1861 = vmatmul.mubr.bf16.gmra.mrb[140].mxu1 %v7635_v53  ;;  %2375 = vmatmul.mubr.bf16.gmra.mrb[140].mxu0 %v12950_v22  ;;  %v9324_v60 = vpack.c.bf16 %v1284_v25, %v1280_v58 }
 0x2c9   : > { %v9326_v13 = vpack.c.bf16 %v1599_v27, %v1595_v29  ;;  %2417 = vmatprep.mubr.bf16.mxu1 %v12950_v22  ;;  %v9329_v38 = vpack.c.bf16 %v1286_v54, %v1282_v14  ;;  %3066 = vmatprep.mubr.bf16.mxu0 %v12950_v22 }
 0x2ca   : > { %12951 = vst [vmem:[#allocation54_spill] sm:$0xff] %v9324_v60 }
 0x2cb   : > { %12952 = vst [vmem:[#allocation55_spill] sm:$0xff] %v9329_v38  ;;  %v1602_v31 = vpop.f32.mrb[36].mxu1  ;;  %v1289_v40 = vpop.f32.mrb[36].mxu0  ;;  %5126 = vperm.xlu0 %6845, %v9015_v52  }
 0x2cc   : > { %v1604_v18 = vpop.f32.mrb[37].mxu1  ;;  %v1290_v53 = vadd.f32 %v1289_v40, %v9091_v26  ;;  %v1291_v39 = vpop.f32.mrb[37].mxu0  ;;  %v1603_v25 = vadd.f32 %v1602_v31, %v9198_v37 }
 0x2cd   : > { %v1606_v58 = vpop.f32.mrb[38].mxu1  ;;  %v1292_v48 = vadd.f32 %v1291_v39, %v9094_v28  ;;  %v1293_v8 = vpop.f32.mrb[38].mxu0  ;;  %v1605_v45 = vadd.f32 %v1604_v18, %v9203_v10  ;;  %v7636_v18 = vld [vmem:[%s8799_s20 + $0x8] ss:$16 sps:$4 sm:$0xff]  }
 0x2ce   : > { %v1607_v54 = vadd.f32 %v1606_v58, %v9198_v37  ;;  %v1608_v14 = vpop.f32.mrb[39].mxu1  ;;  %v1294_v29 = vadd.f32 %v1293_v8, %v9091_v26  ;;  %v1295_v27 = vpop.f32.mrb[39].mxu0 }
 0x2cf   : > { %v1609_v40 = vadd.f32 %v1608_v14, %v9203_v10  ;;  %v1296_v0 = vadd.f32 %v1295_v27, %v9094_v28  ;;  %v7637_v14 = vld [vmem:[%s8799_s20 + $0x2c] ss:$16 sps:$4 sm:$0xff]   ;;  %5132 = vperm.xlu0 %6845, %v9029_v57  }
 0x2d0   : > { %v9344_v39 = vpack.c.bf16 %v1607_v54, %v1603_v25  ;;  %2418 = vmatmul.mubr.bf16.vlgmr.msra.gmra.mrb[144].mxu1 %v12950_v22  ;;  %v9347_v31 = vpack.c.bf16 %v1294_v29, %v1290_v53  ;;  %v7639_v57 = vld [vmem:[%s8799_s20 + $0x4c] ss:$16 sps:$4 sm:$0xff]  }
 0x2d1   : > { %v9349_v58 = vpack.c.bf16 %v1609_v40, %v1605_v45  ;;  %2427 = vmatprep.mubr.bf16.mxu1 %v12950_v22  ;;  %v9352_v8 = vpack.c.bf16 %v1296_v0, %v1292_v48  ;;  %3148 = vmatpush1.bf16.msra.mxu1 %v7636_v18  ;;  %v7638_v48 = vld [vmem:[%s8799_s20 + $0x28] ss:$16 sps:$4 sm:$0xff]  }
 0x2d2   : > { %12953 = vst [vmem:[#allocation56_spill] sm:$0xff] %v9347_v31  ;;  %3149 = vmatprep.subr.bf16.mxu1 %v7637_v14 }
 0x2d3   : > { %12954 = vst [vmem:[#allocation57_spill] sm:$0xff] %v9352_v8  ;;  %v1612_v52 = vpop.f32.mrb[40].mxu1  ;;  %v1299_v25 = vpop.f32.mrb[40].mxu0  ;;  %5138 = vperm.xlu0 %6845, %v9043_v2  }
 0x2d4   : > { %v1614_v53 = vpop.f32.mrb[41].mxu1  ;;  %v1300_v54 = vadd.f32 %v1299_v25, %v9091_v26  ;;  %v1301_v29 = vpop.f32.mrb[41].mxu0  ;;  %v1613_v40 = vadd.f32 %v1612_v52, %v9198_v37 }
 0x2d5   : > { %v1616_v27 = vpop.f32.mrb[42].mxu1  ;;  %v1302_v45 = vadd.f32 %v1301_v29, %v9094_v28  ;;  %v1303_v0 = vpop.f32.mrb[42].mxu0  ;;  %3150 = vmatpush1.bf16.msra.mxu1 %v7638_v48  ;;  %v1615_v25 = vadd.f32 %v1614_v53, %v9203_v10  ;;  %v7640_v53 = vld [vmem:[%s8799_s20 + $0x48] ss:$16 sps:$4 sm:$0xff]  }
 0x2d6   : > { %v1617_v18 = vadd.f32 %v1616_v27, %v9198_v37  ;;  %v1618_v14 = vpop.f32.mrb[43].mxu1  ;;  %v1304_v59 = vadd.f32 %v1303_v0, %v9091_v26  ;;  %v1305_v16 = vpop.f32.mrb[43].mxu0  ;;  %3151 = vmatprep.subr.bf16.mxu1 %v7639_v57 }
 0x2d7   : > { %v1619_v29 = vadd.f32 %v1618_v14, %v9203_v10  ;;  %v1306_v48 = vadd.f32 %v1305_v16, %v9094_v28  ;;  %v7641_v16 = vld [vmem:[%s8799_s20 + $0x6c] ss:$16 sps:$4 sm:$0xff]   ;;  %5144 = vperm.xlu0 %6845, %v9058_v9  }
 0x2d8   : > { %v9370_v52 = vpack.c.bf16 %v1617_v18, %v1613_v40  ;;  %2428 = vmatmul.mubr.bf16.gmra.mrb[148].mxu1 %v12950_v22  ;;  %v9373_v27 = vpack.c.bf16 %v1304_v59, %v1300_v54  ;;  %v7643_v9 = vld [vmem:[%s8799_s20 + $0x8c] ss:$16 sps:$4 sm:$0xff]  }
 0x2d9   : > { %v9375_v0 = vpack.c.bf16 %v1619_v29, %v1615_v25  ;;  %2437 = vmatprep.mubr.bf16.mxu1 %v12950_v22  ;;  %v9378_v57 = vpack.c.bf16 %v1306_v48, %v1302_v45  ;;  %3152 = vmatpush1.bf16.msra.mxu1 %v7640_v53  ;;  %v7642_v29 = vld [vmem:[%s8799_s20 + $0x68] ss:$16 sps:$4 sm:$0xff]  }
 0x2da   : > { %12955 = vst [vmem:[#allocation58_spill] sm:$0xff] %v9373_v27  ;;  %3153 = vmatprep.subr.bf16.mxu1 %v7641_v16 }
 0x2db   : > { %12956 = vst [vmem:[#allocation59_spill] sm:$0xff] %v9378_v57  ;;  %v1622_v2 = vpop.f32.mrb[44].mxu1  ;;  %v1309_v40 = vpop.f32.mrb[44].mxu0  ;;  %5150 = vperm.xlu0 %6845, %v9075_v20  }
 0x2dc   : > { %v1624_v59 = vpop.f32.mrb[45].mxu1  ;;  %v1310_v54 = vadd.f32 %v1309_v40, %v9091_v26  ;;  %v1311_v18 = vpop.f32.mrb[45].mxu0  ;;  %v1623_v48 = vadd.f32 %v1622_v2, %v9198_v37 }
 0x2dd   : > { %v1626_v14 = vpop.f32.mrb[46].mxu1  ;;  %v1312_v25 = vadd.f32 %v1311_v18, %v9094_v28  ;;  %v1313_v45 = vpop.f32.mrb[46].mxu0  ;;  %3154 = vmatpush1.bf16.msra.mxu1 %v7642_v29  ;;  %v1625_v40 = vadd.f32 %v1624_v59, %v9203_v10  ;;  %v7644_v59 = vld [vmem:[%s8799_s20 + $0x88] ss:$16 sps:$4 sm:$0xff]  }
 0x2de   : > { %v1627_v53 = vadd.f32 %v1626_v14, %v9198_v37  ;;  %v1628_v16 = vpop.f32.mrb[47].mxu1  ;;  %v1314_v6 = vadd.f32 %v1313_v45, %v9091_v26  ;;  %v1315_v57 = vpop.f32.mrb[47].mxu0  ;;  %3155 = vmatprep.subr.bf16.mxu1 %v7643_v9 }
 0x2df   : > { %v1629_v18 = vadd.f32 %v1628_v16, %v9203_v10  ;;  %v1316_v29 = vadd.f32 %v1315_v57, %v9094_v28  ;;  %v12959_v16 = vmov 3   ;;  %v7645_v57 = vld [vmem:[%s8799_s20 + $0xac] ss:$16 sps:$4 sm:$0xff]  }
 0x2e0   : > { %v9396_v2 = vpack.c.bf16 %v1627_v53, %v1623_v48  ;;  %2438 = vmatmul.mubr.bf16.gmra.mrb[152].mxu1 %v12950_v22  ;;  %v9399_v14 = vpack.c.bf16 %v1314_v6, %v1310_v54  ;;  %6846 = vset.pattern.permute.xlu1 %v12959_v16 }
 0x2e1   : > { %v9401_v45 = vpack.c.bf16 %v1629_v18, %v1625_v40  ;;  %2447 = vmatprep.mubr.bf16.mxu1 %v12950_v22  ;;  %v9404_v9 = vpack.c.bf16 %v1316_v29, %v1312_v25  ;;  %3156 = vmatpush1.bf16.msra.mxu1 %v7644_v59  ;;  %v7646_v29 = vld [vmem:[%s8799_s20 + $0xa8] ss:$16 sps:$4 sm:$0xff]  }
 0x2e2   : > { %12957 = vst [vmem:[#allocation60_spill] sm:$0xff] %v9399_v14  ;;  %3157 = vmatprep.subr.bf16.mxu1 %v7645_v57  ;;  %5108 = vperm.xlu1 %6846, %v8982_v33   ;;  %v7647_v14 = vld [vmem:[%s8799_s20 + $0xcc] ss:$16 sps:$4 sm:$0xff]  }
 0x2e3   : > { %12958 = vst [vmem:[#allocation61_spill] sm:$0xff] %v9404_v9  ;;  %v1632_v20 = vpop.f32.mrb[48].mxu1  ;;  %v1319_v48 = vpop.f32.mrb[48].mxu0 }
 0x2e4   : > { %v1634_v6 = vpop.f32.mrb[49].mxu1  ;;  %v1320_v54 = vadd.f32 %v1319_v48, %v9091_v26  ;;  %v1321_v53 = vpop.f32.mrb[49].mxu0  ;;  %v1633_v59 = vadd.f32 %v1632_v20, %v9198_v37 }
 0x2e5   : > { %v1636_v40 = vpop.f32.mrb[50].mxu1  ;;  %v1322_v18 = vadd.f32 %v1321_v53, %v9094_v28  ;;  %v1323_v25 = vpop.f32.mrb[50].mxu0  ;;  %3158 = vmatpush1.bf16.msra.mxu1 %v7646_v29  ;;  %v1635_v48 = vadd.f32 %v1634_v6, %v9203_v10  ;;  %v7648_v6 = vld [vmem:[%s8799_s20 + $0xc8] ss:$16 sps:$4 sm:$0xff]  }
 0x2e6   : > { %v1637_v16 = vadd.f32 %v1636_v40, %v9198_v37  ;;  %v1638_v57 = vpop.f32.mrb[51].mxu1  ;;  %v1324_v9 = vadd.f32 %v1323_v25, %v9091_v26  ;;  %v1325_v33 = vpop.f32.mrb[51].mxu0  ;;  %3159 = vmatprep.subr.bf16.mxu1 %v7647_v14  ;;  %5111 = vperm.xlu1 %6846, %v8987_v36   ;;  %v7649_v25 = vld [vmem:[%s8799_s20 + $0xec] ss:$16 sps:$4 sm:$0xff]  }
 0x2e7   : > { %v1639_v27 = vadd.f32 %v1638_v57, %v9203_v10  ;;  %v1326_v53 = vadd.f32 %v1325_v33, %v9094_v28 }
 0x2e8   : > { %v9421_v29 = vpack.c.bf16 %v1637_v16, %v1633_v59  ;;  %2448 = vmatmul.mubr.bf16.gmra.mrb[156].mxu1 %v12950_v22  ;;  %v9424_v20 = vpack.c.bf16 %v1324_v9, %v1320_v54 }
 0x2e9   : > { %v9426_v40 = vpack.c.bf16 %v1639_v27, %v1635_v48  ;;  %2457 = vmatprep.mubr.bf16.mxu1 %v12950_v22  ;;  %v9429_v14 = vpack.c.bf16 %v1326_v53, %v1322_v18  ;;  %3160 = vmatpush1.bf16.msra.mxu1 %v7648_v6  ;;  %v7650_v48 = vld [vmem:[%s8799_s20 + $0xe8] ss:$16 sps:$4 sm:$0xff]  }
 0x2ea   : > { %12960 = vst [vmem:[#allocation62_spill] sm:$0xff] %v9421_v29  ;;  %12961 = vst [vmem:[#allocation63_spill] sm:$0xff] %v9424_v20  ;;  %3161 = vmatprep.subr.bf16.mxu1 %v7649_v25  ;;  %5117 = vperm.xlu1 %6846, %v8998_v43   ;;  %v7651_v20 = vld [vmem:[%s8799_s20 + $0xc] ss:$16 sps:$4 sm:$0xff]  }
 0x2eb   : > { %12962 = vst [vmem:[#allocation64_spill] sm:$0xff] %v9426_v40  ;;  %12963 = vst [vmem:[#allocation65_spill] sm:$0xff] %v9429_v14  ;;  %v1642_v57 = vpop.f32.mrb[52].mxu1  ;;  %v1329_v36 = vpop.f32.mrb[52].mxu0 }
 0x2ec   : > { %v1644_v59 = vpop.f32.mrb[53].mxu1  ;;  %v1330_v9 = vadd.f32 %v1329_v36, %v9091_v26  ;;  %v1331_v54 = vpop.f32.mrb[53].mxu0  ;;  %v1643_v18 = vadd.f32 %v1642_v57, %v9198_v37 }
 0x2ed   : > { %v1646_v27 = vpop.f32.mrb[54].mxu1  ;;  %v1332_v16 = vadd.f32 %v1331_v54, %v9094_v28  ;;  %v1333_v33 = vpop.f32.mrb[54].mxu0  ;;  %3162 = vmatpush1.bf16.msra.mxu1 %v7650_v48  ;;  %v1645_v43 = vadd.f32 %v1644_v59, %v9203_v10 }
 0x2ee   : > { %v1647_v53 = vadd.f32 %v1646_v27, %v9198_v37  ;;  %v1648_v6 = vpop.f32.mrb[55].mxu1  ;;  %v1334_v25 = vadd.f32 %v1333_v33, %v9091_v26  ;;  %v1335_v14 = vpop.f32.mrb[55].mxu0  ;;  %3893 = vmatprep.subr.bf16.mxu1 %v7651_v20  ;;  %5123 = vperm.xlu1 %6846, %v9009_v50  }
 0x2ef   : > { %v1649_v36 = vadd.f32 %v1648_v6, %v9203_v10  ;;  %v1336_v40 = vadd.f32 %v1335_v14, %v9094_v28 }
 0x2f0   : > { %v9445_v54 = vpack.c.bf16 %v1647_v53, %v1643_v18  ;;  %2458 = vmatmul.mubr.bf16.gmra.mrb[160].mxu1 %v12950_v22  ;;  %v9448_v57 = vpack.c.bf16 %v1334_v25, %v1330_v9 }
 0x2f1   : > { %v9450_v27 = vpack.c.bf16 %v1649_v36, %v1645_v43  ;;  %2467 = vmatprep.mubr.bf16.mxu1 %v12950_v22  ;;  %v9453_v33 = vpack.c.bf16 %v1336_v40, %v1332_v16 }
 0x2f2   : > { %12964 = vst [vmem:[#allocation66_spill] sm:$0xff] %v9445_v54  ;;  %12965 = vst [vmem:[#allocation67_spill] sm:$0xff] %v9448_v57  ;;  %5129 = vperm.xlu1 %6846, %v9022_v55  }
 0x2f3   : > { %12966 = vst [vmem:[#allocation68_spill] sm:$0xff] %v9450_v27  ;;  %12967 = vst [vmem:[#allocation69_spill] sm:$0xff] %v9453_v33  ;;  %v1652_v20 = vpop.f32.mrb[56].mxu1  ;;  %v1339_v59 = vpop.f32.mrb[56].mxu0 }
 0x2f4   : > { %v1654_v48 = vpop.f32.mrb[57].mxu1  ;;  %v1340_v14 = vadd.f32 %v1339_v59, %v9091_v26  ;;  %v1341_v50 = vpop.f32.mrb[57].mxu0  ;;  %v1653_v9 = vadd.f32 %v1652_v20, %v9198_v37 }
 0x2f5   : > { %v1656_v18 = vpop.f32.mrb[58].mxu1  ;;  %v1342_v53 = vadd.f32 %v1341_v50, %v9094_v28  ;;  %v1343_v6 = vpop.f32.mrb[58].mxu0  ;;  %v1655_v36 = vadd.f32 %v1654_v48, %v9203_v10 }
 0x2f6   : > { %v1657_v25 = vadd.f32 %v1656_v18, %v9198_v37  ;;  %v1658_v43 = vpop.f32.mrb[59].mxu1  ;;  %v1344_v40 = vadd.f32 %v1343_v6, %v9091_v26  ;;  %v1345_v16 = vpop.f32.mrb[59].mxu0  ;;  %5135 = vperm.xlu1 %6846, %v9036_v63  }
 0x2f7   : > { %v1659_v55 = vadd.f32 %v1658_v43, %v9203_v10  ;;  %v1346_v33 = vadd.f32 %v1345_v16, %v9094_v28 }
 0x2f8   : > { %v9465_v59 = vpack.c.bf16 %v1657_v25, %v1653_v9  ;;  %2468 = vmatmul.mubr.bf16.gmra.mrb[164].mxu1 %v12950_v22  ;;  %v9468_v50 = vpack.c.bf16 %v1344_v40, %v1340_v14 }
 0x2f9   : > { %v9470_v20 = vpack.c.bf16 %v1659_v55, %v1655_v36  ;;  %2477 = vmatprep.mubr.bf16.mxu1 %v12950_v22  ;;  %v9473_v18 = vpack.c.bf16 %v1346_v33, %v1342_v53 }
 0x2fa   : > { %12968 = vst [vmem:[#allocation70_spill] sm:$0xff] %v9465_v59  ;;  %12969 = vst [vmem:[#allocation71_spill] sm:$0xff] %v9468_v50  ;;  %5141 = vperm.xlu1 %6846, %v9050_v5  }
 0x2fb   : > { %12970 = vst [vmem:[#allocation72_spill] sm:$0xff] %v9470_v20  ;;  %12971 = vst [vmem:[#allocation73_spill] sm:$0xff] %v9473_v18  ;;  %v1662_v6 = vpop.f32.mrb[60].mxu1  ;;  %v1349_v48 = vpop.f32.mrb[60].mxu0 }
 0x2fc   : > { %v1664_v43 = vpop.f32.mrb[61].mxu1  ;;  %v1350_v16 = vadd.f32 %v1349_v48, %v9091_v26  ;;  %v1351_v63 = vpop.f32.mrb[61].mxu0  ;;  %v1663_v14 = vadd.f32 %v1662_v6, %v9198_v37 }
 0x2fd   : > { %v1666_v9 = vpop.f32.mrb[62].mxu1  ;;  %v1352_v25 = vadd.f32 %v1351_v63, %v9094_v28  ;;  %v1353_v59 = vpop.f32.mrb[62].mxu0  ;;  %v1665_v55 = vadd.f32 %v1664_v43, %v9203_v10 }
 0x2fe   : > { %v1667_v40 = vadd.f32 %v1666_v9, %v9198_v37  ;;  %v1668_v36 = vpop.f32.mrb[63].mxu1  ;;  %v1354_v33 = vadd.f32 %v1353_v59, %v9091_v26  ;;  %v1355_v53 = vpop.f32.mrb[63].mxu0  ;;  %5147 = vperm.xlu1 %6846, %v9065_v17  }
 0x2ff   : > { %v1669_v5 = vadd.f32 %v1668_v36, %v9203_v10  ;;  %v1356_v18 = vadd.f32 %v1355_v53, %v9094_v28 }
 0x300   : > { %v9485_v48 = vpack.c.bf16 %v1667_v40, %v1663_v14  ;;  %2478 = vmatmul.mubr.bf16.gmra.mrb[168].mxu1 %v12950_v22  ;;  %v9488_v63 = vpack.c.bf16 %v1354_v33, %v1350_v16 }
 0x301   : > { %v9490_v6 = vpack.c.bf16 %v1669_v5, %v1665_v55  ;;  %2487 = vmatprep.mubr.bf16.mxu1 %v12950_v22  ;;  %v9493_v59 = vpack.c.bf16 %v1356_v18, %v1352_v25 }
 0x302   : > { %12972 = vst [vmem:[#allocation74_spill] sm:$0xff] %v9485_v48  ;;  %12973 = vst [vmem:[#allocation75_spill] sm:$0xff] %v9488_v63 }
 0x303   : > { %12974 = vst [vmem:[#allocation76_spill] sm:$0xff] %v9490_v6  ;;  %12975 = vst [vmem:[#allocation77_spill] sm:$0xff] %v9493_v59  ;;  %v1672_v9 = vpop.f32.mrb[64].mxu1  ;;  %v1359_v43 = vpop.f32.mrb[64].mxu0 }
 0x304   : > { %v1674_v50 = vpop.f32.mrb[65].mxu1  ;;  %v1360_v36 = vadd.f32 %v1359_v43, %v9091_v26  ;;  %v1361_v53 = vpop.f32.mrb[65].mxu0  ;;  %v1673_v40 = vadd.f32 %v1672_v9, %v9198_v37 }
 0x305   : > { %v1676_v20 = vpop.f32.mrb[66].mxu1  ;;  %v1362_v17 = vadd.f32 %v1361_v53, %v9094_v28  ;;  %v1363_v14 = vpop.f32.mrb[66].mxu0  ;;  %v1675_v18 = vadd.f32 %v1674_v50, %v9203_v10 }
 0x306   : > { %v1677_v16 = vadd.f32 %v1676_v20, %v9198_v37  ;;  %v1678_v33 = vpop.f32.mrb[67].mxu1  ;;  %v1364_v55 = vadd.f32 %v1363_v14, %v9091_v26  ;;  %v1365_v5 = vpop.f32.mrb[67].mxu0 }
 0x307   : > { %v1679_v25 = vadd.f32 %v1678_v33, %v9203_v10  ;;  %v1366_v59 = vadd.f32 %v1365_v5, %v9094_v28 }
 0x308   : > { %v9503_v43 = vpack.c.bf16 %v1677_v16, %v1673_v40  ;;  %2488 = vmatmul.mubr.bf16.gmra.mrb[172].mxu1 %v12950_v22  ;;  %v9506_v53 = vpack.c.bf16 %v1364_v55, %v1360_v36 }
 0x309   : > { %v9508_v63 = vpack.c.bf16 %v1679_v25, %v1675_v18  ;;  %v9510_v9 = vpack.c.bf16 %v1366_v59, %v1362_v17  ;;  %3179 = vmatprep.mubr.bf16.mxu1 %v12950_v22 }
 0x30a   : > { %12976 = vst [vmem:[#allocation78_spill] sm:$0xff] %v9503_v43  ;;  %12977 = vst [vmem:[#allocation79_spill] sm:$0xff] %v9506_v53 }
 0x30b   : > { %12978 = vst [vmem:[#allocation80_spill] sm:$0xff] %v9508_v63  ;;  %12979 = vst [vmem:[#allocation81_spill] sm:$0xff] %v9510_v9  ;;  %v1682_v20 = vpop.f32.mrb[68].mxu1  ;;  %v1369_v14 = vpop.f32.mrb[68].mxu0 }
 0x30c   : > { %v1684_v6 = vpop.f32.mrb[69].mxu1  ;;  %v1370_v50 = vadd.f32 %v1369_v14, %v9091_v26  ;;  %v1371_v33 = vpop.f32.mrb[69].mxu0  ;;  %v1683_v5 = vadd.f32 %v1682_v20, %v9198_v37 }
 0x30d   : > { %v1686_v48 = vpop.f32.mrb[70].mxu1  ;;  %v1372_v40 = vadd.f32 %v1371_v33, %v9094_v28  ;;  %v1373_v16 = vpop.f32.mrb[70].mxu0  ;;  %v1685_v18 = vadd.f32 %v1684_v6, %v9203_v10 }
 0x30e   : > { %v1687_v36 = vadd.f32 %v1686_v48, %v9198_v37  ;;  %v1688_v55 = vpop.f32.mrb[71].mxu1  ;;  %v1374_v59 = vadd.f32 %v1373_v16, %v9091_v26  ;;  %v1375_v17 = vpop.f32.mrb[71].mxu0 }
 0x30f   : > { %v1689_v25 = vadd.f32 %v1688_v55, %v9203_v10  ;;  %v1376_v9 = vadd.f32 %v1375_v17, %v9094_v28 }
 0x310   : > { %v9521_v14 = vpack.c.bf16 %v1687_v36, %v1683_v5  ;;  %v9523_v53 = vpack.c.bf16 %v1374_v59, %v1370_v50 }
 0x311   : > { %v9525_v33 = vpack.c.bf16 %v1689_v25, %v1685_v18  ;;  %v9527_v63 = vpack.c.bf16 %v1376_v9, %v1372_v40 }
 0x312   : > { %12980 = vst [vmem:[#allocation82_spill] sm:$0xff] %v9521_v14  ;;  %12981 = vst [vmem:[#allocation83_spill] sm:$0xff] %v9523_v53 }
 0x313   : > { %12982 = vst [vmem:[#allocation84_spill] sm:$0xff] %v9525_v33  ;;  %12983 = vst [vmem:[#allocation85_spill] sm:$0xff] %v9527_v63  ;;  %v1692_v20 = vpop.f32.mrb[72].mxu1  ;;  %v1379_v48 = vpop.f32.mrb[72].mxu0 }
 0x314   : > { %v1694_v43 = vpop.f32.mrb[73].mxu1  ;;  %v1380_v16 = vadd.f32 %v1379_v48, %v9091_v26  ;;  %v1381_v57 = vpop.f32.mrb[73].mxu0  ;;  %v1693_v17 = vadd.f32 %v1692_v20, %v9198_v37 }
 0x315   : > { %v1696_v27 = vpop.f32.mrb[74].mxu1  ;;  %v1382_v6 = vadd.f32 %v1381_v57, %v9094_v28  ;;  %v1383_v55 = vpop.f32.mrb[74].mxu0  ;;  %v1695_v9 = vadd.f32 %v1694_v43, %v9203_v10 }
 0x316   : > { %v1697_v5 = vadd.f32 %v1696_v27, %v9198_v37  ;;  %v1698_v50 = vpop.f32.mrb[75].mxu1  ;;  %v1384_v36 = vadd.f32 %v1383_v55, %v9091_v26  ;;  %v1385_v59 = vpop.f32.mrb[75].mxu0 }
 0x317   : > { %v1699_v40 = vadd.f32 %v1698_v50, %v9203_v10  ;;  %v1386_v18 = vadd.f32 %v1385_v59, %v9094_v28 }
 0x318   : > { %v9537_v25 = vpack.c.bf16 %v1697_v5, %v1693_v17  ;;  %v9539_v48 = vpack.c.bf16 %v1384_v36, %v1380_v16 }
 0x319   : > { %v9541_v57 = vpack.c.bf16 %v1699_v40, %v1695_v9  ;;  %v9543_v63 = vpack.c.bf16 %v1386_v18, %v1382_v6 }
 0x31a   : > { %12984 = vst [vmem:[#allocation86_spill] sm:$0xff] %v9537_v25  ;;  %12985 = vst [vmem:[#allocation87_spill] sm:$0xff] %v9539_v48 }
 0x31b   : > { %12986 = vst [vmem:[#allocation88_spill] sm:$0xff] %v9541_v57  ;;  %12987 = vst [vmem:[#allocation89_spill] sm:$0xff] %v9543_v63  ;;  %v1702_v20 = vpop.f32.mrb[76].mxu1  ;;  %v1389_v27 = vpop.f32.mrb[76].mxu0 }
 0x31c   : > { %v1704_v53 = vpop.f32.mrb[77].mxu1  ;;  %v1390_v55 = vadd.f32 %v1389_v27, %v9091_v26  ;;  %v1391_v33 = vpop.f32.mrb[77].mxu0  ;;  %v1703_v59 = vadd.f32 %v1702_v20, %v9198_v37 }
 0x31d   : > { %v1706_v14 = vpop.f32.mrb[78].mxu1  ;;  %v1392_v43 = vadd.f32 %v1391_v33, %v9094_v28  ;;  %v1393_v50 = vpop.f32.mrb[78].mxu0  ;;  %v1705_v6 = vadd.f32 %v1704_v53, %v9203_v10 }
 0x31e   : > { %v1707_v17 = vadd.f32 %v1706_v14, %v9198_v37  ;;  %v1708_v16 = vpop.f32.mrb[79].mxu1  ;;  %v1394_v5 = vadd.f32 %v1393_v50, %v9091_v26  ;;  %v1395_v36 = vpop.f32.mrb[79].mxu0 }
 0x31f   : > { %v1709_v9 = vadd.f32 %v1708_v16, %v9203_v10  ;;  %v1396_v40 = vadd.f32 %v1395_v36, %v9094_v28 }
 0x320   : > { %v9553_v18 = vpack.c.bf16 %v1707_v17, %v1703_v59  ;;  %v9555_v27 = vpack.c.bf16 %v1394_v5, %v1390_v55 }
 0x321   : > { %v9557_v33 = vpack.c.bf16 %v1709_v9, %v1705_v6  ;;  %v9559_v63 = vpack.c.bf16 %v1396_v40, %v1392_v43 }
 0x322   : > { %12988 = vst [vmem:[#allocation90_spill] sm:$0xff] %v9553_v18  ;;  %12989 = vst [vmem:[#allocation91_spill] sm:$0xff] %v9555_v27 }
 0x323   : > { %12990 = vst [vmem:[#allocation92_spill] sm:$0xff] %v9557_v33  ;;  %12991 = vst [vmem:[#allocation93_spill] sm:$0xff] %v9559_v63  ;;  %v1712_v20 = vpop.f32.mrb[80].mxu1  ;;  %v1399_v14 = vpop.f32.mrb[80].mxu0 }
 0x324   : > { %v1714_v48 = vpop.f32.mrb[81].mxu1  ;;  %v1400_v50 = vadd.f32 %v1399_v14, %v9091_v26  ;;  %v1401_v57 = vpop.f32.mrb[81].mxu0  ;;  %v1713_v36 = vadd.f32 %v1712_v20, %v9198_v37 }
 0x325   : > { %v1716_v25 = vpop.f32.mrb[82].mxu1  ;;  %v1402_v53 = vadd.f32 %v1401_v57, %v9094_v28  ;;  %v1403_v16 = vpop.f32.mrb[82].mxu0  ;;  %v1715_v43 = vadd.f32 %v1714_v48, %v9203_v10 }
 0x326   : > { %v1717_v59 = vadd.f32 %v1716_v25, %v9198_v37  ;;  %v1718_v55 = vpop.f32.mrb[83].mxu1  ;;  %v1404_v17 = vadd.f32 %v1403_v16, %v9091_v26  ;;  %v1405_v5 = vpop.f32.mrb[83].mxu0 }
 0x327   : > { %v1719_v6 = vadd.f32 %v1718_v55, %v9203_v10  ;;  %v1406_v9 = vadd.f32 %v1405_v5, %v9094_v28 }
 0x328   : > { %v9569_v40 = vpack.c.bf16 %v1717_v59, %v1713_v36  ;;  %v9571_v14 = vpack.c.bf16 %v1404_v17, %v1400_v50 }
 0x329   : > { %v9573_v57 = vpack.c.bf16 %v1719_v6, %v1715_v43  ;;  %v9575_v63 = vpack.c.bf16 %v1406_v9, %v1402_v53 }
 0x32a   : > { %12992 = vst [vmem:[#allocation94_spill] sm:$0xff] %v9569_v40  ;;  %12993 = vst [vmem:[#allocation95_spill] sm:$0xff] %v9571_v14 }
 0x32b   : > { %12994 = vst [vmem:[#allocation96_spill] sm:$0xff] %v9573_v57  ;;  %12995 = vst [vmem:[#allocation97_spill] sm:$0xff] %v9575_v63  ;;  %v1722_v20 = vpop.f32.mrb[84].mxu1  ;;  %v1409_v25 = vpop.f32.mrb[84].mxu0 }
 0x32c   : > { %v1724_v27 = vpop.f32.mrb[85].mxu1  ;;  %v1410_v16 = vadd.f32 %v1409_v25, %v9091_v26  ;;  %v1411_v33 = vpop.f32.mrb[85].mxu0  ;;  %v1723_v5 = vadd.f32 %v1722_v20, %v9198_v37 }
 0x32d   : > { %v1726_v18 = vpop.f32.mrb[86].mxu1  ;;  %v1412_v48 = vadd.f32 %v1411_v33, %v9094_v28  ;;  %v1413_v55 = vpop.f32.mrb[86].mxu0  ;;  %v1725_v53 = vadd.f32 %v1724_v27, %v9203_v10 }
 0x32e   : > { %v1727_v36 = vadd.f32 %v1726_v18, %v9198_v37  ;;  %v1728_v50 = vpop.f32.mrb[87].mxu1  ;;  %v1414_v59 = vadd.f32 %v1413_v55, %v9091_v26  ;;  %v1415_v17 = vpop.f32.mrb[87].mxu0 }
 0x32f   : > { %v1729_v43 = vadd.f32 %v1728_v50, %v9203_v10  ;;  %v1416_v6 = vadd.f32 %v1415_v17, %v9094_v28 }
 0x330   : > { %v9585_v9 = vpack.c.bf16 %v1727_v36, %v1723_v5  ;;  %v9587_v25 = vpack.c.bf16 %v1414_v59, %v1410_v16 }
 0x331   : > { %v9589_v33 = vpack.c.bf16 %v1729_v43, %v1725_v53  ;;  %v9591_v63 = vpack.c.bf16 %v1416_v6, %v1412_v48 }
 0x332   : > { %12996 = vst [vmem:[#allocation98_spill] sm:$0xff] %v9585_v9  ;;  %12997 = vst [vmem:[#allocation99_spill] sm:$0xff] %v9587_v25 }
 0x333   : > { %12998 = vst [vmem:[#allocation100_spill] sm:$0xff] %v9589_v33  ;;  %12999 = vst [vmem:[#allocation101_spill] sm:$0xff] %v9591_v63  ;;  %v1732_v20 = vpop.f32.mrb[88].mxu1  ;;  %v1419_v18 = vpop.f32.mrb[88].mxu0 }
 0x334   : > { %v1734_v14 = vpop.f32.mrb[89].mxu1  ;;  %v1420_v55 = vadd.f32 %v1419_v18, %v9091_v26  ;;  %v1421_v57 = vpop.f32.mrb[89].mxu0  ;;  %v1733_v17 = vadd.f32 %v1732_v20, %v9198_v37 }
 0x335   : > { %v1736_v40 = vpop.f32.mrb[90].mxu1  ;;  %v1422_v27 = vadd.f32 %v1421_v57, %v9094_v28  ;;  %v1423_v50 = vpop.f32.mrb[90].mxu0  ;;  %v1735_v48 = vadd.f32 %v1734_v14, %v9203_v10 }
 0x336   : > { %v1737_v5 = vadd.f32 %v1736_v40, %v9198_v37  ;;  %v1738_v16 = vpop.f32.mrb[91].mxu1  ;;  %v1424_v36 = vadd.f32 %v1423_v50, %v9091_v26  ;;  %v1425_v59 = vpop.f32.mrb[91].mxu0 }
 0x337   : > { %v1739_v53 = vadd.f32 %v1738_v16, %v9203_v10  ;;  %v1426_v43 = vadd.f32 %v1425_v59, %v9094_v28 }
 0x338   : > { %v9601_v6 = vpack.c.bf16 %v1737_v5, %v1733_v17  ;;  %v9603_v18 = vpack.c.bf16 %v1424_v36, %v1420_v55 }
 0x339   : > { %v9605_v57 = vpack.c.bf16 %v1739_v53, %v1735_v48  ;;  %v9607_v63 = vpack.c.bf16 %v1426_v43, %v1422_v27 }
 0x33a   : > { %13000 = vst [vmem:[#allocation102_spill] sm:$0xff] %v9601_v6  ;;  %13001 = vst [vmem:[#allocation103_spill] sm:$0xff] %v9603_v18 }
 0x33b   : > { %13002 = vst [vmem:[#allocation104_spill] sm:$0xff] %v9605_v57  ;;  %13003 = vst [vmem:[#allocation105_spill] sm:$0xff] %v9607_v63  ;;  %v1742_v20 = vpop.f32.mrb[92].mxu1  ;;  %v1429_v40 = vpop.f32.mrb[92].mxu0 }
 0x33c   : > { %v1744_v33 = vpop.f32.mrb[93].mxu1  ;;  %v1430_v50 = vadd.f32 %v1429_v40, %v9091_v26  ;;  %v1431_v25 = vpop.f32.mrb[93].mxu0  ;;  %v1743_v59 = vadd.f32 %v1742_v20, %v9198_v37 }
 0x33d   : > { %v1746_v9 = vpop.f32.mrb[94].mxu1  ;;  %v1432_v14 = vadd.f32 %v1431_v25, %v9094_v28  ;;  %v1433_v16 = vpop.f32.mrb[94].mxu0  ;;  %v1745_v27 = vadd.f32 %v1744_v33, %v9203_v10 }
 0x33e   : > { %v1747_v17 = vadd.f32 %v1746_v9, %v9198_v37  ;;  %v1748_v55 = vpop.f32.mrb[95].mxu1  ;;  %v1434_v5 = vadd.f32 %v1433_v16, %v9091_v26  ;;  %v1435_v36 = vpop.f32.mrb[95].mxu0 }
 0x33f   : > { %v1749_v48 = vadd.f32 %v1748_v55, %v9203_v10  ;;  %v1436_v53 = vadd.f32 %v1435_v36, %v9094_v28 }
 0x340   : > { %v9617_v43 = vpack.c.bf16 %v1747_v17, %v1743_v59  ;;  %v9619_v40 = vpack.c.bf16 %v1434_v5, %v1430_v50 }
 0x341   : > { %v9621_v25 = vpack.c.bf16 %v1749_v48, %v1745_v27  ;;  %v9623_v63 = vpack.c.bf16 %v1436_v53, %v1432_v14 }
 0x342   : > { %13004 = vst [vmem:[#allocation106_spill] sm:$0xff] %v9617_v43  ;;  %13005 = vst [vmem:[#allocation107_spill] sm:$0xff] %v9619_v40 }
 0x343   : > { %13006 = vst [vmem:[#allocation108_spill] sm:$0xff] %v9621_v25  ;;  %13007 = vst [vmem:[#allocation109_spill] sm:$0xff] %v9623_v63  ;;  %v1752_v20 = vpop.f32.mrb[96].mxu1  ;;  %v1439_v9 = vpop.f32.mrb[96].mxu0 }
 0x344   : > { %v1754_v18 = vpop.f32.mrb[97].mxu1  ;;  %v1440_v16 = vadd.f32 %v1439_v9, %v9091_v26  ;;  %v1441_v57 = vpop.f32.mrb[97].mxu0  ;;  %v1753_v36 = vadd.f32 %v1752_v20, %v9198_v37 }
 0x345   : > { %v1756_v6 = vpop.f32.mrb[98].mxu1  ;;  %v1442_v33 = vadd.f32 %v1441_v57, %v9094_v28  ;;  %v1443_v55 = vpop.f32.mrb[98].mxu0  ;;  %v1755_v14 = vadd.f32 %v1754_v18, %v9203_v10 }
 0x346   : > { %v1757_v59 = vadd.f32 %v1756_v6, %v9198_v37  ;;  %v1758_v50 = vpop.f32.mrb[99].mxu1  ;;  %v1444_v17 = vadd.f32 %v1443_v55, %v9091_v26  ;;  %v1445_v5 = vpop.f32.mrb[99].mxu0 }
 0x347   : > { %v1759_v27 = vadd.f32 %v1758_v50, %v9203_v10  ;;  %v1446_v48 = vadd.f32 %v1445_v5, %v9094_v28 }
 0x348   : > { %v9633_v53 = vpack.c.bf16 %v1757_v59, %v1753_v36  ;;  %v9635_v9 = vpack.c.bf16 %v1444_v17, %v1440_v16 }
 0x349   : > { %v9637_v57 = vpack.c.bf16 %v1759_v27, %v1755_v14  ;;  %v9639_v63 = vpack.c.bf16 %v1446_v48, %v1442_v33 }
 0x34a   : > { %13008 = vst [vmem:[#allocation110_spill] sm:$0xff] %v9633_v53  ;;  %13009 = vst [vmem:[#allocation111_spill] sm:$0xff] %v9635_v9 }
 0x34b   : > { %13010 = vst [vmem:[#allocation112_spill] sm:$0xff] %v9637_v57  ;;  %13011 = vst [vmem:[#allocation113_spill] sm:$0xff] %v9639_v63  ;;  %v1762_v20 = vpop.f32.mrb[100].mxu1  ;;  %v1449_v6 = vpop.f32.mrb[100].mxu0 }
 0x34c   : > { %v1764_v25 = vpop.f32.mrb[101].mxu1  ;;  %v1450_v55 = vadd.f32 %v1449_v6, %v9091_v26  ;;  %v1451_v40 = vpop.f32.mrb[101].mxu0  ;;  %v1763_v5 = vadd.f32 %v1762_v20, %v9198_v37 }
 0x34d   : > { %v1766_v43 = vpop.f32.mrb[102].mxu1  ;;  %v1452_v18 = vadd.f32 %v1451_v40, %v9094_v28  ;;  %v1453_v50 = vpop.f32.mrb[102].mxu0  ;;  %v1765_v33 = vadd.f32 %v1764_v25, %v9203_v10 }
 0x34e   : > { %v1767_v36 = vadd.f32 %v1766_v43, %v9198_v37  ;;  %v1768_v16 = vpop.f32.mrb[103].mxu1  ;;  %v1454_v59 = vadd.f32 %v1453_v50, %v9091_v26  ;;  %v1455_v17 = vpop.f32.mrb[103].mxu0 }
 0x34f   : > { %v1769_v14 = vadd.f32 %v1768_v16, %v9203_v10  ;;  %v1456_v27 = vadd.f32 %v1455_v17, %v9094_v28 }
 0x350   : > { %v9649_v48 = vpack.c.bf16 %v1767_v36, %v1763_v5  ;;  %v9651_v6 = vpack.c.bf16 %v1454_v59, %v1450_v55 }
 0x351   : > { %v9653_v40 = vpack.c.bf16 %v1769_v14, %v1765_v33  ;;  %v9655_v63 = vpack.c.bf16 %v1456_v27, %v1452_v18 }
 0x352   : > { %13012 = vst [vmem:[#allocation114_spill] sm:$0xff] %v9649_v48  ;;  %13013 = vst [vmem:[#allocation115_spill] sm:$0xff] %v9651_v6 }
 0x353   : > { %13014 = vst [vmem:[#allocation116_spill] sm:$0xff] %v9653_v40  ;;  %13015 = vst [vmem:[#allocation117_spill] sm:$0xff] %v9655_v63  ;;  %v1772_v20 = vpop.f32.mrb[104].mxu1  ;;  %v1459_v43 = vpop.f32.mrb[104].mxu0 }
 0x354   : > { %v1774_v9 = vpop.f32.mrb[105].mxu1  ;;  %v1460_v50 = vadd.f32 %v1459_v43, %v9091_v26  ;;  %v1461_v57 = vpop.f32.mrb[105].mxu0  ;;  %v1773_v17 = vadd.f32 %v1772_v20, %v9198_v37 }
 0x355   : > { %v1776_v53 = vpop.f32.mrb[106].mxu1  ;;  %v1462_v25 = vadd.f32 %v1461_v57, %v9094_v28  ;;  %v1463_v16 = vpop.f32.mrb[106].mxu0  ;;  %v1775_v18 = vadd.f32 %v1774_v9, %v9203_v10 }
 0x356   : > { %v1777_v5 = vadd.f32 %v1776_v53, %v9198_v37  ;;  %v1778_v55 = vpop.f32.mrb[107].mxu1  ;;  %v1464_v36 = vadd.f32 %v1463_v16, %v9091_v26  ;;  %v1465_v59 = vpop.f32.mrb[107].mxu0 }
 0x357   : > { %v1779_v33 = vadd.f32 %v1778_v55, %v9203_v10  ;;  %v1466_v14 = vadd.f32 %v1465_v59, %v9094_v28 }
 0x358   : > { %v9665_v27 = vpack.c.bf16 %v1777_v5, %v1773_v17  ;;  %v9667_v43 = vpack.c.bf16 %v1464_v36, %v1460_v50 }
 0x359   : > { %v9669_v57 = vpack.c.bf16 %v1779_v33, %v1775_v18  ;;  %v9671_v63 = vpack.c.bf16 %v1466_v14, %v1462_v25 }
 0x35a   : > { %13016 = vst [vmem:[#allocation118_spill] sm:$0xff] %v9665_v27  ;;  %13017 = vst [vmem:[#allocation119_spill] sm:$0xff] %v9667_v43 }
 0x35b   : > { %13018 = vst [vmem:[#allocation120_spill] sm:$0xff] %v9669_v57  ;;  %13019 = vst [vmem:[#allocation121_spill] sm:$0xff] %v9671_v63  ;;  %v1782_v20 = vpop.f32.mrb[108].mxu1  ;;  %v1469_v53 = vpop.f32.mrb[108].mxu0 }
 0x35c   : > { %v1784_v6 = vpop.f32.mrb[109].mxu1  ;;  %v1470_v16 = vadd.f32 %v1469_v53, %v9091_v26  ;;  %v1471_v40 = vpop.f32.mrb[109].mxu0  ;;  %v1783_v59 = vadd.f32 %v1782_v20, %v9198_v37 }
 0x35d   : > { %v1786_v48 = vpop.f32.mrb[110].mxu1  ;;  %v1472_v9 = vadd.f32 %v1471_v40, %v9094_v28  ;;  %v1473_v55 = vpop.f32.mrb[110].mxu0  ;;  %v1785_v25 = vadd.f32 %v1784_v6, %v9203_v10 }
 0x35e   : > { %v1787_v17 = vadd.f32 %v1786_v48, %v9198_v37  ;;  %v1788_v50 = vpop.f32.mrb[111].mxu1  ;;  %v1474_v5 = vadd.f32 %v1473_v55, %v9091_v26  ;;  %v1475_v36 = vpop.f32.mrb[111].mxu0  ;;  %v2048_v48 = vunpack.c.l.bf16 %v9111_v4  ;;  %v2049_v26 = vunpack.c.l.bf16 %v9117_v11 }
 0x35f   : > { %v1789_v18 = vadd.f32 %v1788_v50, %v9203_v10  ;;  %v1476_v33 = vadd.f32 %v1475_v36, %v9094_v28  ;;  %v2052_v28 = vunpack.c.h.bf16 %v9111_v4 }
 0x360   : > { %v9681_v14 = vpack.c.bf16 %v1787_v17, %v1783_v59  ;;  %v9683_v53 = vpack.c.bf16 %v1474_v5, %v1470_v16  ;;  %v2053_v5 = vunpack.c.h.bf16 %v9117_v11  ;;  %v2056_v11 = vunpack.c.l.bf16 %v9133_v56 }
 0x361   : > { %v9685_v40 = vpack.c.bf16 %v1789_v18, %v1785_v25  ;;  %v9687_v63 = vpack.c.bf16 %v1476_v33, %v1472_v9 }
 0x362   : > { %13020 = vst [vmem:[#allocation122_spill] sm:$0xff] %v9681_v14  ;;  %13021 = vst [vmem:[#allocation123_spill] sm:$0xff] %v9683_v53 }
 0x363   : > { %13022 = vst [vmem:[#allocation124_spill] sm:$0xff] %v9685_v40  ;;  %13023 = vst [vmem:[#allocation125_spill] sm:$0xff] %v9687_v63  ;;  %v1792_v20 = vpop.f32.mrb[112].mxu1  ;;  %v2306_v43 = vpop.f32.mrb[112].mxu0 }
 0x364   : > { %v9691_v55 = vadd.f32 %v2306_v43, %v2048_v48  ;;  %v1794_v6 = vpop.f32.mrb[113].mxu1  ;;  %v2308_v50 = vpop.f32.mrb[113].mxu0  ;;  %v1793_v9 = vadd.f32 %v1792_v20, %v9198_v37 }
 0x365   : > { %v9694_v59 = vadd.f32 %v2308_v50, %v2049_v26  ;;  %v1796_v16 = vpop.f32.mrb[114].mxu1  ;;  %v2310_v17 = vpop.f32.mrb[114].mxu0  ;;  %v1795_v43 = vadd.f32 %v1794_v6, %v9203_v10  ;;  %v2060_v6 = vunpack.c.h.bf16 %v9133_v56 }
 0x366   : > { %v1797_v36 = vadd.f32 %v1796_v16, %v9198_v37  ;;  %v9699_v25 = vadd.f32 %v2310_v17, %v2052_v28  ;;  %v1798_v18 = vpop.f32.mrb[115].mxu1  ;;  %v2312_v33 = vpop.f32.mrb[115].mxu0  ;;  %v2057_v16 = vunpack.c.l.bf16 %v9139_v62 }
 0x367   : > { %v1799_v48 = vadd.f32 %v1798_v18, %v9203_v10  ;;  %v9703_v63 = vadd.f32 %v2312_v33, %v2053_v5 }
 0x368   : > { %v9705_v4 = vpack.c.bf16 %v1797_v36, %v1793_v9  ;;  %v2061_v9 = vunpack.c.h.bf16 %v9139_v62  ;;  %v2064_v62 = vunpack.c.l.bf16 %v9159_v51 }
 0x369   : > { %v9707_v26 = vpack.c.bf16 %v1799_v48, %v1795_v43 }
 0x36a   : > { %13024 = vst [vmem:[#allocation126_spill] sm:$0xff] %v9705_v4 }
 0x36b   : > { %13025 = vst [vmem:[#allocation127_spill] sm:$0xff] %v9707_v26  ;;  %v1802_v50 = vpop.f32.mrb[116].mxu1  ;;  %v2316_v20 = vpop.f32.mrb[116].mxu0 }
 0x36c   : > { %v9711_v28 = vadd.f32 %v2316_v20, %v2056_v11  ;;  %v1804_v17 = vpop.f32.mrb[117].mxu1  ;;  %v2318_v53 = vpop.f32.mrb[117].mxu0  ;;  %v1803_v36 = vadd.f32 %v1802_v50, %v9198_v37 }
 0x36d   : > { %v9714_v40 = vadd.f32 %v2318_v53, %v2057_v16  ;;  %v1806_v5 = vpop.f32.mrb[118].mxu1  ;;  %v2320_v18 = vpop.f32.mrb[118].mxu0  ;;  %v1805_v11 = vadd.f32 %v1804_v17, %v9203_v10 }
 0x36e   : > { %v1807_v33 = vadd.f32 %v1806_v5, %v9198_v37  ;;  %v9719_v43 = vadd.f32 %v2320_v18, %v2060_v6  ;;  %v1808_v48 = vpop.f32.mrb[119].mxu1  ;;  %v2322_v26 = vpop.f32.mrb[119].mxu0  ;;  %v2065_v5 = vunpack.c.l.bf16 %v9165_v32 }
 0x36f   : > { %v1809_v20 = vadd.f32 %v1808_v48, %v9203_v10  ;;  %v9723_v4 = vadd.f32 %v2322_v26, %v2061_v9  ;;  %v2068_v26 = vunpack.c.h.bf16 %v9159_v51 }
 0x370   : > { %v9725_v56 = vpack.c.bf16 %v1807_v33, %v1803_v36 }
 0x371   : > { %v9727_v53 = vpack.c.bf16 %v1809_v20, %v1805_v11 }
 0x372   : > { %13026 = vst [vmem:[#allocation128_spill] sm:$0xff] %v9725_v56 }
 0x373   : > { %13027 = vst [vmem:[#allocation129_spill] sm:$0xff] %v9727_v53  ;;  %v1812_v16 = vpop.f32.mrb[120].mxu1  ;;  %v2326_v50 = vpop.f32.mrb[120].mxu0 }
 0x374   : > { %v9731_v6 = vadd.f32 %v2326_v50, %v2064_v62  ;;  %v1814_v18 = vpop.f32.mrb[121].mxu1  ;;  %v2328_v14 = vpop.f32.mrb[121].mxu0  ;;  %v1813_v36 = vadd.f32 %v1812_v16, %v9198_v37  ;;  %v2069_v50 = vunpack.c.h.bf16 %v9165_v32  ;;  %v2072_v16 = vunpack.c.l.bf16 %v9187_v49 }
 0x375   : > { %v9733_v57 = vadd.f32 %v2328_v14, %v2065_v5  ;;  %v1816_v17 = vpop.f32.mrb[122].mxu1  ;;  %v2330_v9 = vpop.f32.mrb[122].mxu0  ;;  %v1815_v20 = vadd.f32 %v1814_v18, %v9203_v10  ;;  %v2073_v18 = vunpack.c.l.bf16 %v9193_v19 }
 0x376   : > { %v1817_v33 = vadd.f32 %v1816_v17, %v9198_v37  ;;  %v1818_v48 = vpop.f32.mrb[123].mxu1  ;;  %v2332_v11 = vpop.f32.mrb[123].mxu0  ;;  %v9739_v53 = vadd.f32 %v2330_v9, %v2068_v26 }
 0x377   : > { %v1819_v62 = vadd.f32 %v1818_v48, %v9203_v10  ;;  %v9747_v51 = vadd.f32 %v2332_v11, %v2069_v50  ;;  %v2076_v48 = vunpack.c.h.bf16 %v9187_v49 }
 0x378   : > { %v9743_v14 = vpack.c.bf16 %v1817_v33, %v1813_v36 }
 0x379   : > { %v9745_v5 = vpack.c.bf16 %v1819_v62, %v1815_v20  ;;  %v2077_v20 = vunpack.c.h.bf16 %v9193_v19  ;;  %v2081_v19 = vunpack.c.l.bf16 %v9229_v30 }
 0x37a   : > { %13028 = vst [vmem:[#allocation130_spill] sm:$0xff] %v9743_v14 }
 0x37b   : > { %13029 = vst [vmem:[#allocation131_spill] sm:$0xff] %v9745_v5  ;;  %v1822_v56 = vpop.f32.mrb[124].mxu1  ;;  %v2336_v17 = vpop.f32.mrb[124].mxu0 }
 0x37c   : > { %v9750_v27 = vadd.f32 %v2336_v17, %v2072_v16  ;;  %v1824_v54 = vpop.f32.mrb[125].mxu1  ;;  %v2338_v26 = vpop.f32.mrb[125].mxu0  ;;  %v1823_v36 = vadd.f32 %v1822_v56, %v9198_v37  ;;  %v2080_v56 = vunpack.c.l.bf16 %v9223_v24 }
 0x37d   : > { %v1826_v9 = vpop.f32.mrb[126].mxu1  ;;  %v2340_v32 = vpop.f32.mrb[126].mxu0  ;;  %v9755_v33 = vadd.f32 %v2338_v26, %v2073_v18  ;;  %v1825_v50 = vadd.f32 %v1824_v54, %v9203_v10 }
 0x37e   : > { %v1828_v11 = vpop.f32.mrb[127].mxu1  ;;  %v2342_v62 = vpop.f32.mrb[127].mxu0  ;;  %v1827_v16 = vadd.f32 %v1826_v9, %v9198_v37  ;;  %v9760_v17 = vadd.f32 %v2340_v32, %v2076_v48 }
 0x37f   : > { %v1829_v5 = vadd.f32 %v1828_v11, %v9203_v10  ;;  %v9767_v29 = vadd.f32 %v2342_v62, %v2077_v20 }
 0x380   : > { %v9763_v14 = vpack.c.bf16 %v1827_v16, %v1823_v36  ;;  %v2084_v36 = vunpack.c.h.bf16 %v9223_v24 }
 0x381   : > { %v9765_v49 = vpack.c.bf16 %v1829_v5, %v1825_v50  ;;  %v2085_v5 = vunpack.c.h.bf16 %v9229_v30  ;;  %v2088_v30 = vunpack.c.l.bf16 %v9251_v61 }
 0x382   : > { %13030 = vst [vmem:[#allocation132_spill] sm:$0xff] %v9763_v14 }
 0x383   : > { %13031 = vst [vmem:[#allocation133_spill] sm:$0xff] %v9765_v49  ;;  %v1832_v18 = vpop.f32.mrb[128].mxu1  ;;  %v2346_v26 = vpop.f32.mrb[128].mxu0 }
 0x384   : > { %v9771_v8 = vadd.f32 %v2346_v26, %v2080_v56  ;;  %v1834_v54 = vpop.f32.mrb[129].mxu1  ;;  %v2348_v9 = vpop.f32.mrb[129].mxu0  ;;  %v1833_v20 = vadd.f32 %v1832_v18, %v9198_v37 }
 0x385   : > { %v9773_v48 = vadd.f32 %v2348_v9, %v2081_v19  ;;  %v1836_v32 = vpop.f32.mrb[130].mxu1  ;;  %v2350_v11 = vpop.f32.mrb[130].mxu0  ;;  %v1835_v49 = vadd.f32 %v1834_v54, %v9203_v10  ;;  %v2089_v54 = vunpack.c.l.bf16 %v9257_v7 }
 0x386   : > { %v1837_v62 = vadd.f32 %v1836_v32, %v9198_v37  ;;  %v1838_v50 = vpop.f32.mrb[131].mxu1  ;;  %v2352_v16 = vpop.f32.mrb[131].mxu0  ;;  %v9780_v56 = vadd.f32 %v2350_v11, %v2084_v36  ;;  %v2092_v36 = vunpack.c.h.bf16 %v9251_v61  ;;  %v2096_v61 = vunpack.c.l.bf16 %v9276_v15 }
 0x387   : > { %v1839_v26 = vadd.f32 %v1838_v50, %v9203_v10  ;;  %v9783_v19 = vadd.f32 %v2352_v16, %v2085_v5  ;;  %v2093_v50 = vunpack.c.h.bf16 %v9257_v7  ;;  %v2563_v5 = vmul.f32 0.5, %v9694_v59 }
 0x388   : > { %v9785_v9 = vpack.c.bf16 %v1837_v62, %v1833_v20  ;;  %v2571_v59 = vmul.f32 0.5, %v9719_v43 }
 0x389   : > { %v9787_v24 = vpack.c.bf16 %v1839_v26, %v1835_v49  ;;  %v2100_v26 = vunpack.c.h.bf16 %v9276_v15  ;;  %v2101_v15 = vunpack.c.h.bf16 %v9282_v35  ;;  %6991 = vtanh.f32 %v2563_v5 }
 0x38a   : > { %13032 = vst [vmem:[#allocation134_spill] sm:$0xff] %v9785_v9 }
 0x38b   : > { %13033 = vst [vmem:[#allocation135_spill] sm:$0xff] %v9787_v24  ;;  %v1842_v14 = vpop.f32.mrb[132].mxu1  ;;  %v2356_v31 = vpop.f32.mrb[132].mxu0 }
 0x38c   : > { %v9796_v20 = vadd.f32 %v2356_v31, %v2088_v30  ;;  %v1844_v49 = vpop.f32.mrb[133].mxu1  ;;  %v2358_v62 = vpop.f32.mrb[133].mxu0  ;;  %v1843_v31 = vadd.f32 %v1842_v14, %v9198_v37  ;;  %v2097_v14 = vunpack.c.l.bf16 %v9282_v35  ;;  %v2569_v35 = vmul.f32 0.5, %v9714_v40 }
 0x38d   : > { %v9801_v32 = vadd.f32 %v2358_v62, %v2089_v54  ;;  %v1846_v18 = vpop.f32.mrb[134].mxu1  ;;  %v2360_v24 = vpop.f32.mrb[134].mxu0  ;;  %v1845_v54 = vadd.f32 %v1844_v49, %v9203_v10 }
 0x38e   : > { %v1847_v30 = vadd.f32 %v1846_v18, %v9198_v37  ;;  %v9808_v9 = vadd.f32 %v2360_v24, %v2092_v36  ;;  %v1848_v7 = vpop.f32.mrb[135].mxu1  ;;  %v2362_v16 = vpop.f32.mrb[135].mxu0  ;;  %v2562_v18 = vmul.f32 0.5, %v9691_v55  ;;  %v2105_v55 = vunpack.c.l.bf16 %v9305_v12 }
 0x38f   : > { %v1849_v62 = vadd.f32 %v1848_v7, %v9203_v10  ;;  %v9813_v38 = vadd.f32 %v2362_v16, %v2093_v50  ;;  %v2565_v50 = vmul.f32 0.5, %v9699_v25  ;;  %v2104_v16 = vunpack.c.l.bf16 %v9299_v47 }
 0x390   : > { %v9817_v60 = vpack.c.bf16 %v1847_v30, %v1843_v31  ;;  %v2566_v30 = vmul.f32 0.5, %v9703_v63  ;;  %6993 = vtanh.f32 %v2562_v18  ;;  %v2568_v63 = vmul.f32 0.5, %v9711_v28 }
 0x391   : > { %v9822_v36 = vpack.c.bf16 %v1849_v62, %v1845_v54  ;;  %6995 = vtanh.f32 %v2565_v50 }
 0x392   : > { %13034 = vst [vmem:[#allocation136_spill] sm:$0xff] %v9817_v60  ;;  %6997 = vtanh.f32 %v2566_v30 }
 0x393   : > { %13035 = vst [vmem:[#allocation137_spill] sm:$0xff] %v9822_v36  ;;  %v1852_v7 = vpop.f32.mrb[136].mxu1  ;;  %v2366_v24 = vpop.f32.mrb[136].mxu0  ;;  %6999 = vtanh.f32 %v2568_v63 }
 0x394   : > { %v1854_v62 = vpop.f32.mrb[137].mxu1  ;;  %v2368_v49 = vpop.f32.mrb[137].mxu0  ;;  %v9838_v31 = vadd.f32 %v2366_v24, %v2096_v61  ;;  %v1853_v5 = vadd.f32 %v1852_v7, %v9198_v37  ;;  %7001 = vtanh.f32 %v2569_v35 }
 0x395   : > { %v9840_v36 = vadd.f32 %v2368_v49, %v2097_v14  ;;  %v1856_v60 = vpop.f32.mrb[138].mxu1  ;;  %v2370_v25 = vpop.f32.mrb[138].mxu0  ;;  %v2572_v14 = vmul.f32 0.5, %v9723_v4  ;;  %v1855_v24 = vadd.f32 %v1854_v62, %v9203_v10  ;;  %7003 = vtanh.f32 %v2571_v59 }
 0x396   : > { %v1857_v54 = vadd.f32 %v1856_v60, %v9198_v37  ;;  %v1858_v22 = vpop.f32.mrb[139].mxu1  ;;  %v9846_v18 = vadd.f32 %v2370_v25, %v2100_v26  ;;  %v2372_v28 = vpop.f32.mrb[139].mxu0  ;;  %v2574_v60 = vmul.f32 0.5, %v9731_v6  ;;  %v2575_v26 = vmul.f32 0.5, %v9733_v57 }
 0x397   : > { %v1859_v40 = vadd.f32 %v1858_v22, %v9203_v10  ;;  %v9855_v50 = vadd.f32 %v2372_v28, %v2101_v15  ;;  %7005 = vtanh.f32 %v2572_v14  ;;  %v2577_v15 = vmul.f32 0.5, %v9739_v53 }
 0x398   : > { %v9851_v49 = vpack.c.bf16 %v1857_v54, %v1853_v5  ;;  %7007 = vtanh.f32 %v2574_v60  ;;  %v2578_v59 = vmul.f32 0.5, %v9747_v51  ;;  %v2580_v14 = vmul.f32 0.5, %v9750_v27 }
 0x399   : > { %v9859_v30 = vpack.c.bf16 %v1859_v40, %v1855_v24  ;;  %v6992_v40 = vpop.eup %6991  ;;  %7009 = vtanh.f32 %v2575_v26  ;;  %v2581_v60 = vmul.f32 0.5, %v9755_v33  ;;  %v2583_v27 = vmul.f32 0.5, %v9760_v17 }
 0x39a   : > { %13036 = vst [vmem:[#allocation138_spill] sm:$0xff] %v9851_v49  ;;  %v6994_v22 = vpop.eup %6993  ;;  %7011 = vtanh.f32 %v2577_v15  ;;  %v2659_v43 = vmul.f32 0.5, %v6992_v40  ;;  %v2584_v33 = vmul.f32 0.5, %v9767_v29  ;;  %v2587_v40 = vmul.f32 0.5, %v9773_v48 }
 0x39b   : > { %13037 = vst [vmem:[#allocation139_spill] sm:$0xff] %v9859_v30  ;;  %v1862_v7 = vpop.f32.mrb[140].mxu1  ;;  %v2376_v54 = vpop.f32.mrb[140].mxu0  ;;  %7013 = vtanh.f32 %v2578_v59 }
 0x39c   : > { %v9866_v25 = vadd.f32 %v2376_v54, %v2104_v16  ;;  %v1864_v35 = vpop.f32.mrb[141].mxu1  ;;  %v2378_v57 = vpop.f32.mrb[141].mxu0  ;;  %v1863_v51 = vadd.f32 %v1862_v7, %v9198_v37  ;;  %7015 = vtanh.f32 %v2580_v14 }
 0x39d   : > { %v9870_v5 = vadd.f32 %v2378_v57, %v2105_v55  ;;  %v1866_v28 = vpop.f32.mrb[142].mxu1  ;;  %v2380_v6 = vpop.f32.mrb[142].mxu0  ;;  %v13038_v57 = vunpack.c.h.bf16 %v9299_v47  ;;  %v1865_v16 = vadd.f32 %v1864_v35, %v9203_v10  ;;  %v2586_v47 = vmul.f32 0.5, %v9771_v8 }
 0x39e   : > { %v1868_v53 = vpop.f32.mrb[143].mxu1  ;;  %v1867_v55 = vadd.f32 %v1866_v28, %v9198_v37  ;;  %v2382_v26 = vpop.f32.mrb[143].mxu0  ;;  %7017 = vtanh.f32 %v2581_v60  ;;  %v13042_v8 = vunpack.c.l.bf16 %v9219_v46  ;;  %v13043_v60 = vunpack.c.l.bf16 %v9225_v44 }
 0x39f   : > { %v9881_v24 = vadd.f32 %v2380_v6, %v13038_v57  ;;  %v6996_v63 = vpop.eup %6995  ;;  %v1869_v54 = vadd.f32 %v1868_v53, %v9203_v10  ;;  %v13041_v6 = vunpack.c.h.bf16 %v9305_v12  ;;  %7019 = vtanh.f32 %v2583_v27 }
 0x3a0   : > { %v6998_v62 = vpop.eup %6997  ;;  %v9887_v7 = vpack.c.bf16 %v1867_v55, %v1863_v51  ;;  %7021 = vtanh.f32 %v2584_v33  ;;  %v2658_v27 = vmul.f32 0.5, %v6994_v22  ;;  %v2661_v48 = vmul.f32 0.5, %v6996_v63  ;;  %v9914_v22 = vpop.permute.xlu1 %2870 }
 0x3a1   : > { %v9890_v37 = vpack.c.bf16 %v1869_v54, %v1865_v16  ;;  %v9894_v15 = vadd.f32 %v2382_v26, %v13041_v6  ;;  %v7000_v17 = vpop.eup %6999  ;;  %v2589_v54 = vmul.f32 0.5, %v9780_v56  ;;  %v2707_v6 = vadd.f32 0.5, %v2659_v43 }
 0x3a2   : > { %13039 = vst [vmem:[#allocation140_spill] sm:$0xff] %v9887_v7  ;;  %v7002_v28 = vpop.eup %7001  ;;  %7023 = vtanh.f32 %v2586_v47  ;;  %v2590_v12 = vmul.f32 0.5, %v9783_v19  ;;  %v13044_v33 = vunpack.c.h.bf16 %v9219_v46  ;;  %v2593_v19 = vmul.f32 0.5, %v9801_v32 }
 0x3a3   : > { %13040 = vst [vmem:[#allocation141_spill] sm:$0xff] %v9890_v37  ;;  %v2419_v35 = vpop.f32.mrb[144].mxu1  ;;  %v7004_v16 = vpop.eup %7003  ;;  %v2665_v63 = vmul.f32 0.5, %v7002_v28  ;;  %v9917_v46 = vadd.f32 0.5, %v2661_v48  ;;  %vm2915_vm0 = vcmp.eq.s32.totalorder %v9914_v22, 1 }
 0x3a4   : > { %v2500_v14 = vadd.f32 %v2419_v35, %v13042_v8  ;;  %v2421_v53 = vpop.f32.mrb[145].mxu1  ;;  %v7006_v26 = vpop.eup %7005  ;;  %v2662_v8 = vmul.f32 0.5, %v6998_v62  ;;  %v2667_v43 = vmul.f32 0.5, %v7004_v16  ;;  %v2595_v16 = vmul.f32 0.5, %v9808_v9 }
 0x3a5   : > { %v2501_v51 = vadd.f32 %v2421_v53, %v13043_v60  ;;  %v2423_v55 = vpop.f32.mrb[146].mxu1  ;;  %v7008_v35 = vpop.eup %7007  ;;  %v2592_v53 = vmul.f32 0.5, %v9796_v20  ;;  %v13045_v60 = vunpack.c.h.bf16 %v9225_v44  ;;  %v2668_v47 = vmul.f32 0.5, %v7006_v26 }
 0x3a6   : > { %v2425_v29 = vpop.f32.mrb[147].mxu1  ;;  %v2504_v56 = vadd.f32 %v2423_v55, %v13044_v33  ;;  %v7010_v59 = vpop.eup %7009  ;;  %v2564_v55 = vmul.f32 0.5, %v2500_v14  ;;  %v2770_v20 = vmul.f32 0.0, %v2707_v6  ;;  %v2710_v33 = vadd.f32 0.5, %v2662_v8 }
 0x3a7   : > { %7025 = vtanh.f32 %v2501_v51  ;;  %v2505_v57 = vadd.f32 %v2425_v29, %v13045_v60  ;;  %v7012_v62 = vpop.eup %7011  ;;  %v2706_v51 = vadd.f32 0.5, %v2658_v27  ;;  %v2664_v44 = vmul.f32 0.5, %v7000_v17  ;;  %v9928_v4 = vpop.permute.xlu1 %2873 }
 0x3a8   : > { %7027 = vtanh.f32 %v2587_v40  ;;  %v7014_v40 = vpop.eup %7013  ;;  %v2567_v28 = vmul.f32 0.5, %v2504_v56  ;;  %v2713_v48 = vadd.f32 0.5, %v2665_v63  ;;  %v2716_v10 = vadd.f32 0.5, %v2668_v47 }
 0x3a9   : > { %7029 = vtanh.f32 %v2589_v54  ;;  %v9919_v60 = vpop.eup %7015  ;;  %v13046_v54 = vunpack.c.l.bf16 %v9247_v34  ;;  %v13047_v14 = vunpack.c.l.bf16 %v9253_v42  ;;  %v2671_v8 = vmul.f32 0.5, %v7010_v59 }
 0x3aa   : > { %7031 = vtanh.f32 %v2505_v57  ;;  %v7018_v27 = vpop.eup %7017  ;;  %v13048_v63 = vunpack.c.h.bf16 %v9247_v34  ;;  %v2598_v59 = vmul.f32 0.5, %v9838_v31  ;;  %v2674_v61 = vmul.f32 0.5, %v7014_v40 }
 0x3ab   : > { %7033 = vtanh.f32 %v2590_v12  ;;  %v2429_v29 = vpop.f32.mrb[148].mxu1  ;;  %v9925_v17 = vpop.eup %7019  ;;  %v2670_v12 = vmul.f32 0.5, %v7008_v35  ;;  %v2712_v35 = vadd.f32 0.5, %v2664_v44  ;;  %v9940_v34 = vmul.f32 0.0, %v2716_v10 }
 0x3ac   : > { %7035 = vtanh.f32 %v2592_v53  ;;  %v2508_v32 = vadd.f32 %v2429_v29, %v13046_v54  ;;  %v2431_v26 = vpop.f32.mrb[149].mxu1  ;;  %v7022_v53 = vpop.eup %7021  ;;  %v2596_v29 = vmul.f32 0.5, %v9813_v38  ;;  %v2719_v44 = vadd.f32 0.5, %v2671_v8 }
 0x3ad   : > { %7037 = vtanh.f32 %v2593_v19  ;;  %v2509_v57 = vadd.f32 %v2431_v26, %v13047_v14  ;;  %v2433_v6 = vpop.f32.mrb[150].mxu1  ;;  %v13049_v19 = vunpack.c.h.bf16 %v9253_v42  ;;  %v7024_v26 = vpop.eup %7023  ;;  %v2771_v14 = vmul.f32 0.0, %v2710_v33 }
 0x3ae   : > { %7039 = vtanh.f32 %v2564_v55  ;;  %v2435_v56 = vpop.f32.mrb[151].mxu1  ;;  %v2512_v47 = vadd.f32 %v2433_v6, %v13048_v63  ;;  %v9936_v55 = vadd.f32 0.5, %v2667_v43  ;;  %v2570_v11 = vmul.f32 0.5, %v2508_v32 }
 0x3af   : > { %7041 = vtanh.f32 %v2509_v57  ;;  %v2513_v54 = vadd.f32 %v2435_v56, %v13049_v19  ;;  %v2772_v57 = vmul.f32 0.0, %v2713_v48  ;;  %v9944_v33 = vadd.f32 0.5, %v2670_v12 }
 0x3b0   : > { %7043 = vtanh.f32 %v2567_v28  ;;  %v2673_v31 = vmul.f32 0.5, %v7012_v62  ;;  %v2573_v32 = vmul.f32 0.5, %v2512_v47  ;;  %v13050_v56 = vunpack.c.l.bf16 %v9272_v41 }
 0x3b1   : > { %v7026_v9 = vpop.eup %7025  ;;  %7045 = vtanh.f32 %v2513_v54  ;;  %v13051_v62 = vunpack.c.l.bf16 %v9278_v21  ;;  %v2680_v47 = vmul.f32 0.5, %v7022_v53  ;;  %v2599_v54 = vmul.f32 0.5, %v9840_v36 }
 0x3b2   : > { %v9938_v38 = vpop.eup %7027  ;;  %7047 = vtanh.f32 %v2595_v16  ;;  %v2786_v42 = vmul.f32 %v7026_v9, %v2706_v51  ;;  %v9952_v51 = vpop.permute.xlu1 %2876  ;;  %v2722_v16 = vadd.f32 0.5, %v2674_v61  ;;  %v2601_v36 = vmul.f32 0.5, %v9846_v18 }
 0x3b3   : > { %v9942_v6 = vpop.eup %7029  ;;  %7049 = vtanh.f32 %v2596_v29  ;;  %v2439_v28 = vpop.f32.mrb[152].mxu1  ;;  %v2682_v18 = vmul.f32 0.5, %v7024_v26  ;;  %vm2916_vm2 = vcmp.eq.s32.totalorder %v9928_v4, 1  ;;  %vm2917_vm3 = vcmp.eq.s32.totalorder %v9952_v51, 1 }
 0x3b4   : > { %v7032_v43 = vpop.eup %7031  ;;  %7051 = vtanh.f32 %v2598_v59  ;;  %v9946_v40 = vadd.f32 %v2786_v42, %v2770_v20  ;;  %v2516_v48 = vadd.f32 %v2439_v28, %v13050_v56  ;;  %v2441_v10 = vpop.f32.mrb[153].mxu1  ;;  %v2677_v20 = vmul.f32 0.5, %v7018_v27  ;;  %vm6472_vm7 = vmpackc.low %vm2917_vm3, %vm2916_vm2 }
 0x3b5   : > { %v9950_v63 = vpop.eup %7033  ;;  %v2787_v12 = vmul.f32 %v7032_v43, %v9917_v46  ;;  %7053 = vtanh.f32 %v2570_v11  ;;  %v2517_v8 = vadd.f32 %v2441_v10, %v13051_v62  ;;  %v2443_v29 = vpop.f32.mrb[154].mxu1  ;;  %v13052_v11 = vunpack.c.h.bf16 %v9272_v41 }
 0x3b6   : > { %v9957_v19 = vpop.eup %7035  ;;  %7055 = vtanh.f32 %v9946_v40  ;;  %v2445_v59 = vpop.f32.mrb[155].mxu1  ;;  %v13053_v46 = vunpack.c.h.bf16 %v9278_v21  ;;  %v9969_v56 = vmul.f32 0.0, %v2719_v44  ;;  %v9971_v27 = vadd.f32 0.5, %v2673_v31 }
 0x3b7   : > { %v9961_v9 = vpop.eup %7037  ;;  %v9963_v42 = vadd.f32 %v2787_v12, %v2771_v14  ;;  %7057 = vtanh.f32 %v2517_v8  ;;  %v2520_v61 = vadd.f32 %v2443_v29, %v13052_v11  ;;  %v9974_v10 = vmul.f32 0.0, %v2722_v16  ;;  %v9979_v31 = vpop.permute.xlu1 %2879 }
 0x3b8   : > { %v2521_v28 = vadd.f32 %v2445_v59, %v13053_v46  ;;  %v7040_v43 = vpop.eup %7039  ;;  %7059 = vtanh.f32 %v2573_v32  ;;  %v2676_v14 = vmul.f32 0.5, %v9919_v60  ;;  %v2576_v41 = vmul.f32 0.5, %v2516_v48 }
 0x3b9   : > { %v7042_v53 = vpop.eup %7041  ;;  %7061 = vtanh.f32 %v9963_v42  ;;  %v2725_v62 = vadd.f32 0.5, %v2677_v20  ;;  %v2679_v21 = vmul.f32 0.5, %v9925_v17  ;;  %v2728_v29 = vadd.f32 0.5, %v2680_v47 }
 0x3ba   : > { %v7044_v12 = vpop.eup %7043  ;;  %v2788_v8 = vmul.f32 %v7042_v53, %v2712_v35  ;;  %7063 = vtanh.f32 %v2521_v28  ;;  %v2660_v32 = vmul.f32 0.5, %v7040_v43  ;;  %v13054_v20 = vunpack.c.l.bf16 %v9295_v1 }
 0x3bb   : > { %v7046_v44 = vpop.eup %7045  ;;  %7065 = vtanh.f32 %v2599_v54  ;;  %v2449_v16 = vpop.f32.mrb[156].mxu1  ;;  %v2683_v46 = vmul.f32 0.5, %v9938_v38  ;;  %v2579_v26 = vmul.f32 0.5, %v2520_v61  ;;  %v13055_v47 = vunpack.c.l.bf16 %v9301_v3 }
 0x3bc   : > { %v9981_v59 = vpop.eup %7047  ;;  %7067 = vtanh.f32 %v2601_v36  ;;  %v9983_v60 = vadd.f32 %v2788_v8, %v2772_v57  ;;  %v2789_v48 = vmul.f32 %v7046_v44, %v9936_v55  ;;  %v2524_v17 = vadd.f32 %v2449_v16, %v13054_v20  ;;  %v2451_v35 = vpop.f32.mrb[157].mxu1 }
 0x3bd   : > { %v9988_v11 = vpop.eup %7049  ;;  %7069 = vtanh.f32 %v2576_v41  ;;  %v2525_v54 = vadd.f32 %v2451_v35, %v13055_v47  ;;  %v2453_v28 = vpop.f32.mrb[158].mxu1  ;;  %v2602_v57 = vmul.f32 0.5, %v9855_v50  ;;  %v2663_v36 = vmul.f32 0.5, %v7044_v12 }
 0x3be   : > { %v9993_v43 = vpop.eup %7051  ;;  %7071 = vtanh.f32 %v9983_v60  ;;  %v9998_v55 = vadd.f32 %v2789_v48, %v9940_v34  ;;  %v2455_v53 = vpop.f32.mrb[159].mxu1  ;;  %v2708_v38 = vadd.f32 0.5, %v2660_v32  ;;  %v13056_v61 = vunpack.c.h.bf16 %v9295_v1 }
 0x3bf   : > { %v7054_v8 = vpop.eup %7053  ;;  %v10000_v44 = vpop.permute.xlu0 %2867  ;;  %7073 = vtanh.f32 %v2525_v54  ;;  %v13057_v16 = vunpack.c.h.bf16 %v9301_v3  ;;  %v2724_v50 = vadd.f32 0.5, %v2676_v14  ;;  %v10007_v12 = vmul.f32 0.0, %v2725_v62 }
 0x3c0   : > { %v2528_v41 = vadd.f32 %v2453_v28, %v13056_v61  ;;  %v7056_v35 = vpop.eup %7055  ;;  %v10009_v34 = vadd.f32 0.5, %v2679_v21  ;;  %vm2914_vm1 = vcmp.eq.s32.totalorder %v10000_v44, 1  ;;  %7075 = vtanh.f32 %v9998_v55  ;;  %v10013_v48 = vpop.permute.xlu1 %2882 }
 0x3c1   : > { %v2529_v20 = vadd.f32 %v2455_v53, %v13057_v16  ;;  %v7058_v32 = vpop.eup %7057  ;;  %v10015_v1 = vmul.f32 0.0, %v2728_v29  ;;  %7077 = vtanh.f32 %v2579_v26  ;;  %v2582_v3 = vmul.f32 0.5, %v2524_v17  ;;  %vm6469_vm4 = vmpackc.low %vm2915_vm0, %vm2914_vm1 }
 0x3c2   : > { %v10017_v47 = vmul.f32 %v7056_v35, %v2708_v38  ;;  %v7060_v54 = vpop.eup %7059  ;;  %v2711_v28 = vadd.f32 0.5, %v2663_v36  ;;  %v2666_v14 = vmul.f32 0.5, %v7054_v8  ;;  %v2790_v62 = vmul.f32 %v7058_v32, %v9944_v33 }
 0x3c3   : > { %7079 = vtanh.f32 %v2529_v20  ;;  %v7062_v21 = vpop.eup %7061  ;;  %v10020_v53 = vadd.f32 0.5, %v2682_v18  ;;  %v2731_v61 = vadd.f32 0.5, %v2683_v46  ;;  %v10023_v16 = vmul.f32 0.5, %v9942_v6  ;;  %v2459_v29 = vpop.f32.mrb[160].mxu1 }
 0x3c4   : > { %7081 = vtanh.f32 %v2602_v57  ;;  %v7064_v37 = vpop.eup %7063  ;;  %v10026_v17 = vadd.f32 %v2790_v62, %v9969_v56  ;;  %v2585_v26 = vmul.f32 0.5, %v2528_v41  ;;  %v13058_v36 = vunpack.c.l.bf16 %v9320_v23  ;;  %v2461_v38 = vpop.f32.mrb[161].mxu1 }
 0x3c5   : > { %v10030_v33 = vmul.f32 %v7062_v21, %v2711_v28  ;;  %v10032_v20 = vpop.eup %7065  ;;  %v2669_v18 = vmul.f32 0.5, %v7060_v54  ;;  %v2791_v46 = vmul.f32 %v7064_v37, %v9971_v27  ;;  %7083 = vtanh.f32 %v2582_v3  ;;  %v2463_v35 = vpop.f32.mrb[162].mxu1 }
 0x3c6   : > { %v2532_v8 = vadd.f32 %v2459_v29, %v13058_v36  ;;  %v13059_v6 = vunpack.c.l.bf16 %v9326_v13  ;;  %v10037_v32 = vpop.eup %7067  ;;  %v2686_v56 = vmul.f32 0.5, %v9950_v63  ;;  %v2604_v41 = vmul.f32 0.5, %v9866_v25  ;;  %v2465_v28 = vpop.f32.mrb[163].mxu1 }
 0x3c7   : > { %v2714_v62 = vadd.f32 0.5, %v2666_v14  ;;  %7085 = vtanh.f32 %v10026_v17  ;;  %v7070_v21 = vpop.eup %7069  ;;  %v10042_v29 = vpop.permute.xlu1 %2885  ;;  %v10045_v37 = vadd.f32 %v2791_v46, %v9974_v10  ;;  %v13060_v27 = vunpack.c.h.bf16 %v9320_v23 }
 0x3c8   : > { %v2533_v57 = vadd.f32 %v2461_v38, %v13059_v6  ;;  %v13061_v54 = vunpack.c.h.bf16 %v9326_v13  ;;  %v7072_v63 = vpop.eup %7071  ;;  %v10053_v25 = vmul.f32 0.0, %v2731_v61  ;;  %v2588_v14 = vmul.f32 0.5, %v2532_v8 }
 0x3c9   : > { %v2536_v3 = vadd.f32 %v2463_v35, %v13060_v27  ;;  %v6470_v10 = vpack.c.bf16 %v10030_v33, %v10017_v47  ;;  %v7074_v38 = vpop.eup %7073  ;;  %v2605_v23 = vmul.f32 0.5, %v9870_v5  ;;  %v2717_v13 = vadd.f32 0.5, %v2669_v18 }
 0x3ca   : > { %7087 = vtanh.f32 %v2533_v57  ;;  %v2537_v36 = vadd.f32 %v2465_v28, %v13061_v54  ;;  %v10063_v46 = vmul.f32 %v7072_v63, %v2714_v62  ;;  %v7076_v61 = vpop.eup %7075  ;;  %v2734_v6 = vadd.f32 0.5, %v2686_v56  ;;  %v7653_v54 = vld [vmem:[%s8799_s20 + $0x8] ss:$16 sps:$4 sm:$0xff]  }
 0x3cb   : > { %7089 = vtanh.f32 %v2585_v26  ;;  %v2672_v26 = vmul.f32 0.5, %v7070_v21  ;;  %v2792_v8 = vmul.f32 %v7074_v38, %v2724_v50  ;;  %6471 = vmatmul.mubr.msk.bf16.vlgmr.msra.gmra.mrb[144].mxu0 %vm6469_vm4, %v6470_v10  ;;  %6495 = vmatmul.mubr.msk.bf16.vlgmr.msra.gmra.mrb[176].mxu1 %vm6469_vm4, %v6470_v10  ;;  %v7078_v57 = vpop.eup %7077  ;;  %v2689_v35 = vmul.f32 0.5, %v9961_v9  ;;  %v2469_v5 = vpop.f32.mrb[164].mxu1 }
 0x3cc   : > { %7091 = vtanh.f32 %v10045_v37  ;;  %v10067_v28 = vmul.f32 0.5, %v9988_v11  ;;  %v13062_v18 = vmov 0   ;;  %v10071_v56 = vmul.f32 %v7076_v61, %v2717_v13  ;;  %v2471_v27 = vpop.f32.mrb[165].mxu1  ;;  %3894 = vmatpush1.bf16.msra.mxu1 %v7653_v54  ;;  %v10082_v63 = vpop.permute.xlu1 %2888  ;;  %v7654_v13 = vld [vmem:[%s8799_s20 + $0x24] ss:$16 sps:$4 sm:$0xff]  }
 0x3cd   : > { %7093 = vtanh.f32 %v2537_v36  ;;  %3076 = vmatprep.mubr.bf16.mxu0 %v13062_v18  ;;  %3189 = vmatprep.mubr.bf16.mxu1 %v13062_v18  ;;  %v7080_v50 = vpop.eup %7079  ;;  %v10074_v62 = vadd.f32 %v2792_v8, %v10007_v12  ;;  %v2591_v21 = vmul.f32 0.5, %v2536_v3  ;;  %v13063_v9 = vunpack.c.l.bf16 %v9344_v39  ;;  %v2473_v3 = vpop.f32.mrb[166].mxu1  ;;  %v7655_v61 = vld [vmem:[%s8799_s20 + $0x2c] ss:$16 sps:$4 sm:$0xff]  }
 0x3ce   : > { %7095 = vtanh.f32 %v2604_v41  ;;  %v7652_v41 = vld [vmem:[%s8799_s20] ss:$16 sps:$4 sm:$0xff]   ;;  %v10080_v36 = vpop.eup %7081  ;;  %v2793_v12 = vmul.f32 %v7080_v50, %v10009_v34  ;;  %v13064_v10 = vunpack.c.l.bf16 %v9349_v58  ;;  %v6473_v38 = vpack.c.bf16 %v10071_v56, %v10063_v46  ;;  %3895 = vmatprep.subr.bf16.mxu1 %v7655_v61 }
 0x3cf   : > { %7097 = vtanh.f32 %v2588_v14  ;;  %v2540_v11 = vadd.f32 %v2469_v5, %v13063_v9  ;;  %3781 = vmatpush1.bf16.msra.mxu0 %v7652_v41  ;;  %vm2918_vm5 = vcmp.eq.s32.totalorder %v9979_v31, 1  ;;  %vm2919_vm6 = vcmp.eq.s32.totalorder %v10013_v48, 1  ;;  %v2475_v5 = vpop.f32.mrb[167].mxu1  ;;  %v7084_v50 = vpop.eup %7083  ;;  %v7656_v61 = vld [vmem:[%s8799_s20 + $0x20] ss:$16 sps:$4 sm:$0xff]  }
 0x3d0   : > { %7099 = vtanh.f32 %v2605_v23  ;;  %v2541_v14 = vadd.f32 %v2471_v27, %v13064_v10  ;;  %3782 = vmatprep.subr.bf16.mxu0 %v7654_v13  ;;  %v2608_v23 = vmul.f32 0.5, %v9894_v15  ;;  %v2720_v8 = vadd.f32 0.5, %v2672_v26  ;;  %vm10163_vm10 = vmpackc.low %vm2919_vm6, %vm2918_vm5 }
 0x3d1   : > { %v2675_v34 = vmul.f32 0.5, %v7078_v57  ;;  %7101 = vtanh.f32 %v10074_v62  ;;  %v10096_v9 = vadd.f32 %v2793_v12, %v10015_v1  ;;  %v13065_v27 = vunpack.c.h.bf16 %v9344_v39  ;;  %v7086_v13 = vpop.eup %7085  ;;  %v7657_v1 = vld [vmem:[%s8799_s20 + $0x28] ss:$16 sps:$4 sm:$0xff]  }
 0x3d2   : > { %7103 = vtanh.f32 %v2541_v14  ;;  %v13066_v54 = vunpack.c.h.bf16 %v9349_v58  ;;  %v2733_v15 = vadd.f32 0.5, %v10023_v16  ;;  %v2779_v26 = vmul.f32 0.0, %v2734_v6  ;;  %3896 = vmatpush1.bf16.msra.mxu1 %v7657_v1  ;;  %v7658_v6 = vld [vmem:[%s8799_s20 + $0x44] ss:$16 sps:$4 sm:$0xff]  }
 0x3d3   : > { %v2544_v41 = vadd.f32 %v2473_v3, %v13065_v27  ;;  %v10104_v57 = vmul.f32 0.5, %v9957_v19  ;;  %7105 = vtanh.f32 %v2591_v21  ;;  %3783 = vmatpush1.bf16.msra.mxu0 %v7656_v61  ;;  %v2737_v39 = vadd.f32 0.5, %v2689_v35  ;;  %v7659_v19 = vld [vmem:[%s8799_s20 + $0x4c] ss:$16 sps:$4 sm:$0xff]   ;;  %6498 = vmatmul.mubr.msk.bf16.gmra.mrb[180].mxu1 %vm6472_vm7, %v6473_v38  ;;  %v10118_v35 = vpop.permute.xlu1 %2891 }
 0x3d4   : > { %v2545_v10 = vadd.f32 %v2475_v5, %v13066_v54  ;;  %v7088_v12 = vpop.eup %7087  ;;  %7107 = vtanh.f32 %v10096_v9  ;;  %v2594_v58 = vmul.f32 0.5, %v2540_v11  ;;  %v10113_v16 = vmul.f32 %v7086_v13, %v2720_v8  ;;  %3784 = vmatprep.subr.bf16.mxu0 %v7658_v6  ;;  %3897 = vmatprep.subr.bf16.mxu1 %v7659_v19  ;;  %v2479_v13 = vpop.f32.mrb[168].mxu1  ;;  %v7662_v19 = vld [vmem:[%s8799_s20 + $0x64] ss:$16 sps:$4 sm:$0xff]  }
 0x3d5   : > { %v7090_v21 = vpop.eup %7089  ;;  %v2723_v14 = vadd.f32 0.5, %v2675_v34  ;;  %v2678_v3 = vmul.f32 0.5, %v7084_v50  ;;  %v2794_v5 = vmul.f32 %v7088_v12, %v10020_v53  ;;  %6474 = vmatmul.mubr.msk.bf16.gmra.mrb[148].mxu0 %vm6472_vm7, %v6473_v38  ;;  %v2691_v11 = vmul.f32 0.5, %v9981_v59  ;;  %3199 = vmatprep.mubr.bf16.mxu1 %v13062_v18 }
 0x3d6   : > { %7109 = vtanh.f32 %v2545_v10  ;;  %v7092_v27 = vpop.eup %7091  ;;  %v2740_v8 = vadd.f32 0.5, %v10067_v28  ;;  %v2607_v54 = vmul.f32 0.5, %v9881_v24  ;;  %3086 = vmatprep.mubr.bf16.mxu0 %v13062_v18  ;;  %v2597_v34 = vmul.f32 0.5, %v2544_v41  ;;  %v2481_v10 = vpop.f32.mrb[169].mxu1  ;;  %v7660_v24 = vld [vmem:[%s8799_s20 + $0x40] ss:$16 sps:$4 sm:$0xff]  }
 0x3d7   : > { %7111 = vtanh.f32 %v2608_v23  ;;  %v7094_v53 = vpop.eup %7093  ;;  %v10126_v38 = vadd.f32 %v2794_v5, %v10053_v25  ;;  %v13067_v50 = vunpack.c.l.bf16 %v9370_v52  ;;  %v10130_v28 = vmul.f32 %v7092_v27, %v2723_v14  ;;  %3785 = vmatpush1.bf16.msra.mxu0 %v7660_v24  ;;  %v7661_v23 = vld [vmem:[%s8799_s20 + $0x48] ss:$16 sps:$4 sm:$0xff]   ;;  %v2483_v6 = vpop.f32.mrb[170].mxu1  ;;  %v7663_v5 = vld [vmem:[%s8799_s20 + $0x6c] ss:$16 sps:$4 sm:$0xff]  }
 0x3d8   : > { %3898 = vmatpush1.bf16.msra.mxu1 %v7661_v23  ;;  %v10134_v61 = vpop.eup %7095  ;;  %v2695_v1 = vmul.f32 0.5, %v10032_v20  ;;  %v2795_v12 = vmul.f32 %v7094_v53, %v2733_v15  ;;  %7113 = vtanh.f32 %v2594_v58  ;;  %v13068_v25 = vunpack.c.l.bf16 %v9375_v0  ;;  %3786 = vmatprep.subr.bf16.mxu0 %v7662_v19  ;;  %v2485_v58 = vpop.f32.mrb[171].mxu1  ;;  %v7665_v19 = vld [vmem:[%s8799_s20 + $0x68] ss:$16 sps:$4 sm:$0xff]  }
 0x3d9   : > { %v2548_v59 = vadd.f32 %v2479_v13, %v13067_v50  ;;  %3899 = vmatprep.subr.bf16.mxu1 %v7663_v5  ;;  %v7098_v14 = vpop.eup %7097  ;;  %vm2920_vm8 = vcmp.eq.s32.totalorder %v10042_v29, 1  ;;  %vm2921_vm9 = vcmp.eq.s32.totalorder %v10082_v63, 1  ;;  %v2726_v27 = vadd.f32 0.5, %v2678_v3 }
 0x3da   : > { %v2549_v41 = vadd.f32 %v2481_v10, %v13068_v25  ;;  %v2681_v13 = vmul.f32 0.5, %v7090_v21  ;;  %7115 = vtanh.f32 %v10126_v38  ;;  %v13069_v20 = vunpack.c.h.bf16 %v9370_v52  ;;  %v10148_v53 = vpop.eup %7099  ;;  %vm6478_vm12 = vmpackc.low %vm2921_vm9, %vm2920_vm8 }
 0x3db   : > { %v10150_v50 = vadd.f32 %v2795_v12, %v2779_v26  ;;  %v13070_v10 = vunpack.c.h.bf16 %v9375_v0  ;;  %v6476_v3 = vpack.c.bf16 %v10130_v28, %v10113_v16  ;;  %v7102_v21 = vpop.eup %7101  ;;  %v2736_v23 = vadd.f32 0.5, %v10104_v57  ;;  %v10167_v12 = vpop.permute.xlu1 %2894 }
 0x3dc   : > { %v10146_v15 = vadd.f32 %v2483_v6, %v13069_v20  ;;  %7117 = vtanh.f32 %v2549_v41  ;;  %v2780_v25 = vmul.f32 0.0, %v2737_v39  ;;  %v2739_v52 = vadd.f32 0.5, %v2691_v11  ;;  %v7664_v6 = vld [vmem:[%s8799_s20 + $0x60] ss:$16 sps:$4 sm:$0xff]   ;;  %3900 = vmatpush1.bf16.msra.mxu1 %v7665_v19  ;;  %v7104_v26 = vpop.eup %7103  ;;  %v7667_v41 = vld [vmem:[%s8799_s20 + $0x8c] ss:$16 sps:$4 sm:$0xff]  }
 0x3dd   : > { %v2553_v24 = vadd.f32 %v2485_v58, %v13070_v10  ;;  %7119 = vtanh.f32 %v2597_v34  ;;  %3787 = vmatpush1.bf16.msra.mxu0 %v7664_v6  ;;  %v2684_v57 = vmul.f32 0.5, %v7098_v14  ;;  %v2600_v39 = vmul.f32 0.5, %v2548_v59  ;;  %v7666_v34 = vld [vmem:[%s8799_s20 + $0x84] ss:$16 sps:$4 sm:$0xff]   ;;  %3901 = vmatprep.subr.bf16.mxu1 %v7667_v41  ;;  %v7106_v5 = vpop.eup %7105  ;;  %v2489_v6 = vpop.f32.mrb[172].mxu1 }
 0x3de   : > { %7121 = vtanh.f32 %v10150_v50  ;;  %v10170_v11 = vmul.f32 %v7102_v21, %v2726_v27  ;;  %3788 = vmatprep.subr.bf16.mxu0 %v7666_v34  ;;  %v2781_v20 = vmul.f32 0.0, %v2740_v8  ;;  %v2729_v58 = vadd.f32 0.5, %v2681_v13  ;;  %6477 = vmatmul.mubr.msk.bf16.gmra.mrb[152].mxu0 %vm10163_vm10, %v6476_v3  ;;  %v7108_v14 = vpop.eup %7107  ;;  %v7670_v41 = vld [vmem:[%s8799_s20 + $0xa4] ss:$16 sps:$4 sm:$0xff]  }
 0x3df   : > { %7123 = vtanh.f32 %v2607_v54  ;;  %v2796_v10 = vmul.f32 %v7104_v26, %v2736_v23  ;;  %6501 = vmatmul.mubr.msk.bf16.gmra.mrb[184].mxu1 %vm10163_vm10, %v6476_v3  ;;  %v2694_v59 = vmul.f32 0.5, %v9993_v43  ;;  %v2743_v27 = vadd.f32 0.5, %v2695_v1  ;;  %3096 = vmatprep.mubr.bf16.mxu0 %v13062_v18  ;;  %v2491_v43 = vpop.f32.mrb[173].mxu1 }
 0x3e0   : > { %v2697_v21 = vmul.f32 0.5, %v10037_v32  ;;  %7125 = vtanh.f32 %v2553_v24  ;;  %3209 = vmatprep.mubr.bf16.mxu1 %v13062_v18  ;;  %v7110_v8 = vpop.eup %7109  ;;  %v2698_v54 = vmul.f32 0.5, %v10080_v36  ;;  %v13073_v3 = vunpack.c.l.bf16 %v9396_v2  ;;  %v7668_v32 = vld [vmem:[%s8799_s20 + $0x80] ss:$16 sps:$4 sm:$0xff]   ;;  %v7669_v24 = vld [vmem:[%s8799_s20 + $0x88] ss:$16 sps:$4 sm:$0xff]  }
 0x3e1   : > { %v10183_v13 = vadd.f32 %v2796_v10, %v2780_v25  ;;  %v10187_v1 = vmul.f32 %v7108_v14, %v2729_v58  ;;  %3789 = vmatpush1.bf16.msra.mxu0 %v7668_v32  ;;  %3902 = vmatpush1.bf16.msra.mxu1 %v7669_v24  ;;  %v10191_v19 = vpop.eup %7111  ;;  %v2732_v26 = vadd.f32 0.5, %v2684_v57  ;;  %v2797_v0 = vmul.f32 %v7110_v8, %v2739_v52  ;;  %v2493_v34 = vpop.f32.mrb[174].mxu1  ;;  %v7671_v10 = vld [vmem:[%s8799_s20 + $0xac] ss:$16 sps:$4 sm:$0xff]  }
 0x3e2   : > { %v2556_v23 = vadd.f32 %v2489_v6, %v13073_v3  ;;  %7127 = vtanh.f32 %v2600_v39  ;;  %v13074_v36 = vunpack.c.l.bf16 %v9401_v45  ;;  %3790 = vmatprep.subr.bf16.mxu0 %v7670_v41  ;;  %3903 = vmatprep.subr.bf16.mxu1 %v7671_v10  ;;  %v2687_v58 = vmul.f32 0.5, %v7106_v5  ;;  %v2495_v52 = vpop.f32.mrb[175].mxu1  ;;  %v7114_v39 = vpop.eup %7113  ;;  %v7674_v41 = vld [vmem:[%s8799_s20 + $0xc4] ss:$16 sps:$4 sm:$0xff]  }
 0x3e3   : > { %7129 = vtanh.f32 %v10183_v13  ;;  %v2603_v14 = vmul.f32 0.5, %v10146_v15  ;;  %v13075_v6 = vunpack.c.h.bf16 %v9396_v2  ;;  %v10201_v8 = vpop.permute.xlu1 %2897  ;;  %v10203_v3 = vadd.f32 %v2797_v0, %v2781_v20 }
 0x3e4   : > { %v2557_v25 = vadd.f32 %v2491_v43, %v13074_v36  ;;  %v13076_v43 = vunpack.c.h.bf16 %v9401_v45  ;;  %v6479_v5 = vpack.c.bf16 %v10187_v1, %v10170_v11  ;;  %v7116_v24 = vpop.eup %7115  ;;  %vm2922_vm11 = vcmp.eq.s32.totalorder %v10118_v35, 1  ;;  %v7672_v36 = vld [vmem:[%s8799_s20 + $0xa0] ss:$16 sps:$4 sm:$0xff]  }
 0x3e5   : > { %v2560_v57 = vadd.f32 %v2493_v34, %v13075_v6  ;;  %v2742_v2 = vadd.f32 0.5, %v2694_v59  ;;  %v2746_v15 = vadd.f32 0.5, %v2698_v54  ;;  %3791 = vmatpush1.bf16.msra.mxu0 %v7672_v36  ;;  %v7673_v34 = vld [vmem:[%s8799_s20 + $0xa8] ss:$16 sps:$4 sm:$0xff]   ;;  %v2701_v45 = vmul.f32 0.5, %v10148_v53 }
 0x3e6   : > { %7131 = vtanh.f32 %v2557_v25  ;;  %v2561_v32 = vadd.f32 %v2495_v52, %v13076_v43  ;;  %3904 = vmatpush1.bf16.msra.mxu1 %v7673_v34  ;;  %v7118_v20 = vpop.eup %7117  ;;  %v2606_v0 = vmul.f32 0.5, %v2556_v23  ;;  %v10218_v25 = vmul.f32 %v7116_v24, %v2732_v26  ;;  %3792 = vmatprep.subr.bf16.mxu0 %v7674_v41  ;;  %v7675_v59 = vld [vmem:[%s8799_s20 + $0xcc] ss:$16 sps:$4 sm:$0xff]   ;;  %v7678_v34 = vld [vmem:[%s8799_s20 + $0xe4] ss:$16 sps:$4 sm:$0xff]  }
 0x3e7   : > { %7133 = vtanh.f32 %v10203_v3  ;;  %3905 = vmatprep.subr.bf16.mxu1 %v7675_v59  ;;  %v7120_v54 = vpop.eup %7119  ;;  %v2782_v10 = vmul.f32 0.0, %v2743_v27  ;;  %v2735_v6 = vadd.f32 0.5, %v2687_v58  ;;  %v2798_v52 = vmul.f32 %v7118_v20, %v2742_v2  ;;  %6480 = vmatmul.mubr.msk.bf16.gmra.mrb[156].mxu0 %vm6478_vm12, %v6479_v5  ;;  %v7677_v2 = vld [vmem:[%s8799_s20 + $0xc8] ss:$16 sps:$4 sm:$0xff]  }
 0x3e8   : > { %7135 = vtanh.f32 %v2603_v14  ;;  %6504 = vmatmul.mubr.msk.bf16.gmra.mrb[188].mxu1 %vm6478_vm12, %v6479_v5  ;;  %v7122_v43 = vpop.eup %7121  ;;  %vm2923_vm13 = vcmp.eq.s32.totalorder %v10167_v12, 1  ;;  %v2745_v53 = vadd.f32 0.5, %v2697_v21  ;;  %v2690_v23 = vmul.f32 0.5, %v7114_v39  ;;  %3106 = vmatprep.mubr.bf16.mxu0 %v13062_v18  ;;  %v7676_v5 = vld [vmem:[%s8799_s20 + $0xc0] ss:$16 sps:$4 sm:$0xff]   ;;  %v10232_v39 = vpop.permute.xlu1 %2900 }
 0x3e9   : > { %7137 = vtanh.f32 %v2561_v32  ;;  %3219 = vmatprep.mubr.bf16.mxu1 %v13062_v18  ;;  %v7124_v26 = vpop.eup %7123  ;;  %v2783_v27 = vmul.f32 0.0, %v2746_v15  ;;  %v2700_v58 = vmul.f32 0.5, %v10134_v61  ;;  %v10226_v14 = vadd.f32 %v2798_v52, %v2782_v10  ;;  %3793 = vmatpush1.bf16.msra.mxu0 %v7676_v5  ;;  %v7679_v61 = vld [vmem:[%s8799_s20 + $0xec] ss:$16 sps:$4 sm:$0xff]   ;;  %v7680_v52 = vld [vmem:[%s8799_s20 + $0xe0] ss:$16 sps:$4 sm:$0xff]   ;;  %vm6481_vm14 = vmpackc.low %vm2923_vm13, %vm2922_vm11 }
 0x3ea   : > { %v10228_v24 = vmul.f32 %v7122_v43, %v2735_v6  ;;  %3906 = vmatpush1.bf16.msra.mxu1 %v7677_v2  ;;  %v7126_v21 = vpop.eup %7125  ;;  %v2749_v32 = vadd.f32 0.5, %v2701_v45  ;;  %v2704_v36 = vmul.f32 0.5, %v10191_v19  ;;  %7139 = vtanh.f32 %v2606_v0  ;;  %3794 = vmatprep.subr.bf16.mxu0 %v7678_v34  ;;  %v7681_v43 = vld [vmem:[%s8799_s20 + $0xe8] ss:$16 sps:$4 sm:$0xff]   ;;  %v13155_v12 = vld [vmem:[#allocation58_spill] sm:$0xff] }
 0x3eb   : > { %v2609_v15 = vmul.f32 0.5, %v2560_v57  ;;  %3907 = vmatprep.subr.bf16.mxu1 %v7679_v61  ;;  %v2693_v20 = vmul.f32 0.5, %v7120_v54  ;;  %7141 = vtanh.f32 %v10226_v14  ;;  %v2799_v41 = vmul.f32 %v7126_v21, %v2745_v53 }
 0x3ec   : > { %v6482_v59 = vpack.c.bf16 %v10228_v24, %v10218_v25  ;;  %v7128_v10 = vpop.eup %7127  ;;  %v2738_v45 = vadd.f32 0.5, %v2690_v23  ;;  %v2748_v0 = vadd.f32 0.5, %v2700_v58  ;;  %v2703_v6 = vmul.f32 0.5, %v7124_v26  ;;  %v7682_v23 = vld [vmem:[%s8799_s20 + $0x4] ss:$16 sps:$4 sm:$0xff]   ;;  %v10253_v34 = vpop.permute.xlu1 %2903 }
 0x3ed   : > { %v7130_v19 = vpop.eup %7129  ;;  %v10240_v57 = vadd.f32 %v2799_v41, %v2783_v27  ;;  %3795 = vmatpush1.bf16.msra.mxu0 %v7680_v52  ;;  %v2784_v53 = vmul.f32 0.0, %v2749_v32  ;;  %7143 = vtanh.f32 %v2609_v15  ;;  %v7683_v58 = vld [vmem:[%s8799_s20 + $0xc] ss:$16 sps:$4 sm:$0xff]   ;;  %v2752_v26 = vadd.f32 0.5, %v2704_v36  ;;  %13078 = vst [vmem:[#allocation143_spill] sm:$0xff] %v10253_v34 }
 0x3ee   : > { %3908 = vmatpush1.bf16.msra.mxu1 %v7681_v43  ;;  %v10248_v5 = vmul.f32 %v7130_v19, %v2738_v45  ;;  %4526 = vmatprep.subr.bf16.mxu0 %v7682_v23  ;;  %v2741_v27 = vadd.f32 0.5, %v2693_v20  ;;  %v2696_v61 = vmul.f32 0.5, %v7128_v10  ;;  %v2751_v15 = vadd.f32 0.5, %v2703_v6 }
 0x3ef   : > { %4639 = vmatprep.subr.bf16.mxu1 %v7683_v58  ;;  %7145 = vtanh.f32 %v10240_v57  ;;  %6483 = vmatmul.mubr.msk.bf16.gmra.mrb[160].mxu0 %vm6481_vm14, %v6482_v59  ;;  %vm2924_vm15 = vcmp.eq.s32.totalorder %v10201_v8, 1  ;;  %vm12767_vm4 = vcmp.eq.s32.totalorder %v10232_v39, 1  ;;  %v2785_v20 = vmul.f32 0.0, %v2752_v26 }
 0x3f0   : > { %v7132_v54 = vpop.eup %7131  ;;  %13077 = vst [vmem:[#allocation142_spill] sm:$0xff] %v10248_v5  ;;  %6507 = vmatmul.mubr.msk.bf16.gmra.mrb[192].mxu1 %vm6481_vm14, %v6482_v59  ;;  %3116 = vmatprep.mubr.bf16.mxu0 %v13062_v18  ;;  %vm6484_vm7 = vmpackc.low %vm12767_vm4, %vm2924_vm15  ;;  %vm2926_vm10 = vcmp.eq.s32.totalorder %v10253_v34, 1  ;;  %v10378_v49 = vsel %vm2914_vm1, %v9946_v40, 0.0  ;;  %v10435_v44 = vsel %vm2920_vm8, %v10074_v62, 0.0  ;;  %v10445_v22 = vsel %vm2917_vm3, %v10071_v56, 0.0 }
 0x3f1   : > { %v2800_v2 = vmul.f32 %v7132_v54, %v2748_v0  ;;  %v7134_v21 = vpop.eup %7133  ;;  %3229 = vmatprep.mubr.bf16.mxu1 %v13062_v18  ;;  %v2744_v0 = vadd.f32 0.5, %v2696_v61  ;;  %v10272_v54 = vpop.permute.xlu1 %2906  ;;  %v10460_v62 = vsel %vm2918_vm5, %v10113_v16, 0.0  ;;  %v10480_v48 = vsel %vm2924_vm15, %v10183_v13, 0.0 }
 0x3f2   : > { %v7136_v32 = vpop.eup %7135  ;;  %v10259_v45 = vmul.f32 %v7134_v21, %v2741_v27  ;;  %13082 = vst [vmem:[#allocation147_spill] sm:$0xff] %v10272_v54  ;;  %vm2927_vm12 = vcmp.eq.s32.totalorder %v10272_v54, 1  ;;  %v10518_v63 = vsel %vm2923_vm13, %v10228_v24, 0.0  ;;  %v13156_v24 = vunpack.c.l.bf16 %v13155_v12 }
 0x3f3   : > { %v10257_v41 = vadd.f32 %v2800_v2, %v2784_v53  ;;  %v7138_v36 = vpop.eup %7137  ;;  %v2699_v52 = vmul.f32 0.5, %v7136_v32  ;;  %vm6487_vm14 = vmpackc.low %vm2927_vm12, %vm2926_vm10  ;;  %13150 = vst [vmem:[#allocation159_spill] sm:$0xff] %v10518_v63 }
 0x3f4   : > { %13080 = vst [vmem:[#allocation145_spill] sm:$0xff] %v10259_v45  ;;  %v2801_v59 = vmul.f32 %v7138_v36, %v2751_v15  ;;  %v6485_v10 = vpack.c.bf16 %v10259_v45, %v10248_v5  ;;  %v7140_v19 = vpop.eup %7139 }
 0x3f5   : > { %13079 = vst [vmem:[#allocation144_spill] sm:$0xff] %v10257_v41  ;;  %7147 = vtanh.f32 %v10257_v41  ;;  %v7142_v6 = vpop.eup %7141  ;;  %v2747_v58 = vadd.f32 0.5, %v2699_v52  ;;  %v2702_v26 = vmul.f32 0.5, %v7140_v19  ;;  %v10283_v21 = vpop.permute.xlu1 %2909 }
 0x3f6   : > { %v10266_v43 = vadd.f32 %v2801_v59, %v2785_v20  ;;  %v10274_v53 = vmul.f32 %v7142_v6, %v2744_v0  ;;  %13085 = vst [vmem:[#allocation150_spill] sm:$0xff] %v10283_v21  ;;  %v13089_v6 = vld [vmem:[#allocation54_spill] sm:$0xff] }
 0x3f7   : > { %6486 = vmatmul.mubr.msk.bf16.gmra.mrb[164].mxu0 %vm6484_vm7, %v6485_v10  ;;  %v7144_v23 = vpop.eup %7143  ;;  %v2750_v61 = vadd.f32 0.5, %v2702_v26  ;;  %v13090_v26 = vld [vmem:[#allocation55_spill] sm:$0xff]  ;;  %13122 = vst [vmem:[#allocation54_spill] sm:$0xff] %v10378_v49 }
 0x3f8   : > { %13081 = vst [vmem:[#allocation146_spill] sm:$0xff] %v10266_v43  ;;  %13083 = vst [vmem:[#allocation148_spill] sm:$0xff] %v10274_v53  ;;  %7149 = vtanh.f32 %v10266_v43  ;;  %6510 = vmatmul.mubr.msk.bf16.gmra.mrb[196].mxu1 %vm6484_vm7, %v6485_v10  ;;  %3126 = vmatprep.mubr.bf16.mxu0 %v13062_v18  ;;  %v2705_v32 = vmul.f32 0.5, %v7144_v23  ;;  %vm12833_vm7 = vcmp.eq.s32.totalorder %v10283_v21, 1  ;;  %v13100_v43 = vld [vmem:[#allocation66_spill] sm:$0xff]  ;;  %v13102_v21 = vld [vmem:[#allocation68_spill] sm:$0xff]  ;;  %v13123_v23 = vunpack.c.l.bf16 %v13090_v26 }
 0x3f9   : > { %3239 = vmatprep.mubr.bf16.mxu1 %v13062_v18  ;;  %v7146_v27 = vpop.eup %7145  ;;  %v10295_v19 = vpop.permute.xlu1 %2912  ;;  %13134 = vst [vmem:[#allocation68_spill] sm:$0xff] %v10460_v62 }
 0x3fa   : > { %v10279_v2 = vmul.f32 %v7146_v27, %v2747_v58  ;;  %v2753_v59 = vadd.f32 0.5, %v2705_v32  ;;  %13087 = vst [vmem:[#allocation152_spill] sm:$0xff] %v10295_v19  ;;  %vm12832_vm4 = vcmp.eq.s32.totalorder %v10295_v19, 1  ;;  %v13091_v32 = vld [vmem:[#allocation56_spill] sm:$0xff]  ;;  %v13117_v19 = vld [vmem:[#allocation86_spill] sm:$0xff] }
 0x3fb   : > { %v13135_v51 = vunpack.c.l.bf16 %v13091_v32 }
 0x3fc   : > { %13084 = vst [vmem:[#allocation149_spill] sm:$0xff] %v10279_v2  ;;  %v6488_v15 = vpack.c.bf16 %v10279_v2, %v10274_v53  ;;  %v13096_v2 = vld [vmem:[#allocation62_spill] sm:$0xff] }
 0x3ff   : > { %v7148_v36 = vpop.eup %7147  ;;  %6489 = vmatmul.mubr.msk.bf16.gmra.mrb[168].mxu0 %vm6487_vm14, %v6488_v15 }
 0x400   : > { %v10291_v20 = vmul.f32 %v7148_v36, %v2750_v61  ;;  %6513 = vmatmul.mubr.msk.bf16.gmra.mrb[200].mxu1 %vm6487_vm14, %v6488_v15  ;;  %3136 = vmatprep.mubr.bf16.mxu0 %v13062_v18  ;;  %vm6490_vm14 = vmpackc.low %vm12832_vm4, %vm12833_vm7  ;;  %v2964_v15 = vunpack.c.l.bf16 %v13096_v2  ;;  %v13120_v61 = vunpack.c.l.bf16 %v13089_v6 }
 0x401   : > { %3249 = vmatprep.mubr.bf16.mxu1 %v13062_v18 }
 0x402   : > { %13086 = vst [vmem:[#allocation151_spill] sm:$0xff] %v10291_v20  ;;  %v7150_v10 = vpop.eup %7149 }
 0x403   : > { %v10297_v0 = vmul.f32 %v7150_v10, %v2753_v59  ;;  %v13092_v59 = vld [vmem:[#allocation57_spill] sm:$0xff] }
 0x404   : > { %v13138_v31 = vunpack.c.l.bf16 %v13092_v59 }
 0x405   : > { %13088 = vst [vmem:[#allocation153_spill] sm:$0xff] %v10297_v0  ;;  %v6491_v52 = vpack.c.bf16 %v10297_v0, %v10291_v20 }
 0x407   : > { %6492 = vmatmul.mubr.msk.bf16.gmra.mrb[172].mxu0 %vm6490_vm14, %v6491_v52 }
 0x408   : > { %6516 = vmatmul.mubr.msk.bf16.gmra.mrb[204].mxu1 %vm6490_vm14, %v6491_v52  ;;  %3812 = vmatprep.mubr.bf16.mxu0 %v13062_v18  ;;  %v13126_v52 = vunpack.c.h.bf16 %v13096_v2 }
 0x409   : > { %3925 = vmatprep.mubr.bf16.mxu1 %v13062_v18  ;;  %v13098_v18 = vld [vmem:[#allocation64_spill] sm:$0xff] }
 0x40a   : > { %v2965_v30 = vunpack.c.l.bf16 %v13098_v18 }
 0x49e   : > { %v3068_v7 = vpop.f32.mrb[144].mxu0  ;;  %v3181_v41 = vpop.f32.mrb[176].mxu1 }
 0x49f   : > { %v3260_v53 = vadd.f32 %v3068_v7, %v13120_v61  ;;  %v3262_v45 = vadd.f32 %v3181_v41, %v2964_v15  ;;  %v3070_v5 = vpop.f32.mrb[145].mxu0  ;;  %v3183_v36 = vpop.f32.mrb[177].mxu1  ;;  %v10385_v7 = vsel %vm2915_vm0, %v9963_v42, 0.0  ;;  %v13125_v61 = vunpack.c.h.bf16 %v13089_v6 }
 0x4a0   : > { %v3261_v58 = vadd.f32 %v3070_v5, %v13123_v23  ;;  %v3263_v54 = vadd.f32 %v3183_v36, %v2965_v30  ;;  %v3072_v27 = vpop.f32.mrb[146].mxu0  ;;  %v3185_v20 = vpop.f32.mrb[178].mxu1  ;;  %13124 = vst [vmem:[#allocation55_spill] sm:$0xff] %v10385_v7  ;;  %v10394_v30 = vsel %vm2916_vm2, %v9983_v60, 0.0  ;;  %v13128_v23 = vunpack.c.h.bf16 %v13090_v26 }
 0x4a1   : > { %v3324_v41 = vmul.f32 0.5, %v3260_v53  ;;  %v3264_v15 = vadd.f32 %v3072_v27, %v13125_v61  ;;  %v3266_v10 = vadd.f32 %v3185_v20, %v13126_v52  ;;  %v3074_v40 = vpop.f32.mrb[147].mxu0  ;;  %v3187_v0 = vpop.f32.mrb[179].mxu1  ;;  %13127 = vst [vmem:[#allocation56_spill] sm:$0xff] %v10394_v30  ;;  %v13129_v42 = vunpack.c.h.bf16 %v13098_v18 }
 0x4a2   : > { %v3325_v5 = vmul.f32 0.5, %v3261_v58  ;;  %v3265_v36 = vadd.f32 %v3074_v40, %v13128_v23  ;;  %v10403_v6 = vsel %vm2917_vm3, %v9998_v55, 0.0  ;;  %v10408_v20 = vsel %vm2918_vm5, %v10026_v17, 0.0 }
 0x4a3   : > { %v3267_v53 = vadd.f32 %v3187_v0, %v13129_v42  ;;  %13130 = vst [vmem:[#allocation57_spill] sm:$0xff] %v10403_v6  ;;  %7151 = vtanh.f32 %v3324_v41  ;;  %v3327_v2 = vmul.f32 0.5, %v3264_v15  ;;  %13131 = vst [vmem:[#allocation62_spill] sm:$0xff] %v10408_v20  ;;  %v10413_v60 = vsel %vm2914_vm1, %v10017_v47, 0.0  ;;  %v10430_v0 = vpop.permute.xlu1 %3613 }
 0x4a4   : > { %v3328_v58 = vmul.f32 0.5, %v3265_v36  ;;  %v10418_v18 = vsel %vm2919_vm6, %v10045_v37, 0.0  ;;  %v10423_v55 = vsel %vm2915_vm0, %v10030_v33, 0.0  ;;  %v10428_v17 = vsel %vm2916_vm2, %v10063_v46, 0.0 }
 0x4a5   : > { %13132 = vst [vmem:[#allocation64_spill] sm:$0xff] %v10418_v18  ;;  %7153 = vtanh.f32 %v3325_v5  ;;  %v10440_v47 = vsel %vm2921_vm9, %v10096_v9, 0.0  ;;  %v10450_v37 = vsel %vm2922_vm11, %v10126_v38, 0.0  ;;  %v10455_v46 = vsel %vm2923_vm13, %v10150_v50, 0.0 }
 0x4a6   : > { %7155 = vtanh.f32 %v3327_v2  ;;  %v3191_v33 = vpop.f32.mrb[180].mxu1  ;;  %13133 = vst [vmem:[#allocation66_spill] sm:$0xff] %v10450_v37  ;;  %v13136_v9 = vunpack.c.l.bf16 %v13100_v43  ;;  %v10469_v52 = vsel %vm2919_vm6, %v10130_v28, 0.0  ;;  %v3326_v50 = vmul.f32 0.5, %v3262_v45 }
 0x4a7   : > { %7157 = vtanh.f32 %v3263_v54  ;;  %v3193_v38 = vpop.f32.mrb[181].mxu1  ;;  %13137 = vst [vmem:[#allocation86_spill] sm:$0xff] %v10469_v52  ;;  %v13139_v54 = vunpack.c.l.bf16 %v13102_v21  ;;  %v13140_v5 = vunpack.c.h.bf16 %v13091_v32  ;;  %v10485_v28 = vsel %vm2920_vm8, %v10170_v11, 0.0 }
 0x4a8   : > { %v3078_v4 = vpop.f32.mrb[148].mxu0  ;;  %v3270_v26 = vadd.f32 %v3191_v33, %v13136_v9  ;;  %7159 = vtanh.f32 %v3328_v58  ;;  %v3195_v15 = vpop.f32.mrb[182].mxu1  ;;  %13141 = vst [vmem:[#allocation154_spill] sm:$0xff] %v10485_v28  ;;  %v13142_v2 = vunpack.c.h.bf16 %v13100_v43  ;;  %v13143_v32 = vunpack.c.h.bf16 %v13092_v59 }
 0x4a9   : > { %v3268_v56 = vadd.f32 %v3078_v4, %v13135_v51  ;;  %v3080_v27 = vpop.f32.mrb[149].mxu0  ;;  %v3271_v41 = vadd.f32 %v3193_v38, %v13139_v54  ;;  %v3197_v42 = vpop.f32.mrb[183].mxu1  ;;  %7161 = vtanh.f32 %v3267_v53  ;;  %v13144_v51 = vunpack.c.h.bf16 %v13102_v21 }
 0x4aa   : > { %v3269_v16 = vadd.f32 %v3080_v27, %v13138_v31  ;;  %v3082_v61 = vpop.f32.mrb[150].mxu0  ;;  %v3274_v58 = vadd.f32 %v3195_v15, %v13142_v2  ;;  %vm13145_vm0 = vcmp.eq.s32.totalorder %v10232_v39, 1  ;;  %v10501_v11 = vsel %vm2921_vm9, %v10187_v1, 0.0  ;;  %v10508_v21 = vpop.permute.xlu1 %3616 }
 0x4ab   : > { %v3330_v40 = vmul.f32 0.5, %v3268_v56  ;;  %v3272_v23 = vadd.f32 %v3082_v61, %v13140_v5  ;;  %v3084_v36 = vpop.f32.mrb[151].mxu0  ;;  %v3275_v56 = vadd.f32 %v3197_v42, %v13144_v51  ;;  %v10496_v13 = vsel %vm13145_vm0, %v10203_v3, 0.0  ;;  %13147 = vst [vmem:[#allocation156_spill] sm:$0xff] %v10501_v11  ;;  %v13161_v51 = vld [vmem:[#allocation144_spill] sm:$0xff]  ;;  %vm13165_vm1 = vmmov %vm13145_vm0 }
 0x4ac   : > { %v3331_v45 = vmul.f32 0.5, %v3269_v16  ;;  %v3273_v4 = vadd.f32 %v3084_v36, %v13143_v32  ;;  %13146 = vst [vmem:[#allocation155_spill] sm:$0xff] %v10496_v13  ;;  %v10506_v43 = vsel %vm2922_vm11, %v10218_v25, 0.0  ;;  %v3329_v53 = vmul.f32 0.5, %v3266_v10  ;;  %v13153_v10 = vld [vmem:[#allocation142_spill] sm:$0xff]  ;;  %v13159_v36 = vld [vmem:[#allocation59_spill] sm:$0xff] }
 0x4ad   : > { %7163 = vtanh.f32 %v3330_v40  ;;  %v3333_v33 = vmul.f32 0.5, %v3272_v23  ;;  %13148 = vst [vmem:[#allocation157_spill] sm:$0xff] %v10506_v43  ;;  %v7152_v59 = vpop.eup %7151  ;;  %v10513_v3 = vsel %vm2926_vm10, %v10226_v14, 0.0  ;;  %v10523_v27 = vsel %vm2927_vm12, %v10240_v57, 0.0  ;;  %v13157_v16 = vld [vmem:[#allocation70_spill] sm:$0xff] }
 0x4ae   : > { %7165 = vtanh.f32 %v3326_v50  ;;  %v3334_v29 = vmul.f32 0.5, %v3273_v4  ;;  %13149 = vst [vmem:[#allocation158_spill] sm:$0xff] %v10513_v3  ;;  %v3420_v1 = vmul.f32 0.5, %v7152_v59  ;;  %13152 = vst [vmem:[#allocation160_spill] sm:$0xff] %v10523_v27  ;;  %v10528_v38 = vsel %vm2924_vm15, %v13153_v10, 0.0  ;;  %v13164_v10 = vld [vmem:[#allocation145_spill] sm:$0xff] }
 0x4af   : > { %7167 = vtanh.f32 %v3331_v45  ;;  %13154 = vst [vmem:[#allocation142_spill] sm:$0xff] %v10528_v38  ;;  %v7154_v14 = vpop.eup %7153  ;;  %v3332_v50 = vmul.f32 0.5, %v3270_v26  ;;  %v13158_v54 = vunpack.c.l.bf16 %v13157_v16  ;;  %v13160_v42 = vunpack.c.l.bf16 %v13159_v36 }
 0x4b0   : > { %7169 = vtanh.f32 %v3333_v33  ;;  %v7156_v5 = vpop.eup %7155  ;;  %v3468_v23 = vadd.f32 0.5, %v3420_v1  ;;  %v3421_v57 = vmul.f32 0.5, %v7154_v14  ;;  %v10546_v14 = vsel %vm13165_vm1, %v13164_v10, 0.0 }
 0x4b1   : > { %v3088_v35 = vpop.f32.mrb[152].mxu0  ;;  %7171 = vtanh.f32 %v3271_v41  ;;  %v7158_v32 = vpop.eup %7157  ;;  %v3423_v26 = vmul.f32 0.5, %v7156_v5  ;;  %13166 = vst [vmem:[#allocation70_spill] sm:$0xff] %v10546_v14  ;;  %v3335_v5 = vmul.f32 0.5, %v3274_v58  ;;  %v13169_v39 = vunpack.c.h.bf16 %v13155_v12 }
 0x4b2   : > { %v3201_v25 = vpop.f32.mrb[184].mxu1  ;;  %v3276_v31 = vadd.f32 %v3088_v35, %v13156_v24  ;;  %v3090_v15 = vpop.f32.mrb[153].mxu0  ;;  %7173 = vtanh.f32 %v3334_v29  ;;  %v10541_v35 = vsel %vm12833_vm7, %v13161_v51, 0.0  ;;  %v3548_v29 = vmul.f32 %v7158_v32, %v3468_v23 }
 0x4b3   : > { %v3278_v61 = vadd.f32 %v3201_v25, %v13158_v54  ;;  %v3203_v40 = vpop.f32.mrb[185].mxu1  ;;  %v3277_v8 = vadd.f32 %v3090_v15, %v13160_v42  ;;  %v3092_v45 = vpop.f32.mrb[154].mxu0  ;;  %7175 = vtanh.f32 %v3329_v53  ;;  %13163 = vst [vmem:[#allocation58_spill] sm:$0xff] %v10541_v35  ;;  %v3469_v25 = vadd.f32 0.5, %v3421_v57  ;;  %v13167_v42 = vld [vmem:[#allocation72_spill] sm:$0xff] }
 0x4b4   : > { %v3205_v2 = vpop.f32.mrb[186].mxu1  ;;  %v3336_v41 = vmul.f32 0.5, %v3276_v31  ;;  %v3094_v4 = vpop.f32.mrb[155].mxu0  ;;  %7177 = vtanh.f32 %v3275_v56  ;;  %v3471_v24 = vadd.f32 0.5, %v3423_v26  ;;  %v13168_v51 = vunpack.c.l.bf16 %v13167_v42 }
 0x4b5   : > { %v10536_v33 = vpop.f32.mrb[187].mxu1  ;;  %v7160_v1 = vpop.eup %7159  ;;  %v3337_v31 = vmul.f32 0.5, %v3277_v8  ;;  %v3532_v15 = vmul.f32 %v3469_v25, %v10378_v49  ;;  %v3280_v26 = vadd.f32 %v3092_v45, %v13169_v39  ;;  %v3338_v10 = vmul.f32 0.5, %v3278_v61 }
 0x4b6   : > { %v3424_v53 = vmul.f32 0.5, %v7160_v1  ;;  %7179 = vtanh.f32 %v3336_v41  ;;  %v7162_v54 = vpop.eup %7161  ;;  %v3279_v59 = vadd.f32 %v3203_v40, %v13168_v51  ;;  %v10551_v23 = vpop.permute.xlu1 %3619  ;;  %v13177_v35 = vunpack.c.h.bf16 %v13167_v42 }
 0x4b7   : > { %7181 = vtanh.f32 %v3332_v50  ;;  %v7164_v57 = vpop.eup %7163  ;;  %v3549_v32 = vmul.f32 %v7162_v54, %v3471_v24  ;;  %v10555_v41 = vadd.f32 %v3548_v29, %v3532_v15  ;;  %v13171_v50 = vunpack.c.h.bf16 %v13157_v16 }
 0x4b8   : > { %v3472_v56 = vadd.f32 0.5, %v3424_v53  ;;  %7183 = vtanh.f32 %v3337_v31  ;;  %v7166_v1 = vpop.eup %7165  ;;  %v3426_v8 = vmul.f32 0.5, %v7164_v57  ;;  %v3339_v53 = vmul.f32 0.5, %v3280_v26  ;;  %v13174_v26 = vld [vmem:[#allocation146_spill] sm:$0xff] }
 0x4b9   : > { %13170 = vst [vmem:[#allocation59_spill] sm:$0xff] %v10555_v41  ;;  %v3282_v58 = vadd.f32 %v3205_v2, %v13171_v50  ;;  %v7168_v40 = vpop.eup %7167  ;;  %7185 = vtanh.f32 %v3279_v59  ;;  %v13172_v24 = vunpack.c.h.bf16 %v13159_v36  ;;  %v13178_v36 = vld [vmem:[#allocation60_spill] sm:$0xff]  ;;  %vm3660_vm2 = vcmp.eq.s32.totalorder %v10430_v0, 1 }
 0x4ba   : > { %v3098_v25 = vpop.f32.mrb[156].mxu0  ;;  %v3533_v51 = vmul.f32 %v3472_v56, %v10385_v7  ;;  %v7170_v54 = vpop.eup %7169  ;;  %v3474_v29 = vadd.f32 0.5, %v3426_v8  ;;  %v3427_v15 = vmul.f32 0.5, %v7168_v40  ;;  %7187 = vtanh.f32 %v3335_v5 }
 0x4bb   : > { %v3211_v9 = vpop.f32.mrb[188].mxu1  ;;  %v3281_v31 = vadd.f32 %v3094_v4, %v13172_v24  ;;  %v3100_v12 = vpop.f32.mrb[157].mxu0  ;;  %v3341_v61 = vmul.f32 0.5, %v3282_v58  ;;  %v3429_v50 = vmul.f32 0.5, %v7170_v54  ;;  %7189 = vtanh.f32 %v3339_v53 }
 0x4bc   : > { %v3213_v45 = vpop.f32.mrb[189].mxu1  ;;  %v3102_v57 = vpop.f32.mrb[158].mxu0  ;;  %v10564_v39 = vadd.f32 %v3549_v32, %v3533_v51  ;;  %v10569_v4 = vsel %vm12832_vm4, %v13174_v26, 0.0  ;;  %v3422_v8 = vmul.f32 0.5, %v7166_v1  ;;  %v3475_v40 = vadd.f32 0.5, %v3427_v15 }
 0x4bd   : > { %v10562_v16 = vpop.f32.mrb[190].mxu1  ;;  %v7172_v2 = vpop.eup %7171  ;;  %13176 = vst [vmem:[#allocation145_spill] sm:$0xff] %v10569_v4  ;;  %7191 = vtanh.f32 %v3338_v10  ;;  %v3477_v34 = vadd.f32 0.5, %v3429_v50  ;;  %v3340_v51 = vmul.f32 0.5, %v3281_v31  ;;  %v3283_v26 = vadd.f32 %v10536_v33, %v13177_v35  ;;  %v13180_v50 = vld [vmem:[#allocation74_spill] sm:$0xff] }
 0x4be   : > { %13173 = vst [vmem:[#allocation144_spill] sm:$0xff] %v10564_v39  ;;  %v3104_v59 = vpop.f32.mrb[159].mxu0  ;;  %v3217_v56 = vpop.f32.mrb[191].mxu1  ;;  %v3550_v5 = vmul.f32 %v7172_v2, %v3474_v29  ;;  %7193 = vtanh.f32 %v10555_v41  ;;  %v3534_v53 = vmul.f32 %v3475_v40, %v10394_v30  ;;  %v13179_v4 = vunpack.c.l.bf16 %v13178_v36 }
 0x4bf   : > { %v7174_v24 = vpop.eup %7173  ;;  %7195 = vtanh.f32 %v3341_v61  ;;  %v10578_v29 = vpop.permute.xlu1 %3622  ;;  %v10591_v7 = vadd.f32 0.5, %v3422_v8  ;;  %v13189_v8 = vunpack.c.h.bf16 %v13180_v50  ;;  %vm3661_vm3 = vcmp.eq.s32.totalorder %v10508_v21, 1  ;;  %v7707_v21 = vld [vmem:[%s8799_s20 + $0xcc] ss:$16 sps:$4 sm:$0xff]  }
 0x4c0   : > { %v7176_v58 = vpop.eup %7175  ;;  %v3430_v32 = vmul.f32 0.5, %v7174_v24  ;;  %v3284_v1 = vadd.f32 %v3098_v25, %v13179_v4  ;;  %7197 = vtanh.f32 %v3340_v51  ;;  %v13181_v24 = vunpack.c.l.bf16 %v13180_v50 }
 0x4c1   : > { %v7178_v54 = vpop.eup %7177  ;;  %v10582_v38 = vadd.f32 %v3550_v5, %v3534_v53  ;;  %7199 = vtanh.f32 %v3283_v26  ;;  %v13185_v53 = vld [vmem:[#allocation76_spill] sm:$0xff]  ;;  %v3425_v50 = vmul.f32 0.5, %v7176_v58  ;;  %vm3662_vm5 = vcmp.eq.s32.totalorder %v10551_v23, 1 }
 0x4c2   : > { %v7180_v15 = vpop.eup %7179  ;;  %v3478_v10 = vadd.f32 0.5, %v3430_v32  ;;  %v3551_v2 = vmul.f32 %v7178_v54, %v3477_v34  ;;  %v3286_v31 = vadd.f32 %v3211_v9, %v13181_v24  ;;  %v3342_v42 = vmul.f32 0.5, %v3284_v1  ;;  %v3108_v40 = vpop.f32.mrb[160].mxu0  ;;  %v13183_v32 = vld [vmem:[#allocation61_spill] sm:$0xff]  ;;  %v7710_v23 = vld [vmem:[%s8799_s20 + $0xe4] ss:$16 sps:$4 sm:$0xff]  }
 0x4c3   : > { %v7182_v14 = vpop.eup %7181  ;;  %13182 = vst [vmem:[#allocation72_spill] sm:$0xff] %v10582_v38  ;;  %v3432_v61 = vmul.f32 0.5, %v7180_v15  ;;  %v3221_v33 = vpop.f32.mrb[192].mxu1  ;;  %7201 = vtanh.f32 %v10564_v39  ;;  %v13184_v34 = vunpack.c.l.bf16 %v13183_v32  ;;  %v13186_v26 = vunpack.c.l.bf16 %v13185_v53 }
 0x4c4   : > { %v7184_v35 = vpop.eup %7183  ;;  %v3535_v25 = vmul.f32 %v3478_v10, %v10403_v6  ;;  %v3344_v4 = vmul.f32 0.5, %v3286_v31  ;;  %v3110_v54 = vpop.f32.mrb[161].mxu0  ;;  %7203 = vtanh.f32 %v10582_v38  ;;  %vm3663_vm6 = vcmp.eq.s32.totalorder %v10578_v29, 1 }
 0x4c5   : > { %v3285_v51 = vadd.f32 %v3100_v12, %v13184_v34  ;;  %v3223_v30 = vpop.f32.mrb[193].mxu1  ;;  %v3480_v9 = vadd.f32 0.5, %v3432_v61  ;;  %v3433_v5 = vmul.f32 0.5, %v7184_v35  ;;  %v3287_v1 = vadd.f32 %v3213_v45, %v13186_v26  ;;  %v3112_v15 = vpop.f32.mrb[162].mxu0 }
 0x4c6   : > { %v3225_v24 = vpop.f32.mrb[194].mxu1  ;;  %v7186_v63 = vpop.eup %7185  ;;  %v10593_v39 = vadd.f32 %v3551_v2, %v3535_v25  ;;  %7205 = vtanh.f32 %v3342_v42  ;;  %v13188_v61 = vunpack.c.h.bf16 %v13178_v36  ;;  %v3290_v2 = vadd.f32 %v10562_v16, %v13189_v8 }
 0x4c7   : > { %v3343_v10 = vmul.f32 0.5, %v3285_v51  ;;  %v3114_v31 = vpop.f32.mrb[163].mxu0  ;;  %v3227_v12 = vpop.f32.mrb[195].mxu1  ;;  %v3481_v6 = vadd.f32 0.5, %v3433_v5  ;;  %v3552_v38 = vmul.f32 %v7186_v63, %v3480_v9  ;;  %7207 = vtanh.f32 %v3344_v4 }
 0x4c8   : > { %13187 = vst [vmem:[#allocation146_spill] sm:$0xff] %v10593_v39  ;;  %v10595_v34 = vpop.eup %7187  ;;  %v3288_v35 = vadd.f32 %v3102_v57, %v13188_v61  ;;  %7209 = vtanh.f32 %v10593_v39  ;;  %v13190_v42 = vunpack.c.h.bf16 %v13183_v32  ;;  %v13191_v51 = vunpack.c.h.bf16 %v13185_v53  ;;  %v10612_v9 = vpop.permute.xlu1 %3625  ;;  %v13194_v53 = vld [vmem:[#allocation63_spill] sm:$0xff] }
 0x4c9   : > { %v7190_v45 = vpop.eup %7189  ;;  %v3536_v63 = vmul.f32 %v3481_v6, %v10408_v20  ;;  %7211 = vtanh.f32 %v3343_v10  ;;  %13192 = vst [vmem:[#allocation60_spill] sm:$0xff] %v10612_v9  ;;  %v3347_v16 = vmul.f32 0.5, %v3290_v2  ;;  %v13195_v61 = vunpack.c.l.bf16 %v13194_v53 }
 0x4ca   : > { %v3289_v25 = vadd.f32 %v3104_v59, %v13190_v42  ;;  %v3291_v26 = vadd.f32 %v3217_v56, %v13191_v51  ;;  %v10607_v43 = vpop.eup %7191  ;;  %v3435_v4 = vmul.f32 0.5, %v7190_v45  ;;  %v3345_v57 = vmul.f32 0.5, %v3288_v35  ;;  %v3118_v45 = vpop.f32.mrb[164].mxu0  ;;  %v13196_v42 = vld [vmem:[#allocation78_spill] sm:$0xff] }
 0x4cb   : > { %v10610_v36 = vpop.eup %7193  ;;  %7213 = vtanh.f32 %v3287_v1  ;;  %v10616_v59 = vadd.f32 %v3552_v38, %v3536_v63  ;;  %v3292_v6 = vadd.f32 %v3108_v40, %v13195_v61  ;;  %v3231_v10 = vpop.f32.mrb[196].mxu1  ;;  %v3428_v8 = vmul.f32 0.5, %v7182_v14  ;;  %v13198_v1 = vld [vmem:[#allocation65_spill] sm:$0xff] }
 0x4cc   : > { %v3346_v5 = vmul.f32 0.5, %v3289_v25  ;;  %v10614_v32 = vpop.eup %7195  ;;  %v3483_v56 = vadd.f32 0.5, %v3435_v4  ;;  %7215 = vtanh.f32 %v3345_v57  ;;  %v13197_v51 = vunpack.c.l.bf16 %v13196_v42  ;;  %v3120_v20 = vpop.f32.mrb[165].mxu0  ;;  %v13200_v57 = vld [vmem:[#allocation80_spill] sm:$0xff] }
 0x4cd   : > { %13193 = vst [vmem:[#allocation74_spill] sm:$0xff] %v10616_v59  ;;  %v7198_v35 = vpop.eup %7197  ;;  %7217 = vtanh.f32 %v3347_v16  ;;  %v13199_v2 = vunpack.c.l.bf16 %v13198_v1  ;;  %v3233_v39 = vpop.f32.mrb[197].mxu1  ;;  %v3348_v4 = vmul.f32 0.5, %v3292_v6  ;;  %v13201_v40 = vunpack.c.l.bf16 %v13200_v57 }
 0x4ce   : > { %v3294_v58 = vadd.f32 %v3221_v33, %v13197_v51  ;;  %v7200_v38 = vpop.eup %7199  ;;  %7219 = vtanh.f32 %v10616_v59  ;;  %v3436_v63 = vmul.f32 0.5, %v7198_v35  ;;  %v10627_v27 = vpop.f32.mrb[166].mxu0 }
 0x4cf   : > { %v3293_v25 = vadd.f32 %v3110_v54, %v13199_v2  ;;  %v3295_v61 = vadd.f32 %v3223_v30, %v13201_v40  ;;  %v10629_v14 = vpop.f32.mrb[198].mxu1  ;;  %v10631_v16 = vpop.eup %7201  ;;  %v3553_v33 = vmul.f32 %v7200_v38, %v3483_v56  ;;  %7221 = vtanh.f32 %v3346_v5  ;;  %v13206_v38 = vld [vmem:[#allocation67_spill] sm:$0xff] }
 0x4d0   : > { %v3350_v51 = vmul.f32 0.5, %v3294_v58  ;;  %v10633_v2 = vpop.f32.mrb[167].mxu0  ;;  %v10635_v41 = vpop.f32.mrb[199].mxu1  ;;  %v3484_v6 = vadd.f32 0.5, %v3436_v63  ;;  %7223 = vtanh.f32 %v3291_v26  ;;  %v13202_v30 = vunpack.c.h.bf16 %v13194_v53 }
 0x4d1   : > { %v3349_v54 = vmul.f32 0.5, %v3293_v25  ;;  %v10637_v59 = vpop.eup %7203  ;;  %v13203_v40 = vunpack.c.h.bf16 %v13196_v42  ;;  %7225 = vtanh.f32 %v3348_v4  ;;  %v13204_v5 = vunpack.c.h.bf16 %v13198_v1 }
 0x4d2   : > { %v3296_v35 = vadd.f32 %v3112_v15, %v13202_v30  ;;  %v7206_v11 = vpop.eup %7205  ;;  %v13205_v58 = vunpack.c.h.bf16 %v13200_v57  ;;  %v13207_v28 = vunpack.c.l.bf16 %v13206_v38  ;;  %v3537_v26 = vmul.f32 %v3484_v6, %v10418_v18 }
 0x4d3   : > { %v3298_v49 = vadd.f32 %v3225_v24, %v13203_v40  ;;  %v3297_v56 = vadd.f32 %v3114_v31, %v13204_v5  ;;  %v10649_v62 = vpop.eup %7207  ;;  %v3438_v53 = vmul.f32 0.5, %v7206_v11  ;;  %7227 = vtanh.f32 %v3350_v51  ;;  %v10654_v24 = vpop.permute.xlu1 %3628  ;;  %v13212_v5 = vld [vmem:[#allocation69_spill] sm:$0xff] }
 0x4d4   : > { %v3299_v25 = vadd.f32 %v3227_v12, %v13205_v58  ;;  %v3300_v52 = vadd.f32 %v3118_v45, %v13207_v28  ;;  %v3351_v15 = vmul.f32 0.5, %v3296_v35  ;;  %v10652_v42 = vpop.eup %7209  ;;  %13208 = vst [vmem:[#allocation61_spill] sm:$0xff] %v10654_v24  ;;  %v10656_v63 = vadd.f32 0.5, %v3425_v50  ;;  %v10663_v11 = vpop.f32.mrb[168].mxu0 }
 0x4d5   : > { %v10658_v31 = vadd.f32 0.5, %v3428_v8  ;;  %v3431_v12 = vmul.f32 0.5, %v10595_v34  ;;  %7229 = vtanh.f32 %v3349_v54  ;;  %v7212_v1 = vpop.eup %7211  ;;  %v10661_v28 = vadd.f32 %v3553_v33, %v3537_v26  ;;  %v10665_v57 = vpop.f32.mrb[200].mxu1  ;;  %v13210_v8 = vld [vmem:[#allocation82_spill] sm:$0xff]  ;;  %v13214_v26 = vld [vmem:[#allocation84_spill] sm:$0xff] }
 0x4d6   : > { %v3486_v45 = vadd.f32 0.5, %v3438_v53  ;;  %7231 = vtanh.f32 %v3295_v61  ;;  %v3352_v4 = vmul.f32 0.5, %v3297_v56  ;;  %v7214_v51 = vpop.eup %7213  ;;  %v3434_v6 = vmul.f32 0.5, %v10607_v43  ;;  %v10670_v34 = vpop.f32.mrb[169].mxu0 }
 0x4d7   : > { %13209 = vst [vmem:[#allocation76_spill] sm:$0xff] %v10661_v28  ;;  %v3439_v50 = vmul.f32 0.5, %v7212_v1  ;;  %7233 = vtanh.f32 %v3351_v15  ;;  %v13211_v30 = vunpack.c.l.bf16 %v13210_v8  ;;  %v10672_v54 = vpop.f32.mrb[201].mxu1  ;;  %v7216_v33 = vpop.eup %7215  ;;  %v3354_v61 = vmul.f32 0.5, %v3300_v52 }
 0x4d8   : > { %v3554_v40 = vmul.f32 %v7214_v51, %v3486_v45  ;;  %v13213_v56 = vunpack.c.l.bf16 %v13212_v5  ;;  %v13215_v53 = vunpack.c.l.bf16 %v13214_v26  ;;  %v10678_v3 = vpop.f32.mrb[170].mxu0  ;;  %v10680_v43 = vpop.f32.mrb[202].mxu1  ;;  %7235 = vtanh.f32 %v10661_v28 }
 0x4d9   : > { %v3302_v35 = vadd.f32 %v3231_v10, %v13211_v30  ;;  %v10682_v15 = vpop.eup %7217  ;;  %v3487_v10 = vadd.f32 0.5, %v3439_v50  ;;  %v3441_v1 = vmul.f32 0.5, %v7216_v33  ;;  %v3353_v30 = vmul.f32 0.5, %v3298_v49  ;;  %v10685_v13 = vpop.f32.mrb[171].mxu0 }
 0x4da   : > { %v3301_v58 = vadd.f32 %v3120_v20, %v13213_v56  ;;  %v3303_v18 = vadd.f32 %v3233_v39, %v13215_v53  ;;  %v10687_v52 = vpop.f32.mrb[203].mxu1  ;;  %v10689_v45 = vpop.eup %7219  ;;  %7237 = vtanh.f32 %v3352_v4  ;;  %v13217_v51 = vunpack.c.h.bf16 %v13206_v38 }
 0x4db   : > { %13216 = vst [vmem:[#allocation63_spill] sm:$0xff] %v10689_v45  ;;  %v3356_v20 = vmul.f32 0.5, %v3302_v35  ;;  %v7222_v50 = vpop.eup %7221  ;;  %v3538_v49 = vmul.f32 %v3487_v10, %v10435_v44  ;;  %v3489_v33 = vadd.f32 0.5, %v3441_v1  ;;  %7239 = vtanh.f32 %v3299_v25  ;;  %v10700_v24 = vpop.permute.xlu1 %3631 }
 0x4dc   : > { %v3355_v39 = vmul.f32 0.5, %v3301_v58  ;;  %v3304_v56 = vadd.f32 %v10627_v27, %v13217_v51  ;;  %v13218_v53 = vunpack.c.h.bf16 %v13210_v8  ;;  %v7224_v45 = vpop.eup %7223  ;;  %v10702_v9 = vadd.f32 0.5, %v3431_v12  ;;  %v10713_v51 = vpop.f32.mrb[172].mxu0 }
 0x4dd   : > { %v10704_v4 = vadd.f32 0.5, %v3434_v6  ;;  %v3442_v35 = vmul.f32 0.5, %v7222_v50  ;;  %7241 = vtanh.f32 %v3354_v61  ;;  %v7226_v38 = vpop.eup %7225  ;;  %v10706_v27 = vadd.f32 %v3554_v40, %v3538_v49  ;;  %v10715_v6 = vpop.f32.mrb[204].mxu1 }
 0x4de   : > { %v3306_v28 = vadd.f32 %v10629_v14, %v13218_v53  ;;  %v3555_v58 = vmul.f32 %v7224_v45, %v3489_v33  ;;  %7243 = vtanh.f32 %v3353_v30  ;;  %v3357_v10 = vmul.f32 0.5, %v3304_v56  ;;  %v10708_v25 = vpop.eup %7227  ;;  %v10722_v50 = vpop.f32.mrb[173].mxu0 }
 0x4df   : > { %v3490_v8 = vadd.f32 0.5, %v3442_v35  ;;  %v3444_v1 = vmul.f32 0.5, %v7226_v38  ;;  %7245 = vtanh.f32 %v3355_v39  ;;  %v13219_v14 = vunpack.c.h.bf16 %v13212_v5  ;;  %v7230_v61 = vpop.eup %7229  ;;  %v10724_v39 = vpop.f32.mrb[205].mxu1 }
 0x4e0   : > { %7247 = vtanh.f32 %v3356_v20  ;;  %v3359_v40 = vmul.f32 0.5, %v3306_v28  ;;  %v13220_v45 = vunpack.c.h.bf16 %v13214_v26  ;;  %v3596_v56 = vmul.f32 %v10610_v36, %v10591_v7  ;;  %v7232_v5 = vpop.eup %7231  ;;  %v10727_v53 = vpop.f32.mrb[174].mxu0 }
 0x4e1   : > { %v3305_v12 = vadd.f32 %v10633_v2, %v13219_v14  ;;  %v3539_v2 = vmul.f32 %v3490_v8, %v10440_v47  ;;  %v3492_v49 = vadd.f32 0.5, %v3444_v1  ;;  %v3445_v33 = vmul.f32 0.5, %v7230_v61  ;;  %v10729_v28 = vpop.f32.mrb[206].mxu1  ;;  %v7234_v26 = vpop.eup %7233 }
 0x4e2   : > { %v3307_v30 = vadd.f32 %v10635_v41, %v13220_v45  ;;  %7249 = vtanh.f32 %v3303_v18  ;;  %v3437_v41 = vmul.f32 0.5, %v10614_v32  ;;  %v3597_v7 = vmul.f32 %v10631_v16, %v10656_v63  ;;  %v10734_v36 = vpop.f32.mrb[175].mxu0  ;;  %v10736_v35 = vpop.f32.mrb[207].mxu1  ;;  %v13223_v63 = vld [vmem:[#allocation71_spill] sm:$0xff] }
 0x4e3   : > { %7251 = vtanh.f32 %v3357_v10  ;;  %v3358_v20 = vmul.f32 0.5, %v3305_v12  ;;  %v10738_v38 = vpop.permute.xlu1 %3634  ;;  %v10740_v8 = vadd.f32 %v3555_v58, %v3539_v2  ;;  %v3493_v18 = vadd.f32 0.5, %v3445_v33  ;;  %v10742_v61 = vpop.eup %7235 }
 0x4e4   : > { %v3556_v1 = vmul.f32 %v7232_v5, %v3492_v49  ;;  %v3447_v14 = vmul.f32 0.5, %v7234_v26  ;;  %7253 = vtanh.f32 %v10706_v27  ;;  %v10748_v32 = vsel %vm3660_vm2, %v3596_v56, %v10413_v60  ;;  %v7238_v12 = vpop.eup %7237 }
 0x4e5   : > { %13221 = vst [vmem:[#allocation78_spill] sm:$0xff] %v10748_v32  ;;  %v10753_v16 = vsel %vm3661_vm3, %v3597_v7, %v10423_v55  ;;  %v13224_v58 = vunpack.c.l.bf16 %v13223_v63  ;;  %v3440_v45 = vmul.f32 0.5, %v10649_v62  ;;  %v3540_v5 = vmul.f32 %v3493_v18, %v10450_v37  ;;  %v7240_v49 = vpop.eup %7239  ;;  %v7686_v37 = vld [vmem:[%s8799_s20 + $0x24] ss:$16 sps:$4 sm:$0xff]  }
 0x4e6   : > { %13222 = vst [vmem:[#allocation65_spill] sm:$0xff] %v10753_v16  ;;  %v3495_v2 = vadd.f32 0.5, %v3447_v14  ;;  %7255 = vtanh.f32 %v3359_v40  ;;  %v3448_v33 = vmul.f32 0.5, %v7238_v12  ;;  %v3772_v60 = vpack.c.bf16 %v10753_v16, %v10748_v32 }
 0x4e7   : > { %v3308_v10 = vadd.f32 %v10663_v11, %v13224_v58  ;;  %7257 = vtanh.f32 %v3358_v20  ;;  %v7242_v55 = vpop.eup %7241  ;;  %v10762_v26 = vadd.f32 0.5, %v3437_v41  ;;  %v10764_v7 = vadd.f32 %v3556_v1, %v3540_v5  ;;  %v10772_v41 = vpop.permute.xlu1 %3637  ;;  %v13228_v5 = vld [vmem:[#allocation88_spill] sm:$0xff] }
 0x4e8   : > { %v3557_v11 = vmul.f32 %v7240_v49, %v3495_v2  ;;  %7259 = vtanh.f32 %v3307_v30  ;;  %v10766_v58 = vpop.eup %7243  ;;  %v3496_v62 = vadd.f32 0.5, %v3448_v33  ;;  %v3450_v18 = vmul.f32 0.5, %v7242_v55  ;;  %3813 = vmatmul.mubr.bf16.vlgmr.msra.gmra.mrb[176].mxu0 %v3772_v60  ;;  %3926 = vmatmul.mubr.bf16.vlgmr.msra.gmra.mrb[208].mxu1 %v3772_v60  ;;  %v13226_v30 = vld [vmem:[#allocation73_spill] sm:$0xff] }
 0x4e9   : > { %v3360_v56 = vmul.f32 0.5, %v3308_v10  ;;  %v13225_v40 = vunpack.c.l.bf16 %v13117_v19  ;;  %v7246_v14 = vpop.eup %7245  ;;  %v10774_v1 = vadd.f32 0.5, %v3440_v45  ;;  %v13227_v10 = vunpack.c.l.bf16 %v13226_v30 }
 0x4ea   : > { %v13229_v2 = vunpack.c.l.bf16 %v13228_v5  ;;  %v10785_v33 = vpop.eup %7247  ;;  %v3541_v45 = vmul.f32 %v3496_v62, %v10455_v46  ;;  %v3498_v60 = vadd.f32 0.5, %v3450_v18  ;;  %v13231_v32 = vunpack.c.h.bf16 %v13223_v63  ;;  %v7687_v62 = vld [vmem:[%s8799_s20 + $0x2c] ss:$16 sps:$4 sm:$0xff]  }
 0x4eb   : > { %7261 = vtanh.f32 %v3360_v56  ;;  %v3310_v20 = vadd.f32 %v10665_v57, %v13225_v40  ;;  %v3309_v12 = vadd.f32 %v10670_v34, %v13227_v10  ;;  %v13230_v57 = vmov 0   ;;  %v7684_v34 = vld [vmem:[%s8799_s20] ss:$16 sps:$4 sm:$0xff]   ;;  %v7685_v40 = vld [vmem:[%s8799_s20 + $0x8] ss:$16 sps:$4 sm:$0xff]  }
 0x4ec   : > { %7263 = vtanh.f32 %v10740_v8  ;;  %v3311_v49 = vadd.f32 %v10672_v54, %v13229_v2  ;;  %3822 = vmatprep.mubr.bf16.mxu0 %v13230_v57  ;;  %3935 = vmatprep.mubr.bf16.mxu1 %v13230_v57  ;;  %v3451_v56 = vmul.f32 0.5, %v7246_v14  ;;  %v7250_v54 = vpop.eup %7249  ;;  %v3443_v10 = vmul.f32 0.5, %v10682_v15 }
 0x4ed   : > { %v3362_v55 = vmul.f32 0.5, %v3310_v20  ;;  %4527 = vmatpush1.bf16.msra.mxu0 %v7684_v34  ;;  %4640 = vmatpush1.bf16.msra.mxu1 %v7685_v40  ;;  %7265 = vtanh.f32 %v10764_v7  ;;  %v3361_v2 = vmul.f32 0.5, %v3309_v12  ;;  %v3312_v16 = vadd.f32 %v10678_v3, %v13231_v32  ;;  %v7252_v18 = vpop.eup %7251 }
 0x4ee   : > { %4528 = vmatprep.subr.bf16.mxu0 %v7686_v37  ;;  %4641 = vmatprep.subr.bf16.mxu1 %v7687_v62  ;;  %v10798_v20 = vadd.f32 %v3557_v11, %v3541_v45  ;;  %v3499_v14 = vadd.f32 0.5, %v3451_v56  ;;  %v3558_v34 = vmul.f32 %v7250_v54, %v3498_v60  ;;  %7267 = vtanh.f32 %v3311_v49  ;;  %v10805_v37 = vpop.eup %7253  ;;  %v7688_v45 = vld [vmem:[%s8799_s20 + $0x20] ss:$16 sps:$4 sm:$0xff]   ;;  %v10818_v60 = vpop.permute.xlu1 %3640 }
 0x4ef   : > { %v3453_v15 = vmul.f32 0.5, %v7252_v18  ;;  %7269 = vtanh.f32 %v3361_v2  ;;  %v3363_v40 = vmul.f32 0.5, %v3312_v16  ;;  %v13232_v12 = vunpack.c.h.bf16 %v13117_v19  ;;  %v7689_v19 = vld [vmem:[%s8799_s20 + $0x28] ss:$16 sps:$4 sm:$0xff]  }
 0x4f0   : > { %v3542_v3 = vmul.f32 %v3499_v14, %v10480_v48  ;;  %7271 = vtanh.f32 %v3362_v55  ;;  %v13233_v32 = vunpack.c.h.bf16 %v13226_v30  ;;  %v13234_v49 = vunpack.c.h.bf16 %v13228_v5  ;;  %v7690_v30 = vld [vmem:[%s8799_s20 + $0x44] ss:$16 sps:$4 sm:$0xff]  }
 0x4f1   : > { %v10803_v63 = vadd.f32 %v10680_v43, %v13232_v12  ;;  %4529 = vmatpush1.bf16.msra.mxu0 %v7688_v45  ;;  %4642 = vmatpush1.bf16.msra.mxu1 %v7689_v19  ;;  %v10816_v43 = vpop.eup %7255  ;;  %v10820_v56 = vadd.f32 0.5, %v3443_v10  ;;  %v3446_v55 = vmul.f32 0.5, %v10708_v25  ;;  %v3501_v54 = vadd.f32 0.5, %v3453_v15  ;;  %v7692_v12 = vld [vmem:[%s8799_s20 + $0x40] ss:$16 sps:$4 sm:$0xff]  }
 0x4f2   : > { %v3313_v11 = vadd.f32 %v10685_v13, %v13233_v32  ;;  %v3315_v16 = vadd.f32 %v10687_v52, %v13234_v49  ;;  %7273 = vtanh.f32 %v3363_v40  ;;  %4530 = vmatprep.subr.bf16.mxu0 %v7690_v30  ;;  %v7691_v13 = vld [vmem:[%s8799_s20 + $0x4c] ss:$16 sps:$4 sm:$0xff]   ;;  %v7258_v52 = vpop.eup %7257  ;;  %v10826_v5 = vadd.f32 %v3558_v34, %v3542_v3  ;;  %v7693_v3 = vld [vmem:[%s8799_s20 + $0x48] ss:$16 sps:$4 sm:$0xff]  }
 0x4f3   : > { %4643 = vmatprep.subr.bf16.mxu1 %v7691_v13  ;;  %7275 = vtanh.f32 %v10798_v20  ;;  %v3598_v10 = vmul.f32 %v10637_v59, %v10658_v31  ;;  %v7260_v62 = vpop.eup %7259  ;;  %v3449_v25 = vmul.f32 0.5, %v10766_v58  ;;  %v3454_v18 = vmul.f32 0.5, %v7258_v52  ;;  %v13235_v59 = vld [vmem:[#allocation75_spill] sm:$0xff]  ;;  %v13241_v52 = vld [vmem:[#allocation77_spill] sm:$0xff] }
 0x4f4   : > { %v3364_v2 = vmul.f32 0.5, %v3313_v11  ;;  %7277 = vtanh.f32 %v3315_v16  ;;  %v3599_v14 = vmul.f32 %v10652_v42, %v10702_v9  ;;  %v3559_v40 = vmul.f32 %v7260_v62, %v3501_v54  ;;  %v7695_v49 = vld [vmem:[%s8799_s20 + $0x6c] ss:$16 sps:$4 sm:$0xff]   ;;  %v13237_v16 = vld [vmem:[#allocation60_spill] sm:$0xff]  ;;  %v13239_v54 = vld [vmem:[#allocation90_spill] sm:$0xff]  ;;  %v10867_v62 = vpop.permute.xlu1 %3643 }
 0x4f5   : > { %v7262_v15 = vpop.eup %7261  ;;  %7279 = vtanh.f32 %v10826_v5  ;;  %v10837_v34 = vsel %vm3662_vm5, %v3598_v10, %v10428_v17  ;;  %v13236_v31 = vunpack.c.l.bf16 %v13235_v59  ;;  %4531 = vmatpush1.bf16.msra.mxu0 %v7692_v12  ;;  %4644 = vmatpush1.bf16.msra.mxu1 %v7693_v3  ;;  %v3502_v9 = vadd.f32 0.5, %v3454_v18  ;;  %v7694_v17 = vld [vmem:[%s8799_s20 + $0x64] ss:$16 sps:$4 sm:$0xff]   ;;  %v13243_v18 = vld [vmem:[#allocation155_spill] sm:$0xff] }
 0x4f6   : > { %v10844_v32 = vpop.eup %7263  ;;  %v3456_v42 = vmul.f32 0.5, %v7262_v15  ;;  %7281 = vtanh.f32 %v3364_v2  ;;  %v10849_v11 = vsel %vm3663_vm6, %v3599_v14, %v10445_v22  ;;  %4532 = vmatprep.subr.bf16.mxu0 %v7694_v17  ;;  %4645 = vmatprep.subr.bf16.mxu1 %v7695_v49  ;;  %vm3664_vm8 = vcmp.eq.s32.totalorder %v13237_v16, 1 }
 0x4f7   : > { %v3316_v58 = vadd.f32 %v10713_v51, %v13236_v31  ;;  %v13238_v51 = vld [vmem:[#allocation61_spill] sm:$0xff]  ;;  %v3773_v45 = vpack.c.bf16 %v10849_v11, %v10837_v34  ;;  %v13240_v30 = vunpack.c.l.bf16 %v13239_v54  ;;  %v13242_v22 = vunpack.c.l.bf16 %v13241_v52  ;;  %v10865_v10 = vpop.eup %7265  ;;  %v13244_v31 = vld [vmem:[#allocation92_spill] sm:$0xff] }
 0x4f8   : > { %vm3665_vm9 = vcmp.eq.s32.totalorder %v13238_v51, 1  ;;  %v3543_v14 = vmul.f32 %v3502_v9, %v13243_v18  ;;  %v3504_v15 = vadd.f32 0.5, %v3456_v42  ;;  %v13245_v12 = vunpack.c.l.bf16 %v13244_v31  ;;  %v7268_v17 = vpop.eup %7267 }
 0x4f9   : > { %v3366_v19 = vmul.f32 0.5, %v3316_v58  ;;  %v10860_v13 = vadd.f32 %v10715_v6, %v13240_v30  ;;  %v3317_v2 = vadd.f32 %v10722_v50, %v13242_v22  ;;  %v13246_v3 = vunpack.c.h.bf16 %v13235_v59  ;;  %3823 = vmatmul.mubr.bf16.gmra.mrb[180].mxu0 %v3773_v45  ;;  %3936 = vmatmul.mubr.bf16.gmra.mrb[212].mxu1 %v3773_v45  ;;  %v7270_v59 = vpop.eup %7269  ;;  %v7697_v22 = vld [vmem:[%s8799_s20 + $0x68] ss:$16 sps:$4 sm:$0xff]  }
 0x4fa   : > { %v3319_v58 = vadd.f32 %v10724_v39, %v13245_v12  ;;  %vm3666_vm11 = vcmp.eq.s32.totalorder %v10700_v24, 1  ;;  %vm3667_vm13 = vcmp.eq.s32.totalorder %v10738_v38, 1  ;;  %v10878_v50 = vadd.f32 0.5, %v3446_v55  ;;  %3832 = vmatprep.mubr.bf16.mxu0 %v13230_v57  ;;  %3945 = vmatprep.mubr.bf16.mxu1 %v13230_v57  ;;  %v10892_v45 = vpop.eup %7271  ;;  %v7698_v12 = vld [vmem:[%s8799_s20 + $0x84] ss:$16 sps:$4 sm:$0xff]  }
 0x4fb   : > { %v3320_v6 = vadd.f32 %v10727_v53, %v13246_v3  ;;  %7283 = vtanh.f32 %v3366_v19  ;;  %v3367_v9 = vmul.f32 0.5, %v3317_v2  ;;  %v13247_v42 = vunpack.c.h.bf16 %v13239_v54  ;;  %4646 = vmatpush1.bf16.msra.mxu1 %v7697_v22  ;;  %v13251_v22 = vld [vmem:[#allocation158_spill] sm:$0xff] }
 0x4fc   : > { %v10885_v53 = vadd.f32 0.5, %v3449_v25  ;;  %v3452_v49 = vmul.f32 0.5, %v10785_v33  ;;  %v10888_v30 = vadd.f32 %v3559_v40, %v3543_v14  ;;  %v3560_v55 = vmul.f32 %v7268_v17, %v3504_v15  ;;  %v7696_v25 = vld [vmem:[%s8799_s20 + $0x60] ss:$16 sps:$4 sm:$0xff]   ;;  %v7274_v33 = vpop.eup %7273  ;;  %v10912_v17 = vpop.permute.xlu1 %3646 }
 0x4fd   : > { %v10883_v39 = vadd.f32 %v10729_v28, %v13247_v42  ;;  %v3457_v19 = vmul.f32 0.5, %v7270_v59  ;;  %v3365_v28 = vmul.f32 0.5, %v10803_v63  ;;  %7285 = vtanh.f32 %v3319_v58  ;;  %4533 = vmatpush1.bf16.msra.mxu0 %v7696_v25  ;;  %v7699_v58 = vld [vmem:[%s8799_s20 + $0x8c] ss:$16 sps:$4 sm:$0xff]   ;;  %v7276_v3 = vpop.eup %7275 }
 0x4fe   : > { %v3369_v54 = vmul.f32 0.5, %v3320_v6  ;;  %vm3668_vm15 = vcmp.eq.s32.totalorder %v10772_v41, 1  ;;  %v3455_v40 = vmul.f32 0.5, %v10816_v43  ;;  %7287 = vtanh.f32 %v10888_v30  ;;  %4534 = vmatprep.subr.bf16.mxu0 %v7698_v12  ;;  %4647 = vmatprep.subr.bf16.mxu1 %v7699_v58 }
 0x4ff   : > { %v13248_v2 = vunpack.c.h.bf16 %v13241_v52  ;;  %v13249_v15 = vunpack.c.h.bf16 %v13244_v31  ;;  %vm3669_vm14 = vcmp.eq.s32.totalorder %v10818_v60, 1  ;;  %vm3670_vm0 = vcmp.eq.s32.totalorder %v10867_v62, 1  ;;  %v7278_v31 = vpop.eup %7277  ;;  %v7713_v60 = vld [vmem:[%s8799_s20 + $0xe8] ss:$16 sps:$4 sm:$0xff]  }
 0x500   : > { %v3505_v43 = vadd.f32 0.5, %v3457_v19  ;;  %v3459_v6 = vmul.f32 0.5, %v7274_v33  ;;  %7289 = vtanh.f32 %v3367_v9  ;;  %v3601_v42 = vmul.f32 %v10742_v61, %v10762_v26  ;;  %v7280_v25 = vpop.eup %7279  ;;  %v13252_v61 = vld [vmem:[#allocation68_spill] sm:$0xff] }
 0x501   : > { %v3321_v14 = vadd.f32 %v10734_v36, %v13248_v2  ;;  %v3323_v63 = vadd.f32 %v10736_v35, %v13249_v15  ;;  %v13250_v36 = vld [vmem:[#allocation63_spill] sm:$0xff]  ;;  %7291 = vtanh.f32 %v3369_v54  ;;  %v3602_v59 = vmul.f32 %v10805_v37, %v10774_v1  ;;  %v7282_v54 = vpop.eup %7281  ;;  %v13254_v1 = vld [vmem:[#allocation86_spill] sm:$0xff] }
 0x502   : > { %v3600_v52 = vmul.f32 %v13250_v36, %v10704_v4  ;;  %v3500_v19 = vadd.f32 0.5, %v3452_v49  ;;  %v3544_v9 = vmul.f32 %v3505_v43, %v13251_v22  ;;  %v3507_v33 = vadd.f32 0.5, %v3459_v6  ;;  %v7700_v4 = vld [vmem:[%s8799_s20 + $0x80] ss:$16 sps:$4 sm:$0xff]   ;;  %v7701_v2 = vld [vmem:[%s8799_s20 + $0x88] ss:$16 sps:$4 sm:$0xff]  }
 0x503   : > { %v3370_v35 = vmul.f32 0.5, %v3321_v14  ;;  %7293 = vtanh.f32 %v3365_v28  ;;  %4535 = vmatpush1.bf16.msra.mxu0 %v7700_v4  ;;  %4648 = vmatpush1.bf16.msra.mxu1 %v7701_v2  ;;  %vm3671_vm1 = vcmp.eq.s32.totalorder %v10912_v17, 1  ;;  %v10930_v37 = vsel %vm3665_vm9, %v3601_v42, %v13254_v1  ;;  %v7702_v28 = vld [vmem:[%s8799_s20 + $0xa4] ss:$16 sps:$4 sm:$0xff]   ;;  %v7703_v14 = vld [vmem:[%s8799_s20 + $0xac] ss:$16 sps:$4 sm:$0xff]  }
 0x504   : > { %v10925_v26 = vsel %vm3664_vm8, %v3600_v52, %v13252_v61  ;;  %13255 = vst [vmem:[#allocation67_spill] sm:$0xff] %v10930_v37  ;;  %v3603_v49 = vmul.f32 %v10844_v32, %v10820_v56  ;;  %4536 = vmatprep.subr.bf16.mxu0 %v7702_v28  ;;  %4649 = vmatprep.subr.bf16.mxu1 %v7703_v14  ;;  %v3503_v15 = vadd.f32 0.5, %v3455_v40  ;;  %v3460_v58 = vmul.f32 0.5, %v7282_v54  ;;  %v13256_v36 = vld [vmem:[#allocation154_spill] sm:$0xff]  ;;  %v13258_v56 = vld [vmem:[#allocation156_spill] sm:$0xff]  ;;  %v13261_v61 = vld [vmem:[#allocation59_spill] sm:$0xff] }
 0x505   : > { %7295 = vtanh.f32 %v3370_v35  ;;  %13253 = vst [vmem:[#allocation80_spill] sm:$0xff] %v10925_v26  ;;  %v10936_v12 = vadd.f32 %v3560_v55, %v3544_v9  ;;  %v3561_v43 = vmul.f32 %v7278_v31, %v3507_v33  ;;  %v3774_v6 = vpack.c.bf16 %v10930_v37, %v10925_v26  ;;  %v7284_v35 = vpop.eup %7283  ;;  %v7704_v31 = vld [vmem:[%s8799_s20 + $0xa0] ss:$16 sps:$4 sm:$0xff]   ;;  %v7705_v42 = vld [vmem:[%s8799_s20 + $0xa8] ss:$16 sps:$4 sm:$0xff]   ;;  %v10958_v9 = vpop.permute.xlu0 %3649 }
 0x506   : > { %7297 = vtanh.f32 %v3323_v63  ;;  %v10943_v52 = vsel %vm3666_vm11, %v3602_v59, %v13256_v36  ;;  %v10948_v32 = vsel %vm3667_vm13, %v3603_v49, %v13258_v56  ;;  %v3508_v55 = vadd.f32 0.5, %v3460_v58  ;;  %v10956_v59 = vpop.permute.xlu1 %3652  ;;  %v13260_v54 = vld [vmem:[#allocation54_spill] sm:$0xff]  ;;  %v13262_v1 = vld [vmem:[#allocation160_spill] sm:$0xff]  ;;  %v13267_v58 = vld [vmem:[#allocation159_spill] sm:$0xff] }
 0x507   : > { %13257 = vst [vmem:[#allocation82_spill] sm:$0xff] %v10943_v52  ;;  %13259 = vst [vmem:[#allocation69_spill] sm:$0xff] %v10948_v32  ;;  %7299 = vtanh.f32 %v10936_v12  ;;  %v3368_v40 = vmul.f32 0.5, %v10860_v13  ;;  %v3604_v63 = vmul.f32 %v10865_v10, %v10878_v50  ;;  %4537 = vmatpush1.bf16.msra.mxu0 %v7704_v31  ;;  %4650 = vmatpush1.bf16.msra.mxu1 %v7705_v42  ;;  %v3462_v33 = vmul.f32 0.5, %v7284_v35  ;;  %v7286_v10 = vpop.eup %7285  ;;  %v13269_v36 = vld [vmem:[#allocation142_spill] sm:$0xff]  ;;  %v13271_v31 = vld [vmem:[#allocation56_spill] sm:$0xff] }
 0x508   : > { %3833 = vmatmul.mubr.bf16.gmra.mrb[184].mxu0 %v3774_v6  ;;  %3946 = vmatmul.mubr.bf16.gmra.mrb[216].mxu1 %v3774_v6  ;;  %v3605_v4 = vmul.f32 %v7276_v3, %v10885_v53  ;;  %v3606_v2 = vmul.f32 %v7280_v25, %v3500_v19  ;;  %v10965_v13 = vsel %vm3660_vm2, %v13261_v61, %v13260_v54  ;;  %vm3673_vm4 = vcmp.eq.s32.totalorder %v10956_v59, 1  ;;  %v13263_v53 = vld [vmem:[#allocation157_spill] sm:$0xff]  ;;  %v13265_v3 = vld [vmem:[#allocation55_spill] sm:$0xff]  ;;  %v13266_v25 = vld [vmem:[#allocation144_spill] sm:$0xff]  ;;  %v7288_v28 = vpop.eup %7287 }
 0x509   : > { %vm3672_vm7 = vcmp.eq.s32.totalorder %v10958_v9, 1  ;;  %v3458_v50 = vmul.f32 0.5, %v10892_v45  ;;  %v3545_v49 = vmul.f32 %v3508_v55, %v13262_v1  ;;  %3842 = vmatprep.mubr.bf16.mxu0 %v13230_v57  ;;  %3955 = vmatprep.mubr.bf16.mxu1 %v13230_v57  ;;  %v10976_v0 = vsel %vm3668_vm15, %v3604_v63, %v13263_v53  ;;  %v7706_v35 = vld [vmem:[%s8799_s20 + $0xc4] ss:$16 sps:$4 sm:$0xff]  }
 0x50a   : > { %13264 = vst [vmem:[#allocation84_spill] sm:$0xff] %v10976_v0  ;;  %v10982_v19 = vsel %vm3661_vm3, %v13266_v25, %v13265_v3  ;;  %v3510_v45 = vadd.f32 0.5, %v3462_v33  ;;  %v3371_v14 = vmul.f32 0.5, %v10883_v39  ;;  %v10988_v6 = vsel %vm3669_vm14, %v3605_v4, %v13267_v58  ;;  %4538 = vmatprep.subr.bf16.mxu0 %v7706_v35  ;;  %4651 = vmatprep.subr.bf16.mxu1 %v7707_v21  ;;  %v7290_v55 = vpop.eup %7289  ;;  %v13272_v42 = vld [vmem:[#allocation72_spill] sm:$0xff]  ;;  %v13274_v3 = vld [vmem:[#allocation57_spill] sm:$0xff]  ;;  %v13275_v25 = vld [vmem:[#allocation146_spill] sm:$0xff] }
 0x50b   : > { %13268 = vst [vmem:[#allocation71_spill] sm:$0xff] %v10988_v6  ;;  %v10993_v56 = vsel %vm3670_vm0, %v3606_v2, %v13269_v36  ;;  %v3577_v63 = vadd.f32 %v3561_v43, %v3545_v49  ;;  %7301 = vtanh.f32 %v3368_v40  ;;  %v3607_v39 = vmul.f32 %v7288_v28, %v3503_v15  ;;  %v7708_v4 = vld [vmem:[%s8799_s20 + $0xc0] ss:$16 sps:$4 sm:$0xff]   ;;  %v7292_v2 = vpop.eup %7291  ;;  %v7709_v43 = vld [vmem:[%s8799_s20 + $0xc8] ss:$16 sps:$4 sm:$0xff]  }
 0x50c   : > { %13270 = vst [vmem:[#allocation73_spill] sm:$0xff] %v10993_v56  ;;  %v11001_v33 = vsel %vm3662_vm5, %v13272_v42, %v13271_v31  ;;  %4539 = vmatpush1.bf16.msra.mxu0 %v7708_v4  ;;  %v3463_v54 = vmul.f32 0.5, %v7290_v55  ;;  %v3562_v61 = vmul.f32 %v7286_v10, %v3510_v45  ;;  %v3775_v53 = vpack.c.bf16 %v10948_v32, %v10943_v52  ;;  %v13277_v28 = vld [vmem:[#allocation70_spill] sm:$0xff]  ;;  %v7711_v36 = vld [vmem:[%s8799_s20 + $0xec] ss:$16 sps:$4 sm:$0xff]   ;;  %v13282_v31 = vld [vmem:[#allocation64_spill] sm:$0xff] }
 0x50d   : > { %13273 = vst [vmem:[#allocation88_spill] sm:$0xff] %v11001_v33  ;;  %v11010_v15 = vsel %vm3663_vm6, %v13275_v25, %v13274_v3  ;;  %4652 = vmatpush1.bf16.msra.mxu1 %v7709_v43  ;;  %4540 = vmatprep.subr.bf16.mxu0 %v7710_v23  ;;  %v7294_v40 = vpop.eup %7293  ;;  %7303 = vtanh.f32 %v3577_v63  ;;  %v3465_v49 = vmul.f32 0.5, %v7292_v2  ;;  %v11017_v10 = vsel %vm3671_vm1, %v3607_v39, %v13277_v28  ;;  %v13279_v45 = vld [vmem:[#allocation62_spill] sm:$0xff]  ;;  %v13283_v42 = vld [vmem:[#allocation76_spill] sm:$0xff] }
 0x50e   : > { %13276 = vst [vmem:[#allocation75_spill] sm:$0xff] %v11010_v15  ;;  %13278 = vst [vmem:[#allocation60_spill] sm:$0xff] %v11017_v10  ;;  %v13280_v58 = vld [vmem:[#allocation74_spill] sm:$0xff]  ;;  %4653 = vmatprep.subr.bf16.mxu1 %v7711_v36  ;;  %v3506_v21 = vadd.f32 0.5, %v3458_v50  ;;  %v3511_v55 = vadd.f32 0.5, %v3463_v54  ;;  %7305 = vtanh.f32 %v3371_v14  ;;  %v11030_v4 = vsel %vm3665_vm9, %v13283_v42, %v13282_v31  ;;  %v13298_v36 = vld [vmem:[#allocation149_spill] sm:$0xff] }
 0x50f   : > { %v11023_v29 = vsel %vm3664_vm8, %v13280_v58, %v13279_v45  ;;  %v7296_v35 = vpop.eup %7295  ;;  %13284 = vst [vmem:[#allocation90_spill] sm:$0xff] %v11030_v4  ;;  %v3513_v39 = vadd.f32 0.5, %v3465_v49  ;;  %v11036_v16 = vsel %vm3666_vm11, %v10706_v27, %v10435_v44  ;;  %v11042_v50 = vsel %vm3667_vm13, %v10740_v8, %v10440_v47  ;;  %v7712_v14 = vld [vmem:[%s8799_s20 + $0xe0] ss:$16 sps:$4 sm:$0xff]  }
 0x510   : > { %13281 = vst [vmem:[#allocation61_spill] sm:$0xff] %v11023_v29  ;;  %v3466_v2 = vmul.f32 0.5, %v7296_v35  ;;  %13285 = vst [vmem:[#allocation77_spill] sm:$0xff] %v11036_v16  ;;  %4541 = vmatpush1.bf16.msra.mxu0 %v7712_v14  ;;  %v7298_v54 = vpop.eup %7297  ;;  %v3461_v51 = vmul.f32 0.5, %v7294_v40  ;;  %v13287_v3 = vld [vmem:[#allocation58_spill] sm:$0xff]  ;;  %3956 = vmatmul.mubr.bf16.gmra.mrb[220].mxu1 %v3775_v53  ;;  %v11056_v47 = vsel %vm3669_vm14, %v10798_v20, %v10455_v46  ;;  %v3656_v46 = vpop.permute.xlu1 %3655 }
 0x511   : > { %13286 = vst [vmem:[#allocation155_spill] sm:$0xff] %v11042_v50  ;;  %v3546_v25 = vmul.f32 %v3511_v55, %v13287_v3  ;;  %3843 = vmatmul.mubr.bf16.gmra.mrb[188].mxu0 %v3775_v53  ;;  %v13288_v43 = vld [vmem:[#allocation66_spill] sm:$0xff]  ;;  %v7300_v24 = vpop.eup %7299  ;;  %v3563_v38 = vmul.f32 %v7298_v54, %v3513_v39  ;;  %3965 = vmatprep.mubr.bf16.mxu1 %v13230_v57  ;;  %vm3674_vm2 = vcmp.eq.s32.totalorder %v3656_v46, 1 }
 0x512   : > { %v11050_v44 = vsel %vm3668_vm15, %v10764_v7, %v13288_v43  ;;  %v3514_v27 = vadd.f32 0.5, %v3466_v2  ;;  %3852 = vmatprep.mubr.bf16.mxu0 %v13230_v57  ;;  %v11064_v8 = vsel %vm3670_vm0, %v10826_v5, %v10480_v48  ;;  %v11070_v7 = vsel %vm3671_vm1, %v10888_v30, %v13243_v18  ;;  %4654 = vmatpush1.bf16.msra.mxu1 %v7713_v60  ;;  %v13292_v5 = vld [vmem:[#allocation145_spill] sm:$0xff]  ;;  %v13293_v18 = vld [vmem:[#allocation148_spill] sm:$0xff]  ;;  %v13337_v52 = vld [vmem:[#allocation114_spill] sm:$0xff] }
 0x513   : > { %13289 = vst [vmem:[#allocation92_spill] sm:$0xff] %v11070_v7  ;;  %v3578_v41 = vadd.f32 %v3562_v61, %v3546_v25  ;;  %v3608_v20 = vmul.f32 %v7300_v24, %v3506_v21  ;;  %v11077_v53 = vsel %vm3672_vm7, %v10936_v12, %v13251_v22  ;;  %v11082_v48 = vsel %vm3673_vm4, %v3577_v63, %v13262_v1  ;;  %v3659_v63 = vpop.permute.xlu0 %3658  ;;  %v13310_v30 = vld [vmem:[#allocation81_spill] sm:$0xff] }
 0x514   : > { %13290 = vst [vmem:[#allocation63_spill] sm:$0xff] %v11077_v53  ;;  %13291 = vst [vmem:[#allocation158_spill] sm:$0xff] %v11082_v48  ;;  %v3547_v62 = vmul.f32 %v3514_v27, %v13292_v5  ;;  %v2958_v17 = vsel %vm2926_vm10, %v13293_v18, 0.0  ;;  %v3776_v61 = vpack.c.bf16 %v10988_v6, %v10976_v0  ;;  %vm3675_vm3 = vcmp.eq.s32.totalorder %v3659_v63, 1  ;;  %v13305_v27 = vld [vmem:[#allocation153_spill] sm:$0xff] }
 0x515   : > { %7307 = vtanh.f32 %v3578_v41  ;;  %v11092_v22 = vsel %vm3672_vm7, %v3608_v20, %v2958_v17  ;;  %v11096_v12 = vsel %vm3674_vm2, %v3578_v41, %v13287_v3  ;;  %v7302_v1 = vpop.eup %7301  ;;  %v3509_v40 = vadd.f32 0.5, %v3461_v51  ;;  %v13301_v51 = vld [vmem:[#allocation151_spill] sm:$0xff]  ;;  %v13302_v3 = vld [vmem:[#allocation150_spill] sm:$0xff] }
 0x516   : > { %13295 = vst [vmem:[#allocation68_spill] sm:$0xff] %v11092_v22  ;;  %13296 = vst [vmem:[#allocation86_spill] sm:$0xff] %v11096_v12  ;;  %v3579_v23 = vadd.f32 %v3563_v38, %v3547_v62  ;;  %v3464_v58 = vmul.f32 0.5, %v7302_v1  ;;  %v2959_v21 = vsel %vm2927_vm12, %v13298_v36, 0.0  ;;  %v3777_v42 = vpack.c.bf16 %v11017_v10, %v10993_v56  ;;  %v13306_v38 = vld [vmem:[#allocation152_spill] sm:$0xff]  ;;  %v13311_v1 = vld [vmem:[#allocation83_spill] sm:$0xff] }
 0x517   : > { %v7304_v49 = vpop.eup %7303  ;;  %vm13303_vm10 = vcmp.eq.s32.totalorder %v13302_v3, 1  ;;  %v3709_v17 = vunpack.c.l.bf16 %v13310_v30  ;;  %v13314_v36 = vld [vmem:[#allocation87_spill] sm:$0xff] }
 0x518   : > { %7309 = vtanh.f32 %v3579_v23  ;;  %v11100_v28 = vsel %vm3675_vm3, %v3579_v23, %v13292_v5  ;;  %v7306_v45 = vpop.eup %7305  ;;  %3966 = vmatmul.mubr.bf16.gmra.mrb[224].mxu1 %v3776_v61  ;;  %v3609_v9 = vmul.f32 %v7304_v49, %v3509_v40  ;;  %v3512_v39 = vadd.f32 0.5, %v3464_v58  ;;  %v13309_v5 = vld [vmem:[#allocation79_spill] sm:$0xff]  ;;  %v13312_v40 = vld [vmem:[#allocation94_spill] sm:$0xff] }
 0x519   : > { %13297 = vst [vmem:[#allocation154_spill] sm:$0xff] %v11100_v28  ;;  %3853 = vmatmul.mubr.bf16.gmra.mrb[192].mxu0 %v3776_v61  ;;  %3975 = vmatprep.mubr.bf16.mxu1 %v13230_v57  ;;  %v3467_v31 = vmul.f32 0.5, %v7306_v45  ;;  %v2960_v25 = vsel %vm13303_vm10, %v13301_v51, 0.0  ;;  %v3708_v62 = vunpack.c.l.bf16 %v13309_v5  ;;  %v3712_v18 = vunpack.c.h.bf16 %v13309_v5  ;;  %v13313_v45 = vld [vmem:[#allocation85_spill] sm:$0xff] }
 0x51a   : > { %3862 = vmatprep.mubr.bf16.mxu0 %v13230_v57  ;;  %v11109_v55 = vsel %vm3673_vm4, %v3609_v9, %v2959_v21  ;;  %vm13307_vm4 = vcmp.eq.s32.totalorder %v13306_v38, 1  ;;  %v3713_v61 = vunpack.c.h.bf16 %v13310_v30  ;;  %v3710_v49 = vunpack.c.l.bf16 %v13312_v40  ;;  %v13317_v38 = vld [vmem:[#allocation91_spill] sm:$0xff] }
 0x51b   : > { %13300 = vst [vmem:[#allocation156_spill] sm:$0xff] %v11109_v55  ;;  %v3515_v54 = vadd.f32 0.5, %v3467_v31  ;;  %v2961_v41 = vsel %vm13307_vm4, %v13305_v27, 0.0  ;;  %v3778_v20 = vpack.c.bf16 %v11109_v55, %v11092_v22  ;;  %v3714_v27 = vunpack.c.h.bf16 %v13312_v40  ;;  %v13332_v55 = vld [vmem:[#allocation110_spill] sm:$0xff] }
 0x51f   : > { %v7308_v2 = vpop.eup %7307 }
 0x520   : > { %v3610_v14 = vmul.f32 %v7308_v2, %v3512_v39  ;;  %3976 = vmatmul.mubr.bf16.gmra.mrb[228].mxu1 %v3777_v42  ;;  %v13316_v2 = vld [vmem:[#allocation89_spill] sm:$0xff] }
 0x521   : > { %3863 = vmatmul.mubr.bf16.gmra.mrb[196].mxu0 %v3777_v42  ;;  %3985 = vmatprep.mubr.bf16.mxu1 %v13230_v57  ;;  %v13315_v42 = vld [vmem:[#allocation96_spill] sm:$0xff] }
 0x522   : > { %v7310_v43 = vpop.eup %7309  ;;  %3872 = vmatprep.mubr.bf16.mxu0 %v13230_v57  ;;  %v11119_v59 = vsel %vm3674_vm2, %v3610_v14, %v2960_v25  ;;  %v3711_v39 = vunpack.c.l.bf16 %v13315_v42  ;;  %v3715_v35 = vunpack.c.h.bf16 %v13315_v42  ;;  %v13324_v42 = vld [vmem:[#allocation101_spill] sm:$0xff]  ;;  %v13327_v14 = vld [vmem:[#allocation103_spill] sm:$0xff] }
 0x523   : > { %13304 = vst [vmem:[#allocation54_spill] sm:$0xff] %v11119_v59  ;;  %v3611_v24 = vmul.f32 %v7310_v43, %v3515_v54 }
 0x525   : > { %v11127_v60 = vsel %vm3675_vm3, %v3611_v24, %v2961_v41  ;;  %v13326_v41 = vld [vmem:[#allocation104_spill] sm:$0xff] }
 0x526   : > { %13308 = vst [vmem:[#allocation59_spill] sm:$0xff] %v11127_v60  ;;  %v3779_v46 = vpack.c.bf16 %v11127_v60, %v11119_v59  ;;  %v13331_v59 = vld [vmem:[#allocation108_spill] sm:$0xff] }
 0x527   : > { %v13335_v60 = vld [vmem:[#allocation112_spill] sm:$0xff] }
 0x528   : > { %3986 = vmatmul.mubr.bf16.gmra.mrb[232].mxu1 %v3778_v20 }
 0x529   : > { %3873 = vmatmul.mubr.bf16.gmra.mrb[200].mxu0 %v3778_v20  ;;  %3995 = vmatprep.mubr.bf16.mxu1 %v13230_v57 }
 0x52a   : > { %3882 = vmatprep.mubr.bf16.mxu0 %v13230_v57 }
 0x530   : > { %3996 = vmatmul.mubr.bf16.gmra.mrb[236].mxu1 %v3779_v46 }
 0x531   : > { %3883 = vmatmul.mubr.bf16.gmra.mrb[204].mxu0 %v3779_v46  ;;  %4671 = vmatprep.mubr.bf16.mxu1 %v13230_v57 }
 0x532   : > { %4558 = vmatprep.mubr.bf16.mxu0 %v13230_v57 }
 0x5bb   : > { %v3814_v21 = vpop.f32.mrb[176].mxu0  ;;  %v3927_v31 = vpop.f32.mrb[208].mxu1 }
 0x5bc   : > { %v4006_v3 = vadd.f32 %v3814_v21, %v3708_v62  ;;  %v4008_v25 = vadd.f32 %v3927_v31, %v3710_v49  ;;  %v3816_v43 = vpop.f32.mrb[177].mxu0  ;;  %v3929_v24 = vpop.f32.mrb[209].mxu1  ;;  %v13318_v49 = vld [vmem:[#allocation93_spill] sm:$0xff]  ;;  %v6975_v21 = vld [vmem:[%s11173_s11 + $0x40] sm:$0xff]  }
 0x5bd   : > { %v4007_v20 = vadd.f32 %v3816_v43, %v3709_v17  ;;  %v4009_v46 = vadd.f32 %v3929_v24, %v3711_v39  ;;  %v3818_v5 = vpop.f32.mrb[178].mxu0  ;;  %v3931_v30 = vpop.f32.mrb[210].mxu1  ;;  %v13319_v39 = vld [vmem:[#allocation95_spill] sm:$0xff]  ;;  %v13325_v43 = vld [vmem:[#allocation102_spill] sm:$0xff]  ;;  %6550 = vmatprep.subr.bf16.mxu0 %v6975_v21 }
 0x5be   : > { %v4070_v58 = vmul.f32 0.5, %v4006_v3  ;;  %v4010_v54 = vadd.f32 %v3818_v5, %v3712_v18  ;;  %v4012_v23 = vadd.f32 %v3931_v30, %v3714_v27  ;;  %v3820_v51 = vpop.f32.mrb[179].mxu0  ;;  %v3933_v62 = vpop.f32.mrb[211].mxu1  ;;  %v13320_v3 = vld [vmem:[#allocation98_spill] sm:$0xff]  ;;  %v13321_v27 = vld [vmem:[#allocation97_spill] sm:$0xff] }
 0x5bf   : > { %v4071_v31 = vmul.f32 0.5, %v4007_v20  ;;  %v4011_v9 = vadd.f32 %v3820_v51, %v3713_v61  ;;  %v4013_v40 = vadd.f32 %v3933_v62, %v3715_v35  ;;  %v3718_v18 = vunpack.c.l.bf16 %v13320_v3  ;;  %v13322_v35 = vld [vmem:[#allocation99_spill] sm:$0xff]  ;;  %v13329_v5 = vld [vmem:[#allocation105_spill] sm:$0xff] }
 0x5c0   : > { %7311 = vtanh.f32 %v4070_v58  ;;  %v4073_v17 = vmul.f32 0.5, %v4010_v54  ;;  %v13323_v54 = vld [vmem:[#allocation100_spill] sm:$0xff]  ;;  %v4075_v63 = vmul.f32 0.5, %v4012_v23  ;;  %v13334_v58 = vunpack.c.l.bf16 %v13311_v1 }
 0x5c1   : > { %v4074_v24 = vmul.f32 0.5, %v4011_v9  ;;  %7313 = vtanh.f32 %v4071_v31  ;;  %v3719_v20 = vunpack.c.l.bf16 %v13323_v54  ;;  %v13330_v31 = vld [vmem:[#allocation107_spill] sm:$0xff]  ;;  %v13336_v61 = vunpack.c.l.bf16 %v13313_v45 }
 0x5c2   : > { %7315 = vtanh.f32 %v4073_v17  ;;  %v4072_v17 = vmul.f32 0.5, %v4008_v25  ;;  %v13340_v28 = vunpack.c.h.bf16 %v13320_v3 }
 0x5c3   : > { %7317 = vtanh.f32 %v4009_v46  ;;  %v13328_v46 = vld [vmem:[#allocation106_spill] sm:$0xff] }
 0x5c4   : > { %7319 = vtanh.f32 %v4074_v24  ;;  %v13339_v24 = vld [vmem:[#allocation116_spill] sm:$0xff] }
 0x5c5   : > { %7321 = vtanh.f32 %v4013_v40 }
 0x5c6   : > { %7323 = vtanh.f32 %v4072_v17 }
 0x5c7   : > { %7325 = vtanh.f32 %v4075_v63  ;;  %v11202_v63 = vpop.permute.xlu0 %4362 }
 0x5c8   : > { %vm4407_vm12 = vcmp.eq.s32.totalorder %v11202_v63, 1 }
 0x5ca   : > { %v7312_v51 = vpop.eup %7311 }
 0x5cb   : > { %v4166_v0 = vmul.f32 0.5, %v7312_v51  ;;  %v7314_v32 = vpop.eup %7313 }
 0x5cc   : > { %v3824_v22 = vpop.f32.mrb[180].mxu0  ;;  %v3937_v62 = vpop.f32.mrb[212].mxu1  ;;  %v4167_v37 = vmul.f32 0.5, %v7314_v32 }
 0x5cd   : > { %v4014_v21 = vadd.f32 %v3824_v22, %v13334_v58  ;;  %v4016_v25 = vadd.f32 %v3937_v62, %v3718_v18  ;;  %v3826_v23 = vpop.f32.mrb[181].mxu0  ;;  %v3939_v10 = vpop.f32.mrb[213].mxu1  ;;  %v13338_v22 = vunpack.c.h.bf16 %v13311_v1  ;;  %v4214_v51 = vadd.f32 0.5, %v4166_v0 }
 0x5ce   : > { %v4015_v6 = vadd.f32 %v3826_v23, %v13336_v61  ;;  %v4017_v30 = vadd.f32 %v3939_v10, %v3719_v20  ;;  %v3828_v12 = vpop.f32.mrb[182].mxu0  ;;  %v3941_v56 = vpop.f32.mrb[214].mxu1 }
 0x5cf   : > { %v4076_v48 = vmul.f32 0.5, %v4014_v21  ;;  %v4018_v18 = vadd.f32 %v3828_v12, %v13338_v22  ;;  %v3830_v58 = vpop.f32.mrb[183].mxu0  ;;  %v3943_v62 = vpop.f32.mrb[215].mxu1  ;;  %v4215_v21 = vadd.f32 0.5, %v4167_v37  ;;  %v4078_v1 = vmul.f32 0.5, %v4016_v25 }
 0x5d0   : > { %v7316_v9 = vpop.eup %7315  ;;  %v4077_v61 = vmul.f32 0.5, %v4015_v6  ;;  %v4020_v0 = vadd.f32 %v3941_v56, %v13340_v28  ;;  %v13342_v56 = vunpack.c.h.bf16 %v13323_v54  ;;  %v13345_v54 = vunpack.c.l.bf16 %v13325_v43 }
 0x5d1   : > { %v7318_v10 = vpop.eup %7317  ;;  %v4169_v20 = vmul.f32 0.5, %v7316_v9  ;;  %7327 = vtanh.f32 %v4076_v48  ;;  %v4079_v23 = vmul.f32 0.5, %v4018_v18  ;;  %v4278_v6 = vmul.f32 %v4215_v21, %v10965_v13  ;;  %v11208_v18 = vpop.permute.xlu1 %4359 }
 0x5d2   : > { %v7320_v17 = vpop.eup %7319  ;;  %v4294_v53 = vmul.f32 %v7318_v10, %v4214_v51  ;;  %7329 = vtanh.f32 %v4017_v30  ;;  %v13341_v48 = vunpack.c.h.bf16 %v13313_v45  ;;  %v4081_v51 = vmul.f32 0.5, %v4020_v0 }
 0x5d3   : > { %v4217_v12 = vadd.f32 0.5, %v4169_v20  ;;  %v4170_v22 = vmul.f32 0.5, %v7320_v17  ;;  %7331 = vtanh.f32 %v4077_v61  ;;  %v7322_v32 = vpop.eup %7321  ;;  %v4021_v28 = vadd.f32 %v3943_v62, %v13342_v56  ;;  %v13343_v20 = vld [vmem:[#allocation118_spill] sm:$0xff] }
 0x5d4   : > { %7333 = vtanh.f32 %v4079_v23  ;;  %v4019_v9 = vadd.f32 %v3830_v58, %v13341_v48  ;;  %vm4406_vm7 = vcmp.eq.s32.totalorder %v11208_v18, 1  ;;  %v4310_v3 = vadd.f32 %v4294_v53, %v4278_v6  ;;  %v11226_v0 = vpop.eup %7323 }
 0x5d5   : > { %v4218_v30 = vadd.f32 0.5, %v4170_v22  ;;  %v4295_v25 = vmul.f32 %v7322_v32, %v4217_v12  ;;  %7335 = vtanh.f32 %v4078_v1  ;;  %v13344_v21 = vunpack.c.l.bf16 %v13314_v36 }
 0x5d6   : > { %v4080_v61 = vmul.f32 0.5, %v4019_v9  ;;  %7337 = vtanh.f32 %v4081_v51  ;;  %v11224_v1 = vsel %vm4406_vm7, %v4310_v3, %v10965_v13  ;;  %v13347_v6 = vunpack.c.l.bf16 %v13316_v2 }
 0x5d7   : > { %v4279_v45 = vmul.f32 %v4218_v30, %v10982_v19  ;;  %7339 = vtanh.f32 %v4310_v3  ;;  %13346 = vst [vmem:[#allocation160_spill] sm:$0xff] %v11224_v1  ;;  %v13348_v9 = vunpack.c.l.bf16 %v13326_v41  ;;  %v13349_v13 = vunpack.c.h.bf16 %v13314_v36 }
 0x5d8   : > { %7341 = vtanh.f32 %v4080_v61  ;;  %v13389_v18 = vunpack.c.l.bf16 %v13329_v5 }
 0x5d9   : > { %v4311_v32 = vadd.f32 %v4295_v25, %v4279_v45  ;;  %7343 = vtanh.f32 %v4021_v28  ;;  %v13350_v45 = vunpack.c.h.bf16 %v13325_v43 }
 0x5db   : > { %v3834_v58 = vpop.f32.mrb[184].mxu0  ;;  %v3947_v10 = vpop.f32.mrb[216].mxu1  ;;  %7345 = vtanh.f32 %v4311_v32 }
 0x5dc   : > { %v4022_v12 = vadd.f32 %v3834_v58, %v13344_v21  ;;  %v4024_v62 = vadd.f32 %v3947_v10, %v13345_v54  ;;  %v3836_v22 = vpop.f32.mrb[185].mxu0  ;;  %v3949_v53 = vpop.f32.mrb[217].mxu1 }
 0x5dd   : > { %v4023_v48 = vadd.f32 %v3836_v22, %v13347_v6  ;;  %v4025_v30 = vadd.f32 %v3949_v53, %v13348_v9  ;;  %v3838_v51 = vpop.f32.mrb[186].mxu0  ;;  %v3951_v56 = vpop.f32.mrb[218].mxu1  ;;  %v13351_v53 = vunpack.c.h.bf16 %v13316_v2  ;;  %v11247_v2 = vsel %vm4407_vm12, %v4311_v32, %v10982_v19 }
 0x5de   : > { %v11232_v58 = vpop.eup %7325  ;;  %v4082_v10 = vmul.f32 0.5, %v4022_v12  ;;  %v4084_v21 = vmul.f32 0.5, %v4024_v62  ;;  %v4026_v3 = vadd.f32 %v3838_v51, %v13349_v13  ;;  %v3840_v54 = vpop.f32.mrb[187].mxu0  ;;  %v4028_v22 = vadd.f32 %v3951_v56, %v13350_v45  ;;  %v13353_v13 = vld [vmem:[#allocation120_spill] sm:$0xff]  ;;  %13354 = vst [vmem:[#allocation157_spill] sm:$0xff] %v11247_v2 }
 0x5df   : > { %v3953_v17 = vpop.f32.mrb[219].mxu1  ;;  %v7328_v25 = vpop.eup %7327  ;;  %v4083_v61 = vmul.f32 0.5, %v4023_v48  ;;  %v4027_v6 = vadd.f32 %v3840_v54, %v13351_v53  ;;  %v13352_v12 = vunpack.c.h.bf16 %v13326_v41 }
 0x5e0   : > { %v7330_v9 = vpop.eup %7329  ;;  %v4172_v23 = vmul.f32 0.5, %v7328_v25  ;;  %7347 = vtanh.f32 %v4082_v10  ;;  %v4085_v28 = vmul.f32 0.5, %v4026_v3  ;;  %v13355_v3 = vld [vmem:[#allocation122_spill] sm:$0xff]  ;;  %v4087_v32 = vmul.f32 0.5, %v4028_v22 }
 0x5e1   : > { %v4029_v62 = vadd.f32 %v3953_v17, %v13352_v12  ;;  %v7332_v36 = vpop.eup %7331  ;;  %7349 = vtanh.f32 %v4084_v21  ;;  %v4086_v51 = vmul.f32 0.5, %v4027_v6  ;;  %v13358_v21 = vunpack.c.l.bf16 %v13318_v49 }
 0x5e2   : > { %v7334_v26 = vpop.eup %7333  ;;  %v4220_v43 = vadd.f32 0.5, %v4172_v23  ;;  %v4173_v56 = vmul.f32 0.5, %v7332_v36  ;;  %7351 = vtanh.f32 %v4083_v61  ;;  %v13356_v23 = vunpack.c.l.bf16 %v13317_v38 }
 0x5e3   : > { %v4175_v10 = vmul.f32 0.5, %v7334_v26  ;;  %7353 = vtanh.f32 %v4025_v30  ;;  %v3957_v17 = vpop.f32.mrb[220].mxu1  ;;  %v11251_v25 = vpop.eup %7335  ;;  %v13357_v30 = vunpack.c.l.bf16 %v13328_v46 }
 0x5e4   : > { %v3844_v41 = vpop.f32.mrb[188].mxu0  ;;  %v4221_v45 = vadd.f32 0.5, %v4173_v56  ;;  %v4296_v53 = vmul.f32 %v7330_v9, %v4220_v43  ;;  %7355 = vtanh.f32 %v4085_v28  ;;  %v3959_v12 = vpop.f32.mrb[221].mxu1 }
 0x5e5   : > { %v4030_v61 = vadd.f32 %v3844_v41, %v13356_v23  ;;  %v3846_v6 = vpop.f32.mrb[189].mxu0  ;;  %v11255_v19 = vpop.eup %7337  ;;  %v4223_v26 = vadd.f32 0.5, %v4175_v10  ;;  %v4032_v36 = vadd.f32 %v3957_v17, %v13357_v30  ;;  %7357 = vtanh.f32 %v4086_v51 }
 0x5e6   : > { %v4031_v54 = vadd.f32 %v3846_v6, %v13358_v21  ;;  %v3848_v48 = vpop.f32.mrb[190].mxu0  ;;  %v3961_v37 = vpop.f32.mrb[222].mxu1  ;;  %v4280_v9 = vmul.f32 %v4221_v45, %v11001_v33  ;;  %7359 = vtanh.f32 %v4029_v62  ;;  %v13360_v17 = vunpack.c.l.bf16 %v13331_v59 }
 0x5e7   : > { %v11261_v56 = vpop.eup %7339  ;;  %v4088_v28 = vmul.f32 0.5, %v4030_v61  ;;  %v3850_v43 = vpop.f32.mrb[191].mxu0  ;;  %v4090_v22 = vmul.f32 0.5, %v4032_v36  ;;  %v4168_v6 = vmul.f32 0.5, %v11226_v0  ;;  %v13362_v61 = vunpack.c.h.bf16 %v13317_v38 }
 0x5e8   : > { %v3963_v41 = vpop.f32.mrb[223].mxu1  ;;  %v7342_v10 = vpop.eup %7341  ;;  %v4089_v1 = vmul.f32 0.5, %v4031_v54  ;;  %v4033_v30 = vadd.f32 %v3959_v12, %v13360_v17  ;;  %v11268_v40 = vadd.f32 %v4296_v53, %v4280_v9  ;;  %v13363_v62 = vunpack.c.h.bf16 %v13328_v46 }
 0x5e9   : > { %v7344_v21 = vpop.eup %7343  ;;  %v4176_v7 = vmul.f32 0.5, %v7342_v10  ;;  %7361 = vtanh.f32 %v4088_v28  ;;  %v4034_v2 = vadd.f32 %v3848_v48, %v13362_v61  ;;  %v13364_v12 = vunpack.c.h.bf16 %v13318_v49 }
 0x5ea   : > { %13361 = vst [vmem:[#allocation55_spill] sm:$0xff] %v11268_v40  ;;  %v11270_v51 = vpop.eup %7345  ;;  %v4297_v45 = vmul.f32 %v7344_v21, %v4223_v26  ;;  %7363 = vtanh.f32 %v4087_v32  ;;  %v4036_v54 = vadd.f32 %v3961_v37, %v13363_v62  ;;  %v13365_v53 = vunpack.c.h.bf16 %v13331_v59 }
 0x5eb   : > { %v7348_v36 = vpop.eup %7347  ;;  %v4224_v33 = vadd.f32 0.5, %v4176_v7  ;;  %7365 = vtanh.f32 %v4090_v22  ;;  %v4035_v0 = vadd.f32 %v3850_v43, %v13364_v12  ;;  %v4091_v26 = vmul.f32 0.5, %v4034_v2  ;;  %v3967_v38 = vpop.f32.mrb[224].mxu1 }
 0x5ec   : > { %v4037_v9 = vadd.f32 %v3963_v41, %v13365_v53  ;;  %v11280_v28 = vpop.eup %7349  ;;  %v4178_v10 = vmul.f32 0.5, %v7348_v36  ;;  %7367 = vtanh.f32 %v4089_v1  ;;  %v3854_v32 = vpop.f32.mrb[192].mxu0  ;;  %v4093_v7 = vmul.f32 0.5, %v4036_v54 }
 0x5ed   : > { %v7352_v46 = vpop.eup %7351  ;;  %v4281_v37 = vmul.f32 %v4224_v33, %v11010_v15  ;;  %7369 = vtanh.f32 %v4033_v30  ;;  %v4092_v22 = vmul.f32 0.5, %v4035_v0  ;;  %v3856_v49 = vpop.f32.mrb[193].mxu0  ;;  %v13366_v21 = vunpack.c.l.bf16 %v13319_v39 }
 0x5ee   : > { %v3969_v43 = vpop.f32.mrb[225].mxu1  ;;  %v7354_v17 = vpop.eup %7353  ;;  %v4226_v59 = vadd.f32 0.5, %v4178_v10  ;;  %v4179_v41 = vmul.f32 0.5, %v7352_v46  ;;  %7371 = vtanh.f32 %v4091_v26  ;;  %v11286_v36 = vadd.f32 0.5, %v4168_v6 }
 0x5ef   : > { %v4038_v1 = vadd.f32 %v3854_v32, %v13366_v21  ;;  %v3858_v2 = vpop.f32.mrb[194].mxu0  ;;  %v3971_v61 = vpop.f32.mrb[226].mxu1  ;;  %7373 = vtanh.f32 %v11268_v40  ;;  %v11289_v33 = vadd.f32 %v4297_v45, %v4281_v37  ;;  %v13368_v30 = vunpack.c.l.bf16 %v13332_v55 }
 0x5f0   : > { %v7356_v62 = vpop.eup %7355  ;;  %v3860_v12 = vpop.f32.mrb[195].mxu0  ;;  %v4227_v53 = vadd.f32 0.5, %v4179_v41  ;;  %v4298_v10 = vmul.f32 %v7354_v17, %v4226_v59  ;;  %7375 = vtanh.f32 %v4092_v22  ;;  %v4171_v32 = vmul.f32 0.5, %v11232_v58 }
 0x5f1   : > { %13367 = vst [vmem:[#allocation144_spill] sm:$0xff] %v11289_v33  ;;  %v4040_v54 = vadd.f32 %v3967_v38, %v13368_v30  ;;  %v3973_v0 = vpop.f32.mrb[227].mxu1  ;;  %v4181_v26 = vmul.f32 0.5, %v7356_v62  ;;  %v7358_v46 = vpop.eup %7357  ;;  %v4174_v21 = vmul.f32 0.5, %v11251_v25  ;;  %7377 = vtanh.f32 %v4093_v7 }
 0x5f2   : > { %v4094_v6 = vmul.f32 0.5, %v4038_v1  ;;  %v7360_v48 = vpop.eup %7359  ;;  %v4282_v45 = vmul.f32 %v4227_v53, %v11023_v29  ;;  %v4182_v15 = vmul.f32 0.5, %v7358_v46  ;;  %7379 = vtanh.f32 %v4037_v9 }
 0x5f3   : > { %v4229_v37 = vadd.f32 0.5, %v4181_v26  ;;  %v7362_v38 = vpop.eup %7361  ;;  %v4177_v30 = vmul.f32 0.5, %v11255_v19  ;;  %v13369_v17 = vunpack.c.l.bf16 %v13321_v27  ;;  %v13370_v59 = vunpack.c.l.bf16 %v13335_v60  ;;  %v3977_v26 = vpop.f32.mrb[228].mxu1 }
 0x5f4   : > { %7381 = vtanh.f32 %v4094_v6  ;;  %v11301_v41 = vpop.eup %7363  ;;  %v11303_v25 = vadd.f32 %v4298_v10, %v4282_v45  ;;  %v4230_v7 = vadd.f32 0.5, %v4182_v15  ;;  %v4184_v62 = vmul.f32 0.5, %v7362_v38  ;;  %v3864_v53 = vpop.f32.mrb[196].mxu0 }
 0x5f5   : > { %v4039_v22 = vadd.f32 %v3856_v49, %v13369_v17  ;;  %v4041_v58 = vadd.f32 %v3969_v43, %v13370_v59  ;;  %v4299_v1 = vmul.f32 %v7360_v48, %v4229_v37  ;;  %v11305_v9 = vpop.eup %7365  ;;  %v11307_v46 = vadd.f32 0.5, %v4171_v32  ;;  %v3866_v43 = vpop.f32.mrb[197].mxu0 }
 0x5f6   : > { %7383 = vtanh.f32 %v11289_v33  ;;  %v13371_v49 = vunpack.c.h.bf16 %v13319_v39  ;;  %v3979_v17 = vpop.f32.mrb[229].mxu1  ;;  %v7368_v59 = vpop.eup %7367  ;;  %v4283_v10 = vmul.f32 %v4230_v7, %v11030_v4  ;;  %v4232_v15 = vadd.f32 0.5, %v4184_v62 }
 0x5f7   : > { %v4095_v19 = vmul.f32 0.5, %v4039_v22  ;;  %v4096_v48 = vmul.f32 0.5, %v4040_v54  ;;  %v13372_v45 = vunpack.c.h.bf16 %v13332_v55  ;;  %v3868_v38 = vpop.f32.mrb[198].mxu0  ;;  %v11315_v29 = vpop.f32.mrb[230].mxu1  ;;  %v11317_v40 = vadd.f32 0.5, %v4174_v21 }
 0x5f8   : > { %v4042_v6 = vadd.f32 %v3858_v2, %v13371_v49  ;;  %v7370_v32 = vpop.eup %7369  ;;  %v4185_v22 = vmul.f32 0.5, %v7368_v59  ;;  %v3870_v2 = vpop.f32.mrb[199].mxu0  ;;  %v11321_v23 = vadd.f32 0.5, %v4177_v30  ;;  %v11323_v7 = vadd.f32 %v4299_v1, %v4283_v10 }
 0x5f9   : > { %v4044_v37 = vadd.f32 %v3971_v61, %v13372_v45  ;;  %7385 = vtanh.f32 %v4095_v19  ;;  %v11319_v49 = vpop.f32.mrb[231].mxu1  ;;  %v7372_v33 = vpop.eup %7371  ;;  %v4300_v54 = vmul.f32 %v7370_v32, %v4232_v15  ;;  %v13374_v21 = vunpack.c.h.bf16 %v13321_v27 }
 0x5fa   : > { %v4097_v39 = vmul.f32 0.5, %v4042_v6  ;;  %13373 = vst [vmem:[#allocation159_spill] sm:$0xff] %v11323_v7  ;;  %7387 = vtanh.f32 %v4041_v58  ;;  %v11325_v55 = vpop.eup %7373  ;;  %v4233_v61 = vadd.f32 0.5, %v4185_v22  ;;  %v4187_v62 = vmul.f32 0.5, %v7372_v33 }
 0x5fb   : > { %v4043_v59 = vadd.f32 %v3860_v12, %v13374_v21  ;;  %v7376_v19 = vpop.eup %7375  ;;  %v4180_v6 = vmul.f32 0.5, %v11280_v28  ;;  %v13375_v45 = vunpack.c.h.bf16 %v13335_v60  ;;  %v13376_v1 = vunpack.c.l.bf16 %v13322_v35 }
 0x5fc   : > { %7389 = vtanh.f32 %v4097_v39  ;;  %v11334_v15 = vpop.eup %7377  ;;  %v4284_v33 = vmul.f32 %v4233_v61, %v11036_v16  ;;  %v4235_v58 = vadd.f32 0.5, %v4187_v62  ;;  %v4188_v32 = vmul.f32 0.5, %v7376_v19  ;;  %v11338_v39 = vpop.f32.mrb[232].mxu1 }
 0x5fd   : > { %7391 = vtanh.f32 %v4096_v48  ;;  %v4045_v30 = vadd.f32 %v3973_v0, %v13375_v45  ;;  %v4046_v10 = vadd.f32 %v3864_v53, %v13376_v1  ;;  %v7380_v27 = vpop.eup %7379  ;;  %v4099_v12 = vmul.f32 0.5, %v4044_v37  ;;  %v3874_v48 = vpop.f32.mrb[200].mxu0 }
 0x5fe   : > { %7393 = vtanh.f32 %v11303_v25  ;;  %v4098_v22 = vmul.f32 0.5, %v4043_v59  ;;  %v7382_v60 = vpop.eup %7381  ;;  %v11340_v0 = vadd.f32 %v4300_v54, %v4284_v33  ;;  %v4236_v53 = vadd.f32 0.5, %v4188_v32  ;;  %v11344_v4 = vpop.f32.mrb[201].mxu0 }
 0x5ff   : > { %7395 = vtanh.f32 %v4045_v30  ;;  %v4100_v28 = vmul.f32 0.5, %v4046_v10  ;;  %v4301_v21 = vmul.f32 %v7380_v27, %v4235_v58  ;;  %v13377_v45 = vunpack.c.l.bf16 %v13337_v52  ;;  %v11346_v61 = vpop.f32.mrb[233].mxu1  ;;  %v11352_v10 = vpop.f32.mrb[202].mxu0 }
 0x600   : > { %v4190_v62 = vmul.f32 0.5, %v7382_v60  ;;  %7397 = vtanh.f32 %v4098_v22  ;;  %v13378_v37 = vunpack.c.l.bf16 %v13324_v42  ;;  %v13379_v19 = vunpack.c.l.bf16 %v13339_v24  ;;  %v11354_v54 = vpop.f32.mrb[234].mxu1  ;;  %v11356_v33 = vpop.eup %7383 }
 0x601   : > { %v4048_v1 = vadd.f32 %v3977_v26, %v13377_v45  ;;  %v4183_v26 = vmul.f32 0.5, %v11301_v41  ;;  %7399 = vtanh.f32 %v11323_v7  ;;  %v4285_v58 = vmul.f32 %v4236_v53, %v11042_v50  ;;  %v11363_v22 = vpop.f32.mrb[203].mxu0 }
 0x602   : > { %v4047_v59 = vadd.f32 %v3866_v43, %v13378_v37  ;;  %v4049_v30 = vadd.f32 %v3979_v17, %v13379_v19  ;;  %v13380_v32 = vunpack.c.h.bf16 %v13322_v35  ;;  %v11365_v43 = vpop.f32.mrb[235].mxu1  ;;  %v11367_v17 = vadd.f32 0.5, %v4180_v6 }
 0x603   : > { %v4238_v60 = vadd.f32 0.5, %v4190_v62  ;;  %7401 = vtanh.f32 %v4100_v28  ;;  %v7386_v37 = vpop.eup %7385  ;;  %v11369_v19 = vadd.f32 %v4301_v21, %v4285_v58  ;;  %v13381_v16 = vunpack.c.h.bf16 %v13337_v52  ;;  %v11376_v62 = vpop.permute.xlu1 %4365 }
 0x604   : > { %v4050_v27 = vadd.f32 %v3868_v38, %v13380_v32  ;;  %v4101_v45 = vmul.f32 0.5, %v4047_v59  ;;  %7403 = vtanh.f32 %v4099_v12  ;;  %v7388_v35 = vpop.eup %7387  ;;  %v4191_v38 = vmul.f32 0.5, %v7386_v37 }
 0x605   : > { %v4052_v53 = vadd.f32 %v11315_v29, %v13381_v16  ;;  %v4102_v32 = vmul.f32 0.5, %v4048_v1  ;;  %v13382_v50 = vunpack.c.h.bf16 %v13324_v42  ;;  %v11378_v28 = vadd.f32 0.5, %v4183_v26  ;;  %v11386_v42 = vpop.f32.mrb[204].mxu0 }
 0x606   : > { %v4103_v41 = vmul.f32 0.5, %v4050_v27  ;;  %7405 = vtanh.f32 %v4101_v45  ;;  %v7390_v7 = vpop.eup %7389  ;;  %v4302_v12 = vmul.f32 %v7388_v35, %v4238_v60  ;;  %v13383_v21 = vunpack.c.h.bf16 %v13339_v24  ;;  %v11398_v27 = vpop.f32.mrb[205].mxu0 }
 0x607   : > { %v4051_v6 = vadd.f32 %v3870_v2, %v13382_v50  ;;  %7407 = vtanh.f32 %v11340_v0  ;;  %v11384_v29 = vpop.eup %7391  ;;  %v4239_v16 = vadd.f32 0.5, %v4191_v38  ;;  %v4193_v1 = vmul.f32 0.5, %v7390_v7  ;;  %v11388_v50 = vpop.f32.mrb[236].mxu1 }
 0x608   : > { %v4053_v52 = vadd.f32 %v11319_v49, %v13383_v21  ;;  %7409 = vtanh.f32 %v4049_v30  ;;  %v11390_v2 = vpop.eup %7393  ;;  %v4342_v26 = vmul.f32 %v11261_v56, %v11286_v36  ;;  %v4343_v24 = vmul.f32 %v11270_v51, %v11307_v46  ;;  %v11400_v7 = vpop.f32.mrb[237].mxu1  ;;  %v13385_v51 = vld [vmem:[#allocation65_spill] sm:$0xff] }
 0x609   : > { %v4104_v59 = vmul.f32 0.5, %v4051_v6  ;;  %7411 = vtanh.f32 %v4103_v41  ;;  %v13384_v49 = vunpack.c.l.bf16 %v13327_v14  ;;  %v7396_v30 = vpop.eup %7395  ;;  %v4186_v60 = vmul.f32 0.5, %v11305_v9  ;;  %v11404_v41 = vpop.f32.mrb[206].mxu0 }
 0x60a   : > { %v4286_v45 = vmul.f32 %v4239_v16, %v11050_v44  ;;  %v4241_v37 = vadd.f32 0.5, %v4193_v1  ;;  %7413 = vtanh.f32 %v4102_v32  ;;  %v11406_v56 = vpop.f32.mrb[238].mxu1  ;;  %v4105_v36 = vmul.f32 0.5, %v4052_v53  ;;  %v11413_v35 = vpop.f32.mrb[207].mxu0  ;;  %v13387_v53 = vld [vmem:[#allocation78_spill] sm:$0xff] }
 0x60b   : > { %v4054_v58 = vadd.f32 %v3874_v48, %v13384_v49  ;;  %7415 = vtanh.f32 %v4104_v59  ;;  %v11411_v46 = vsel %vm4407_vm12, %v4343_v24, %v13385_v51  ;;  %v11415_v9 = vpop.f32.mrb[239].mxu1  ;;  %v7398_v38 = vpop.eup %7397  ;;  %v11424_v63 = vsel %vm4406_vm7, %v4342_v26, %v13387_v53 }
 0x60c   : > { %13386 = vst [vmem:[#allocation142_spill] sm:$0xff] %v11411_v46  ;;  %v11417_v6 = vpop.permute.xlu0 %4371  ;;  %v11419_v32 = vadd.f32 %v4302_v12, %v4286_v45  ;;  %v4303_v21 = vmul.f32 %v7396_v30, %v4241_v37  ;;  %7417 = vtanh.f32 %v4053_v52  ;;  %v11426_v16 = vpop.eup %7399  ;;  %v4194_v59 = vmul.f32 0.5, %v7398_v38 }
 0x60d   : > { %v4106_v48 = vmul.f32 0.5, %v4054_v58  ;;  %v11428_v1 = vpop.permute.xlu1 %4368  ;;  %v4518_v24 = vpack.c.bf16 %v11411_v46, %v11424_v63  ;;  %v13388_v12 = vunpack.c.l.bf16 %v13343_v20  ;;  %v6976_v58 = vld [vmem:[%s11173_s11] sm:$0xff]   ;;  %v7402_v52 = vpop.eup %7401  ;;  %vm4408_vm5 = vcmp.eq.s32.totalorder %v11376_v62, 1 }
 0x60e   : > { %v4055_v26 = vadd.f32 %v11344_v4, %v13389_v18  ;;  %v13390_v30 = vunpack.c.l.bf16 %v13353_v13  ;;  %v13391_v37 = vunpack.c.h.bf16 %v13327_v14  ;;  %vm4409_vm6 = vcmp.eq.s32.totalorder %v11428_v1, 1 }
 0x60f   : > { %7419 = vtanh.f32 %v4106_v48  ;;  %v4056_v49 = vadd.f32 %v11338_v39, %v13388_v12  ;;  %v6977_v48 = vld [vmem:[%s11173_s11 + $0x48] sm:$0xff]   ;;  %v7404_v39 = vpop.eup %7403  ;;  %v4242_v38 = vadd.f32 0.5, %v4194_v59  ;;  %v4196_v53 = vmul.f32 0.5, %v7402_v52  ;;  %4559 = vmatmul.mubr.bf16.vlgmr.msra.gmra.mrb[208].mxu0 %v4518_v24  ;;  %4672 = vmatmul.mubr.bf16.vlgmr.msra.gmra.mrb[240].mxu1 %v4518_v24 }
 0x610   : > { %7421 = vtanh.f32 %v11369_v19  ;;  %v4057_v45 = vadd.f32 %v11346_v61, %v13390_v30  ;;  %v4058_v51 = vadd.f32 %v11352_v10, %v13391_v37  ;;  %v13392_v4 = vunpack.c.h.bf16 %v13343_v20  ;;  %v7406_v61 = vpop.eup %7405  ;;  %4568 = vmatprep.mubr.bf16.mxu0 %v13230_v57  ;;  %4681 = vmatprep.mubr.bf16.mxu1 %v13230_v57  ;;  %v11461_v30 = vpop.permute.xlu0 %4377 }
 0x611   : > { %7423 = vtanh.f32 %v4105_v36  ;;  %v4108_v14 = vmul.f32 0.5, %v4056_v49  ;;  %v4107_v10 = vmul.f32 0.5, %v4055_v26  ;;  %v11457_v36 = vpop.eup %7407  ;;  %v4287_v59 = vmul.f32 %v4242_v38, %v11056_v47  ;;  %6551 = vmatpush3.bf16.msra.mxu0 %v6976_v58 }
 0x612   : > { %v11452_v12 = vadd.f32 %v11354_v54, %v13392_v4  ;;  %7425 = vtanh.f32 %v11419_v32  ;;  %v4109_v18 = vmul.f32 0.5, %v4058_v51  ;;  %v4244_v24 = vadd.f32 0.5, %v4196_v53  ;;  %v6978_v54 = vld [vmem:[%s11173_s11 + $0x8] sm:$0xff]   ;;  %v7410_v52 = vpop.eup %7409  ;;  %6552 = vmatprep.subr.bf16.mxu0 %v6977_v48  ;;  %v6979_v4 = vld [vmem:[%s11173_s11 + $0x50] sm:$0xff]   ;;  %v11470_v53 = vpop.permute.xlu1 %4374 }
 0x613   : > { %v4197_v20 = vmul.f32 0.5, %v7406_v61  ;;  %7427 = vtanh.f32 %v4057_v45  ;;  %v11463_v49 = vadd.f32 0.5, %v4186_v60  ;;  %v4189_v26 = vmul.f32 0.5, %v11334_v15  ;;  %v7412_v38 = vpop.eup %7411 }
 0x614   : > { %7429 = vtanh.f32 %v4107_v10  ;;  %v13393_v37 = vunpack.c.h.bf16 %v13329_v5  ;;  %v11472_v58 = vadd.f32 %v4303_v21, %v4287_v59  ;;  %v4304_v61 = vmul.f32 %v7410_v52, %v4244_v24  ;;  %v11474_v60 = vpop.eup %7413 }
 0x615   : > { %v4245_v45 = vadd.f32 0.5, %v4197_v20  ;;  %7431 = vtanh.f32 %v4109_v18  ;;  %v4199_v46 = vmul.f32 0.5, %v7412_v38  ;;  %v13394_v5 = vunpack.c.h.bf16 %v13353_v13  ;;  %v7416_v48 = vpop.eup %7415  ;;  %6553 = vmatpush3.bf16.msra.mxu0 %v6978_v54  ;;  %v6980_v18 = vld [vmem:[%s11173_s11 + $0x10] sm:$0xff]  }
 0x616   : > { %v4059_v51 = vadd.f32 %v11363_v22, %v13393_v37  ;;  %7433 = vtanh.f32 %v4108_v14  ;;  %v4192_v10 = vmul.f32 0.5, %v11384_v29  ;;  %v4344_v59 = vmul.f32 %v11325_v55, %v11317_v40  ;;  %v7418_v24 = vpop.eup %7417  ;;  %6554 = vmatprep.subr.bf16.mxu0 %v6979_v4  ;;  %v11496_v55 = vpop.permute.xlu0 %4383 }
 0x617   : > { %v4061_v22 = vadd.f32 %v11365_v43, %v13394_v5  ;;  %7435 = vtanh.f32 %v11472_v58  ;;  %v4288_v21 = vmul.f32 %v4245_v45, %v11064_v8  ;;  %v4247_v20 = vadd.f32 0.5, %v4199_v46 }
 0x618   : > { %v4110_v15 = vmul.f32 0.5, %v4059_v51  ;;  %v4200_v14 = vmul.f32 0.5, %v7416_v48  ;;  %v4345_v13 = vmul.f32 %v11356_v33, %v11321_v23  ;;  %v4195_v52 = vmul.f32 0.5, %v7404_v39  ;;  %v11503_v39 = vpop.permute.xlu1 %4380  ;;  %v13398_v48 = vld [vmem:[#allocation109_spill] sm:$0xff] }
 0x619   : > { %v7420_v43 = vpop.eup %7419  ;;  %v11487_v29 = vadd.f32 %v4304_v61, %v4288_v21  ;;  %v11492_v37 = vsel %vm4408_vm5, %v4344_v59, %v10837_v34  ;;  %v4305_v54 = vmul.f32 %v7418_v24, %v4247_v20  ;;  %v13395_v4 = vunpack.c.l.bf16 %v13330_v31  ;;  %6555 = vmatpush3.bf16.msra.mxu0 %v6980_v18  ;;  %v13400_v24 = vld [vmem:[#allocation124_spill] sm:$0xff] }
 0x61a   : > { %7437 = vtanh.f32 %v4110_v15  ;;  %v11494_v40 = vpop.eup %7421  ;;  %v4248_v46 = vadd.f32 0.5, %v4200_v14  ;;  %v4202_v51 = vmul.f32 0.5, %v7420_v43  ;;  %v11501_v23 = vsel %vm4409_vm6, %v4345_v13, %v10849_v11  ;;  %v13397_v11 = vld [vmem:[#allocation92_spill] sm:$0xff] }
 0x61b   : > { %7439 = vtanh.f32 %v4061_v22  ;;  %v7424_v33 = vpop.eup %7423  ;;  %v4519_v34 = vpack.c.bf16 %v11501_v23, %v11492_v37  ;;  %v4062_v38 = vadd.f32 %v11386_v42, %v13395_v4  ;;  %v13396_v45 = vunpack.c.l.bf16 %v13355_v3 }
 0x61c   : > { %7441 = vtanh.f32 %v11487_v29  ;;  %v11514_v15 = vpop.eup %7425  ;;  %vm4410_vm8 = vcmp.eq.s32.totalorder %v11417_v6, 1  ;;  %v4289_v5 = vmul.f32 %v4248_v46, %v13397_v11  ;;  %v4250_v22 = vadd.f32 0.5, %v4202_v51 }
 0x61d   : > { %v4064_v61 = vadd.f32 %v11388_v50, %v13396_v45  ;;  %v13399_v21 = vunpack.c.l.bf16 %v13398_v48  ;;  %v13401_v20 = vunpack.c.l.bf16 %v13400_v24  ;;  %v7428_v14 = vpop.eup %7427  ;;  %vm4411_vm9 = vcmp.eq.s32.totalorder %v11470_v53, 1  ;;  %4569 = vmatmul.mubr.bf16.gmra.mrb[212].mxu0 %v4519_v34  ;;  %4682 = vmatmul.mubr.bf16.gmra.mrb[244].mxu1 %v4519_v34 }
 0x61e   : > { %v4111_v50 = vmul.f32 0.5, %v11452_v12  ;;  %v4112_v18 = vmul.f32 0.5, %v4062_v38  ;;  %v13402_v13 = vunpack.c.h.bf16 %v13330_v31  ;;  %v13403_v46 = vunpack.c.h.bf16 %v13355_v3  ;;  %v7430_v51 = vpop.eup %7429  ;;  %4578 = vmatprep.mubr.bf16.mxu0 %v13230_v57  ;;  %4691 = vmatprep.mubr.bf16.mxu1 %v13230_v57  ;;  %v11538_v3 = vpop.permute.xlu0 %4389 }
 0x61f   : > { %v4063_v59 = vadd.f32 %v11398_v27, %v13399_v21  ;;  %v4065_v42 = vadd.f32 %v11400_v7, %v13401_v20  ;;  %v4237_v4 = vadd.f32 0.5, %v4189_v26  ;;  %v11534_v7 = vadd.f32 %v4305_v54, %v4289_v5  ;;  %v7432_v12 = vpop.eup %7431 }
 0x620   : > { %v4066_v43 = vadd.f32 %v11404_v41, %v13402_v13  ;;  %v11532_v27 = vadd.f32 %v11406_v56, %v13403_v46  ;;  %v4306_v45 = vmul.f32 %v7428_v14, %v4250_v22  ;;  %v4240_v34 = vadd.f32 0.5, %v4192_v10  ;;  %v7434_v41 = vpop.eup %7433 }
 0x621   : > { %v4113_v21 = vmul.f32 0.5, %v4063_v59  ;;  %v4243_v31 = vadd.f32 0.5, %v4195_v52  ;;  %v4203_v38 = vmul.f32 0.5, %v7430_v51  ;;  %7443 = vtanh.f32 %v4112_v18  ;;  %v7436_v22 = vpop.eup %7435  ;;  %v11545_v59 = vpop.permute.xlu1 %4386  ;;  %v13406_v51 = vld [vmem:[#allocation63_spill] sm:$0xff] }
 0x622   : > { %7445 = vtanh.f32 %v11534_v7  ;;  %v4205_v56 = vmul.f32 0.5, %v7432_v12  ;;  %v4115_v26 = vmul.f32 0.5, %v4066_v43  ;;  %v13404_v54 = vunpack.c.h.bf16 %v13398_v48 }
 0x623   : > { %vm4413_vm11 = vcmp.eq.s32.totalorder %v11503_v39, 1  ;;  %v4198_v10 = vmul.f32 0.5, %v11474_v60  ;;  %v4251_v52 = vadd.f32 0.5, %v4203_v38  ;;  %7447 = vtanh.f32 %v4111_v50 }
 0x624   : > { %v4067_v5 = vadd.f32 %v11413_v35, %v13404_v54  ;;  %v13405_v20 = vunpack.c.h.bf16 %v13400_v24  ;;  %v7438_v18 = vpop.eup %7437  ;;  %v4253_v13 = vadd.f32 0.5, %v4205_v56  ;;  %7449 = vtanh.f32 %v4113_v21 }
 0x625   : > { %v4346_v35 = vmul.f32 %v11390_v2, %v11367_v17  ;;  %v7440_v48 = vpop.eup %7439  ;;  %vm4412_vm13 = vcmp.eq.s32.totalorder %v11461_v30, 1  ;;  %v4201_v46 = vmul.f32 0.5, %v7424_v33  ;;  %v4290_v12 = vmul.f32 %v4251_v52, %v13406_v51  ;;  %v13407_v2 = vld [vmem:[#allocation80_spill] sm:$0xff] }
 0x626   : > { %v4069_v14 = vadd.f32 %v11415_v9, %v13405_v20  ;;  %v4116_v43 = vmul.f32 0.5, %v4067_v5  ;;  %v4206_v60 = vmul.f32 0.5, %v7438_v18  ;;  %7451 = vtanh.f32 %v4065_v42  ;;  %v7442_v24 = vpop.eup %7441 }
 0x627   : > { %v4307_v50 = vmul.f32 %v7440_v48, %v4253_v13  ;;  %v4114_v38 = vmul.f32 0.5, %v4064_v61  ;;  %7453 = vtanh.f32 %v4115_v26  ;;  %v4347_v9 = vmul.f32 %v11426_v16, %v11378_v28  ;;  %v11568_v61 = vpop.permute.xlu0 %4395  ;;  %v13409_v28 = vld [vmem:[#allocation67_spill] sm:$0xff]  ;;  %v11579_v26 = vpop.permute.xlu1 %4392  ;;  %v13412_v13 = vld [vmem:[#allocation69_spill] sm:$0xff] }
 0x628   : > { %vm4414_vm15 = vcmp.eq.s32.totalorder %v11496_v55, 1  ;;  %v11558_v21 = vadd.f32 %v4306_v45, %v4290_v12  ;;  %v4254_v17 = vadd.f32 0.5, %v4206_v60  ;;  %v11563_v33 = vsel %vm4410_vm8, %v4346_v35, %v13407_v2  ;;  %v13417_v35 = vld [vmem:[#allocation144_spill] sm:$0xff]  ;;  %v13422_v2 = vld [vmem:[#allocation159_spill] sm:$0xff] }
 0x629   : > { %13408 = vst [vmem:[#allocation56_spill] sm:$0xff] %v11563_v33  ;;  %v4348_v42 = vmul.f32 %v11457_v36, %v11463_v49  ;;  %vm4416_vm14 = vcmp.eq.s32.totalorder %v11538_v3, 1  ;;  %7455 = vtanh.f32 %v4116_v43  ;;  %v11573_v16 = vsel %vm4411_vm9, %v4347_v9, %v13409_v28  ;;  %v13411_v49 = vld [vmem:[#allocation158_spill] sm:$0xff] }
 0x62a   : > { %13410 = vst [vmem:[#allocation72_spill] sm:$0xff] %v11573_v16  ;;  %v4349_v45 = vmul.f32 %v11494_v40, %v4237_v4  ;;  %v11577_v56 = vmul.f32 %v11514_v15, %v4240_v34  ;;  %vm4418_vm0 = vcmp.eq.s32.totalorder %v11568_v61, 1  ;;  %v4246_v36 = vadd.f32 0.5, %v4198_v10  ;;  %v13418_v9 = vld [vmem:[#allocation82_spill] sm:$0xff] }
 0x62b   : > { %7457 = vtanh.f32 %v11558_v21  ;;  %v4291_v54 = vmul.f32 %v4254_v17, %v13411_v49  ;;  %v4520_v5 = vpack.c.bf16 %v11573_v16, %v11563_v33  ;;  %vm4415_vm1 = vcmp.eq.s32.totalorder %v11545_v59, 1  ;;  %v7444_v4 = vpop.eup %7443  ;;  %v13421_v17 = vld [vmem:[#allocation90_spill] sm:$0xff] }
 0x62c   : > { %v4249_v52 = vadd.f32 0.5, %v4201_v46  ;;  %7459 = vtanh.f32 %v4069_v14  ;;  %v4351_v40 = vmul.f32 %v7436_v22, %v4243_v31  ;;  %v4204_v15 = vmul.f32 0.5, %v7434_v41  ;;  %v7446_v10 = vpop.eup %7445  ;;  %v13414_v31 = vld [vmem:[#allocation88_spill] sm:$0xff]  ;;  %v13415_v22 = vld [vmem:[#allocation55_spill] sm:$0xff]  ;;  %v13446_v61 = vld [vmem:[#allocation54_spill] sm:$0xff] }
 0x62d   : > { %v4323_v34 = vadd.f32 %v4307_v50, %v4291_v54  ;;  %7461 = vtanh.f32 %v4114_v38  ;;  %4579 = vmatmul.mubr.bf16.gmra.mrb[216].mxu0 %v4520_v5  ;;  %4692 = vmatmul.mubr.bf16.gmra.mrb[248].mxu1 %v4520_v5  ;;  %v11587_v20 = vmul.f32 %v7442_v24, %v4246_v36  ;;  %v4208_v18 = vmul.f32 0.5, %v7444_v4  ;;  %v13416_v14 = vld [vmem:[#allocation75_spill] sm:$0xff]  ;;  %v7448_v46 = vpop.eup %7447  ;;  %v13420_v24 = vld [vmem:[#allocation61_spill] sm:$0xff] }
 0x62e   : > { %4588 = vmatprep.mubr.bf16.mxu0 %v13230_v57  ;;  %4701 = vmatprep.mubr.bf16.mxu1 %v13230_v57  ;;  %v11594_v43 = vsel %vm4413_vm11, %v4349_v45, %v13412_v13  ;;  %v11600_v41 = vsel %vm4408_vm5, %v13415_v22, %v13414_v31  ;;  %v11606_v48 = vsel %vm4409_vm6, %v13417_v35, %v13416_v14  ;;  %vm4417_vm2 = vcmp.eq.s32.totalorder %v11579_v26, 1  ;;  %v7450_v50 = vpop.eup %7449  ;;  %v11629_v45 = vpop.permute.xlu1 %4398  ;;  %v13423_v54 = vld [vmem:[#allocation77_spill] sm:$0xff]  ;;  %v13440_v26 = vld [vmem:[#allocation156_spill] sm:$0xff] }
 0x62f   : > { %13413 = vst [vmem:[#allocation57_spill] sm:$0xff] %v11594_v43  ;;  %7463 = vtanh.f32 %v4323_v34  ;;  %v4117_v12 = vmul.f32 0.5, %v11532_v27  ;;  %v11610_v60 = vmul.f32 %v7446_v10, %v4249_v52  ;;  %v4256_v38 = vadd.f32 0.5, %v4208_v18 }
 0x630   : > { %v11615_v62 = vsel %vm4412_vm13, %v4348_v42, %v13418_v9  ;;  %v11621_v1 = vsel %vm4410_vm8, %v11303_v25, %v13420_v24  ;;  %v11627_v27 = vsel %vm4411_vm9, %v13422_v2, %v13421_v17  ;;  %v7452_v28 = vpop.eup %7451  ;;  %v4209_v36 = vmul.f32 0.5, %v7450_v50  ;;  %v13424_v25 = vld [vmem:[#allocation155_spill] sm:$0xff]  ;;  %v13433_v9 = vld [vmem:[#allocation154_spill] sm:$0xff] }
 0x631   : > { %13419 = vst [vmem:[#allocation146_spill] sm:$0xff] %v11615_v62  ;;  %v4521_v42 = vpack.c.bf16 %v11594_v43, %v11615_v62  ;;  %v11637_v6 = vsel %vm4412_vm13, %v11340_v0, %v13423_v54  ;;  %v11643_v53 = vsel %vm4413_vm11, %v11369_v19, %v13424_v25  ;;  %v7454_v5 = vpop.eup %7453  ;;  %vm4419_vm3 = vcmp.eq.s32.totalorder %v11629_v45, 1  ;;  %v13438_v25 = vld [vmem:[#allocation73_spill] sm:$0xff]  ;;  %v13444_v45 = vld [vmem:[#allocation59_spill] sm:$0xff] }
 0x632   : > { %v4252_v52 = vadd.f32 0.5, %v4204_v15  ;;  %v4308_v4 = vmul.f32 %v7452_v28, %v4256_v38  ;;  %v11650_v10 = vsel %vm4414_vm15, %v11419_v32, %v11050_v44  ;;  %v4257_v30 = vadd.f32 0.5, %v4209_v36  ;;  %v4405_v2 = vpop.permute.xlu1 %4404  ;;  %v13436_v36 = vld [vmem:[#allocation60_spill] sm:$0xff] }
 0x633   : > { %v4211_v0 = vmul.f32 0.5, %v7454_v5  ;;  %v11656_v39 = vsel %vm4415_vm1, %v11472_v58, %v11056_v47  ;;  %v11662_v19 = vsel %vm4416_vm14, %v11487_v29, %v11064_v8  ;;  %v7456_v15 = vpop.eup %7455  ;;  %v4207_v18 = vmul.f32 0.5, %v7448_v46  ;;  %v13428_v58 = vld [vmem:[#allocation86_spill] sm:$0xff] }
 0x634   : > { %v11668_v44 = vsel %vm4417_vm2, %v11534_v7, %v13397_v11  ;;  %v11674_v47 = vsel %vm4418_vm0, %v11558_v21, %v13406_v51  ;;  %v11679_v32 = vsel %vm4419_vm3, %v4323_v34, %v13411_v49  ;;  %v4292_v29 = vmul.f32 %v4257_v30, %v13428_v58  ;;  %v13429_v7 = vld [vmem:[#allocation71_spill] sm:$0xff]  ;;  %v4402_v34 = vpop.permute.xlu0 %4401 }
 0x635   : > { %13425 = vst [vmem:[#allocation70_spill] sm:$0xff] %v11668_v44  ;;  %13426 = vst [vmem:[#allocation62_spill] sm:$0xff] %v11674_v47  ;;  %v7458_v8 = vpop.eup %7457  ;;  %v4259_v13 = vadd.f32 0.5, %v4211_v0  ;;  %7465 = vtanh.f32 %v4117_v12  ;;  %v4212_v31 = vmul.f32 0.5, %v7456_v15  ;;  %4589 = vmatmul.mubr.bf16.gmra.mrb[220].mxu0 %v4521_v42  ;;  %4702 = vmatmul.mubr.bf16.gmra.mrb[252].mxu1 %v4521_v42  ;;  %v11687_v51 = vsel %vm4415_vm1, %v4351_v40, %v13429_v7  ;;  %v13431_v12 = vld [vmem:[#allocation84_spill] sm:$0xff]  ;;  %v6981_v7 = vld [vmem:[%s11173_s11 + $0x58] sm:$0xff]  }
 0x636   : > { %13427 = vst [vmem:[#allocation74_spill] sm:$0xff] %v11679_v32  ;;  %v7460_v11 = vpop.eup %7459  ;;  %4598 = vmatprep.mubr.bf16.mxu0 %v13230_v57  ;;  %4711 = vmatprep.mubr.bf16.mxu1 %v13230_v57  ;;  %13430 = vst [vmem:[#allocation64_spill] sm:$0xff] %v11687_v51  ;;  %v4354_v21 = vmul.f32 %v7458_v8, %v4252_v52  ;;  %v4324_v22 = vadd.f32 %v4308_v4, %v4292_v29  ;;  %vm4420_vm10 = vcmp.eq.s32.totalorder %v4402_v34, 1  ;;  %v6985_v34 = vld [vmem:[%s11173_s11 + $0x68] sm:$0xff]   ;;  %v13475_v32 = vld [vmem:[#allocation137_spill] sm:$0xff] }
 0x637   : > { %v7462_v49 = vpop.eup %7461  ;;  %v4260_v14 = vadd.f32 0.5, %v4212_v31  ;;  %v4309_v35 = vmul.f32 %v7460_v11, %v4259_v13  ;;  %v4255_v46 = vadd.f32 0.5, %v4207_v18  ;;  %v11693_v50 = vsel %vm4414_vm15, %v11577_v56, %v13431_v12  ;;  %6556 = vmatprep.subr.bf16.mxu0 %v6981_v7  ;;  %v6990_v12 = vld [vmem:[%s11173_s11 + $0x38] sm:$0xff]   ;;  %v11849_v47 = vld [vmem:[%s8720_s3 + $0x20] sm:$0xff] }
 0x638   : > { %13432 = vst [vmem:[#allocation76_spill] sm:$0xff] %v11693_v50  ;;  %7467 = vtanh.f32 %v4324_v22  ;;  %v4522_v40 = vpack.c.bf16 %v11687_v51, %v11693_v50  ;;  %v11700_v24 = vsel %vm4420_vm10, %v4324_v22, %v13428_v58  ;;  %vm4421_vm4 = vcmp.eq.s32.totalorder %v4405_v2, 1  ;;  %v6986_v22 = vld [vmem:[%s11173_s11 + $0x28] sm:$0xff]   ;;  %13488 = vst [vmem:[#allocation153_spill] sm:$0xff] %v11849_v47 }
 0x639   : > { %v7464_v38 = vpop.eup %7463  ;;  %v4293_v59 = vmul.f32 %v4260_v14, %v13433_v9  ;;  %13434 = vst [vmem:[#allocation58_spill] sm:$0xff] %v11700_v24  ;;  %v4210_v56 = vmul.f32 0.5, %v7462_v49  ;;  %v11712_v42 = vsel %vm4417_vm2, %v11610_v60, %v13436_v36  ;;  %v11718_v5 = vsel %vm4416_vm14, %v11587_v20, %v13438_v25  ;;  %v13442_v60 = vld [vmem:[#allocation68_spill] sm:$0xff]  ;;  %v6984_v49 = vld [vmem:[%s11173_s11 + $0x20] sm:$0xff]   ;;  %v13451_v36 = vld [vmem:[#allocation49_spill] sm:$0xff] }
 0x63a   : > { %v4355_v17 = vmul.f32 %v7464_v38, %v4255_v46  ;;  %13437 = vst [vmem:[#allocation145_spill] sm:$0xff] %v11712_v42  ;;  %13439 = vst [vmem:[#allocation148_spill] sm:$0xff] %v11718_v5  ;;  %v4523_v52 = vpack.c.bf16 %v11712_v42, %v11718_v5  ;;  %v11732_v8 = vsel %vm4418_vm0, %v4354_v21, %v13442_v60  ;;  %v6982_v21 = vld [vmem:[%s11173_s11 + $0x18] sm:$0xff]   ;;  %v6987_v14 = vld [vmem:[%s11173_s11 + $0x70] sm:$0xff]  }
 0x63b   : > { %v4325_v28 = vadd.f32 %v4309_v35, %v4293_v59  ;;  %v4258_v4 = vadd.f32 0.5, %v4210_v56  ;;  %13443 = vst [vmem:[#allocation149_spill] sm:$0xff] %v11732_v8  ;;  %6557 = vmatpush3.bf16.msra.mxu0 %v6982_v21  ;;  %v6988_v35 = vld [vmem:[%s11173_s11 + $0x30] sm:$0xff]   ;;  %v6989_v46 = vld [vmem:[%s11173_s11 + $0x78] sm:$0xff]   ;;  %v13448_v38 = vld [vmem:[#allocation46_spill] sm:$0xff] }
 0x63c   : > { %v11727_v3 = vsel %vm4419_vm3, %v4355_v17, %v13440_v26  ;;  %v13449_v59 = vld [vmem:[#allocation47_spill] sm:$0xff] }
 0x63d   : > { %7469 = vtanh.f32 %v4325_v28  ;;  %4599 = vmatmul.mubr.bf16.gmra.mrb[224].mxu0 %v4522_v40  ;;  %4712 = vmatmul.mubr.bf16.gmra.mrb[0].mxu1 %v4522_v40  ;;  %v11704_v55 = vsel %vm4421_vm4, %v4325_v28, %v13433_v9  ;;  %13441 = vst [vmem:[#allocation143_spill] sm:$0xff] %v11727_v3  ;;  %v4524_v29 = vpack.c.bf16 %v11727_v3, %v11732_v8  ;;  %v13450_v28 = vld [vmem:[#allocation48_spill] sm:$0xff]  ;;  %v13460_v2 = vld [vmem:[#allocation115_spill] sm:$0xff]  ;;  %v13470_v3 = vld [vmem:[#allocation125_spill] sm:$0xff] }
 0x63e   : > { %13435 = vst [vmem:[#allocation66_spill] sm:$0xff] %v11704_v55  ;;  %4608 = vmatprep.mubr.bf16.mxu0 %v13230_v57  ;;  %4721 = vmatprep.mubr.bf16.mxu1 %v13230_v57  ;;  %v4462_v17 = vunpack.c.l.bf16 %v13460_v2 }
 0x63f   : > { %v7466_v54 = vpop.eup %7465 }
 0x640   : > { %v4213_v30 = vmul.f32 0.5, %v7466_v54 }
 0x642   : > { %v7468_v0 = vpop.eup %7467  ;;  %v4261_v18 = vadd.f32 0.5, %v4213_v30 }
 0x643   : > { %v4356_v15 = vmul.f32 %v7468_v0, %v4258_v4  ;;  %v13452_v4 = vld [vmem:[#allocation50_spill] sm:$0xff]  ;;  %v13453_v0 = vld [vmem:[#allocation51_spill] sm:$0xff] }
 0x645   : > { %4609 = vmatmul.mubr.bf16.gmra.mrb[228].mxu0 %v4523_v52  ;;  %4722 = vmatmul.mubr.bf16.gmra.mrb[4].mxu1 %v4523_v52  ;;  %v11744_v31 = vsel %vm4420_vm10, %v4356_v15, %v13446_v61 }
 0x646   : > { %4618 = vmatprep.mubr.bf16.mxu0 %v13230_v57  ;;  %4731 = vmatprep.mubr.bf16.mxu1 %v13230_v57  ;;  %13447 = vst [vmem:[#allocation151_spill] sm:$0xff] %v11744_v31 }
 0x647   : > { %v7470_v20 = vpop.eup %7469 }
 0x648   : > { %v4357_v58 = vmul.f32 %v7470_v20, %v4261_v18  ;;  %v13454_v20 = vld [vmem:[#allocation52_spill] sm:$0xff] }
 0x64a   : > { %v11740_v13 = vsel %vm4421_vm4, %v4357_v58, %v13444_v45  ;;  %v13455_v58 = vld [vmem:[#allocation111_spill] sm:$0xff]  ;;  %v13456_v45 = vld [vmem:[#allocation126_spill] sm:$0xff] }
 0x64b   : > { %13445 = vst [vmem:[#allocation147_spill] sm:$0xff] %v11740_v13  ;;  %v4525_v11 = vpack.c.bf16 %v11740_v13, %v11744_v31  ;;  %v4456_v61 = vunpack.c.l.bf16 %v13456_v45  ;;  %v4460_v30 = vunpack.c.h.bf16 %v13456_v45  ;;  %v13463_v31 = vld [vmem:[#allocation121_spill] sm:$0xff] }
 0x64d   : > { %4619 = vmatmul.mubr.bf16.gmra.mrb[232].mxu0 %v4524_v29  ;;  %4732 = vmatmul.mubr.bf16.gmra.mrb[8].mxu1 %v4524_v29  ;;  %v4454_v29 = vunpack.c.l.bf16 %v13455_v58 }
 0x64e   : > { %4628 = vmatprep.mubr.bf16.mxu0 %v13230_v57  ;;  %4741 = vmatprep.mubr.bf16.mxu1 %v13230_v57  ;;  %v6983_v57 = vld [vmem:[%s11173_s11 + $0x60] sm:$0xff]  }
 0x64f   : > { %6558 = vmatprep.subr.bf16.mxu0 %v6983_v57 }
 0x650   : > { %6559 = vmatpush3.bf16.msra.mxu0 %v6984_v49 }
 0x651   : > { %6560 = vmatprep.subr.bf16.mxu0 %v6985_v34  ;;  %v13458_v34 = vld [vmem:[#allocation113_spill] sm:$0xff] }
 0x652   : > { %v4459_v7 = vunpack.c.h.bf16 %v13458_v34 }
 0x654   : > { %6561 = vmatpush3.bf16.msra.mxu0 %v6986_v22  ;;  %v4455_v22 = vunpack.c.l.bf16 %v13458_v34  ;;  %v4466_v34 = vunpack.c.h.bf16 %v13460_v2 }
 0x655   : > { %4629 = vmatmul.mubr.bf16.gmra.mrb[236].mxu0 %v4525_v11  ;;  %4742 = vmatmul.mubr.bf16.gmra.mrb[12].mxu1 %v4525_v11 }
 0x656   : > { %6562 = vmatprep.subr.bf16.mxu0 %v6987_v14  ;;  %v13459_v14 = vld [vmem:[#allocation127_spill] sm:$0xff] }
 0x657   : > { %v4461_v56 = vunpack.c.h.bf16 %v13459_v14 }
 0x658   : > { %6563 = vmatpush3.bf16.msra.mxu0 %v6988_v35  ;;  %v4457_v35 = vunpack.c.l.bf16 %v13459_v14 }
 0x659   : > { %6564 = vmatprep.subr.bf16.mxu0 %v6989_v46  ;;  %v4458_v46 = vunpack.c.h.bf16 %v13455_v58 }
 0x65c   : > { %6565 = vmatpush3.bf16.msra.mxu0 %v6990_v12 }
 0x6e2   : > { %v4560_v57 = vpop.f32.mrb[208].mxu0  ;;  %v4673_v49 = vpop.f32.mrb[240].mxu1 }
 0x6e3   : > { %v4752_v26 = vadd.f32 %v4560_v57, %v4454_v29  ;;  %v4754_v60 = vadd.f32 %v4673_v49, %v4456_v61  ;;  %v4562_v18 = vpop.f32.mrb[209].mxu0  ;;  %v4675_v15 = vpop.f32.mrb[241].mxu1  ;;  %v13461_v61 = vld [vmem:[#allocation117_spill] sm:$0xff] }
 0x6e4   : > { %v4753_v52 = vadd.f32 %v4562_v18, %v4455_v22  ;;  %v4755_v21 = vadd.f32 %v4675_v15, %v4457_v35  ;;  %v4564_v25 = vpop.f32.mrb[210].mxu0  ;;  %v4677_v54 = vpop.f32.mrb[242].mxu1  ;;  %v4463_v57 = vunpack.c.l.bf16 %v13461_v61  ;;  %v4467_v18 = vunpack.c.h.bf16 %v13461_v61  ;;  %v13462_v22 = vld [vmem:[#allocation119_spill] sm:$0xff] }
 0x6e5   : > { %v4816_v40 = vmul.f32 0.5, %v4752_v26  ;;  %v4756_v58 = vadd.f32 %v4564_v25, %v4458_v46  ;;  %v4758_v9 = vadd.f32 %v4677_v54, %v4460_v30  ;;  %v4566_v12 = vpop.f32.mrb[211].mxu0  ;;  %v4679_v29 = vpop.f32.mrb[243].mxu1  ;;  %v13464_v30 = vld [vmem:[#allocation128_spill] sm:$0xff]  ;;  %v13466_v46 = vld [vmem:[#allocation130_spill] sm:$0xff]  ;;  %v13468_v61 = vld [vmem:[#allocation131_spill] sm:$0xff] }
 0x6e6   : > { %v4817_v49 = vmul.f32 0.5, %v4753_v52  ;;  %v4757_v13 = vadd.f32 %v4566_v12, %v4459_v7  ;;  %v4759_v45 = vadd.f32 %v4679_v29, %v4461_v56  ;;  %v4464_v52 = vunpack.c.l.bf16 %v13464_v30  ;;  %v13465_v7 = vld [vmem:[#allocation129_spill] sm:$0xff]  ;;  %v13469_v26 = vld [vmem:[#allocation132_spill] sm:$0xff] }
 0x6e7   : > { %7471 = vtanh.f32 %v4816_v40  ;;  %v4819_v15 = vmul.f32 0.5, %v4756_v58  ;;  %v4465_v56 = vunpack.c.l.bf16 %v13465_v7  ;;  %v4468_v2 = vunpack.c.h.bf16 %v13464_v30  ;;  %v13467_v58 = vld [vmem:[#allocation123_spill] sm:$0xff] }
 0x6e8   : > { %v4820_v35 = vmul.f32 0.5, %v4757_v13  ;;  %7473 = vtanh.f32 %v4817_v49  ;;  %v4469_v40 = vunpack.c.h.bf16 %v13465_v7  ;;  %v4818_v29 = vmul.f32 0.5, %v4754_v60  ;;  %v13473_v49 = vld [vmem:[#allocation135_spill] sm:$0xff] }
 0x6e9   : > { %7475 = vtanh.f32 %v4819_v15  ;;  %v13471_v15 = vld [vmem:[#allocation133_spill] sm:$0xff]  ;;  %v4821_v42 = vmul.f32 0.5, %v4758_v9 }
 0x6ea   : > { %7477 = vtanh.f32 %v4755_v21 }
 0x6eb   : > { %7479 = vtanh.f32 %v4820_v35  ;;  %v13472_v35 = vld [vmem:[#allocation134_spill] sm:$0xff] }
 0x6ec   : > { %7481 = vtanh.f32 %v4759_v45 }
 0x6ed   : > { %7483 = vtanh.f32 %v4818_v29  ;;  %v13474_v29 = vld [vmem:[#allocation136_spill] sm:$0xff] }
 0x6f0   : > { %v4570_v21 = vpop.f32.mrb[212].mxu0  ;;  %v4683_v13 = vpop.f32.mrb[244].mxu1 }
 0x6f1   : > { %v4760_v14 = vadd.f32 %v4570_v21, %v4462_v17  ;;  %v4762_v30 = vadd.f32 %v4683_v13, %v4464_v52  ;;  %v4572_v24 = vpop.f32.mrb[213].mxu0  ;;  %v4685_v8 = vpop.f32.mrb[245].mxu1 }
 0x6f2   : > { %v4761_v12 = vadd.f32 %v4572_v24, %v4463_v57  ;;  %v4763_v5 = vadd.f32 %v4685_v8, %v4465_v56  ;;  %v4574_v60 = vpop.f32.mrb[214].mxu0  ;;  %v4687_v45 = vpop.f32.mrb[246].mxu1 }
 0x6f3   : > { %v7472_v50 = vpop.eup %7471  ;;  %v4822_v25 = vmul.f32 0.5, %v4760_v14  ;;  %v4764_v43 = vadd.f32 %v4574_v60, %v4466_v34  ;;  %v4766_v54 = vadd.f32 %v4687_v45, %v4468_v2  ;;  %v4576_v62 = vpop.f32.mrb[215].mxu0  ;;  %v4824_v8 = vmul.f32 0.5, %v4762_v30 }
 0x6f4   : > { %v4689_v55 = vpop.f32.mrb[247].mxu1  ;;  %v4912_v52 = vmul.f32 0.5, %v7472_v50  ;;  %v4823_v13 = vmul.f32 0.5, %v4761_v12  ;;  %v4765_v21 = vadd.f32 %v4576_v62, %v4467_v18  ;;  %v7474_v9 = vpop.eup %7473  ;;  %v13476_v12 = vld [vmem:[#allocation138_spill] sm:$0xff]  ;;  %v13483_v62 = vunpack.c.l.bf16 %v13466_v46 }
 0x6f5   : > { %7485 = vtanh.f32 %v4822_v25  ;;  %v4825_v24 = vmul.f32 0.5, %v4764_v43  ;;  %v7476_v56 = vpop.eup %7475  ;;  %v4913_v34 = vmul.f32 0.5, %v7474_v9  ;;  %v4767_v50 = vadd.f32 %v4689_v55, %v4469_v40  ;;  %v13477_v43 = vld [vmem:[#allocation139_spill] sm:$0xff] }
 0x6f6   : > { %v4960_v14 = vadd.f32 0.5, %v4912_v52  ;;  %7487 = vtanh.f32 %v4821_v42  ;;  %v4826_v2 = vmul.f32 0.5, %v4765_v21  ;;  %v7478_v60 = vpop.eup %7477  ;;  %v4915_v45 = vmul.f32 0.5, %v7476_v56  ;;  %v13478_v21 = vld [vmem:[#allocation160_spill] sm:$0xff] }
 0x6f7   : > { %7489 = vtanh.f32 %v4823_v13  ;;  %v7480_v18 = vpop.eup %7479  ;;  %v4961_v7 = vadd.f32 0.5, %v4913_v34  ;;  %v13481_v13 = vld [vmem:[#allocation157_spill] sm:$0xff] }
 0x6f8   : > { %v5040_v25 = vmul.f32 %v7478_v60, %v4960_v14  ;;  %7491 = vtanh.f32 %v4825_v24  ;;  %v4963_v57 = vadd.f32 0.5, %v4915_v45  ;;  %v4916_v17 = vmul.f32 0.5, %v7480_v18  ;;  %v7482_v52 = vpop.eup %7481  ;;  %v11821_v60 = vld [vmem:[%s8720_s3] sm:$0xff]  ;;  %v11824_v24 = vld [vmem:[%s8720_s3 + $0x8] sm:$0xff] }
 0x6f9   : > { %7493 = vtanh.f32 %v4763_v5  ;;  %v5024_v9 = vmul.f32 %v4961_v7, %v13478_v21  ;;  %v7484_v56 = vpop.eup %7483  ;;  %v13490_v45 = vunpack.c.h.bf16 %v13466_v46 }
 0x6fa   : > { %7495 = vtanh.f32 %v4826_v2  ;;  %v4964_v34 = vadd.f32 0.5, %v4916_v17  ;;  %v5041_v14 = vmul.f32 %v7482_v52, %v4963_v57  ;;  %v4827_v57 = vmul.f32 0.5, %v4766_v54 }
 0x6fb   : > { %v5056_v42 = vadd.f32 %v5040_v25, %v5024_v9  ;;  %7497 = vtanh.f32 %v4767_v50  ;;  %v13482_v52 = vunpack.c.l.bf16 %v13462_v22  ;;  %v4914_v30 = vmul.f32 0.5, %v7484_v56 }
 0x6fc   : > { %v5025_v17 = vmul.f32 %v4964_v34, %v13481_v13  ;;  %v13484_v50 = vunpack.c.l.bf16 %v13463_v31  ;;  %v13485_v9 = vunpack.c.l.bf16 %v13468_v61  ;;  %v11841_v34 = vld [vmem:[%s8720_s3 + $0x10] sm:$0xff] }
 0x6fd   : > { %13486 = vst [vmem:[#allocation150_spill] sm:$0xff] %v11841_v34  ;;  %7499 = vtanh.f32 %v5056_v42 }
 0x6fe   : > { %7501 = vtanh.f32 %v4824_v8 }
 0x6ff   : > { %7503 = vtanh.f32 %v4827_v57 }
 0x700   : > { %v4580_v7 = vpop.f32.mrb[216].mxu0  ;;  %v4693_v2 = vpop.f32.mrb[248].mxu1 }
 0x701   : > { %v4768_v55 = vadd.f32 %v4580_v7, %v13482_v52  ;;  %v4770_v18 = vadd.f32 %v4693_v2, %v13483_v62  ;;  %v4582_v51 = vpop.f32.mrb[217].mxu0  ;;  %v4695_v5 = vpop.f32.mrb[249].mxu1  ;;  %v11844_v7 = vld [vmem:[%s8720_s3 + $0x18] sm:$0xff]  ;;  %v5057_v2 = vadd.f32 %v5041_v14, %v5025_v17  ;;  %v13487_v52 = vunpack.c.h.bf16 %v13462_v22 }
 0x702   : > { %v4769_v25 = vadd.f32 %v4582_v51, %v13484_v50  ;;  %v4771_v21 = vadd.f32 %v4695_v5, %v13485_v9  ;;  %v4584_v16 = vpop.f32.mrb[218].mxu0  ;;  %v4697_v13 = vpop.f32.mrb[250].mxu1  ;;  %v11852_v5 = vld [vmem:[%s8720_s3 + $0x28] sm:$0xff] }
 0x703   : > { %v7486_v62 = vpop.eup %7485  ;;  %v4828_v56 = vmul.f32 0.5, %v4768_v55  ;;  %v4772_v33 = vadd.f32 %v4584_v16, %v13487_v52  ;;  %v4586_v51 = vpop.f32.mrb[219].mxu0  ;;  %13489 = vst [vmem:[#allocation152_spill] sm:$0xff] %v11852_v5  ;;  %v4774_v11 = vadd.f32 %v4697_v13, %v13490_v45  ;;  %v13491_v55 = vunpack.c.h.bf16 %v13463_v31 }
 0x704   : > { %v4699_v50 = vpop.f32.mrb[251].mxu1  ;;  %v7488_v9 = vpop.eup %7487  ;;  %v4918_v44 = vmul.f32 0.5, %v7486_v62  ;;  %v4829_v54 = vmul.f32 0.5, %v4769_v25  ;;  %v4962_v62 = vadd.f32 0.5, %v4914_v30  ;;  %v4830_v30 = vmul.f32 0.5, %v4770_v18 }
 0x705   : > { %v7490_v40 = vpop.eup %7489  ;;  %v4831_v42 = vmul.f32 0.5, %v4772_v33  ;;  %v4773_v22 = vadd.f32 %v4586_v51, %v13491_v55  ;;  %7505 = vtanh.f32 %v4828_v56  ;;  %v4917_v33 = vmul.f32 0.5, %v7488_v9 }
 0x706   : > { %v7492_v14 = vpop.eup %7491  ;;  %v4966_v17 = vadd.f32 0.5, %v4918_v44  ;;  %v4919_v52 = vmul.f32 0.5, %v7490_v40  ;;  %7507 = vtanh.f32 %v4771_v21  ;;  %v13492_v44 = vunpack.c.h.bf16 %v13468_v61 }
 0x707   : > { %v7494_v25 = vpop.eup %7493  ;;  %v4921_v46 = vmul.f32 0.5, %v7492_v14  ;;  %v4832_v45 = vmul.f32 0.5, %v4773_v22  ;;  %7509 = vtanh.f32 %v4829_v54  ;;  %v13493_v9 = vunpack.c.l.bf16 %v13467_v58 }
 0x708   : > { %v7496_v57 = vpop.eup %7495  ;;  %v4967_v13 = vadd.f32 0.5, %v4919_v52  ;;  %v5042_v31 = vmul.f32 %v7494_v25, %v4966_v17  ;;  %v4590_v51 = vpop.f32.mrb[220].mxu0  ;;  %7511 = vtanh.f32 %v4831_v42  ;;  %v4775_v40 = vadd.f32 %v4699_v50, %v13492_v44 }
 0x709   : > { %v4703_v55 = vpop.f32.mrb[252].mxu1  ;;  %v4969_v16 = vadd.f32 0.5, %v4921_v46  ;;  %v4922_v34 = vmul.f32 0.5, %v7496_v57  ;;  %v4592_v56 = vpop.f32.mrb[221].mxu0  ;;  %7513 = vtanh.f32 %v5057_v2  ;;  %v4776_v22 = vadd.f32 %v4590_v51, %v13493_v9 }
 0x70a   : > { %v4705_v8 = vpop.f32.mrb[253].mxu1  ;;  %v7498_v47 = vpop.eup %7497  ;;  %v5026_v21 = vmul.f32 %v4967_v13, %v11600_v41  ;;  %7515 = vtanh.f32 %v4832_v45  ;;  %v13494_v42 = vunpack.c.l.bf16 %v13469_v26  ;;  %v4833_v57 = vmul.f32 0.5, %v4774_v11 }
 0x70b   : > { %v4594_v14 = vpop.f32.mrb[222].mxu0  ;;  %v4707_v54 = vpop.f32.mrb[254].mxu1  ;;  %v4970_v17 = vadd.f32 0.5, %v4922_v34  ;;  %v5043_v52 = vmul.f32 %v7498_v47, %v4969_v16  ;;  %v4834_v44 = vmul.f32 0.5, %v4776_v22  ;;  %v13495_v2 = vunpack.c.l.bf16 %v13470_v3 }
 0x70c   : > { %v4778_v25 = vadd.f32 %v4703_v55, %v13494_v42  ;;  %v4596_v61 = vpop.f32.mrb[223].mxu0  ;;  %v4709_v50 = vpop.f32.mrb[255].mxu1  ;;  %v5058_v46 = vadd.f32 %v5042_v31, %v5026_v21  ;;  %7517 = vtanh.f32 %v4775_v40  ;;  %v13496_v51 = vunpack.c.l.bf16 %v13471_v15 }
 0x70d   : > { %v4777_v41 = vadd.f32 %v4592_v56, %v13495_v2  ;;  %v7500_v18 = vpop.eup %7499  ;;  %v5027_v13 = vmul.f32 %v4970_v17, %v11606_v48  ;;  %v13497_v47 = vunpack.c.h.bf16 %v13467_v58  ;;  %7519 = vtanh.f32 %v4830_v30 }
 0x70e   : > { %v4779_v34 = vadd.f32 %v4705_v8, %v13496_v51  ;;  %v7502_v45 = vpop.eup %7501  ;;  %v13498_v31 = vunpack.c.h.bf16 %v13469_v26  ;;  %v13499_v21 = vunpack.c.h.bf16 %v13470_v3  ;;  %v11880_v22 = vadd.f32 0.5, %v4917_v33 }
 0x70f   : > { %v4780_v16 = vadd.f32 %v4594_v14, %v13497_v47  ;;  %v4835_v55 = vmul.f32 0.5, %v4777_v41  ;;  %v7504_v56 = vpop.eup %7503  ;;  %v11882_v48 = vadd.f32 %v5043_v52, %v5027_v13  ;;  %7521 = vtanh.f32 %v4834_v44 }
 0x710   : > { %v4782_v11 = vadd.f32 %v4707_v54, %v13498_v31  ;;  %v4781_v9 = vadd.f32 %v4596_v61, %v13499_v21  ;;  %v13500_v8 = vunpack.c.h.bf16 %v13471_v15  ;;  %v7506_v58 = vpop.eup %7505  ;;  %7523 = vtanh.f32 %v4833_v57  ;;  %v4600_v17 = vpop.f32.mrb[224].mxu0 }
 0x711   : > { %v4836_v14 = vmul.f32 0.5, %v4778_v25  ;;  %v4837_v30 = vmul.f32 0.5, %v4780_v16  ;;  %v4713_v42 = vpop.f32.mrb[0].mxu1  ;;  %v11886_v26 = vmul.f32 %v7500_v18, %v4962_v62  ;;  %v7508_v54 = vpop.eup %7507  ;;  %7525 = vtanh.f32 %v5058_v46 }
 0x712   : > { %v4783_v40 = vadd.f32 %v4709_v50, %v13500_v8  ;;  %v4924_v3 = vmul.f32 0.5, %v7506_v58  ;;  %v13501_v33 = vunpack.c.l.bf16 %v13448_v38  ;;  %v13502_v52 = vunpack.c.l.bf16 %v13472_v35  ;;  %v4602_v2 = vpop.f32.mrb[225].mxu0  ;;  %v4715_v15 = vpop.f32.mrb[1].mxu1 }
 0x713   : > { %v7510_v50 = vpop.eup %7509  ;;  %7527 = vtanh.f32 %v4835_v55  ;;  %v4838_v57 = vmul.f32 0.5, %v4781_v9  ;;  %v13503_v25 = vunpack.c.l.bf16 %v13449_v59  ;;  %v13504_v62 = vunpack.c.l.bf16 %v13473_v49  ;;  %v4604_v13 = vpop.f32.mrb[226].mxu0 }
 0x714   : > { %v4784_v61 = vadd.f32 %v4600_v17, %v13501_v33  ;;  %v4786_v44 = vadd.f32 %v4713_v42, %v13502_v52  ;;  %v4717_v46 = vpop.f32.mrb[2].mxu1  ;;  %v7512_v51 = vpop.eup %7511  ;;  %v4920_v47 = vmul.f32 0.5, %v7502_v45  ;;  %v4972_v16 = vadd.f32 0.5, %v4924_v3 }
 0x715   : > { %v4785_v41 = vadd.f32 %v4602_v2, %v13503_v25  ;;  %v4787_v18 = vadd.f32 %v4715_v15, %v13504_v62  ;;  %v4925_v31 = vmul.f32 0.5, %v7510_v50  ;;  %7529 = vtanh.f32 %v4779_v34  ;;  %v4606_v21 = vpop.f32.mrb[227].mxu0  ;;  %v4719_v8 = vpop.f32.mrb[3].mxu1 }
 0x716   : > { %v11896_v58 = vpop.eup %7513  ;;  %v4923_v17 = vmul.f32 0.5, %v7504_v56  ;;  %v4927_v55 = vmul.f32 0.5, %v7512_v51  ;;  %7531 = vtanh.f32 %v4837_v30  ;;  %v4840_v9 = vmul.f32 0.5, %v4784_v61 }
 0x717   : > { %v7516_v42 = vpop.eup %7515  ;;  %v4973_v33 = vadd.f32 0.5, %v4925_v31  ;;  %v5044_v52 = vmul.f32 %v7508_v54, %v4972_v16  ;;  %7533 = vtanh.f32 %v4836_v14  ;;  %v4839_v2 = vmul.f32 0.5, %v4782_v11 }
 0x718   : > { %v4975_v15 = vadd.f32 0.5, %v4927_v55  ;;  %v4928_v25 = vmul.f32 0.5, %v7516_v42  ;;  %7535 = vtanh.f32 %v4838_v57  ;;  %v4841_v45 = vmul.f32 0.5, %v4785_v41  ;;  %v7518_v3 = vpop.eup %7517  ;;  %v4610_v11 = vpop.f32.mrb[228].mxu0 }
 0x719   : > { %v5028_v34 = vmul.f32 %v4973_v33, %v11621_v1  ;;  %7537 = vtanh.f32 %v4783_v40  ;;  %v4842_v50 = vmul.f32 0.5, %v4786_v44  ;;  %v13505_v62 = vunpack.c.h.bf16 %v13448_v38  ;;  %v7520_v51 = vpop.eup %7519  ;;  %v4723_v16 = vpop.f32.mrb[4].mxu1 }
 0x71a   : > { %v4976_v30 = vadd.f32 0.5, %v4928_v25  ;;  %v5045_v61 = vmul.f32 %v7518_v3, %v4975_v15  ;;  %7539 = vtanh.f32 %v4840_v9  ;;  %v13506_v54 = vunpack.c.h.bf16 %v13472_v35  ;;  %v7522_v31 = vpop.eup %7521  ;;  %v4612_v44 = vpop.f32.mrb[229].mxu0 }
 0x71b   : > { %v4788_v56 = vadd.f32 %v4604_v13, %v13505_v62  ;;  %v5060_v57 = vadd.f32 %v5044_v52, %v5028_v34  ;;  %7541 = vtanh.f32 %v4839_v2  ;;  %v13507_v1 = vunpack.c.h.bf16 %v13449_v59  ;;  %v4725_v55 = vpop.f32.mrb[5].mxu1  ;;  %v7524_v38 = vpop.eup %7523 }
 0x71c   : > { %v4790_v14 = vadd.f32 %v4717_v46, %v13506_v54  ;;  %v11905_v13 = vadd.f32 0.5, %v4920_v47  ;;  %v5029_v42 = vmul.f32 %v4976_v30, %v11627_v27  ;;  %v4930_v9 = vmul.f32 0.5, %v7522_v31  ;;  %v4614_v35 = vpop.f32.mrb[230].mxu0  ;;  %v4727_v46 = vpop.f32.mrb[6].mxu1 }
 0x71d   : > { %v4843_v41 = vmul.f32 0.5, %v4788_v56  ;;  %v4789_v40 = vadd.f32 %v4606_v21, %v13507_v1  ;;  %7543 = vtanh.f32 %v4841_v45  ;;  %v11908_v33 = vpop.eup %7525  ;;  %v4926_v15 = vmul.f32 0.5, %v7520_v51  ;;  %v11912_v21 = vpop.f32.mrb[231].mxu0 }
 0x71e   : > { %7545 = vtanh.f32 %v4842_v50  ;;  %v13508_v2 = vunpack.c.h.bf16 %v13473_v49  ;;  %v11914_v25 = vpop.f32.mrb[7].mxu1  ;;  %v7528_v47 = vpop.eup %7527  ;;  %v5061_v3 = vadd.f32 %v5045_v61, %v5029_v42  ;;  %v4978_v34 = vadd.f32 0.5, %v4930_v9 }
 0x71f   : > { %v4844_v52 = vmul.f32 0.5, %v4789_v40  ;;  %7547 = vtanh.f32 %v4787_v18  ;;  %v13509_v27 = vunpack.c.l.bf16 %v13450_v28  ;;  %v7530_v62 = vpop.eup %7529  ;;  %v11918_v56 = vadd.f32 0.5, %v4923_v17  ;;  %v11922_v30 = vpop.permute.xlu0 %5105 }
 0x720   : > { %v4791_v59 = vadd.f32 %v4719_v8, %v13508_v2  ;;  %v4931_v51 = vmul.f32 0.5, %v7528_v47  ;;  %7549 = vtanh.f32 %v4843_v41  ;;  %v13510_v50 = vunpack.c.l.bf16 %v13474_v29  ;;  %v7532_v8 = vpop.eup %7531  ;;  %v11924_v54 = vpop.permute.xlu1 %5108 }
 0x721   : > { %v4792_v45 = vadd.f32 %v4610_v11, %v13509_v27  ;;  %7551 = vtanh.f32 %v11882_v48  ;;  %v5046_v61 = vmul.f32 %v7530_v62, %v4978_v34  ;;  %v13511_v31 = vunpack.c.l.bf16 %v13451_v36  ;;  %v7534_v1 = vpop.eup %7533  ;;  %v4620_v27 = vpop.f32.mrb[232].mxu0 }
 0x722   : > { %v4794_v49 = vadd.f32 %v4723_v16, %v13510_v50  ;;  %v11929_v17 = vadd.f32 0.5, %v4926_v15  ;;  %7553 = vtanh.f32 %v5060_v57  ;;  %v4979_v41 = vadd.f32 0.5, %v4931_v51  ;;  %v7536_v42 = vpop.eup %7535  ;;  %v11933_v48 = vpop.f32.mrb[8].mxu1 }
 0x723   : > { %v4846_v18 = vmul.f32 0.5, %v4792_v45  ;;  %v4793_v11 = vadd.f32 %v4612_v44, %v13511_v31  ;;  %v4933_v40 = vmul.f32 0.5, %v7532_v8  ;;  %v4929_v16 = vmul.f32 0.5, %v7524_v38  ;;  %v7538_v34 = vpop.eup %7537  ;;  %v11938_v45 = vpop.f32.mrb[233].mxu0 }
 0x724   : > { %v4845_v9 = vmul.f32 0.5, %v4790_v14  ;;  %7555 = vtanh.f32 %v4844_v52  ;;  %v13512_v2 = vunpack.c.l.bf16 %v13475_v32  ;;  %vm5152_vm12 = vcmp.eq.s32.totalorder %v11922_v30, 1  ;;  %v11940_v14 = vpop.f32.mrb[9].mxu1  ;;  %v7540_v38 = vpop.eup %7539 }
 0x725   : > { %vm5153_vm7 = vcmp.eq.s32.totalorder %v11924_v54, 1  ;;  %v5030_v44 = vmul.f32 %v4979_v41, %v11637_v6  ;;  %v4981_v57 = vadd.f32 0.5, %v4933_v40  ;;  %v4934_v15 = vmul.f32 0.5, %v7536_v42  ;;  %v11946_v8 = vpop.f32.mrb[234].mxu0  ;;  %v11948_v31 = vpop.f32.mrb[10].mxu1 }
 0x726   : > { %v4795_v47 = vadd.f32 %v4725_v55, %v13512_v2  ;;  %7557 = vtanh.f32 %v4791_v59  ;;  %v4847_v55 = vmul.f32 0.5, %v4793_v11  ;;  %v13513_v52 = vunpack.c.h.bf16 %v13450_v28  ;;  %v7542_v6 = vpop.eup %7541  ;;  %v11950_v2 = vpop.f32.mrb[235].mxu0 }
 0x727   : > { %7559 = vtanh.f32 %v4846_v18  ;;  %v13514_v51 = vunpack.c.h.bf16 %v13474_v29  ;;  %v5062_v41 = vadd.f32 %v5046_v61, %v5030_v44  ;;  %v4982_v59 = vadd.f32 0.5, %v4934_v15  ;;  %v11952_v5 = vpop.f32.mrb[11].mxu1  ;;  %v7544_v18 = vpop.eup %7543 }
 0x728   : > { %v4796_v62 = vadd.f32 %v4614_v35, %v13513_v52  ;;  %v5047_v40 = vmul.f32 %v7538_v34, %v4981_v57  ;;  %v4936_v42 = vmul.f32 0.5, %v7540_v38  ;;  %v11954_v11 = vadd.f32 0.5, %v4929_v16  ;;  %v7546_v35 = vpop.eup %7545  ;;  %v11965_v15 = vpop.permute.xlu1 %5111 }
 0x729   : > { %v4798_v50 = vadd.f32 %v4727_v46, %v13514_v51  ;;  %7561 = vtanh.f32 %v5061_v3  ;;  %v11956_v28 = vmul.f32 0.5, %v7534_v1  ;;  %v5031_v46 = vmul.f32 %v4982_v59, %v11643_v53  ;;  %v7548_v61 = vpop.eup %7547  ;;  %v11967_v38 = vpop.permute.xlu0 %5114 }
 0x72a   : > { %v4849_v29 = vmul.f32 0.5, %v4796_v62  ;;  %v4984_v52 = vadd.f32 0.5, %v4936_v42  ;;  %v4937_v51 = vmul.f32 0.5, %v7544_v18  ;;  %7563 = vtanh.f32 %v4845_v9  ;;  %v7550_v1 = vpop.eup %7549 }
 0x72b   : > { %v4848_v34 = vmul.f32 0.5, %v4794_v49  ;;  %7565 = vtanh.f32 %v4847_v55  ;;  %v13515_v44 = vunpack.c.h.bf16 %v13451_v36  ;;  %v13516_v16 = vunpack.c.h.bf16 %v13475_v32  ;;  %v11969_v9 = vpop.eup %7551  ;;  %v11973_v32 = vpop.f32.mrb[236].mxu0 }
 0x72c   : > { %v5063_v53 = vadd.f32 %v5047_v40, %v5031_v46  ;;  %v4985_v62 = vadd.f32 0.5, %v4937_v51  ;;  %v5048_v59 = vmul.f32 %v7548_v61, %v4984_v52  ;;  %7567 = vtanh.f32 %v4795_v47  ;;  %v11977_v55 = vpop.eup %7553  ;;  %v11982_v52 = vpop.f32.mrb[237].mxu0 }
 0x72d   : > { %v4797_v57 = vadd.f32 %v11912_v21, %v13515_v44  ;;  %v4799_v3 = vadd.f32 %v11914_v25, %v13516_v16  ;;  %v4939_v49 = vmul.f32 0.5, %v7550_v1  ;;  %7569 = vtanh.f32 %v4849_v29  ;;  %v11975_v25 = vpop.f32.mrb[12].mxu1 }
 0x72e   : > { %v5089_v21 = vmul.f32 %v11896_v58, %v11880_v22  ;;  %v4935_v42 = vmul.f32 0.5, %v7542_v6  ;;  %v4938_v18 = vmul.f32 0.5, %v7546_v35  ;;  %v5032_v40 = vmul.f32 %v4985_v62, %v11650_v10  ;;  %v11984_v29 = vpop.f32.mrb[13].mxu1  ;;  %v7556_v51 = vpop.eup %7555  ;;  %v13518_v58 = vld [vmem:[#allocation142_spill] sm:$0xff] }
 0x72f   : > { %v4850_v36 = vmul.f32 0.5, %v4797_v57  ;;  %v13517_v47 = vunpack.c.l.bf16 %v13452_v4  ;;  %v4987_v61 = vadd.f32 0.5, %v4939_v49  ;;  %7571 = vtanh.f32 %v4848_v34  ;;  %v11993_v10 = vpop.f32.mrb[238].mxu0  ;;  %v11995_v35 = vpop.f32.mrb[14].mxu1 }
 0x730   : > { %v5168_v22 = vsel %vm5152_vm12, %v11886_v26, %v11424_v63  ;;  %v5169_v6 = vsel %vm5153_vm7, %v5089_v21, %v13518_v58  ;;  %v5064_v44 = vadd.f32 %v5048_v59, %v5032_v40  ;;  %v4940_v57 = vmul.f32 0.5, %v7556_v51  ;;  %v11997_v1 = vpop.f32.mrb[239].mxu0  ;;  %v11999_v34 = vpop.f32.mrb[15].mxu1 }
 0x731   : > { %v4800_v46 = vadd.f32 %v4620_v27, %v13517_v47  ;;  %v7558_v27 = vpop.eup %7557  ;;  %7573 = vtanh.f32 %v4850_v36  ;;  %v5208_v16 = vpack.c.bf16 %v5169_v6, %v5168_v22  ;;  %v4851_v63 = vmul.f32 0.5, %v4798_v50 }
 0x732   : > { %v7560_v62 = vpop.eup %7559  ;;  %v5049_v30 = vmul.f32 %v7558_v27, %v4987_v61  ;;  %7575 = vtanh.f32 %v4799_v3  ;;  %vm5155_vm5 = vcmp.eq.s32.totalorder %v11967_v38, 1  ;;  %v4988_v54 = vadd.f32 0.5, %v4940_v57  ;;  %v13528_v38 = vld [vmem:[#allocation140_spill] sm:$0xff] }
 0x733   : > { %v4852_v26 = vmul.f32 0.5, %v4800_v46  ;;  %7577 = vtanh.f32 %v5062_v41  ;;  %v4942_v49 = vmul.f32 0.5, %v7560_v62  ;;  %5395 = vmatprep.mubr.bf16.mxu0 %v5208_v16  ;;  %v13519_v59 = vunpack.c.l.bf16 %v13476_v12  ;;  %v12005_v21 = vpop.eup %7561 }
 0x734   : > { %vm5154_vm6 = vcmp.eq.s32.totalorder %v11965_v15, 1  ;;  %v13520_v40 = vpack.c.bf16 %v11824_v24, %v11821_v60  ;;  %v13521_v50 = vunpack.c.l.bf16 %v13453_v0  ;;  %v13522_v3 = vunpack.c.l.bf16 %v13477_v43  ;;  %v7564_v51 = vpop.eup %7563  ;;  %v13530_v15 = vld [vmem:[#allocation53_spill] sm:$0xff] }
 0x735   : > { %v4802_v36 = vadd.f32 %v11933_v48, %v13519_v59  ;;  %7579 = vtanh.f32 %v4852_v26  ;;  %v13523_v46 = vunpack.c.h.bf16 %v13452_v4  ;;  %v12021_v61 = vadd.f32 0.5, %v11956_v28  ;;  %v7566_v22 = vpop.eup %7565 }
 0x736   : > { %5396 = vmatmul.mubr.bf16.vlgmr.msra.gmra.mrb[240].mxu0 %v13520_v40  ;;  %v4801_v41 = vadd.f32 %v11938_v45, %v13521_v50  ;;  %v4803_v47 = vadd.f32 %v11940_v14, %v13522_v3  ;;  %7581 = vtanh.f32 %v5063_v53  ;;  %v5033_v60 = vmul.f32 %v4988_v54, %v11656_v39  ;;  %v7568_v4 = vpop.eup %7567  ;;  %v12031_v53 = vpop.permute.xlu1 %5117 }
 0x737   : > { %v4804_v48 = vadd.f32 %v11946_v8, %v13523_v46  ;;  %v4990_v24 = vadd.f32 0.5, %v4942_v49  ;;  %7583 = vtanh.f32 %v4851_v63  ;;  %v13524_v6 = vunpack.c.h.bf16 %v13476_v12  ;;  %v7570_v28 = vpop.eup %7569  ;;  %v12038_v63 = vpop.permute.xlu0 %5120 }
 0x738   : > { %v4853_v58 = vmul.f32 0.5, %v4801_v41  ;;  %v12029_v27 = vadd.f32 0.5, %v4935_v42  ;;  %v5065_v8 = vadd.f32 %v5049_v30, %v5033_v60  ;;  %v4943_v57 = vmul.f32 0.5, %v7566_v22 }
 0x739   : > { %v4855_v45 = vmul.f32 0.5, %v4804_v48  ;;  %v12027_v14 = vadd.f32 %v11948_v31, %v13524_v6  ;;  %7585 = vtanh.f32 %v4803_v47  ;;  %v12033_v39 = vadd.f32 0.5, %v4938_v18  ;;  %v7572_v54 = vpop.eup %7571 }
 0x73a   : > { %v5050_v16 = vmul.f32 %v7568_v4, %v4990_v24  ;;  %7587 = vtanh.f32 %v4853_v58  ;;  %v13525_v62 = vunpack.c.h.bf16 %v13453_v0  ;;  %v4991_v31 = vadd.f32 0.5, %v4943_v57  ;;  %v12048_v41 = vpop.permute.xlu1 %5123  ;;  %v13534_v57 = vld [vmem:[#allocation70_spill] sm:$0xff] }
 0x73b   : > { %7589 = vtanh.f32 %v5064_v44  ;;  %v4945_v42 = vmul.f32 0.5, %v7570_v28  ;;  %v13526_v30 = vunpack.c.h.bf16 %v13477_v43  ;;  %v5090_v18 = vmul.f32 %v11908_v33, %v11905_v13  ;;  %v7574_v59 = vpop.eup %7573  ;;  %v12055_v33 = vpop.permute.xlu0 %5126 }
 0x73c   : > { %v4805_v12 = vadd.f32 %v11950_v2, %v13525_v62  ;;  %7591 = vtanh.f32 %v4855_v45  ;;  %v5091_v0 = vmul.f32 %v11969_v9, %v11918_v56  ;;  %v4941_v2 = vmul.f32 0.5, %v7564_v51  ;;  %v7576_v50 = vpop.eup %7575  ;;  %v13532_v45 = vld [vmem:[#allocation141_spill] sm:$0xff] }
 0x73d   : > { %v4807_v26 = vadd.f32 %v11952_v5, %v13526_v30  ;;  %7593 = vtanh.f32 %v5065_v8  ;;  %v5034_v44 = vmul.f32 %v4991_v31, %v11662_v19  ;;  %v4993_v40 = vadd.f32 0.5, %v4945_v42  ;;  %v12053_v13 = vpop.eup %7577 }
 0x73e   : > { %v4856_v49 = vmul.f32 0.5, %v4805_v12  ;;  %v4946_v43 = vmul.f32 0.5, %v7574_v59  ;;  %v4854_v5 = vmul.f32 0.5, %v4802_v36  ;;  %v5171_v3 = vsel %vm5155_vm5, %v5091_v0, %v11501_v23  ;;  %v12078_v8 = vpop.permute.xlu1 %5129 }
 0x73f   : > { %v5066_v56 = vadd.f32 %v5050_v16, %v5034_v44  ;;  %v5051_v9 = vmul.f32 %v7576_v50, %v4993_v40  ;;  %v5170_v19 = vsel %vm5154_vm6, %v5090_v18, %v11492_v37  ;;  %v7580_v47 = vpop.eup %7579  ;;  %v13527_v36 = vunpack.c.l.bf16 %v13454_v20  ;;  %v12086_v42 = vpop.permute.xlu0 %5132 }
 0x740   : > { %7595 = vtanh.f32 %v4856_v49  ;;  %v4994_v46 = vadd.f32 0.5, %v4946_v43  ;;  %v5209_v48 = vpack.c.bf16 %v5171_v3, %v5170_v19  ;;  %v13529_v23 = vunpack.c.l.bf16 %v13528_v38  ;;  %v12068_v24 = vpop.eup %7581 }
 0x741   : > { %7597 = vtanh.f32 %v4807_v26  ;;  %v4808_v51 = vadd.f32 %v11973_v32, %v13527_v36  ;;  %vm5156_vm8 = vcmp.eq.s32.totalorder %v12031_v53, 1  ;;  %vm5157_vm9 = vcmp.eq.s32.totalorder %v12038_v63, 1  ;;  %v7584_v4 = vpop.eup %7583  ;;  %v13544_v63 = vld [vmem:[#allocation74_spill] sm:$0xff] }
 0x742   : > { %v12066_v60 = vadd.f32 %v11975_v25, %v13529_v23  ;;  %7599 = vtanh.f32 %v5066_v56  ;;  %v4948_v37 = vmul.f32 0.5, %v7580_v47  ;;  %v13531_v22 = vunpack.c.l.bf16 %v13530_v15  ;;  %5403 = vmatprep.mubr.bf16.mxu0 %v5209_v48 }
 0x743   : > { %v13533_v6 = vunpack.c.l.bf16 %v13532_v45  ;;  %v12080_v25 = vadd.f32 0.5, %v4941_v2  ;;  %v5035_v28 = vmul.f32 %v4994_v46, %v13534_v57  ;;  %v4858_v16 = vmul.f32 0.5, %v4808_v51  ;;  %v7586_v31 = vpop.eup %7585 }
 0x744   : > { %v4809_v58 = vadd.f32 %v11982_v52, %v13531_v22  ;;  %v13535_v62 = vunpack.c.h.bf16 %v13454_v20  ;;  %v4996_v52 = vadd.f32 0.5, %v4948_v37  ;;  %7601 = vtanh.f32 %v4854_v5  ;;  %v7588_v0 = vpop.eup %7587 }
 0x745   : > { %v4811_v32 = vadd.f32 %v11984_v29, %v13533_v6  ;;  %v13536_v29 = vld [vmem:[#allocation150_spill] sm:$0xff]  ;;  %v13538_v49 = vunpack.c.h.bf16 %v13528_v38  ;;  %v4944_v59 = vmul.f32 0.5, %v7572_v54  ;;  %v5067_v20 = vadd.f32 %v5051_v9, %v5035_v28  ;;  %v7590_v2 = vpop.eup %7589  ;;  %v5136_v28 = vpop.permute.xlu1 %5135 }
 0x746   : > { %v4812_v12 = vadd.f32 %v11993_v10, %v13535_v62  ;;  %v13537_v30 = vpack.c.bf16 %v11844_v7, %v13536_v29  ;;  %v4859_v26 = vmul.f32 0.5, %v4809_v58  ;;  %7603 = vtanh.f32 %v4858_v16  ;;  %v7592_v50 = vpop.eup %7591  ;;  %v5139_v16 = vpop.permute.xlu0 %5138 }
 0x747   : > { %v12094_v18 = vadd.f32 %v11995_v35, %v13538_v49  ;;  %vm5158_vm11 = vcmp.eq.s32.totalorder %v12048_v41, 1  ;;  %vm5159_vm13 = vcmp.eq.s32.totalorder %v12055_v33, 1  ;;  %vm5160_vm15 = vcmp.eq.s32.totalorder %v12078_v8, 1  ;;  %v7594_v56 = vpop.eup %7593  ;;  %v13551_v41 = vld [vmem:[#allocation64_spill] sm:$0xff] }
 0x748   : > { %5404 = vmatmul.mubr.bf16.gmra.mrb[244].mxu0 %v13537_v30  ;;  %v4861_v10 = vmul.f32 0.5, %v4812_v12  ;;  %v4949_v7 = vmul.f32 0.5, %v7588_v0  ;;  %v5052_v44 = vmul.f32 %v7586_v31, %v4996_v52  ;;  %v4857_v40 = vmul.f32 0.5, %v12027_v14  ;;  %v13548_v0 = vld [vmem:[#allocation152_spill] sm:$0xff] }
 0x749   : > { %7605 = vtanh.f32 %v4811_v32  ;;  %vm5161_vm14 = vcmp.eq.s32.totalorder %v12086_v42, 1  ;;  %v4947_v35 = vmul.f32 0.5, %v7584_v4  ;;  %v13539_v54 = vunpack.c.h.bf16 %v13530_v15  ;;  %v13542_v15 = vld [vmem:[#allocation56_spill] sm:$0xff] }
 0x74a   : > { %7607 = vtanh.f32 %v5067_v20  ;;  %v13540_v5 = vunpack.c.h.bf16 %v13532_v45  ;;  %v4997_v9 = vadd.f32 0.5, %v4949_v7  ;;  %v4951_v19 = vmul.f32 0.5, %v7592_v50  ;;  %v7596_v47 = vpop.eup %7595 }
 0x74b   : > { %v4813_v43 = vadd.f32 %v11997_v1, %v13539_v54  ;;  %7609 = vtanh.f32 %v4859_v26  ;;  %v5092_v14 = vmul.f32 %v11977_v55, %v11929_v17  ;;  %v4992_v46 = vadd.f32 0.5, %v4944_v59  ;;  %v7598_v51 = vpop.eup %7597  ;;  %v13541_v1 = vld [vmem:[#allocation62_spill] sm:$0xff]  ;;  %v13543_v17 = vld [vmem:[#allocation72_spill] sm:$0xff]  ;;  %v13549_v59 = vld [vmem:[#allocation153_spill] sm:$0xff] }
 0x74c   : > { %v4815_v3 = vadd.f32 %v11999_v34, %v13540_v5  ;;  %7611 = vtanh.f32 %v4861_v10  ;;  %v5093_v36 = vmul.f32 %v12005_v21, %v11954_v11  ;;  %v5036_v38 = vmul.f32 %v4997_v9, %v13541_v1  ;;  %v7600_v58 = vpop.eup %7599  ;;  %v5190_v10 = vld [vmem:[%s8720_s3 + $0x30] sm:$0xff] }
 0x74d   : > { %v4862_v48 = vmul.f32 0.5, %v4813_v43  ;;  %v4999_v23 = vadd.f32 0.5, %v4951_v19  ;;  %7613 = vtanh.f32 %v4857_v40  ;;  %v4952_v34 = vmul.f32 0.5, %v7596_v47  ;;  %v13552_v19 = vld [vmem:[#allocation148_spill] sm:$0xff]  ;;  %v13553_v47 = vld [vmem:[#allocation145_spill] sm:$0xff] }
 0x74e   : > { %v4995_v37 = vadd.f32 0.5, %v4947_v35  ;;  %v5172_v22 = vsel %vm5156_vm8, %v5092_v14, %v13542_v15  ;;  %v5173_v55 = vsel %vm5157_vm9, %v5093_v36, %v13543_v17  ;;  %v5068_v45 = vadd.f32 %v5052_v44, %v5036_v38  ;;  %v7602_v53 = vpop.eup %7601 }
 0x74f   : > { %7615 = vtanh.f32 %v4862_v48  ;;  %v5000_v6 = vadd.f32 0.5, %v4952_v34  ;;  %v5053_v11 = vmul.f32 %v7598_v51, %v4999_v23  ;;  %v5210_v21 = vpack.c.bf16 %v5173_v55, %v5172_v22 }
 0x750   : > { %7617 = vtanh.f32 %v4815_v3  ;;  %v5094_v32 = vmul.f32 %v12053_v13, %v12021_v61  ;;  %v5095_v4 = vmul.f32 %v12068_v24, %v12029_v27  ;;  %v5096_v57 = vmul.f32 %v7590_v2, %v12033_v39  ;;  %v7604_v52 = vpop.eup %7603  ;;  %v13545_v61 = vld [vmem:[#allocation146_spill] sm:$0xff]  ;;  %v13546_v39 = vld [vmem:[#allocation57_spill] sm:$0xff]  ;;  %v13547_v24 = vld [vmem:[#allocation76_spill] sm:$0xff] }
 0x751   : > { %7619 = vtanh.f32 %v5068_v45  ;;  %v5037_v62 = vmul.f32 %v5000_v6, %v13544_v63  ;;  %v5097_v12 = vmul.f32 %v7594_v56, %v12080_v25  ;;  %v5098_v31 = vmul.f32 %v7600_v58, %v4992_v46  ;;  %5411 = vmatprep.mubr.bf16.mxu0 %v5210_v21  ;;  %v5191_v2 = vld [vmem:[%s8720_s3 + $0x38] sm:$0xff]  ;;  %v5192_v45 = vld [vmem:[%s8720_s3 + $0x40] sm:$0xff]  ;;  %v5193_v6 = vld [vmem:[%s8720_s3 + $0x48] sm:$0xff] }
 0x752   : > { %v4860_v29 = vmul.f32 0.5, %v12066_v60  ;;  %v5174_v27 = vsel %vm5158_vm11, %v5094_v32, %v13545_v61  ;;  %v5175_v13 = vsel %vm5159_vm13, %v5095_v4, %v13546_v39  ;;  %v5176_v30 = vsel %vm5160_vm15, %v5096_v57, %v13547_v24  ;;  %v13555_v21 = vld [vmem:[#allocation66_spill] sm:$0xff]  ;;  %v5142_v4 = vpop.permute.xlu1 %5141  ;;  %v5145_v57 = vpop.permute.xlu0 %5144  ;;  %v5194_v24 = vld [vmem:[%s8720_s3 + $0x50] sm:$0xff] }
 0x753   : > { %v7606_v26 = vpop.eup %7605  ;;  %v5069_v49 = vadd.f32 %v5053_v11, %v5037_v62  ;;  %v4954_v25 = vmul.f32 0.5, %v7604_v52  ;;  %v13550_v20 = vpack.c.bf16 %v13548_v0, %v13549_v59  ;;  %v5211_v60 = vpack.c.bf16 %v5175_v13, %v5174_v27 }
 0x754   : > { %v5177_v7 = vsel %vm5161_vm14, %v5097_v12, %v13551_v41  ;;  %v7608_v33 = vpop.eup %7607  ;;  %vm5162_vm0 = vcmp.eq.s32.totalorder %v5136_v28, 1  ;;  %vm5163_vm1 = vcmp.eq.s32.totalorder %v5139_v16, 1  ;;  %v4863_v50 = vmul.f32 0.5, %v12094_v18  ;;  %v5196_v41 = vld [vmem:[%s8720_s3 + $0x60] sm:$0xff] }
 0x755   : > { %5412 = vmatmul.mubr.bf16.gmra.mrb[248].mxu0 %v13550_v20  ;;  %v5212_v44 = vpack.c.bf16 %v5177_v7, %v5176_v30  ;;  %v7610_v8 = vpop.eup %7609  ;;  %7621 = vtanh.f32 %v5069_v49  ;;  %v5002_v40 = vadd.f32 0.5, %v4954_v25  ;;  %v5099_v35 = vmul.f32 %v7608_v33, %v4995_v37  ;;  %v13554_v37 = vld [vmem:[#allocation58_spill] sm:$0xff]  ;;  %v5195_v30 = vld [vmem:[%s8720_s3 + $0x58] sm:$0xff]  ;;  %v5197_v7 = vld [vmem:[%s8720_s3 + $0x68] sm:$0xff] }
 0x756   : > { %5419 = vmatprep.mubr.bf16.mxu0 %v5211_v60  ;;  %v7612_v54 = vpop.eup %7611  ;;  %v4950_v43 = vmul.f32 0.5, %v7602_v53  ;;  %7623 = vtanh.f32 %v4860_v29  ;;  %v4955_v5 = vmul.f32 0.5, %v7610_v8  ;;  %v5203_v3 = vpack.c.bf16 %v5191_v2, %v5190_v10  ;;  %v13557_v29 = vld [vmem:[#allocation143_spill] sm:$0xff]  ;;  %v5148_v20 = vpop.permute.xlu1 %5147 }
 0x757   : > { %v7614_v56 = vpop.eup %7613  ;;  %v5054_v9 = vmul.f32 %v7606_v26, %v5002_v40  ;;  %v4957_v42 = vmul.f32 0.5, %v7612_v54  ;;  %v5178_v14 = vsel %vm5162_vm0, %v5098_v31, %v13552_v19  ;;  %v5179_v46 = vsel %vm5163_vm1, %v5099_v35, %v13553_v47  ;;  %v13556_v31 = vld [vmem:[#allocation149_spill] sm:$0xff]  ;;  %v5151_v60 = vpop.permute.xlu0 %5150  ;;  %v13559_v40 = vld [vmem:[#allocation147_spill] sm:$0xff] }
 0x758   : > { %v5003_v36 = vadd.f32 0.5, %v4955_v5  ;;  %v5213_v18 = vpack.c.bf16 %v5179_v46, %v5178_v14  ;;  %7625 = vtanh.f32 %v4863_v50  ;;  %v4998_v23 = vadd.f32 0.5, %v4950_v43  ;;  %v5198_v43 = vld [vmem:[%s8720_s3 + $0x70] sm:$0xff]  ;;  %v5199_v5 = vld [vmem:[%s8720_s3 + $0x78] sm:$0xff]  ;;  %v5217_v47 = vld [vmem:[%s8753_s13 + $0x8] sm:$0xff] }
 0x759   : > { %v7616_v48 = vpop.eup %7615  ;;  %v5005_v1 = vadd.f32 0.5, %v4957_v42  ;;  %v4953_v34 = vmul.f32 0.5, %v7614_v56  ;;  %v5204_v63 = vpack.c.bf16 %v5193_v6, %v5192_v45  ;;  %vm5164_vm2 = vcmp.eq.s32.totalorder %v5142_v4, 1  ;;  %v5220_v45 = vld [vmem:[%s8753_s13 + $0x20] sm:$0xff] }
 0x75a   : > { %v7618_v51 = vpop.eup %7617  ;;  %v4958_v38 = vmul.f32 0.5, %v7616_v48  ;;  %v5038_v15 = vmul.f32 %v5003_v36, %v13554_v37  ;;  %vm5165_vm3 = vcmp.eq.s32.totalorder %v5145_v57, 1  ;;  %v5205_v25 = vpack.c.bf16 %v5195_v30, %v5194_v24  ;;  %v5219_v37 = vld [vmem:[%s8753_s13 + $0x18] sm:$0xff]  ;;  %v5224_v24 = vld [vmem:[%s8753_s13 + $0x40] sm:$0xff] }
 0x75b   : > { %v7620_v22 = vpop.eup %7619  ;;  %v5055_v55 = vmul.f32 %v7618_v51, %v5005_v1  ;;  %v5001_v53 = vadd.f32 0.5, %v4953_v34  ;;  %vm5166_vm10 = vcmp.eq.s32.totalorder %v5148_v20, 1  ;;  %vm5167_vm4 = vcmp.eq.s32.totalorder %v5151_v60, 1  ;;  %v5218_v1 = vld [vmem:[%s8753_s13 + $0x10] sm:$0xff] }
 0x75c   : > { %v5006_v17 = vadd.f32 0.5, %v4958_v38  ;;  %v5070_v58 = vadd.f32 %v5054_v9, %v5038_v15  ;;  %v5100_v11 = vmul.f32 %v7620_v22, %v4998_v23  ;;  %v5206_v35 = vpack.c.bf16 %v5197_v7, %v5196_v41  ;;  %v5216_v9 = vld [vmem:[%s8753_s13] sm:$0xff] }
 0x75d   : > { %5420 = vmatmul.mubr.bf16.gmra.mrb[252].mxu0 %v5203_v3  ;;  %v5207_v3 = vpack.c.bf16 %v5199_v5, %v5198_v43  ;;  %v5228_v43 = vld [vmem:[%s8753_s13 + $0x60] sm:$0xff] }
 0x75e   : > { %5427 = vmatprep.mubr.bf16.mxu0 %v5212_v44  ;;  %v5039_v32 = vmul.f32 %v5006_v17, %v13555_v21  ;;  %7627 = vtanh.f32 %v5070_v58  ;;  %v5180_v52 = vsel %vm5164_vm2, %v5100_v11, %v13556_v31  ;;  %v13558_v44 = vld [vmem:[#allocation151_spill] sm:$0xff] }
 0x75f   : > { %v7622_v28 = vpop.eup %7621 }
 0x760   : > { %v5071_v16 = vadd.f32 %v5055_v55, %v5039_v32  ;;  %v7624_v62 = vpop.eup %7623  ;;  %v5101_v12 = vmul.f32 %v7622_v28, %v5001_v53  ;;  %v5221_v32 = vld [vmem:[%s8753_s13 + $0x28] sm:$0xff] }
 0x761   : > { %v4956_v39 = vmul.f32 0.5, %v7624_v62 }
 0x762   : > { %7629 = vtanh.f32 %v5071_v16  ;;  %v5181_v61 = vsel %vm5165_vm3, %v5101_v12, %v13557_v29  ;;  %v7626_v27 = vpop.eup %7625 }
 0x763   : > { %v5214_v13 = vpack.c.bf16 %v5181_v61, %v5180_v52  ;;  %v4959_v26 = vmul.f32 0.5, %v7626_v27  ;;  %v5004_v49 = vadd.f32 0.5, %v4956_v39  ;;  %v5223_v52 = vld [vmem:[%s8753_s13 + $0x38] sm:$0xff] }
 0x765   : > { %5428 = vmatmul.mubr.bf16.gmra.mrb[0].mxu0 %v5204_v63  ;;  %v5007_v10 = vadd.f32 0.5, %v4959_v26  ;;  %v5222_v63 = vld [vmem:[%s8753_s13 + $0x30] sm:$0xff] }
 0x766   : > { %5435 = vmatprep.mubr.bf16.mxu0 %v5213_v18 }
 0x768   : > { %v7628_v0 = vpop.eup %7627 }
 0x769   : > { %v5102_v59 = vmul.f32 %v7628_v0, %v5004_v49 }
 0x76b   : > { %v5182_v8 = vsel %vm5166_vm10, %v5102_v59, %v13558_v44  ;;  %v5227_v44 = vld [vmem:[%s8753_s13 + $0x58] sm:$0xff] }
 0x76c   : > { %v7630_v2 = vpop.eup %7629 }
 0x76d   : > { %5436 = vmatmul.mubr.bf16.gmra.mrb[4].mxu0 %v5205_v25  ;;  %v5103_v33 = vmul.f32 %v7630_v2, %v5007_v10  ;;  %v5225_v25 = vld [vmem:[%s8753_s13 + $0x48] sm:$0xff]  ;;  %v5226_v2 = vld [vmem:[%s8753_s13 + $0x50] sm:$0xff] }
 0x76e   : > { %5443 = vmatprep.mubr.bf16.mxu0 %v5214_v13 }
 0x76f   : > { %v5183_v50 = vsel %vm5167_vm4, %v5103_v33, %v13559_v40 }
 0x770   : > { %v5215_v54 = vpack.c.bf16 %v5183_v50, %v5182_v8 }
 0x775   : > { %5444 = vmatmul.mubr.bf16.gmra.mrb[8].mxu0 %v5206_v35 }
 0x776   : > { %5451 = vmatprep.mubr.bf16.mxu0 %v5215_v54 }
 0x77d   : > { %5452 = vmatmul.mubr.bf16.gmra.mrb[12].mxu0 %v5207_v3 }
 0x809   : > { %v6566_v56 = vpop.f32.mrb[240].mxu0 }
 0x80a   : > { %v6567_v42 = vpop.f32.mrb[241].mxu0 }
 0x80b   : > { %v6568_v19 = vadd.f32 %v6567_v42, %v6566_v56  ;;  %v6569_v14 = vpop.f32.mrb[242].mxu0 }
 0x80c   : > { %v6570_v46 = vpop.f32.mrb[243].mxu0 }
 0x80d   : > { %v5460_v48 = vadd.f32 %v6568_v19, %v5216_v9  ;;  %v6571_v36 = vadd.f32 %v6570_v46, %v6569_v14  ;;  %v5229_v9 = vld [vmem:[%s8753_s13 + $0x68] sm:$0xff] }
 0x80f   : > { %5476 = vst [vmem:[%s8753_s13] sm:$0xff] %v5460_v48  ;;  %v5461_v18 = vadd.f32 %v6571_v36, %v5217_v47  ;;  %v5230_v48 = vld [vmem:[%s8753_s13 + $0x70] sm:$0xff] }
 0x811   : > { %5477 = vst [vmem:[%s8753_s13 + $0x8] sm:$0xff] %v5461_v18 }
 0x81b   : > { %v6572_v51 = vpop.f32.mrb[244].mxu0 }
 0x81c   : > { %v6573_v38 = vpop.f32.mrb[245].mxu0 }
 0x81d   : > { %v6574_v23 = vadd.f32 %v6573_v38, %v6572_v51  ;;  %v6575_v34 = vpop.f32.mrb[246].mxu0 }
 0x81e   : > { %v6576_v15 = vpop.f32.mrb[247].mxu0 }
 0x81f   : > { %v5462_v22 = vadd.f32 %v6574_v23, %v5218_v1  ;;  %v6577_v17 = vadd.f32 %v6576_v15, %v6575_v34  ;;  %v5231_v1 = vld [vmem:[%s8753_s13 + $0x78] sm:$0xff]  ;;  %v5496_v15 = vld [vmem:[%s8753_s13] sm:$0xff] (!%p6535_p13) }
 0x820   : > { %5514 = vadd.xlane.f32.xlu0 (!%p6535_p13), %v5496_v15 }
 0x821   : > { %5478 = vst [vmem:[%s8753_s13 + $0x10] sm:$0xff] %v5462_v22  ;;  %v5463_v55 = vadd.f32 %v6577_v17, %v5219_v37  ;;  %v5497_v17 = vld [vmem:[%s8753_s13 + $0x8] sm:$0xff] (!%p6535_p13) }
 0x823   : > { %5479 = vst [vmem:[%s8753_s13 + $0x18] sm:$0xff] %v5463_v55 }
 0x824   : > { %5516 = vadd.xlane.f32.xlu0 (!%p6535_p13), %v5497_v17 }
 0x828   : > { %v6578_v58 = vpop.f32.mrb[248].mxu0  ;;  %v5498_v22 = vld [vmem:[%s8753_s13 + $0x10] sm:$0xff] (!%p6535_p13) }
 0x829   : > { %v6579_v6 = vpop.f32.mrb[249].mxu0  ;;  %5518 = vadd.xlane.f32.xlu1 (!%p6535_p13), %v5498_v22 }
 0x82a   : > { %v6580_v11 = vadd.f32 %v6579_v6, %v6578_v58  ;;  %v6581_v21 = vpop.f32.mrb[250].mxu0  ;;  %v5499_v55 = vld [vmem:[%s8753_s13 + $0x18] sm:$0xff] (!%p6535_p13) }
 0x82b   : > { %v6582_v4 = vpop.f32.mrb[251].mxu0 }
 0x82c   : > { %v5464_v57 = vadd.f32 %v6580_v11, %v5220_v45  ;;  %v6583_v53 = vadd.f32 %v6582_v4, %v6581_v21 }
 0x82d   : > { %5520 = vadd.xlane.f32.xlu1 (!%p6535_p13), %v5499_v55 }
 0x82e   : > { %5480 = vst [vmem:[%s8753_s13 + $0x20] sm:$0xff] %v5464_v57  ;;  %v5465_v28 = vadd.f32 %v6583_v53, %v5221_v32 }
 0x830   : > { %5481 = vst [vmem:[%s8753_s13 + $0x28] sm:$0xff] %v5465_v28  ;;  %v6584_v16 = vpop.f32.mrb[252].mxu0 }
 0x831   : > { %v6585_v62 = vpop.f32.mrb[253].mxu0 }
 0x832   : > { %v6586_v12 = vadd.f32 %v6585_v62, %v6584_v16  ;;  %v6587_v31 = vpop.f32.mrb[254].mxu0 }
 0x833   : > { %v6588_v29 = vpop.f32.mrb[255].mxu0 }
 0x834   : > { %v5466_v61 = vadd.f32 %v6586_v12, %v5222_v63  ;;  %v6589_v27 = vadd.f32 %v6588_v29, %v6587_v31 }
 0x835   : > { %v5500_v58 = vld [vmem:[%s8753_s13 + $0x20] sm:$0xff] (!%p6535_p13) }
 0x836   : > { %5482 = vst [vmem:[%s8753_s13 + $0x30] sm:$0xff] %v5466_v61  ;;  %v5467_v39 = vadd.f32 %v6589_v27, %v5223_v52  ;;  %5522 = vadd.xlane.f32.xlu0 (!%p6535_p13), %v5500_v58 }
 0x837   : > { %v5501_v45 = vld [vmem:[%s8753_s13 + $0x28] sm:$0xff] (!%p6535_p13) }
 0x838   : > { %5483 = vst [vmem:[%s8753_s13 + $0x38] sm:$0xff] %v5467_v39  ;;  %v6590_v13 = vpop.f32.mrb[0].mxu0  ;;  %5524 = vadd.xlane.f32.xlu1 (!%p6535_p13), %v5501_v45 }
 0x839   : > { %v6591_v30 = vpop.f32.mrb[1].mxu0 }
 0x83a   : > { %v6592_v26 = vadd.f32 %v6591_v30, %v6590_v13  ;;  %v6593_v49 = vpop.f32.mrb[2].mxu0 }
 0x83b   : > { %v6594_v0 = vpop.f32.mrb[3].mxu0 }
 0x83c   : > { %v5468_v59 = vadd.f32 %v6592_v26, %v5224_v24  ;;  %v6595_v20 = vadd.f32 %v6594_v0, %v6593_v49 }
 0x83d   : > { %v5502_v6 = vld [vmem:[%s8753_s13 + $0x30] sm:$0xff] (!%p6535_p13) }
 0x83e   : > { %5484 = vst [vmem:[%s8753_s13 + $0x40] sm:$0xff] %v5468_v59  ;;  %v5469_v60 = vadd.f32 %v6595_v20, %v5225_v25  ;;  %5526 = vadd.xlane.f32.xlu0 (!%p6535_p13), %v5502_v6 }
 0x83f   : > { %v5503_v11 = vld [vmem:[%s8753_s13 + $0x38] sm:$0xff] (!%p6535_p13) }
 0x840   : > { %5485 = vst [vmem:[%s8753_s13 + $0x48] sm:$0xff] %v5469_v60  ;;  %v6596_v10 = vpop.f32.mrb[4].mxu0  ;;  %5528 = vadd.xlane.f32.xlu1 (!%p6535_p13), %v5503_v11 }
 0x841   : > { %v6597_v41 = vpop.f32.mrb[5].mxu0 }
 0x842   : > { %v6598_v7 = vadd.f32 %v6597_v41, %v6596_v10  ;;  %v6599_v33 = vpop.f32.mrb[6].mxu0 }
 0x843   : > { %v6600_v8 = vpop.f32.mrb[7].mxu0 }
 0x844   : > { %v5470_v40 = vadd.f32 %v6598_v7, %v5226_v2  ;;  %v6601_v50 = vadd.f32 %v6600_v8, %v6599_v33 }
 0x845   : > { %v5504_v21 = vld [vmem:[%s8753_s13 + $0x40] sm:$0xff] (!%p6535_p13) }
 0x846   : > { %5486 = vst [vmem:[%s8753_s13 + $0x50] sm:$0xff] %v5470_v40  ;;  %v5471_v35 = vadd.f32 %v6601_v50, %v5227_v44  ;;  %5530 = vadd.xlane.f32.xlu0 (!%p6535_p13), %v5504_v21 }
 0x847   : > { %v5505_v32 = vld [vmem:[%s8753_s13 + $0x48] sm:$0xff] (!%p6535_p13) }
 0x848   : > { %5487 = vst [vmem:[%s8753_s13 + $0x58] sm:$0xff] %v5471_v35  ;;  %v6602_v54 = vpop.f32.mrb[8].mxu0  ;;  %5532 = vadd.xlane.f32.xlu1 (!%p6535_p13), %v5505_v32 }
 0x849   : > { %v6603_v5 = vpop.f32.mrb[9].mxu0 }
 0x84a   : > { %v6604_v3 = vadd.f32 %v6603_v5, %v6602_v54  ;;  %v6605_v56 = vpop.f32.mrb[10].mxu0 }
 0x84b   : > { %v6606_v42 = vpop.f32.mrb[11].mxu0 }
 0x84c   : > { %v5472_v19 = vadd.f32 %v6604_v3, %v5228_v43  ;;  %v6607_v14 = vadd.f32 %v6606_v42, %v6605_v56 }
 0x84d   : > { %v5506_v4 = vld [vmem:[%s8753_s13 + $0x50] sm:$0xff] (!%p6535_p13) }
 0x84e   : > { %5488 = vst [vmem:[%s8753_s13 + $0x60] sm:$0xff] %v5472_v19  ;;  %v5473_v47 = vadd.f32 %v6607_v14, %v5229_v9  ;;  %5534 = vadd.xlane.f32.xlu0 (!%p6535_p13), %v5506_v4 }
 0x84f   : > { %v12207_v57 = vld [vmem:[%s8753_s13 + $0x58] sm:$0xff] (!%p6535_p13) }
 0x850   : > { %5489 = vst [vmem:[%s8753_s13 + $0x68] sm:$0xff] %v5473_v47  ;;  %v6608_v46 = vpop.f32.mrb[12].mxu0  ;;  %5536 = vadd.xlane.f32.xlu1 (!%p6535_p13), %v12207_v57 }
 0x851   : > { %v6609_v36 = vpop.f32.mrb[13].mxu0 }
 0x852   : > { %v6610_v18 = vadd.f32 %v6609_v36, %v6608_v46  ;;  %v6611_v51 = vpop.f32.mrb[14].mxu0  ;;  %5495 = sbr.rel (%p6535_p13) target bundleno = 2775 (0xad7), region = 116 }
 0x853   : > { %v6612_v38 = vpop.f32.mrb[15].mxu0 }
 0x854   : > { %v5474_v23 = vadd.f32 %v6610_v18, %v5230_v48  ;;  %v6613_v34 = vadd.f32 %v6612_v38, %v6611_v51 }
 0x855   : > { %v12211_v53 = vld [vmem:[%s8753_s13 + $0x60] sm:$0xff] (!%p6535_p13) }
 0x856   : > { %5490 = vst [vmem:[%s8753_s13 + $0x70] sm:$0xff] %v5474_v23  ;;  %v5475_v37 = vadd.f32 %v6613_v34, %v5231_v1  ;;  %5538 = vadd.xlane.f32.xlu0 (!%p6535_p13), %v12211_v53 }
 0x857   : > { %v12214_v28 = vld [vmem:[%s8753_s13 + $0x68] sm:$0xff] (!%p6535_p13) }
 0x858   : > { %5491 = vst [vmem:[%s8753_s13 + $0x78] sm:$0xff] %v5475_v37  ;;  %5540 = vadd.xlane.f32.xlu1 (!%p6535_p13), %v12214_v28 }
 0x85d   : > { %v12219_v16 = vld [vmem:[%s8753_s13 + $0x70] sm:$0xff] }
 0x85e   : > { %5542 = vadd.xlane.f32.xlu0 %v12219_v16 }
 0x85f   : > { %v12222_v63 = vld [vmem:[%s8753_s13 + $0x78] sm:$0xff] }
 0x860   : > { %5544 = vadd.xlane.f32.xlu1 %v12222_v63 }
 0x8ad   : > { %v5515_v62 = vpop.xlane.xlu0 %5514 }
 0x8ae   : > { %v5547_v31 = vmul.f32 0.0078125, %v5515_v62 }
 0x8b0   : > { %v12226_v29 = vsub.f32 %v5496_v15, %v5547_v31 }
 0x8b1   : > { %v5517_v27 = vpop.xlane.xlu0 %5516 }
 0x8b2   : > { %v5548_v13 = vmul.f32 0.0078125, %v5517_v27  ;;  %v5579_v24 = vmul.f32 %v12226_v29, %v12226_v29 }
 0x8b4   : > { %v12232_v26 = vsub.f32 %v5497_v17, %v5548_v13  ;;  %5595 = vadd.xlane.f32.xlu0 %v5579_v24 }
 0x8b6   : > { %v5519_v12 = vpop.xlane.xlu1 %5518  ;;  %v5580_v60 = vmul.f32 %v12232_v26, %v12232_v26 }
 0x8b7   : > { %v5549_v52 = vmul.f32 0.0078125, %v5519_v12 }
 0x8b8   : > { %5597 = vadd.xlane.f32.xlu1 %v5580_v60 }
 0x8b9   : > { %v12228_v61 = vsub.f32 %v5498_v22, %v5549_v52 }
 0x8ba   : > { %v5521_v39 = vpop.xlane.xlu1 %5520 }
 0x8bb   : > { %v5550_v30 = vmul.f32 0.0078125, %v5521_v39  ;;  %v5581_v25 = vmul.f32 %v12228_v61, %v12228_v61 }
 0x8bd   : > { %v12234_v49 = vsub.f32 %v5499_v55, %v5550_v30  ;;  %5599 = vadd.xlane.f32.xlu0 %v5581_v25 }
 0x8bf   : > { %v5582_v7 = vmul.f32 %v12234_v49, %v12234_v49 }
 0x8c1   : > { %5601 = vadd.xlane.f32.xlu1 %v5582_v7 }
 0x8c3   : > { %v5523_v0 = vpop.xlane.xlu0 %5522 }
 0x8c4   : > { %v5551_v20 = vmul.f32 0.0078125, %v5523_v0 }
 0x8c5   : > { %v5525_v59 = vpop.xlane.xlu1 %5524 }
 0x8c6   : > { %v5552_v10 = vmul.f32 0.0078125, %v5525_v59  ;;  %v12240_v2 = vsub.f32 %v5500_v58, %v5551_v20 }
 0x8c8   : > { %v12242_v41 = vsub.f32 %v5501_v45, %v5552_v10  ;;  %v5583_v40 = vmul.f32 %v12240_v2, %v12240_v2 }
 0x8ca   : > { %5603 = vadd.xlane.f32.xlu0 %v5583_v40  ;;  %v5584_v43 = vmul.f32 %v12242_v41, %v12242_v41 }
 0x8cb   : > { %v5527_v33 = vpop.xlane.xlu0 %5526 }
 0x8cc   : > { %v5553_v8 = vmul.f32 0.0078125, %v5527_v33  ;;  %5605 = vadd.xlane.f32.xlu1 %v5584_v43 }
 0x8cd   : > { %v5529_v44 = vpop.xlane.xlu1 %5528 }
 0x8ce   : > { %v5554_v50 = vmul.f32 0.0078125, %v5529_v44  ;;  %v12248_v35 = vsub.f32 %v5502_v6, %v5553_v8 }
 0x8d0   : > { %v12250_v54 = vsub.f32 %v5503_v11, %v5554_v50  ;;  %v5585_v9 = vmul.f32 %v12248_v35, %v12248_v35 }
 0x8d2   : > { %5607 = vadd.xlane.f32.xlu0 %v5585_v9  ;;  %v5586_v47 = vmul.f32 %v12250_v54, %v12250_v54 }
 0x8d3   : > { %v5531_v5 = vpop.xlane.xlu0 %5530 }
 0x8d4   : > { %v5555_v56 = vmul.f32 0.0078125, %v5531_v5  ;;  %5609 = vadd.xlane.f32.xlu1 %v5586_v47  ;;  %v12295_v5 = vld [vmem:[#allocation14] ss:$0 sm:$0xff] }
 0x8d5   : > { %v5533_v3 = vpop.xlane.xlu1 %5532 }
 0x8d6   : > { %v5556_v42 = vmul.f32 0.0078125, %v5533_v3  ;;  %v12256_v19 = vsub.f32 %v5504_v21, %v5555_v56 }
 0x8d8   : > { %v12258_v14 = vsub.f32 %v5505_v32, %v5556_v42  ;;  %v5587_v18 = vmul.f32 %v12256_v19, %v12256_v19 }
 0x8da   : > { %5611 = vadd.xlane.f32.xlu0 %v5587_v18  ;;  %v5588_v23 = vmul.f32 %v12258_v14, %v12258_v14 }
 0x8db   : > { %v5535_v46 = vpop.xlane.xlu0 %5534 }
 0x8dc   : > { %v5557_v36 = vmul.f32 0.0078125, %v5535_v46  ;;  %5613 = vadd.xlane.f32.xlu1 %v5588_v23  ;;  %v12298_v46 = vld [vmem:[#allocation16] ss:$0 sm:$0xff] }
 0x8dd   : > { %v5537_v48 = vpop.xlane.xlu1 %5536 }
 0x8de   : > { %v5558_v51 = vmul.f32 0.0078125, %v5537_v48  ;;  %v12264_v1 = vsub.f32 %v5506_v4, %v5557_v36 }
 0x8e0   : > { %v12267_v38 = vsub.f32 %v12207_v57, %v5558_v51  ;;  %v5589_v22 = vmul.f32 %v12264_v1, %v12264_v1 }
 0x8e2   : > { %5615 = vadd.xlane.f32.xlu0 %v5589_v22  ;;  %v5590_v45 = vmul.f32 %v12267_v38, %v12267_v38 }
 0x8e3   : > { %v5539_v34 = vpop.xlane.xlu0 %5538 }
 0x8e4   : > { %v5559_v15 = vmul.f32 0.0078125, %v5539_v34  ;;  %5617 = vadd.xlane.f32.xlu1 %v5590_v45 }
 0x8e5   : > { %v5541_v37 = vpop.xlane.xlu1 %5540 }
 0x8e6   : > { %v5560_v17 = vmul.f32 0.0078125, %v5541_v37  ;;  %v12274_v55 = vsub.f32 %v12211_v53, %v5559_v15 }
 0x8e8   : > { %v12277_v58 = vsub.f32 %v12214_v28, %v5560_v17  ;;  %v5591_v32 = vmul.f32 %v12274_v55, %v12274_v55 }
 0x8ea   : > { %5619 = vadd.xlane.f32.xlu0 %v5591_v32  ;;  %v5592_v28 = vmul.f32 %v12277_v58, %v12277_v58 }
 0x8eb   : > { %v5543_v6 = vpop.xlane.xlu0 %5542 }
 0x8ec   : > { %v5561_v21 = vmul.f32 0.0078125, %v5543_v6  ;;  %5621 = vadd.xlane.f32.xlu1 %v5592_v28 }
 0x8ed   : > { %v5545_v11 = vpop.xlane.xlu1 %5544 }
 0x8ee   : > { %v5562_v4 = vmul.f32 0.0078125, %v5545_v11  ;;  %v12284_v57 = vsub.f32 %v12219_v16, %v5561_v21  ;;  %v5783_v11 = vld [vmem:[%s8720_s3] sm:$0xff] }
 0x8f0   : > { %v12287_v53 = vsub.f32 %v12222_v63, %v5562_v4  ;;  %v5593_v62 = vmul.f32 %v12284_v57, %v12284_v57 }
 0x8f2   : > { %5623 = vadd.xlane.f32.xlu0 %v5593_v62  ;;  %v5594_v12 = vmul.f32 %v12287_v53, %v12287_v53 }
 0x8f4   : > { %5625 = vadd.xlane.f32.xlu1 %v5594_v12 }
 0x941   : > { %v5596_v31 = vpop.xlane.xlu0 %5595 }
 0x942   : > { %v5627_v16 = vmul.f32 0.0078125, %v5596_v31 }
 0x944   : > { %v5643_v52 = vadd.f32 1e-05, %v5627_v16 }
 0x945   : > { %v5598_v27 = vpop.xlane.xlu1 %5597 }
 0x946   : > { %7714 = vrsqrt.f32 %v5643_v52  ;;  %v5628_v63 = vmul.f32 0.0078125, %v5598_v27 }
 0x948   : > { %v5644_v24 = vadd.f32 1e-05, %v5628_v63 }
 0x94a   : > { %v5600_v39 = vpop.xlane.xlu0 %5599  ;;  %7716 = vrsqrt.f32 %v5644_v24  ;;  %v5784_v24 = vld [vmem:[%s8720_s3 + $0x8] sm:$0xff] }
 0x94b   : > { %v5629_v13 = vmul.f32 0.0078125, %v5600_v39 }
 0x94d   : > { %v5645_v30 = vadd.f32 1e-05, %v5629_v13 }
 0x94e   : > { %v5602_v25 = vpop.xlane.xlu1 %5601 }
 0x94f   : > { %v5630_v59 = vmul.f32 0.0078125, %v5602_v25  ;;  %7718 = vrsqrt.f32 %v5645_v30 }
 0x950   : > { %v7715_v40 = vpop.eup %7714 }
 0x951   : > { %v5646_v60 = vadd.f32 1e-05, %v5630_v59  ;;  %v5675_v9 = vmul.f32 %v7715_v40, %v12226_v29 }
 0x953   : > { %7720 = vrsqrt.f32 %v5646_v60  ;;  %v5697_v48 = vmul.f32 %v12295_v5, %v5675_v9 }
 0x954   : > { %v7717_v36 = vpop.eup %7716 }
 0x955   : > { %v5719_v15 = vadd.f32 %v12298_v46, %v5697_v48  ;;  %v5676_v22 = vmul.f32 %v7717_v36, %v12232_v26 }
 0x957   : > { %v5604_v0 = vpop.xlane.xlu0 %5603  ;;  %vm5735_vm12 = vcmp.ge.f32.partialorder %v5719_v15, 0.0  ;;  %v5751_v6 = vmul.f32 0.01, %v5719_v15  ;;  %v5698_v21 = vmul.f32 %v12295_v5, %v5676_v22 }
 0x958   : > { %v5631_v20 = vmul.f32 0.0078125, %v5604_v0 }
 0x959   : > { %v5606_v7 = vpop.xlane.xlu1 %5605  ;;  %v7719_v23 = vpop.eup %7718  ;;  %v5767_v16 = vsel %vm5735_vm12, %v5719_v15, %v5751_v6  ;;  %v5720_v52 = vadd.f32 %v12298_v46, %v5698_v21 }
 0x95a   : > { %v5647_v10 = vadd.f32 1e-05, %v5631_v20  ;;  %v5632_v44 = vmul.f32 0.0078125, %v5606_v7  ;;  %v5677_v45 = vmul.f32 %v7719_v23, %v12228_v61  ;;  %v12309_v63 = vadd.f32 %v5783_v11, %v5767_v16  ;;  %v5786_v23 = vld [vmem:[%s8720_s3 + $0x18] sm:$0xff]  ;;  %v5787_v11 = vld [vmem:[%s8720_s3 + $0x20] sm:$0xff] }
 0x95b   : > { %vm5736_vm7 = vcmp.ge.f32.partialorder %v5720_v52, 0.0  ;;  %v5752_v13 = vmul.f32 0.01, %v5720_v52 }
 0x95c   : > { %7722 = vrsqrt.f32 %v5647_v10  ;;  %v5648_v50 = vadd.f32 1e-05, %v5632_v44  ;;  %v5699_v62 = vmul.f32 %v12295_v5, %v5677_v45  ;;  %5817 = vadd.xlane.f32.xlu0 %v12309_v63  ;;  %v5785_v44 = vld [vmem:[%s8720_s3 + $0x10] sm:$0xff] }
 0x95d   : > { %v7721_v32 = vpop.eup %7720  ;;  %v5768_v7 = vsel %vm5736_vm7, %v5720_v52, %v5752_v13 }
 0x95e   : > { %7724 = vrsqrt.f32 %v5648_v50  ;;  %v5678_v61 = vmul.f32 %v7721_v32, %v12234_v49  ;;  %v5721_v30 = vadd.f32 %v12298_v46, %v5699_v62 }
 0x95f   : > { %v5608_v33 = vpop.xlane.xlu0 %5607 }
 0x960   : > { %v5633_v8 = vmul.f32 0.0078125, %v5608_v33  ;;  %v5700_v20 = vmul.f32 %v12295_v5, %v5678_v61  ;;  %vm5737_vm5 = vcmp.ge.f32.partialorder %v5721_v30, 0.0  ;;  %v5753_v33 = vmul.f32 0.01, %v5721_v30 }
 0x961   : > { %v5610_v3 = vpop.xlane.xlu1 %5609 }
 0x962   : > { %v5649_v43 = vadd.f32 1e-05, %v5633_v8  ;;  %v5634_v42 = vmul.f32 0.0078125, %v5610_v3  ;;  %v12318_v3 = vadd.f32 %v5784_v24, %v5768_v7  ;;  %v5722_v9 = vadd.f32 %v12298_v46, %v5700_v20 }
 0x964   : > { %7726 = vrsqrt.f32 %v5649_v43  ;;  %v5650_v18 = vadd.f32 1e-05, %v5634_v42  ;;  %5819 = vadd.xlane.f32.xlu1 %v12318_v3  ;;  %vm5738_vm6 = vcmp.ge.f32.partialorder %v5722_v9, 0.0 }
 0x966   : > { %7728 = vrsqrt.f32 %v5650_v18  ;;  %v7723_v12 = vpop.eup %7722 }
 0x967   : > { %v5612_v56 = vpop.xlane.xlu0 %5611  ;;  %v5679_v49 = vmul.f32 %v7723_v12, %v12240_v2 }
 0x968   : > { %v5635_v47 = vmul.f32 0.0078125, %v5612_v56  ;;  %v7725_v25 = vpop.eup %7724  ;;  %v5769_v56 = vsel %vm5737_vm5, %v5721_v30, %v5753_v33 }
 0x969   : > { %v5614_v34 = vpop.xlane.xlu1 %5613  ;;  %v5680_v8 = vmul.f32 %v7725_v25, %v12242_v41  ;;  %v5701_v2 = vmul.f32 %v12295_v5, %v5679_v49  ;;  %v12323_v36 = vadd.f32 %v5785_v44, %v5769_v56  ;;  %v5790_v25 = vld [vmem:[%s8720_s3 + $0x38] sm:$0xff] }
 0x96a   : > { %v5651_v51 = vadd.f32 1e-05, %v5635_v47  ;;  %v5636_v29 = vmul.f32 0.0078125, %v5614_v34 }
 0x96b   : > { %v5702_v41 = vmul.f32 %v12295_v5, %v5680_v8  ;;  %v5723_v34 = vadd.f32 %v12298_v46, %v5701_v2  ;;  %5821 = vadd.xlane.f32.xlu0 %v12323_v36 }
 0x96c   : > { %7730 = vrsqrt.f32 %v5651_v51  ;;  %v5652_v4 = vadd.f32 1e-05, %v5636_v29  ;;  %v5754_v51 = vmul.f32 0.01, %v5722_v9 }
 0x96d   : > { %v5724_v29 = vadd.f32 %v12298_v46, %v5702_v41  ;;  %vm5739_vm8 = vcmp.ge.f32.partialorder %v5723_v34, 0.0  ;;  %v5755_v6 = vmul.f32 0.01, %v5723_v34 }
 0x96e   : > { %7732 = vrsqrt.f32 %v5652_v4  ;;  %v7727_v40 = vpop.eup %7726  ;;  %v5770_v45 = vsel %vm5738_vm6, %v5722_v9, %v5754_v51  ;;  %v5791_v9 = vld [vmem:[%s8720_s3 + $0x40] sm:$0xff] }
 0x96f   : > { %v5616_v37 = vpop.xlane.xlu0 %5615  ;;  %v12333_v4 = vadd.f32 %v5786_v23, %v5770_v45  ;;  %vm5740_vm9 = vcmp.ge.f32.partialorder %v5724_v29, 0.0  ;;  %v5771_v12 = vsel %vm5739_vm8, %v5723_v34, %v5755_v6 }
 0x970   : > { %v5637_v17 = vmul.f32 0.0078125, %v5616_v37  ;;  %v7729_v42 = vpop.eup %7728  ;;  %v5681_v37 = vmul.f32 %v7727_v40, %v12248_v35  ;;  %v5756_v35 = vmul.f32 0.01, %v5724_v29  ;;  %v12340_v16 = vadd.f32 %v5787_v11, %v5771_v12 }
 0x971   : > { %v5618_v31 = vpop.xlane.xlu1 %5617  ;;  %5823 = vadd.xlane.f32.xlu1 %v12333_v4 }
 0x972   : > { %v5653_v28 = vadd.f32 1e-05, %v5637_v17  ;;  %v5638_v27 = vmul.f32 0.0078125, %v5618_v31  ;;  %v5682_v17 = vmul.f32 %v7729_v42, %v12250_v54  ;;  %v5703_v31 = vmul.f32 %v12295_v5, %v5681_v37  ;;  %5825 = vadd.xlane.f32.xlu0 %v12340_v16  ;;  %v5793_v37 = vld [vmem:[%s8720_s3 + $0x50] sm:$0xff] }
 0x973   : > { %v5772_v52 = vsel %vm5740_vm9, %v5724_v29, %v5756_v35  ;;  %v5794_v35 = vld [vmem:[%s8720_s3 + $0x58] sm:$0xff] }
 0x974   : > { %7734 = vrsqrt.f32 %v5653_v28  ;;  %v5654_v0 = vadd.f32 1e-05, %v5638_v27  ;;  %v5788_v28 = vld [vmem:[%s8720_s3 + $0x28] sm:$0xff]  ;;  %v5704_v54 = vmul.f32 %v12295_v5, %v5682_v17 }
 0x975   : > { %v12343_v27 = vadd.f32 %v5788_v28, %v5772_v52 }
 0x976   : > { %7736 = vrsqrt.f32 %v5654_v0  ;;  %v7731_v15 = vpop.eup %7730  ;;  %v5726_v13 = vadd.f32 %v12298_v46, %v5704_v54 }
 0x977   : > { %v5620_v26 = vpop.xlane.xlu0 %5619  ;;  %5827 = vadd.xlane.f32.xlu1 %v12343_v27 }
 0x978   : > { %v5639_v39 = vmul.f32 0.0078125, %v5620_v26  ;;  %v7733_v21 = vpop.eup %7732  ;;  %v5683_v26 = vmul.f32 %v7731_v15, %v12256_v19  ;;  %v5789_v19 = vld [vmem:[%s8720_s3 + $0x30] sm:$0xff]  ;;  %vm5742_vm13 = vcmp.ge.f32.partialorder %v5726_v13, 0.0  ;;  %v5758_v49 = vmul.f32 0.01, %v5726_v13 }
 0x979   : > { %v5622_v60 = vpop.xlane.xlu1 %5621  ;;  %v5684_v61 = vmul.f32 %v7733_v21, %v12258_v14 }
 0x97a   : > { %v5655_v59 = vadd.f32 1e-05, %v5639_v39  ;;  %v5640_v50 = vmul.f32 0.0078125, %v5622_v60  ;;  %v5725_v39 = vadd.f32 %v12298_v46, %v5703_v31  ;;  %v5705_v24 = vmul.f32 %v12295_v5, %v5683_v26 }
 0x97b   : > { %v5706_v0 = vmul.f32 %v12295_v5, %v5684_v61  ;;  %v5774_v8 = vsel %vm5742_vm13, %v5726_v13, %v5758_v49  ;;  %v5796_v61 = vld [vmem:[%s8720_s3 + $0x68] sm:$0xff] }
 0x97c   : > { %7738 = vrsqrt.f32 %v5655_v59  ;;  %v5656_v47 = vadd.f32 1e-05, %v5640_v50  ;;  %vm5741_vm11 = vcmp.ge.f32.partialorder %v5725_v39, 0.0  ;;  %v5757_v14 = vmul.f32 0.01, %v5725_v39 }
 0x97d   : > { %v5727_v60 = vadd.f32 %v12298_v46, %v5705_v24 }
 0x97e   : > { %7740 = vrsqrt.f32 %v5656_v47  ;;  %v7735_v62 = vpop.eup %7734  ;;  %v5773_v44 = vsel %vm5741_vm11, %v5725_v39, %v5757_v14  ;;  %v5792_v47 = vld [vmem:[%s8720_s3 + $0x48] sm:$0xff] }
 0x97f   : > { %v5624_v10 = vpop.xlane.xlu0 %5623  ;;  %v5685_v59 = vmul.f32 %v7735_v62, %v12264_v1  ;;  %v12359_v50 = vadd.f32 %v5789_v19, %v5773_v44  ;;  %vm5743_vm15 = vcmp.ge.f32.partialorder %v5727_v60, 0.0  ;;  %v5759_v56 = vmul.f32 0.01, %v5727_v60  ;;  %v5795_v62 = vld [vmem:[%s8720_s3 + $0x60] sm:$0xff] }
 0x980   : > { %v5641_v43 = vmul.f32 0.0078125, %v5624_v10  ;;  %v7737_v30 = vpop.eup %7736  ;;  %v5728_v10 = vadd.f32 %v12298_v46, %v5706_v0 }
 0x981   : > { %v5626_v18 = vpop.xlane.xlu1 %5625  ;;  %v5707_v7 = vmul.f32 %v12295_v5, %v5685_v59  ;;  %v5686_v33 = vmul.f32 %v7737_v30, %v12267_v38  ;;  %5829 = vadd.xlane.f32.xlu0 %v12359_v50  ;;  %v5798_v59 = vld [vmem:[%s8720_s3 + $0x78] sm:$0xff] }
 0x982   : > { %v5657_v48 = vadd.f32 1e-05, %v5641_v43  ;;  %v5642_v22 = vmul.f32 0.0078125, %v5626_v18  ;;  %v12361_v43 = vadd.f32 %v5790_v25, %v5774_v8  ;;  %vm5744_vm14 = vcmp.ge.f32.partialorder %v5728_v10, 0.0  ;;  %v5797_v25 = vld [vmem:[%s8720_s3 + $0x70] sm:$0xff] }
 0x983   : > { %v5760_v42 = vmul.f32 0.01, %v5728_v10  ;;  %v5708_v38 = vmul.f32 %v12295_v5, %v5686_v33 }
 0x984   : > { %7742 = vrsqrt.f32 %v5657_v48  ;;  %v5658_v32 = vadd.f32 1e-05, %v5642_v22  ;;  %v5729_v48 = vadd.f32 %v12298_v46, %v5707_v7  ;;  %5831 = vadd.xlane.f32.xlu1 %v12361_v43 }
 0x985   : > { %v5776_v23 = vsel %vm5744_vm14, %v5728_v10, %v5760_v42  ;;  %v5730_v29 = vadd.f32 %v12298_v46, %v5708_v38 }
 0x986   : > { %7744 = vrsqrt.f32 %v5658_v32  ;;  %v7739_v20 = vpop.eup %7738  ;;  %vm5745_vm0 = vcmp.ge.f32.partialorder %v5729_v48, 0.0  ;;  %v5761_v34 = vmul.f32 0.01, %v5729_v48  ;;  %v12374_v22 = vadd.f32 %v5792_v47, %v5776_v23 }
 0x987   : > { %v5687_v1 = vmul.f32 %v7739_v20, %v12274_v55  ;;  %v5775_v55 = vsel %vm5743_vm15, %v5727_v60, %v5759_v56  ;;  %vm5746_vm1 = vcmp.ge.f32.partialorder %v5730_v29, 0.0  ;;  %v5762_v32 = vmul.f32 0.01, %v5730_v29 }
 0x988   : > { %v7741_v40 = vpop.eup %7740  ;;  %v12371_v51 = vadd.f32 %v5791_v9, %v5775_v55  ;;  %v5777_v6 = vsel %vm5745_vm0, %v5729_v48, %v5761_v34  ;;  %5835 = vadd.xlane.f32.xlu1 %v12374_v22 }
 0x989   : > { %v5709_v41 = vmul.f32 %v12295_v5, %v5687_v1  ;;  %v5688_v18 = vmul.f32 %v7741_v40, %v12277_v58  ;;  %v12383_v21 = vadd.f32 %v5793_v37, %v5777_v6 }
 0x98a   : > { %5833 = vadd.xlane.f32.xlu0 %v12371_v51 }
 0x98b   : > { %v5731_v17 = vadd.f32 %v12298_v46, %v5709_v41  ;;  %v5710_v45 = vmul.f32 %v12295_v5, %v5688_v18 }
 0x98d   : > { %vm5747_vm2 = vcmp.ge.f32.partialorder %v5731_v17, 0.0  ;;  %v5763_v28 = vmul.f32 0.01, %v5731_v17  ;;  %v5732_v12 = vadd.f32 %v12298_v46, %v5710_v45 }
 0x98e   : > { %v7743_v2 = vpop.eup %7742  ;;  %5837 = vadd.xlane.f32.xlu0 %v12383_v21 }
 0x98f   : > { %v5689_v58 = vmul.f32 %v7743_v2, %v12284_v57  ;;  %v5779_v26 = vsel %vm5747_vm2, %v5731_v17, %v5763_v28  ;;  %vm5748_vm3 = vcmp.ge.f32.partialorder %v5732_v12, 0.0  ;;  %v5764_v52 = vmul.f32 0.01, %v5732_v12 }
 0x990   : > { %v7745_v15 = vpop.eup %7744  ;;  %v12394_v39 = vadd.f32 %v5795_v62, %v5779_v26 }
 0x991   : > { %v5690_v11 = vmul.f32 %v7745_v15, %v12287_v53  ;;  %v5711_v31 = vmul.f32 %v12295_v5, %v5689_v58  ;;  %v5778_v53 = vsel %vm5746_vm1, %v5730_v29, %v5762_v32 }
 0x992   : > { %v12390_v54 = vadd.f32 %v5794_v35, %v5778_v53  ;;  %5841 = vadd.xlane.f32.xlu0 %v12394_v39 }
 0x993   : > { %v5712_v57 = vmul.f32 %v12295_v5, %v5690_v11  ;;  %v5733_v13 = vadd.f32 %v12298_v46, %v5711_v31  ;;  %v5780_v5 = vsel %vm5748_vm3, %v5732_v12, %v5764_v52 }
 0x994   : > { %5839 = vadd.xlane.f32.xlu1 %v12390_v54  ;;  %v12399_v30 = vadd.f32 %v5796_v61, %v5780_v5 }
 0x995   : > { %v5734_v24 = vadd.f32 %v12298_v46, %v5712_v57  ;;  %vm5749_vm10 = vcmp.ge.f32.partialorder %v5733_v13, 0.0  ;;  %v5765_v19 = vmul.f32 0.01, %v5733_v13 }
 0x997   : > { %vm5750_vm4 = vcmp.ge.f32.partialorder %v5734_v24, 0.0  ;;  %v5766_v0 = vmul.f32 0.01, %v5734_v24  ;;  %v5781_v20 = vsel %vm5749_vm10, %v5733_v13, %v5765_v19 }
 0x998   : > { %5843 = vadd.xlane.f32.xlu1 %v12399_v30  ;;  %v12405_v14 = vadd.f32 %v5797_v25, %v5781_v20 }
 0x999   : > { %v5782_v49 = vsel %vm5750_vm4, %v5734_v24, %v5766_v0 }
 0x99a   : > { %v12407_v46 = vadd.f32 %v5798_v59, %v5782_v49  ;;  %5845 = vadd.xlane.f32.xlu0 %v12405_v14 }
 0x99c   : > { %5847 = vadd.xlane.f32.xlu1 %v12407_v46 }
 0x9e9   : > { %v5818_v60 = vpop.xlane.xlu0 %5817 }
 0x9ea   : > { %v5849_v10 = vmul.f32 0.0078125, %v5818_v60 }
 0x9ec   : > { %v12412_v7 = vsub.f32 %v12309_v63, %v5849_v10 }
 0x9ee   : > { %v5881_v8 = vmul.f32 %v12412_v7, %v12412_v7 }
 0x9f0   : > { %5897 = vadd.xlane.f32.xlu0 %v5881_v8 }
 0x9f1   : > { %v5820_v33 = vpop.xlane.xlu1 %5819 }
 0x9f2   : > { %v5850_v44 = vmul.f32 0.0078125, %v5820_v33 }
 0x9f4   : > { %v12417_v40 = vsub.f32 %v12318_v3, %v5850_v44 }
 0x9f6   : > { %v5882_v2 = vmul.f32 %v12417_v40, %v12417_v40 }
 0x9f8   : > { %v5822_v1 = vpop.xlane.xlu0 %5821  ;;  %5899 = vadd.xlane.f32.xlu1 %v5882_v2 }
 0x9f9   : > { %v5851_v56 = vmul.f32 0.0078125, %v5822_v1 }
 0x9fb   : > { %v12420_v9 = vsub.f32 %v12323_v36, %v5851_v56 }
 0x9fd   : > { %v5883_v47 = vmul.f32 %v12420_v9, %v12420_v9 }
 0x9fe   : > { %v5824_v42 = vpop.xlane.xlu1 %5823 }
 0x9ff   : > { %v5852_v63 = vmul.f32 0.0078125, %v5824_v42  ;;  %v5826_v48 = vpop.xlane.xlu0 %5825  ;;  %5901 = vadd.xlane.f32.xlu0 %v5883_v47 }
 0xa00   : > { %v5853_v3 = vmul.f32 0.0078125, %v5826_v48 }
 0xa01   : > { %v12427_v38 = vsub.f32 %v12333_v4, %v5852_v63 }
 0xa02   : > { %v12430_v41 = vsub.f32 %v12340_v16, %v5853_v3 }
 0xa03   : > { %v5884_v18 = vmul.f32 %v12427_v38, %v12427_v38 }
 0xa04   : > { %v5828_v55 = vpop.xlane.xlu1 %5827  ;;  %v5885_v34 = vmul.f32 %v12430_v41, %v12430_v41 }
 0xa05   : > { %v5854_v36 = vmul.f32 0.0078125, %v5828_v55  ;;  %5903 = vadd.xlane.f32.xlu1 %v5884_v18 }
 0xa06   : > { %5905 = vadd.xlane.f32.xlu0 %v5885_v34  ;;  %v12491_v34 = vld [vmem:[#allocation17] ss:$0 sm:$0xff] }
 0xa07   : > { %v12435_v23 = vsub.f32 %v12343_v27, %v5854_v36 }
 0xa09   : > { %v5886_v16 = vmul.f32 %v12435_v23, %v12435_v23 }
 0xa0b   : > { %5907 = vadd.xlane.f32.xlu1 %v5886_v16 }
 0xa0e   : > { %v5830_v37 = vpop.xlane.xlu0 %5829 }
 0xa0f   : > { %v5855_v15 = vmul.f32 0.0078125, %v5830_v37 }
 0xa11   : > { %v5832_v4 = vpop.xlane.xlu1 %5831  ;;  %v12442_v17 = vsub.f32 %v12359_v50, %v5855_v15 }
 0xa12   : > { %v5856_v29 = vmul.f32 0.0078125, %v5832_v4 }
 0xa13   : > { %v5887_v11 = vmul.f32 %v12442_v17, %v12442_v17 }
 0xa14   : > { %v12445_v45 = vsub.f32 %v12361_v43, %v5856_v29  ;;  %v12494_v29 = vld [vmem:[#allocation19] ss:$0 sm:$0xff] }
 0xa15   : > { %v5836_v6 = vpop.xlane.xlu1 %5835  ;;  %5909 = vadd.xlane.f32.xlu0 %v5887_v11 }
 0xa16   : > { %v5858_v32 = vmul.f32 0.0078125, %v5836_v6  ;;  %v5888_v35 = vmul.f32 %v12445_v45, %v12445_v45 }
 0xa17   : > { %v5834_v27 = vpop.xlane.xlu0 %5833 }
 0xa18   : > { %v5857_v58 = vmul.f32 0.0078125, %v5834_v27  ;;  %v12455_v50 = vsub.f32 %v12374_v22, %v5858_v32  ;;  %5911 = vadd.xlane.f32.xlu1 %v5888_v35 }
 0xa1a   : > { %v12452_v28 = vsub.f32 %v12371_v51, %v5857_v58  ;;  %v5890_v57 = vmul.f32 %v12455_v50, %v12455_v50 }
 0xa1b   : > { %v5838_v43 = vpop.xlane.xlu0 %5837 }
 0xa1c   : > { %v5859_v62 = vmul.f32 0.0078125, %v5838_v43  ;;  %v5889_v12 = vmul.f32 %v12452_v28, %v12452_v28  ;;  %5915 = vadd.xlane.f32.xlu1 %v5890_v57 }
 0xa1e   : > { %v12462_v26 = vsub.f32 %v12383_v21, %v5859_v62  ;;  %5913 = vadd.xlane.f32.xlu0 %v5889_v12 }
 0xa1f   : > { %v5842_v22 = vpop.xlane.xlu0 %5841 }
 0xa20   : > { %v5861_v52 = vmul.f32 0.0078125, %v5842_v22  ;;  %v5891_v61 = vmul.f32 %v12462_v26, %v12462_v26 }
 0xa21   : > { %v5840_v31 = vpop.xlane.xlu1 %5839 }
 0xa22   : > { %v5860_v53 = vmul.f32 0.0078125, %v5840_v31  ;;  %v12472_v19 = vsub.f32 %v12394_v39, %v5861_v52  ;;  %5917 = vadd.xlane.f32.xlu0 %v5891_v61 }
 0xa24   : > { %v12465_v51 = vsub.f32 %v12390_v54, %v5860_v53  ;;  %v5893_v0 = vmul.f32 %v12472_v19, %v12472_v19 }
 0xa25   : > { %v5844_v13 = vpop.xlane.xlu1 %5843 }
 0xa26   : > { %v5862_v24 = vmul.f32 0.0078125, %v5844_v13  ;;  %v5892_v5 = vmul.f32 %v12465_v51, %v12465_v51  ;;  %5921 = vadd.xlane.f32.xlu0 %v5893_v0 }
 0xa27   : > { %v5846_v25 = vpop.xlane.xlu0 %5845 }
 0xa28   : > { %v12475_v21 = vsub.f32 %v12399_v30, %v5862_v24  ;;  %5919 = vadd.xlane.f32.xlu1 %v5892_v5  ;;  %v5863_v54 = vmul.f32 0.0078125, %v5846_v25 }
 0xa29   : > { %v5848_v59 = vpop.xlane.xlu1 %5847 }
 0xa2a   : > { %v5864_v20 = vmul.f32 0.0078125, %v5848_v59  ;;  %v5894_v49 = vmul.f32 %v12475_v21, %v12475_v21  ;;  %v12482_v60 = vsub.f32 %v12405_v14, %v5863_v54 }
 0xa2c   : > { %v12485_v39 = vsub.f32 %v12407_v46, %v5864_v20  ;;  %5923 = vadd.xlane.f32.xlu1 %v5894_v49  ;;  %v5895_v30 = vmul.f32 %v12482_v60, %v12482_v60 }
 0xa2e   : > { %v5896_v10 = vmul.f32 %v12485_v39, %v12485_v39  ;;  %5925 = vadd.xlane.f32.xlu0 %v5895_v30 }
 0xa30   : > { %5927 = vadd.xlane.f32.xlu1 %v5896_v10 }
 0xa7d   : > { %v5898_v33 = vpop.xlane.xlu0 %5897 }
 0xa7e   : > { %v5929_v44 = vmul.f32 0.0078125, %v5898_v33 }
 0xa80   : > { %v5945_v8 = vadd.f32 1e-05, %v5929_v44 }
 0xa82   : > { %7746 = vrsqrt.f32 %v5945_v8 }
 0xa85   : > { %v5900_v1 = vpop.xlane.xlu1 %5899 }
 0xa86   : > { %v5930_v14 = vmul.f32 0.0078125, %v5900_v1 }
 0xa88   : > { %v5946_v2 = vadd.f32 1e-05, %v5930_v14 }
 0xa8a   : > { %7748 = vrsqrt.f32 %v5946_v2 }
 0xa8c   : > { %v5902_v56 = vpop.xlane.xlu0 %5901  ;;  %v7747_v18 = vpop.eup %7746 }
 0xa8d   : > { %v5931_v42 = vmul.f32 0.0078125, %v5902_v56  ;;  %v5977_v15 = vmul.f32 %v7747_v18, %v12412_v7 }
 0xa8f   : > { %v5947_v46 = vadd.f32 1e-05, %v5931_v42  ;;  %v5999_v27 = vmul.f32 %v12491_v34, %v5977_v15 }
 0xa91   : > { %7750 = vrsqrt.f32 %v5947_v46  ;;  %v6021_v43 = vadd.f32 %v12494_v29, %v5999_v27 }
 0xa92   : > { %v5904_v63 = vpop.xlane.xlu1 %5903 }
 0xa93   : > { %v5932_v47 = vmul.f32 0.0078125, %v5904_v63  ;;  %v5906_v48 = vpop.xlane.xlu0 %5905  ;;  %vm6037_vm12 = vcmp.ge.f32.partialorder %v6021_v43, 0.0  ;;  %v6053_v57 = vmul.f32 0.01, %v6021_v43 }
 0xa94   : > { %v5933_v55 = vmul.f32 0.0078125, %v5906_v48  ;;  %v7749_v11 = vpop.eup %7748 }
 0xa95   : > { %v5948_v3 = vadd.f32 1e-05, %v5932_v47  ;;  %v5978_v62 = vmul.f32 %v7749_v11, %v12417_v40  ;;  %v6069_v5 = vsel %vm6037_vm12, %v6021_v43, %v6053_v57 }
 0xa96   : > { %v5949_v37 = vadd.f32 1e-05, %v5933_v55  ;;  %6085 = vst [vmem:[%s8753_s13] sm:$0xff] %v6069_v5 }
 0xa97   : > { %7752 = vrsqrt.f32 %v5948_v3  ;;  %v6000_v53 = vmul.f32 %v12491_v34, %v5978_v62 }
 0xa98   : > { %v5908_v36 = vpop.xlane.xlu1 %5907  ;;  %7754 = vrsqrt.f32 %v5949_v37 }
 0xa99   : > { %v5934_v4 = vmul.f32 0.0078125, %v5908_v36  ;;  %v6022_v25 = vadd.f32 %v12494_v29, %v6000_v53 }
 0xa9b   : > { %v5950_v16 = vadd.f32 1e-05, %v5934_v4  ;;  %v7751_v12 = vpop.eup %7750  ;;  %vm6038_vm7 = vcmp.ge.f32.partialorder %v6022_v25, 0.0  ;;  %v6054_v20 = vmul.f32 0.01, %v6022_v25 }
 0xa9c   : > { %v5979_v22 = vmul.f32 %v7751_v12, %v12420_v9 }
 0xa9d   : > { %7756 = vrsqrt.f32 %v5950_v16  ;;  %v6070_v8 = vsel %vm6038_vm7, %v6022_v25, %v6054_v20 }
 0xa9e   : > { %v6001_v40 = vmul.f32 %v12491_v34, %v5979_v22  ;;  %6086 = vst [vmem:[%s8753_s13 + $0x8] sm:$0xff] %v6070_v8 }
 0xaa0   : > { %v6023_v9 = vadd.f32 %v12494_v29, %v6001_v40 }
 0xaa1   : > { %v7753_v54 = vpop.eup %7752 }
 0xaa2   : > { %v5910_v6 = vpop.xlane.xlu0 %5909  ;;  %v5980_v49 = vmul.f32 %v7753_v54, %v12427_v38  ;;  %v7755_v10 = vpop.eup %7754  ;;  %vm6039_vm5 = vcmp.ge.f32.partialorder %v6023_v9, 0.0  ;;  %v6055_v1 = vmul.f32 0.01, %v6023_v9 }
 0xaa3   : > { %v5935_v32 = vmul.f32 0.0078125, %v5910_v6  ;;  %v5981_v2 = vmul.f32 %v7755_v10, %v12430_v41 }
 0xaa4   : > { %v6002_v14 = vmul.f32 %v12491_v34, %v5980_v49  ;;  %v6071_v63 = vsel %vm6039_vm5, %v6023_v9, %v6055_v1 }
 0xaa5   : > { %v5912_v58 = vpop.xlane.xlu1 %5911  ;;  %v5951_v31 = vadd.f32 1e-05, %v5935_v32  ;;  %6087 = vst [vmem:[%s8753_s13 + $0x10] sm:$0xff] %v6071_v63  ;;  %v6003_v3 = vmul.f32 %v12491_v34, %v5981_v2 }
 0xaa6   : > { %v5936_v35 = vmul.f32 0.0078125, %v5912_v58  ;;  %v6024_v38 = vadd.f32 %v12494_v29, %v6002_v14 }
 0xaa7   : > { %7758 = vrsqrt.f32 %v5951_v31  ;;  %v7757_v56 = vpop.eup %7756  ;;  %v6025_v16 = vadd.f32 %v12494_v29, %v6003_v3 }
 0xaa8   : > { %v5952_v7 = vadd.f32 1e-05, %v5936_v35  ;;  %v5982_v47 = vmul.f32 %v7757_v56, %v12435_v23  ;;  %vm6040_vm6 = vcmp.ge.f32.partialorder %v6024_v38, 0.0  ;;  %v6056_v37 = vmul.f32 0.01, %v6024_v38 }
 0xaa9   : > { %v5916_v61 = vpop.xlane.xlu1 %5915  ;;  %vm6041_vm8 = vcmp.ge.f32.partialorder %v6025_v16, 0.0  ;;  %v6057_v43 = vmul.f32 0.01, %v6025_v16 }
 0xaaa   : > { %v5938_v24 = vmul.f32 0.0078125, %v5916_v61  ;;  %7760 = vrsqrt.f32 %v5952_v7  ;;  %v6004_v41 = vmul.f32 %v12491_v34, %v5982_v47  ;;  %v6072_v6 = vsel %vm6040_vm6, %v6024_v38, %v6056_v37 }
 0xaab   : > { %v5914_v52 = vpop.xlane.xlu0 %5913  ;;  %6088 = vst [vmem:[%s8753_s13 + $0x18] sm:$0xff] %v6072_v6  ;;  %v6073_v53 = vsel %vm6041_vm8, %v6025_v16, %v6057_v43 }
 0xaac   : > { %v5937_v13 = vmul.f32 0.0078125, %v5914_v52  ;;  %v5954_v59 = vadd.f32 1e-05, %v5938_v24  ;;  %v6026_v58 = vadd.f32 %v12494_v29, %v6004_v41  ;;  %6089 = vst [vmem:[%s8753_s13 + $0x20] sm:$0xff] %v6073_v53 }
 0xaae   : > { %v5953_v0 = vadd.f32 1e-05, %v5937_v13  ;;  %vm6042_vm9 = vcmp.ge.f32.partialorder %v6026_v58, 0.0  ;;  %v6058_v31 = vmul.f32 0.01, %v6026_v58 }
 0xaaf   : > { %v5918_v30 = vpop.xlane.xlu0 %5917 }
 0xab0   : > { %7762 = vrsqrt.f32 %v5953_v0  ;;  %v5939_v33 = vmul.f32 0.0078125, %v5918_v30  ;;  %v6074_v61 = vsel %vm6042_vm9, %v6026_v58, %v6058_v31 }
 0xab1   : > { %7764 = vrsqrt.f32 %v5954_v59  ;;  %v7759_v15 = vpop.eup %7758  ;;  %6090 = vst [vmem:[%s8753_s13 + $0x28] sm:$0xff] %v6074_v61 }
 0xab2   : > { %v5955_v42 = vadd.f32 1e-05, %v5939_v33  ;;  %v5983_v11 = vmul.f32 %v7759_v15, %v12442_v17 }
 0xab3   : > { %v5922_v48 = vpop.xlane.xlu0 %5921 }
 0xab4   : > { %7766 = vrsqrt.f32 %v5955_v42  ;;  %v5941_v36 = vmul.f32 0.0078125, %v5922_v48  ;;  %v7761_v23 = vpop.eup %7760  ;;  %v6005_v7 = vmul.f32 %v12491_v34, %v5983_v11 }
 0xab5   : > { %v5920_v44 = vpop.xlane.xlu1 %5919  ;;  %v5984_v62 = vmul.f32 %v7761_v23, %v12445_v45 }
 0xab6   : > { %v5940_v46 = vmul.f32 0.0078125, %v5920_v44  ;;  %v5957_v27 = vadd.f32 1e-05, %v5941_v36  ;;  %v6027_v13 = vadd.f32 %v12494_v29, %v6005_v7 }
 0xab7   : > { %v6006_v17 = vmul.f32 %v12491_v34, %v5984_v62 }
 0xab8   : > { %v5956_v55 = vadd.f32 1e-05, %v5940_v46  ;;  %vm6043_vm11 = vcmp.ge.f32.partialorder %v6027_v13, 0.0  ;;  %v6059_v54 = vmul.f32 0.01, %v6027_v13 }
 0xab9   : > { %v5924_v18 = vpop.xlane.xlu1 %5923  ;;  %v6028_v5 = vadd.f32 %v12494_v29, %v6006_v17 }
 0xaba   : > { %v5942_v4 = vmul.f32 0.0078125, %v5924_v18  ;;  %7768 = vrsqrt.f32 %v5956_v55  ;;  %v7763_v57 = vpop.eup %7762  ;;  %v6075_v49 = vsel %vm6043_vm11, %v6027_v13, %v6059_v54 }
 0xabb   : > { %v5926_v35 = vpop.xlane.xlu0 %5925  ;;  %7770 = vrsqrt.f32 %v5957_v27  ;;  %v5985_v45 = vmul.f32 %v7763_v57, %v12452_v28  ;;  %v7765_v24 = vpop.eup %7764  ;;  %vm6044_vm13 = vcmp.ge.f32.partialorder %v6028_v5, 0.0  ;;  %v6060_v9 = vmul.f32 0.01, %v6028_v5  ;;  %6091 = vst [vmem:[%s8753_s13 + $0x30] sm:$0xff] %v6075_v49 }
 0xabc   : > { %v5958_v32 = vadd.f32 1e-05, %v5942_v4  ;;  %v5943_v22 = vmul.f32 0.0078125, %v5926_v35  ;;  %v5986_v59 = vmul.f32 %v7765_v24, %v12455_v50 }
 0xabd   : > { %v5928_v12 = vpop.xlane.xlu1 %5927  ;;  %v6007_v0 = vmul.f32 %v12491_v34, %v5985_v45  ;;  %v6076_v44 = vsel %vm6044_vm13, %v6028_v5, %v6060_v9 }
 0xabe   : > { %7772 = vrsqrt.f32 %v5958_v32  ;;  %v5944_v52 = vmul.f32 0.0078125, %v5928_v12  ;;  %v5959_v25 = vadd.f32 1e-05, %v5943_v22  ;;  %v7767_v20 = vpop.eup %7766  ;;  %v6008_v30 = vmul.f32 %v12491_v34, %v5986_v59  ;;  %6092 = vst [vmem:[%s8753_s13 + $0x38] sm:$0xff] %v6076_v44 }
 0xabf   : > { %v6029_v28 = vadd.f32 %v12494_v29, %v6007_v0  ;;  %v5987_v10 = vmul.f32 %v7767_v20, %v12462_v26 }
 0xac0   : > { %v5960_v40 = vadd.f32 1e-05, %v5944_v52  ;;  %7774 = vrsqrt.f32 %v5959_v25  ;;  %v6030_v50 = vadd.f32 %v12494_v29, %v6008_v30 }
 0xac1   : > { %vm6045_vm15 = vcmp.ge.f32.partialorder %v6029_v28, 0.0  ;;  %v6061_v8 = vmul.f32 0.01, %v6029_v28  ;;  %v6009_v1 = vmul.f32 %v12491_v34, %v5987_v10 }
 0xac2   : > { %7776 = vrsqrt.f32 %v5960_v40  ;;  %vm6046_vm14 = vcmp.ge.f32.partialorder %v6030_v50, 0.0  ;;  %v6062_v26 = vmul.f32 0.01, %v6030_v50 }
 0xac3   : > { %v6077_v42 = vsel %vm6045_vm15, %v6029_v28, %v6061_v8  ;;  %v6031_v46 = vadd.f32 %v12494_v29, %v6009_v1 }
 0xac4   : > { %v7769_v33 = vpop.eup %7768  ;;  %6093 = vst [vmem:[%s8753_s13 + $0x40] sm:$0xff] %v6077_v42  ;;  %v6078_v48 = vsel %vm6046_vm14, %v6030_v50, %v6062_v26 }
 0xac5   : > { %v7771_v14 = vpop.eup %7770  ;;  %v5988_v56 = vmul.f32 %v7769_v33, %v12465_v51  ;;  %vm6047_vm0 = vcmp.ge.f32.partialorder %v6031_v46, 0.0  ;;  %v6063_v3 = vmul.f32 0.01, %v6031_v46  ;;  %6094 = vst [vmem:[%s8753_s13 + $0x48] sm:$0xff] %v6078_v48 }
 0xac6   : > { %v5989_v38 = vmul.f32 %v7771_v14, %v12472_v19 }
 0xac7   : > { %v6010_v63 = vmul.f32 %v12491_v34, %v5988_v56  ;;  %v6079_v18 = vsel %vm6047_vm0, %v6031_v46, %v6063_v3 }
 0xac8   : > { %v7773_v2 = vpop.eup %7772  ;;  %v6011_v55 = vmul.f32 %v12491_v34, %v5989_v38  ;;  %6095 = vst [vmem:[%s8753_s13 + $0x50] sm:$0xff] %v6079_v18 }
 0xac9   : > { %v5990_v47 = vmul.f32 %v7773_v2, %v12475_v21  ;;  %v6032_v51 = vadd.f32 %v12494_v29, %v6010_v63 }
 0xaca   : > { %v7775_v37 = vpop.eup %7774  ;;  %v6033_v19 = vadd.f32 %v12494_v29, %v6011_v55 }
 0xacb   : > { %v6012_v36 = vmul.f32 %v12491_v34, %v5990_v47  ;;  %vm6048_vm1 = vcmp.ge.f32.partialorder %v6032_v51, 0.0  ;;  %v6064_v41 = vmul.f32 0.01, %v6032_v51  ;;  %v5991_v4 = vmul.f32 %v7775_v37, %v12482_v60 }
 0xacc   : > { %v7777_v15 = vpop.eup %7776  ;;  %vm6049_vm2 = vcmp.ge.f32.partialorder %v6033_v19, 0.0  ;;  %v6065_v27 = vmul.f32 0.01, %v6033_v19 }
 0xacd   : > { %v6034_v21 = vadd.f32 %v12494_v29, %v6012_v36  ;;  %v6080_v16 = vsel %vm6048_vm1, %v6032_v51, %v6064_v41  ;;  %v6013_v6 = vmul.f32 %v12491_v34, %v5991_v4  ;;  %v5992_v58 = vmul.f32 %v7777_v15, %v12485_v39 }
 0xace   : > { %6096 = vst [vmem:[%s8753_s13 + $0x58] sm:$0xff] %v6080_v16  ;;  %v6081_v11 = vsel %vm6049_vm2, %v6033_v19, %v6065_v27 }
 0xacf   : > { %vm6050_vm3 = vcmp.ge.f32.partialorder %v6034_v21, 0.0  ;;  %v6066_v23 = vmul.f32 0.01, %v6034_v21  ;;  %6097 = vst [vmem:[%s8753_s13 + $0x60] sm:$0xff] %v6081_v11  ;;  %v6035_v35 = vadd.f32 %v12494_v29, %v6013_v6  ;;  %v6014_v60 = vmul.f32 %v12491_v34, %v5992_v58 }
 0xad1   : > { %v6082_v32 = vsel %vm6050_vm3, %v6034_v21, %v6066_v23  ;;  %vm6051_vm10 = vcmp.ge.f32.partialorder %v6035_v35, 0.0  ;;  %v6067_v43 = vmul.f32 0.01, %v6035_v35  ;;  %v6036_v62 = vadd.f32 %v12494_v29, %v6014_v60 }
 0xad2   : > { %6098 = vst [vmem:[%s8753_s13 + $0x68] sm:$0xff] %v6082_v32 }
 0xad3   : > { %v6083_v12 = vsel %vm6051_vm10, %v6035_v35, %v6067_v43  ;;  %vm6052_vm4 = vcmp.ge.f32.partialorder %v6036_v62, 0.0  ;;  %v6068_v31 = vmul.f32 0.01, %v6036_v62 }
 0xad4   : > { %6099 = vst [vmem:[%s8753_s13 + $0x70] sm:$0xff] %v6083_v12 }
 0xad5   : > { %v6084_v7 = vsel %vm6052_vm4, %v6036_v62, %v6068_v31 }
 0xad6   : > { %6100 = vst [vmem:[%s8753_s13 + $0x78] sm:$0xff] %v6084_v7 }
 0xad7 PF: > { %s13560_s3 = sld [smem:[#allocation35_spill]]  ;;  %s13561_s12 = sld [smem:[#allocation43_spill]] }
 0xad8   : > { %s13562_s14 = sld [smem:[#allocation166_spill]]  ;;  %s6115_s15 = sshll.u32 %s8753_s13, 4  ;;  %s12566_s15 = int_to_ptr.vmem [resolvable:$true] %s6115_s15 }
 0xad9   : > { %s6102_s1 = scalar_lea.sflag [#allocation4], %s8716_s28  ;;  %s8058_s21 = scalar_lea.vmem %s12566_s15, 2048 }
 0xada   : > { %p8059_p0 = scmp.ne.s32.totalorder %s12566_s15, %s8058_s21  ;;  %s8229_s30 = smov [#allocation20]  }
 0xadb   : > { %s8062_s17 = sshll.u32 %s8229_s30, 4  ;;  %s8063_s17 = int_to_ptr.vmem [resolvable:$false] %s8062_s17 }
 0xadc   : > { %s8064_s20 = scalar_lea.vmem %s8063_s17, 4096  ;;  %p8065_p5 = scmp.lt.s32.totalorder %s12566_s15, %s8063_s17 }
 0xadd   : > { %s6549_s2 = sshll.u32 %s13560_s3, 11  ;;  %p13563_p10 = scmp.ne.s32.totalorder %s13561_s12, 0 }
 0xade   : > { %s12563_s0 = scalar_lea.hbm %s13562_s14, %s6549_s2  ;;  %p8066_p2 = scmp.lt.s32.totalorder %s8064_s20, %s8058_s21 }
 0xadf   : > { %p8060_p4 = pnand %p8059_p0, %p13563_p10 }
 0xae0   : > { %p8067_p8 = por %p8066_p2, %p8065_p5 }
 0xae1   : > { %p8061_p11 = pneg %p8060_p4 }
 0xae3   : > { %p8068_p9 = pnand %p8067_p8, %p8061_p11 }
 0xae5   : > { %8071 = shalt.err (!%p8068_p9)
}
 0xae6   : > { %s8072_s13 = scalar_lea.hbm %s12563_s0, 2048  ;;  %s8076_s16 = scalar_lea.hbm %s13562_s14, 4096 }
 0xae7   : > { %p8073_p3 = scmp.ne.s32.totalorder %s12563_s0, %s8072_s13  ;;  %p8077_p12 = scmp.lt.u32.totalorder %s12563_s0, %s13562_s14 }
 0xae8   : > { %p8078_p7 = scmp.lt.u32.totalorder %s8076_s16, %s8072_s13  ;;  %p8080_p0 = scmp.lt.u32.totalorder %s8072_s13, %s12563_s0 }
 0xae9   : > { %p8074_p1 = pnand %p8073_p3, %p13563_p10 }
 0xaea   : > { %p8079_p13 = por %p8078_p7, %p8077_p12 }
 0xaeb   : > { %p8075_p6 = pneg %p8074_p1 }
 0xaec   : > { %p8081_p4 = por %p8080_p0, %p8079_p13 }
 0xaee   : > { %p8082_p11 = pnand %p8081_p4, %p8075_p6 }
 0xaf0   : > { %8085 = shalt.err (!%p8082_p11)
}
 0xaf1   : > { %s8230_s2 = smov 128   ;;  %s8231_s18 = smov 8  }
 0xaf2   : > { %6675 = dma.vmem_to_hbm [thread:$0]  (%p13563_p10), %s12566_s15, 2048, %s12563_s0, %s6102_s1, %s8230_s2, %s8230_s2, %s8231_s18  }
 0xaf3 PF: > { %s13564_s29 = sld [smem:[#allocation32_spill]]  ;;  %s13565_s21 = sld [smem:[#allocation44_spill]] }
 0xaf4   : > { %p6722_p5 = scmp.ge.s32.totalorder %s8200_s27, 2 }
 0xaf9   : > { %s6130_s30 = sand.u32 1, %s13564_s29   ;;  %p13566_p2 = scmp.ne.s32.totalorder %s13565_s21, 0 }
 0xafa   : > { %s6131_s17 = scalar_lea.sflag [#allocation4], %s6130_s30 }
 0xafb   : > { %p6703_p8 = pnand %p6722_p5, %p13566_p2 }
 0xafd   : > { %8155 = dma.done.wait (!%p6703_p8), %s6131_s17, 2048  }
 0xafe   : > { %8157 = vsyncadd (!%p6703_p8), %s6131_s17, 4294965248  ;;  %s34_s27 = sadd.s32 1, %s8200_s27   ;;  %s13567_s17 = sld [smem:[#allocation31_spill]] }
 0xaff   : > { %p31_p9 = scmp.ge.s32.totalorder %s34_s27, 6   ;;  %s13568_s20 = sld [smem:[#allocation41_spill]] }
 0xb00   : > { %s13569_s12 = sld [smem:[#allocation33_spill]]  ;;  %s13570_s28 = sld [smem:[#allocation40_spill]] }
 0xb01   : > { %s13571_s0 = sld [smem:[#allocation37_spill]]  ;;  %s13572_s15 = sld [smem:[#allocation38_spill]] }
 0xb02   : > { %s13573_s18 = smov %s8168_s19  ;;  %s13576_s21 = smov %s8180_s22 }
 0xb03   : > { %s13578_s23 = smov %s8192_s25  ;;  %s13579_s24 = smov %s8196_s26 }
 0xb04   :  { %33 = sbr.rel (!%p31_p9) target bundleno = 22 (0x16), region = 182 }
 0xb05   : > { %s13574_s19 = smov %s13568_s20 }
 0xb06   : > { %s13575_s20 = smov %s13569_s12  ;;  %s13577_s22 = smov %s13570_s28 }
 0xb07   : > { %s13580_s25 = smov %s13571_s0  ;;  %s13581_s26 = smov %s13572_s15 }
 0xb0b   :  { %6136 = vsyncpa [#allocation3], 1 }
 0xb0c   :  { %6138 = vsyncpa [#allocation3 + $0x1], 1 }
 0xb0d   :  { %6139 = vsyncpa [#allocation6], 1 }
 0xb0e   :  { %6141 = vsyncpa [#allocation6 + $0x1], 1 }
 0xb0f   :  { %6142 = vsyncpa [#allocation9], 1 }
 0xb10   :  { %6143 = vsyncpa [#allocation12], 1 }
 0xb11   :  { %6144 = vsyncpa [#allocation15], 1 }
 0xb12   :  { %6145 = vsyncpa [#allocation18], 1 }
 0xb13   :  { %6146 = vsyncpa [#allocation4], 1 }
 0xb14   :  { %6148 = vsyncpa [#allocation4 + $0x1], 1 }

</bundles_post_ra>
